<compile_context>
chip_gen: v5e
topology: v5e:2x2
jax: 0.10.0
libtpu: 0.0.40
codegen_flags: <defaults>
</compile_context>

<pallas_src>
import jax
import jax.numpy as jnp
from jax import lax
from jax.experimental import pallas as pl
from jax.experimental.pallas import tpu as pltpu

EPS = 1e-5


def fused_kernel(x_ref, s_ref, w1_ref, g1_ref, b1_ref,
                 w2_ref, g2_ref, b2_ref, o_ref):
    # Fold the per-channel scale into conv1's weight (1x1 conv identity):
    #   conv(s * x, w1) == conv(x, w1 * s)    (scale is per *input* channel)
    # w1 arrives bf16; do the fold in f32 (v5e VPU has no bf16 math), cast for MXU.
    w1s = (w1_ref[...].astype(jnp.float32) * s_ref[...]).astype(jnp.bfloat16)  # (C1,C0)

    # conv2d43: channels-first 1x1 conv == (C1,C0) @ (C0,P) matmul, f32 accumulate.
    y = jnp.dot(w1s, x_ref[...], preferred_element_type=jnp.float32)  # (C1,P) f32

    # batchnorm2d25: single-pass batch stats over the spatial axis, fused apply.
    inv_p = 1.0 / float(y.shape[1])
    mu1 = jnp.sum(y, axis=1, keepdims=True) * inv_p                    # (C1,1)
    var1 = jnp.maximum(
        jnp.sum(y * y, axis=1, keepdims=True) * inv_p - mu1 * mu1, 0.0)
    a1 = g1_ref[...] * lax.rsqrt(var1 + EPS)                           # (C1,1)
    c1 = b1_ref[...] - mu1 * a1
    y_bn = (y * a1 + c1).astype(jnp.bfloat16)                          # bf16 for MXU

    # conv2d44: (C2_blk, C1) @ (C1, P) matmul (this program's slice of C2).
    z = jnp.dot(w2_ref[...], y_bn, preferred_element_type=jnp.float32)  # (C2b,P) f32

    # batchnorm2d26 (per-channel stats -> splitting C2 across programs is exact).
    mu2 = jnp.sum(z, axis=1, keepdims=True) * inv_p
    var2 = jnp.maximum(
        jnp.sum(z * z, axis=1, keepdims=True) * inv_p - mu2 * mu2, 0.0)
    a2 = g2_ref[...] * lax.rsqrt(var2 + EPS)
    c2 = b2_ref[...] - mu2 * a2
    o_ref[...] = z * a2 + c2                                           # f32 out


def _has_two_tensorcores():
    """Best-effort detection of a 2-TensorCore chip (v7x)."""
    try:
        kind = jax.devices()[0].device_kind.lower()
    except Exception:
        return False
    return ("v7" in kind) or ("7x" in kind)


def model_forward(x130, x125, w1, gamma1, beta1, w2, gamma2, beta2):
    """x130: (N,C0,1,1), x125: (N,C0,H,W), w1: (C1,C0,1,1), w2: (C2,C1,1,1)."""
    N, C0, H, W = x125.shape
    # Channels-first free reshape + folding the scale into w1 both rely on N == 1
    # (the shapes baked into this module).
    assert N == 1, "kernel assumes batch size 1 (as in the source module)"
    P = H * W
    C1 = w1.shape[0]
    C2 = w2.shape[0]

    # Channels-first, no transposes anywhere (all reshapes below are free).
    # bf16 for the MXU operands only; BN params / scale stay f32.
    x = x125.reshape(C0, P).astype(jnp.bfloat16)
    s = x130.reshape(1, C0)
    w1m = w1.reshape(C1, C0).astype(jnp.bfloat16)
    w2m = w2.reshape(C2, C1).astype(jnp.bfloat16)
    g1 = gamma1.reshape(C1, 1)
    b1 = beta1.reshape(C1, 1)
    g2 = gamma2.reshape(C2, 1)
    b2 = beta2.reshape(C2, 1)

    flops = 2 * C1 * C0 * P + 2 * C2 * C1 * P
    bytes_accessed = (x.size * 2 + w1m.size * 2 + w2m.size * 2 + C2 * P * 4
                      + (s.size + g1.size + b1.size + g2.size + b2.size) * 4)
    cost = pl.CostEstimate(flops=flops, transcendentals=C1 + C2,
                           bytes_accessed=bytes_accessed)

    def build_call(nblk, semantics):
        c2b = C2 // nblk
        return pl.pallas_call(
            fused_kernel,
            out_shape=jax.ShapeDtypeStruct((C2, P), jnp.float32),
            grid=(nblk,),
            in_specs=[
                pl.BlockSpec((C0, P), lambda i: (0, 0)),    # x        (resident)
                pl.BlockSpec((1, C0), lambda i: (0, 0)),    # scale
                pl.BlockSpec((C1, C0), lambda i: (0, 0)),   # w1
                pl.BlockSpec((C1, 1), lambda i: (0, 0)),    # gamma1
                pl.BlockSpec((C1, 1), lambda i: (0, 0)),    # beta1
                pl.BlockSpec((c2b, C1), lambda i: (i, 0)),  # w2 slice
                pl.BlockSpec((c2b, 1), lambda i: (i, 0)),   # gamma2 slice
                pl.BlockSpec((c2b, 1), lambda i: (i, 0)),   # beta2 slice
            ],
            out_specs=pl.BlockSpec((c2b, P), lambda i: (i, 0)),
            compiler_params=pltpu.CompilerParams(dimension_semantics=semantics),
            cost_estimate=cost,
        )

    args = (x, s, w1m, g1, b1, w2m, g2, b2)

    out = None
    if _has_two_tensorcores() and (C2 % 2 == 0):
        # v7x: shard the C2 axis across both TensorCores (CORE_PARALLEL actually
        # changes codegen, unlike plain "parallel").  Redundant stage-1 per core
        # (~11 MFLOP) is negligible vs. halving stage-2 + the output writeback.
        try:
            out = build_call(2, (pltpu.CORE_PARALLEL,))(*args)
        except Exception:
            out = None
    if out is None:
        # Single-TC chips (v5e/v6e): one grid step, no redundant stage-1 work.
        out = build_call(1, ("arbitrary",))(*args)

    # (C2, P) -> NCHW is a free reshape (no transpose).
    return out.reshape(N, C2, H, W)


def reference_forward(x130, x125, w1, gamma1, beta1, w2, gamma2, beta2):
    """Pure-JAX (XLA) f32 reference with identical semantics, in NCHW."""
    def bn(t, g, b):
        mu = jnp.mean(t, axis=(0, 2, 3), keepdims=True)
        var = jnp.mean((t - mu) ** 2, axis=(0, 2, 3), keepdims=True)
        return (t - mu) * lax.rsqrt(var + EPS) * g.reshape(1, -1, 1, 1) \
            + b.reshape(1, -1, 1, 1)

    x = x130 * x125
    y = lax.conv_general_dilated(x, w1, (1, 1), 'VALID',
                                 dimension_numbers=('NCHW', 'OIHW', 'NCHW'))
    y = bn(y, gamma1, beta1)
    z = lax.conv_general_dilated(y, w2, (1, 1), 'VALID',
                                 dimension_numbers=('NCHW', 'OIHW', 'NCHW'))
    return bn(z, gamma2, beta2)


if __name__ == "__main__":
    key = jax.random.PRNGKey(0)
    k = jax.random.split(key, 8)

    # Shapes implied by the module's forward.
    x125 = jax.random.normal(k[0], (1, 288, 14, 14), jnp.float32)
    x130 = jax.random.normal(k[1], (1, 288, 1, 1), jnp.float32)

    # Deterministic synthetic parameters (conv weights OIHW, BN affine params).
    w1 = 0.05 * jax.random.normal(k[2], (96, 288, 1, 1), jnp.float32)
    w2 = 0.05 * jax.random.normal(k[3], (576, 96, 1, 1), jnp.float32)
    gamma1 = 1.0 + 0.1 * jax.random.normal(k[4], (96,), jnp.float32)
    beta1 = 0.1 * jax.random.normal(k[5], (96,), jnp.float32)
    gamma2 = 1.0 + 0.1 * jax.random.normal(k[6], (576,), jnp.float32)
    beta2 = 0.1 * jax.random.normal(k[7], (576,), jnp.float32)

    out = model_forward(x130, x125, w1, gamma1, beta1, w2, gamma2, beta2)
    out = jax.block_until_ready(out)

    ref = reference_forward(x130, x125, w1, gamma1, beta1, w2, gamma2, beta2)
    ref = jax.block_until_ready(ref)

    assert out.shape == (1, 576, 14, 14), out.shape
    assert jnp.allclose(out, ref, atol=2e-2, rtol=2e-2), \
        float(jnp.max(jnp.abs(out - ref)))

    print("KERNEL_OK")
</pallas_src>

<mosaic_0001>
module attributes {stable_mosaic.version = 11 : i64} {
  func.func @fused_kernel(%arg0: i32, %arg1: memref<288x196xbf16, #tpu.memory_space<vmem>>, %arg2: memref<1x288xf32, #tpu.memory_space<vmem>>, %arg3: memref<96x288xbf16, #tpu.memory_space<vmem>>, %arg4: memref<96x1xf32, #tpu.memory_space<vmem>>, %arg5: memref<96x1xf32, #tpu.memory_space<vmem>>, %arg6: memref<576x96xbf16, #tpu.memory_space<vmem>>, %arg7: memref<576x1xf32, #tpu.memory_space<vmem>>, %arg8: memref<576x1xf32, #tpu.memory_space<vmem>>, %arg9: memref<576x196xf32, #tpu.memory_space<vmem>>) attributes {dimension_semantics = [#tpu.dimension_semantics<arbitrary>], iteration_bounds = array<i64: 1>, scalar_prefetch = 0 : i64, scratch_operands = 0 : i64, tpu.core_type = #tpu.core_type<tc>, window_params = [{pipeline_mode = #tpu.pipeline_mode<synchronous>, transform_indices = @transform_0, window_bounds = array<i64: 288, 196>}, {pipeline_mode = #tpu.pipeline_mode<synchronous>, transform_indices = @transform_1, window_bounds = array<i64: 1, 288>}, {pipeline_mode = #tpu.pipeline_mode<synchronous>, transform_indices = @transform_2, window_bounds = array<i64: 96, 288>}, {pipeline_mode = #tpu.pipeline_mode<synchronous>, transform_indices = @transform_3, window_bounds = array<i64: 96, 1>}, {pipeline_mode = #tpu.pipeline_mode<synchronous>, transform_indices = @transform_4, window_bounds = array<i64: 96, 1>}, {transform_indices = @transform_5, window_bounds = array<i64: 576, 96>}, {transform_indices = @transform_6, window_bounds = array<i64: 576, 1>}, {transform_indices = @transform_7, window_bounds = array<i64: 576, 1>}, {transform_indices = @transform_8, window_bounds = array<i64: 576, 196>}]} {
    %c0 = arith.constant 0 : index
    %c0_0 = arith.constant 0 : index
    %0 = vector.load %arg3[%c0, %c0_0] : memref<96x288xbf16, #tpu.memory_space<vmem>>, vector<96x288xbf16>
    %1 = arith.extf %0 : vector<96x288xbf16> to vector<96x288xf32>
    %c0_1 = arith.constant 0 : index
    %c0_2 = arith.constant 0 : index
    %2 = vector.load %arg2[%c0_1, %c0_2] : memref<1x288xf32, #tpu.memory_space<vmem>>, vector<1x288xf32>
    %3 = vector.broadcast %2 : vector<1x288xf32> to vector<96x288xf32>
    %4 = arith.mulf %1, %3 : vector<96x288xf32>
    %5 = arith.truncf %4 : vector<96x288xf32> to vector<96x288xbf16>
    %c0_3 = arith.constant 0 : index
    %c0_4 = arith.constant 0 : index
    %6 = vector.load %arg1[%c0_3, %c0_4] : memref<288x196xbf16, #tpu.memory_space<vmem>>, vector<288x196xbf16>
    %cst = arith.constant dense<0.000000e+00> : vector<96x196xf32>
    %7 = tpu.matmul %5, %6, %cst {dimension_numbers = #tpu.dot_dimension_numbers<[1], [0], [0], [1], [0, 0, 1, 1], [], []>} : vector<96x288xbf16>, vector<288x196xbf16>, vector<96x196xf32> -> vector<96x196xf32>
    %cst_5 = arith.constant dense<0.000000e+00> : vector<96xf32>
    %8 = vector.multi_reduction <add>, %7, %cst_5 [1] : vector<96x196xf32> to vector<96xf32>
    %9 = vector.shape_cast %8 : vector<96xf32> to vector<96x1xf32>
    %cst_6 = arith.constant 0.00510204071 : f32
    %10 = vector.broadcast %cst_6 : f32 to vector<96x1xf32>
    %11 = arith.mulf %9, %10 : vector<96x1xf32>
    %12 = arith.mulf %7, %7 : vector<96x196xf32>
    %cst_7 = arith.constant dense<0.000000e+00> : vector<96xf32>
    %13 = vector.multi_reduction <add>, %12, %cst_7 [1] : vector<96x196xf32> to vector<96xf32>
    %14 = vector.shape_cast %13 : vector<96xf32> to vector<96x1xf32>
    %cst_8 = arith.constant 0.00510204071 : f32
    %15 = vector.broadcast %cst_8 : f32 to vector<96x1xf32>
    %16 = arith.mulf %14, %15 : vector<96x1xf32>
    %17 = arith.mulf %11, %11 : vector<96x1xf32>
    %18 = arith.subf %16, %17 : vector<96x1xf32>
    %cst_9 = arith.constant 0.000000e+00 : f32
    %19 = vector.broadcast %cst_9 : f32 to vector<96x1xf32>
    %20 = arith.maximumf %18, %19 : vector<96x1xf32>
    %c0_10 = arith.constant 0 : index
    %c0_11 = arith.constant 0 : index
    %21 = vector.load %arg4[%c0_10, %c0_11] : memref<96x1xf32, #tpu.memory_space<vmem>>, vector<96x1xf32>
    %cst_12 = arith.constant 9.99999974E-6 : f32
    %22 = vector.broadcast %cst_12 : f32 to vector<96x1xf32>
    %23 = arith.addf %20, %22 : vector<96x1xf32>
    %24 = math.rsqrt %23 : vector<96x1xf32>
    %25 = arith.mulf %21, %24 : vector<96x1xf32>
    %c0_13 = arith.constant 0 : index
    %c0_14 = arith.constant 0 : index
    %26 = vector.load %arg5[%c0_13, %c0_14] : memref<96x1xf32, #tpu.memory_space<vmem>>, vector<96x1xf32>
    %27 = arith.mulf %11, %25 : vector<96x1xf32>
    %28 = arith.subf %26, %27 : vector<96x1xf32>
    %29 = vector.broadcast %25 : vector<96x1xf32> to vector<96x196xf32>
    %30 = arith.mulf %7, %29 : vector<96x196xf32>
    %31 = vector.broadcast %28 : vector<96x1xf32> to vector<96x196xf32>
    %32 = arith.addf %30, %31 : vector<96x196xf32>
    %33 = arith.truncf %32 : vector<96x196xf32> to vector<96x196xbf16>
    %c0_15 = arith.constant 0 : index
    %c0_16 = arith.constant 0 : index
    %34 = vector.load %arg6[%c0_15, %c0_16] : memref<576x96xbf16, #tpu.memory_space<vmem>>, vector<576x96xbf16>
    %cst_17 = arith.constant dense<0.000000e+00> : vector<576x196xf32>
    %35 = tpu.matmul %34, %33, %cst_17 {dimension_numbers = #tpu.dot_dimension_numbers<[1], [0], [0], [1], [0, 0, 1, 1], [], []>} : vector<576x96xbf16>, vector<96x196xbf16>, vector<576x196xf32> -> vector<576x196xf32>
    %cst_18 = arith.constant dense<0.000000e+00> : vector<576xf32>
    %36 = vector.multi_reduction <add>, %35, %cst_18 [1] : vector<576x196xf32> to vector<576xf32>
    %37 = vector.shape_cast %36 : vector<576xf32> to vector<576x1xf32>
    %cst_19 = arith.constant 0.00510204071 : f32
    %38 = vector.broadcast %cst_19 : f32 to vector<576x1xf32>
    %39 = arith.mulf %37, %38 : vector<576x1xf32>
    %40 = arith.mulf %35, %35 : vector<576x196xf32>
    %cst_20 = arith.constant dense<0.000000e+00> : vector<576xf32>
    %41 = vector.multi_reduction <add>, %40, %cst_20 [1] : vector<576x196xf32> to vector<576xf32>
    %42 = vector.shape_cast %41 : vector<576xf32> to vector<576x1xf32>
    %cst_21 = arith.constant 0.00510204071 : f32
    %43 = vector.broadcast %cst_21 : f32 to vector<576x1xf32>
    %44 = arith.mulf %42, %43 : vector<576x1xf32>
    %45 = arith.mulf %39, %39 : vector<576x1xf32>
    %46 = arith.subf %44, %45 : vector<576x1xf32>
    %cst_22 = arith.constant 0.000000e+00 : f32
    %47 = vector.broadcast %cst_22 : f32 to vector<576x1xf32>
    %48 = arith.maximumf %46, %47 : vector<576x1xf32>
    %c0_23 = arith.constant 0 : index
    %c0_24 = arith.constant 0 : index
    %49 = vector.load %arg7[%c0_23, %c0_24] : memref<576x1xf32, #tpu.memory_space<vmem>>, vector<576x1xf32>
    %cst_25 = arith.constant 9.99999974E-6 : f32
    %50 = vector.broadcast %cst_25 : f32 to vector<576x1xf32>
    %51 = arith.addf %48, %50 : vector<576x1xf32>
    %52 = math.rsqrt %51 : vector<576x1xf32>
    %53 = arith.mulf %49, %52 : vector<576x1xf32>
    %c0_26 = arith.constant 0 : index
    %c0_27 = arith.constant 0 : index
    %54 = vector.load %arg8[%c0_26, %c0_27] : memref<576x1xf32, #tpu.memory_space<vmem>>, vector<576x1xf32>
    %55 = arith.mulf %39, %53 : vector<576x1xf32>
    %56 = arith.subf %54, %55 : vector<576x1xf32>
    %57 = vector.broadcast %53 : vector<576x1xf32> to vector<576x196xf32>
    %58 = arith.mulf %35, %57 : vector<576x196xf32>
    %59 = vector.broadcast %56 : vector<576x1xf32> to vector<576x196xf32>
    %60 = arith.addf %58, %59 : vector<576x196xf32>
    %c0_28 = arith.constant 0 : index
    %c0_29 = arith.constant 0 : index
    %61 = vector.load %arg9[%c0_28, %c0_29] : memref<576x196xf32, #tpu.memory_space<vmem>>, vector<576x196xf32>
    tpu.vector_store %arg9[%c0_28, %c0_29], %60 {strides = array<i32>} : memref<576x196xf32, #tpu.memory_space<vmem>>, vector<576x196xf32>,
    return
  }
  func.func @transform_0(%arg0: i32) -> (i32, i32) {
    %c0_i32 = arith.constant 0 : i32
    %c0_i32_0 = arith.constant 0 : i32
    %c0_i32_1 = arith.constant 0 : i32
    return %c0_i32, %c0_i32_0 : i32, i32
  }
  func.func @transform_1(%arg0: i32) -> (i32, i32) {
    %c0_i32 = arith.constant 0 : i32
    %c0_i32_0 = arith.constant 0 : i32
    %c0_i32_1 = arith.constant 0 : i32
    return %c0_i32, %c0_i32_0 : i32, i32
  }
  func.func @transform_2(%arg0: i32) -> (i32, i32) {
    %c0_i32 = arith.constant 0 : i32
    %c0_i32_0 = arith.constant 0 : i32
    %c0_i32_1 = arith.constant 0 : i32
    return %c0_i32, %c0_i32_0 : i32, i32
  }
  func.func @transform_3(%arg0: i32) -> (i32, i32) {
    %c0_i32 = arith.constant 0 : i32
    %c0_i32_0 = arith.constant 0 : i32
    %c0_i32_1 = arith.constant 0 : i32
    return %c0_i32, %c0_i32_0 : i32, i32
  }
  func.func @transform_4(%arg0: i32) -> (i32, i32) {
    %c0_i32 = arith.constant 0 : i32
    %c0_i32_0 = arith.constant 0 : i32
    %c0_i32_1 = arith.constant 0 : i32
    return %c0_i32, %c0_i32_0 : i32, i32
  }
  func.func @transform_5(%arg0: i32) -> (i32, i32) {
    %c0_i32 = arith.constant 0 : i32
    %c0_i32_0 = arith.constant 0 : i32
    return %arg0, %c0_i32 : i32, i32
  }
  func.func @transform_6(%arg0: i32) -> (i32, i32) {
    %c0_i32 = arith.constant 0 : i32
    %c0_i32_0 = arith.constant 0 : i32
    return %arg0, %c0_i32 : i32, i32
  }
  func.func @transform_7(%arg0: i32) -> (i32, i32) {
    %c0_i32 = arith.constant 0 : i32
    %c0_i32_0 = arith.constant 0 : i32
    return %arg0, %c0_i32 : i32, i32
  }
  func.func @transform_8(%arg0: i32) -> (i32, i32) {
    %c0_i32 = arith.constant 0 : i32
    %c0_i32_0 = arith.constant 0 : i32
    return %arg0, %c0_i32 : i32, i32
  }
}

</mosaic_0001>

<bundles_post_ra>
// kernel: tpu_custom_call.1
= control target key start
LH: loop header
LB: loop body
LE: loop exit
PB: predicated region body
PF: predicated region fallthrough
CT: control target
= control target key end

     0   :  { %vm368_vm0 = vcmask 261120   ;;  %vm621_vm1 = vcmask 556032   ;;  %s10124_s0 = inlined_call_operand.vmem [shape: bf16[288,196], index: 0, kind: input, shape index: {}]   ;;  %s10125_s2 = inlined_call_operand.vmem [shape: bf16[96,288], index: 2, kind: input, shape index: {}]   ;;  %s10126_s1 = inlined_call_operand.vmem [shape: f32[1,288], index: 1, kind: input, shape index: {}]   ;;  %s10127_s3 = inlined_call_operand.vmem [shape: f32[96,1], index: 3, kind: input, shape index: {}]   ;;  %s10128_s4 = inlined_call_operand.vmem [shape: f32[96,1], index: 4, kind: input, shape index: {}]   ;;  %s10129_s5 = inlined_call_operand.vmem [shape: bf16[576,96], index: 5, kind: input, shape index: {}]   ;;  %s10130_s6 = inlined_call_operand.vmem [shape: f32[576,1], index: 6, kind: input, shape index: {}]   ;;  %s10131_s7 = inlined_call_operand.vmem [shape: f32[576,1], index: 7, kind: input, shape index: {}]   ;;  %s10132_s8 = inlined_call_operand.vmem [shape: f32[576,196], index: 8, kind: output, shape index: {}]  }
   0x1   :  { %v5359_v0 = vld [vmem:[%s10124_s0 + $0x70] sm:$0xf]  ;;  %v5688_v1 = vld [vmem:[%s10124_s0 + $0x74] sm:$0xf0]  ;;  %v5351_v5 = vld [vmem:[%s10124_s0 + $0x60] sm:$0xf] }
   0x2   :  { %v5423_v2 = vld [vmem:[%s10124_s0 + $0xf0] sm:$0xf]  ;;  %v5360_v3 = vor.u32 %v5688_v1, %v5359_v0  ;;  %v5704_v4 = vld [vmem:[%s10124_s0 + $0xf4] sm:$0xf0]  ;;  %v5686_v6 = vld [vmem:[%s10124_s0 + $0x64] sm:$0xf0] }
   0x3   :  { %v5424_v7 = vor.u32 %v5704_v4, %v5423_v2  ;;  %v5415_v8 = vld [vmem:[%s10124_s0 + $0xe0] sm:$0xf]  ;;  %v5702_v9 = vld [vmem:[%s10124_s0 + $0xe4] sm:$0xf0]  ;;  %v5352_v10 = vor.u32 %v5686_v6, %v5351_v5  ;;  %v5343_v11 = vld [vmem:[%s10124_s0 + $0x50] sm:$0xf] }
   0x4   :  { %387 = vmatpush.bf16.msra.mxu0 %v5360_v3  ;;  %v5416_v12 = vor.u32 %v5702_v9, %v5415_v8  ;;  %v5684_v13 = vld [vmem:[%s10124_s0 + $0x54] sm:$0xf0]  ;;  %v5439_v14 = vld [vmem:[%s10124_s0 + $0x110] sm:$0xf]  ;;  %v5431_v19 = vld [vmem:[%s10124_s0 + $0x100] sm:$0xf] }
   0x5   :  { %426 = vmatpush.bf16.msra.mxu1 %v5424_v7  ;;  %v5708_v15 = vld [vmem:[%s10124_s0 + $0x114] sm:$0xf0]  ;;  %v5407_v16 = vld [vmem:[%s10124_s0 + $0xd0] sm:$0xf]  ;;  %v5706_v20 = vld [vmem:[%s10124_s0 + $0x104] sm:$0xf0]  ;;  %v5344_v22 = vor.u32 %v5684_v13, %v5343_v11 }
   0x6   :  { %v5700_v17 = vld [vmem:[%s10124_s0 + $0xd4] sm:$0xf0]  ;;  %v5440_v18 = vor.u32 %v5708_v15, %v5439_v14  ;;  %v31_v21 = vld [vmem:[%s10125_s2 + $0x8] sm:$0xf]  ;;  %v5432_v23 = vor.u32 %v5706_v20, %v5431_v19  ;;  %v33_v24 = vld [vmem:[%s10125_s2 + $0x14] sm:$0xf] }
   0x7   :  { %v56_v25 = vunpack.c.l.bf16 %v31_v21  ;;  %v90_v26 = vld [vmem:[%s10126_s1] sm:$0x7]  ;;  %v5408_v27 = vor.u32 %v5700_v17, %v5407_v16  ;;  %v5682_v29 = vld [vmem:[%s10124_s0 + $0x44] sm:$0xf0]  ;;  %v59_v30 = vunpack.c.l.bf16 %v33_v24  ;;  %v5327_v39 = vld [vmem:[%s10124_s0 + $0x30] sm:$0xf] }
   0x8   :  { %388 = vmatpush.bf16.msra.mxu0 %v5352_v10  ;;  %471 = vmatpush.bf16.msra.mxu2 %v5440_v18  ;;  %v5335_v28 = vld [vmem:[%s10124_s0 + $0x40] sm:$0xf]  ;;  %v6038_v31 = vperm.slane %v90_v26, 2  ;;  %v5698_v33 = vld [vmem:[%s10124_s0 + $0xc4] sm:$0xf0]  ;;  %v32_v55 = vld [vmem:[%s10125_s2 + $0xc] sm:$0xff] }
   0x9   :  { %427 = vmatpush.bf16.msra.mxu1 %v5416_v12  ;;  %v5399_v32 = vld [vmem:[%s10124_s0 + $0xc0] sm:$0xf]  ;;  %v5336_v36 = vor.u32 %v5682_v29, %v5335_v28  ;;  %v5680_v40 = vld [vmem:[%s10124_s0 + $0x34] sm:$0xf0]  ;;  %v5391_v41 = vld [vmem:[%s10124_s0 + $0xb0] sm:$0xf]  ;;  %v57_v62 = vunpack.c.l.bf16 %v32_v55  ;;  %v58_v4 = vunpack.c.h.bf16 %v32_v55 }
   0xa   :  { %v100_v34 = vmul.f32 %v6038_v31, %v56_v25  ;;  %v103_v35 = vmul.f32 %v6038_v31, %v59_v30  ;;  %v5400_v37 = vor.u32 %v5698_v33, %v5399_v32  ;;  %v5696_v42 = vld [vmem:[%s10124_s0 + $0xb4] sm:$0xf0]  ;;  %v5328_v43 = vor.u32 %v5680_v40, %v5327_v39  ;;  %v35_v44 = vld [vmem:[%s10125_s2 + $0x20] sm:$0xf]  ;;  %v37_v45 = vld [vmem:[%s10125_s2 + $0x2c] sm:$0xf] }
   0xb   :  { %v5392_v46 = vor.u32 %v5696_v42, %v5391_v41  ;;  %v5319_v47 = vld [vmem:[%s10124_s0 + $0x20] sm:$0xf]  ;;  %v5678_v48 = vld [vmem:[%s10124_s0 + $0x24] sm:$0xf0]  ;;  %v62_v52 = vunpack.c.l.bf16 %v35_v44  ;;  %v65_v53 = vunpack.c.l.bf16 %v37_v45  ;;  %v5311_v57 = vld [vmem:[%s10124_s0 + $0x10] sm:$0xf] }
   0xc   :  { %389 = vmatpush.bf16.msra.mxu0 %v5344_v22  ;;  %472 = vmatpush.bf16.msra.mxu2 %v5432_v23  ;;  %v6048_v38 = vpack.c.bf16 %v103_v35, %v100_v34  ;;  %v5383_v49 = vld [vmem:[%s10124_s0 + $0xa0] sm:$0xf]  ;;  %v5694_v50 = vld [vmem:[%s10124_s0 + $0xa4] sm:$0xf0]  ;;  %v5320_v54 = vor.u32 %v5678_v48, %v5319_v47  ;;  %v5676_v58 = vld [vmem:[%s10124_s0 + $0x14] sm:$0xf0] }
   0xd   :  { %428 = vmatpush.bf16.msra.mxu1 %v5408_v27  ;;  %v30_v51 = vld [vmem:[%s10125_s2] sm:$0xff]  ;;  %v5384_v56 = vor.u32 %v5694_v50, %v5383_v49  ;;  %v5375_v59 = vld [vmem:[%s10124_s0 + $0x90] sm:$0xf]  ;;  %v5692_v60 = vld [vmem:[%s10124_s0 + $0x94] sm:$0xf0]  ;;  %v6100_v63 = vperm.slane %v90_v26, 0  ;;  %v106_v0 = vmul.f32 %v6038_v31, %v62_v52  ;;  %v109_v1 = vmul.f32 %v6038_v31, %v65_v53 }
   0xe   :  { %v54_v61 = vunpack.c.l.bf16 %v30_v51  ;;  %v5312_v2 = vor.u32 %v5676_v58, %v5311_v57  ;;  %v55_v3 = vunpack.c.h.bf16 %v30_v51  ;;  %v6104_v5 = vperm.slane %v90_v26, 1  ;;  %v5303_v7 = vld [vmem:[%s10124_s0] sm:$0xf]  ;;  %v5674_v8 = vld [vmem:[%s10124_s0 + $0x4] sm:$0xf0]  ;;  %v34_v24 = vld [vmem:[%s10125_s2 + $0x18] sm:$0xff] }
   0xf   :  { %5445 = vmatmul.msk.bf16.vlgmr.msra.gmra.mxu2 %vm368_vm0, %v6048_v38  ;;  %v5376_v6 = vor.u32 %v5692_v60, %v5375_v59  ;;  %v5367_v9 = vld [vmem:[%s10124_s0 + $0x80] sm:$0xf]  ;;  %v5690_v10 = vld [vmem:[%s10124_s0 + $0x84] sm:$0xf0]  ;;  %v101_v12 = vmul.f32 %v6100_v63, %v57_v62  ;;  %v6120_v13 = vpack.c.bf16 %v109_v1, %v106_v0  ;;  %v5304_v14 = vor.u32 %v5674_v8, %v5303_v7  ;;  %v39_v20 = vld [vmem:[%s10125_s2 + $0x38] sm:$0xf] }
  0x10   :  { %390 = vmatpush.bf16.msra.mxu0 %v5336_v36  ;;  %v98_v11 = vmul.f32 %v6100_v63, %v54_v61  ;;  %v99_v15 = vmul.f32 %v6104_v5, %v55_v3  ;;  %v102_v16 = vmul.f32 %v6104_v5, %v58_v4  ;;  %v5368_v17 = vor.u32 %v5690_v10, %v5367_v9  ;;  %v41_v21 = vld [vmem:[%s10125_s2 + $0x44] sm:$0xf]  ;;  %v43_v41 = vld [vmem:[%s10125_s2 + $0x50] sm:$0xf]  ;;  %v45_v42 = vld [vmem:[%s10125_s2 + $0x5c] sm:$0xf] }
  0x11   :  { %429 = vmatpush.bf16.msra.mxu1 %v5400_v37  ;;  %v68_v22 = vunpack.c.l.bf16 %v39_v20  ;;  %v71_v23 = vunpack.c.l.bf16 %v41_v21  ;;  %v36_v25 = vld [vmem:[%s10125_s2 + $0x24] sm:$0xff]  ;;  %v60_v26 = vunpack.c.l.bf16 %v34_v24  ;;  %v61_v30 = vunpack.c.h.bf16 %v34_v24  ;;  %v5361_v44 = vld [vmem:[%s10124_s0 + $0x78] sm:$0xf0]  ;;  %v5703_v45 = vld [vmem:[%s10124_s0 + $0xf4] sm:$0xf] }
  0x12   :  { %v6124_v18 = vpack.c.bf16 %v101_v12, %v98_v11  ;;  %v6128_v19 = vpack.c.bf16 %v102_v16, %v99_v15  ;;  %v63_v27 = vunpack.c.l.bf16 %v36_v25  ;;  %v64_v32 = vunpack.c.h.bf16 %v36_v25  ;;  %v40_v47 = vld [vmem:[%s10125_s2 + $0x3c] sm:$0xff]  ;;  %v5685_v53 = vld [vmem:[%s10124_s0 + $0x64] sm:$0xf]  ;;  %v5417_v57 = vld [vmem:[%s10124_s0 + $0xe8] sm:$0xf0] }
  0x13   :  { %v112_v28 = vmul.f32 %v6038_v31, %v68_v22  ;;  %v115_v29 = vmul.f32 %v6038_v31, %v71_v23  ;;  %v104_v33 = vmul.f32 %v6100_v63, %v60_v26  ;;  %v105_v36 = vmul.f32 %v6104_v5, %v61_v30  ;;  %v5425_v51 = vld [vmem:[%s10124_s0 + $0xf8] sm:$0xf0]  ;;  %v5701_v55 = vld [vmem:[%s10124_s0 + $0xe4] sm:$0xf]  ;;  %v5683_v59 = vld [vmem:[%s10124_s0 + $0x54] sm:$0xf] }
  0x14   :  { %391 = vmatpush.bf16.msra.mxu0 %v5328_v43  ;;  %v107_v34 = vmul.f32 %v6100_v63, %v63_v27  ;;  %v108_v37 = vmul.f32 %v6104_v5, %v64_v32  ;;  %v5687_v43 = vld [vmem:[%s10124_s0 + $0x74] sm:$0xf]  ;;  %v74_v48 = vunpack.c.l.bf16 %v43_v41  ;;  %v77_v49 = vunpack.c.l.bf16 %v45_v42  ;;  %v5345_v60 = vld [vmem:[%s10124_s0 + $0x58] sm:$0xf0]  ;;  %v5681_v9 = vld [vmem:[%s10124_s0 + $0x44] sm:$0xf] }
  0x15   :  { %430 = vmatpush.bf16.msra.mxu1 %v5392_v46  ;;  %v6148_v35 = vpack.c.bf16 %v115_v29, %v112_v28  ;;  %v38_v46 = vld [vmem:[%s10125_s2 + $0x30] sm:$0xff]  ;;  %v5364_v50 = vor.u32 %v5687_v43, %v5361_v44  ;;  %v5428_v52 = vor.u32 %v5703_v45, %v5425_v51  ;;  %v5420_v58 = vor.u32 %v5701_v55, %v5417_v57  ;;  %v5409_v3 = vld [vmem:[%s10124_s0 + $0xd8] sm:$0xf0]  ;;  %v5337_v10 = vld [vmem:[%s10124_s0 + $0x48] sm:$0xf0] }
  0x16   :  { %v6152_v39 = vpack.c.bf16 %v107_v34, %v104_v33  ;;  %v6156_v40 = vpack.c.bf16 %v108_v37, %v105_v36  ;;  %v66_v61 = vunpack.c.l.bf16 %v38_v46  ;;  %v69_v62 = vunpack.c.l.bf16 %v40_v47  ;;  %v5697_v15 = vld [vmem:[%s10124_s0 + $0xc4] sm:$0xf]  ;;  %v5401_v16 = vld [vmem:[%s10124_s0 + $0xc8] sm:$0xf0]  ;;  %v47_v25 = vld [vmem:[%s10125_s2 + $0x68] sm:$0xf] }
  0x17   :  { %504 = vmatpush.bf16.msra.mxu3 %v5364_v50  ;;  %543 = vmatpush.bf16.msrb.mxu2 %v5428_v52  ;;  %v118_v0 = vmul.f32 %v6038_v31, %v74_v48  ;;  %v121_v1 = vmul.f32 %v6038_v31, %v77_v49  ;;  %v67_v4 = vunpack.c.h.bf16 %v38_v46  ;;  %v5348_v7 = vor.u32 %v5683_v59, %v5345_v60  ;;  %v49_v26 = vld [vmem:[%s10125_s2 + $0x74] sm:$0xf]  ;;  %v5329_v28 = vld [vmem:[%s10124_s0 + $0x38] sm:$0xf0]  ;;  %v42_v30 = vld [vmem:[%s10125_s2 + $0x48] sm:$0xff] }
  0x18   :  { %392 = vmatpush.bf16.msra.mxu0 %v5320_v54  ;;  %v5353_v54 = vld [vmem:[%s10124_s0 + $0x68] sm:$0xf0]  ;;  %v110_v11 = vmul.f32 %v6100_v63, %v66_v61  ;;  %v113_v12 = vmul.f32 %v6100_v63, %v69_v62  ;;  %v5340_v21 = vor.u32 %v5681_v9, %v5337_v10  ;;  %v5404_v22 = vor.u32 %v5697_v15, %v5401_v16  ;;  %v5679_v27 = vld [vmem:[%s10124_s0 + $0x34] sm:$0xf]  ;;  %v5393_v37 = vld [vmem:[%s10124_s0 + $0xb8] sm:$0xf0] }
  0x19   :  { %431 = vmatpush.bf16.msra.mxu1 %v5384_v56  ;;  %v5356_v56 = vor.u32 %v5685_v53, %v5353_v54  ;;  %v5695_v29 = vld [vmem:[%s10124_s0 + $0xb4] sm:$0xf]  ;;  %v80_v33 = vunpack.c.l.bf16 %v47_v25  ;;  %v83_v34 = vunpack.c.l.bf16 %v49_v26  ;;  %v5332_v36 = vor.u32 %v5679_v27, %v5329_v28  ;;  %v5677_v42 = vld [vmem:[%s10124_s0 + $0x24] sm:$0xf]  ;;  %v5321_v43 = vld [vmem:[%s10124_s0 + $0x28] sm:$0xf0] }
  0x1a   :  { %v6228_v23 = vpack.c.bf16 %v113_v12, %v110_v11  ;;  %v44_v32 = vld [vmem:[%s10125_s2 + $0x54] sm:$0xff]  ;;  %v5396_v41 = vor.u32 %v5695_v29, %v5393_v37  ;;  %v5693_v44 = vld [vmem:[%s10124_s0 + $0xa4] sm:$0xf]  ;;  %v5324_v45 = vor.u32 %v5677_v42, %v5321_v43  ;;  %v5385_v46 = vld [vmem:[%s10124_s0 + $0xa8] sm:$0xf0]  ;;  %v72_v51 = vunpack.c.l.bf16 %v42_v30 }
  0x1b   :  { %505 = vmatpush.bf16.msra.mxu3 %v5356_v56  ;;  %544 = vmatpush.bf16.msrb.mxu2 %v5420_v58  ;;  %v5675_v48 = vld [vmem:[%s10124_s0 + $0x14] sm:$0xf]  ;;  %v5313_v49 = vld [vmem:[%s10124_s0 + $0x18] sm:$0xf0]  ;;  %v75_v52 = vunpack.c.l.bf16 %v44_v32  ;;  %v124_v53 = vmul.f32 %v6038_v31, %v80_v33  ;;  %v127_v54 = vmul.f32 %v6038_v31, %v83_v34  ;;  %v73_v58 = vunpack.c.h.bf16 %v42_v30  ;;  %v51_v16 = vld [vmem:[%s10125_s2 + $0x80] sm:$0xf] }
  0x1c   :  { %393 = vmatpush.bf16.msra.mxu0 %v5312_v2  ;;  %v5699_v2 = vld [vmem:[%s10124_s0 + $0xd4] sm:$0xf]  ;;  %v5377_v56 = vld [vmem:[%s10124_s0 + $0x98] sm:$0xf0]  ;;  %v76_v59 = vunpack.c.h.bf16 %v44_v32  ;;  %v5316_v61 = vor.u32 %v5675_v48, %v5313_v49  ;;  %v48_v25 = vld [vmem:[%s10125_s2 + $0x6c] sm:$0xff] }
  0x1d   :  { %432 = vmatpush.bf16.msra.mxu1 %v5376_v6  ;;  %v70_v6 = vunpack.c.h.bf16 %v40_v47  ;;  %v5412_v8 = vor.u32 %v5699_v2, %v5409_v3  ;;  %v5388_v47 = vor.u32 %v5693_v44, %v5385_v46  ;;  %v5707_v50 = vld [vmem:[%s10124_s0 + $0x114] sm:$0xf]  ;;  %v5441_v57 = vld [vmem:[%s10124_s0 + $0x118] sm:$0xf0]  ;;  %v116_v2 = vmul.f32 %v6100_v63, %v72_v51  ;;  %v5705_v26 = vld [vmem:[%s10124_s0 + $0x104] sm:$0xf] }
  0x1e   :  { %v5691_v55 = vld [vmem:[%s10124_s0 + $0x94] sm:$0xf]  ;;  %v5444_v60 = vor.u32 %v5707_v50, %v5441_v57  ;;  %v119_v3 = vmul.f32 %v6100_v63, %v75_v52  ;;  %v120_v9 = vmul.f32 %v6104_v5, %v76_v59  ;;  %v5433_v27 = vld [vmem:[%s10124_s0 + $0x108] sm:$0xf0]  ;;  %v81_v30 = vunpack.c.l.bf16 %v48_v25  ;;  %v52_v46 = vld [vmem:[%s10125_s2 + $0x84] sm:$0xff] }
  0x1f   :  { %5446 = vmatmul.msk.bf16.gmra.mxu2 %vm368_vm0, %v6120_v13  ;;  %v114_v20 = vmul.f32 %v6104_v5, %v70_v6  ;;  %506 = vmatpush.bf16.msra.mxu3 %v5348_v7  ;;  %v5380_v62 = vor.u32 %v5691_v55, %v5377_v56  ;;  %v5689_v6 = vld [vmem:[%s10124_s0 + $0x84] sm:$0xf]  ;;  %v5369_v7 = vld [vmem:[%s10124_s0 + $0x88] sm:$0xf0]  ;;  %v5436_v28 = vor.u32 %v5705_v26, %v5433_v27  ;;  %v87_v48 = vunpack.c.l.bf16 %v52_v46 }
  0x20   :  { %394 = vmatpush.bf16.msra.mxu0 %v5304_v14  ;;  %v6218_v14 = vpack.c.bf16 %v121_v1, %v118_v0  ;;  %545 = vmatpush.bf16.msrb.mxu2 %v5412_v8  ;;  %v5673_v0 = vld [vmem:[%s10124_s0 + $0x4] sm:$0xf]  ;;  %v5305_v1 = vld [vmem:[%s10124_s0 + $0x8] sm:$0xf0]  ;;  %v117_v8 = vmul.f32 %v6104_v5, %v73_v58  ;;  %v5372_v11 = vor.u32 %v5689_v6, %v5369_v7  ;;  %v88_v50 = vunpack.c.h.bf16 %v52_v46 }
  0x21   :  { %433 = vmatpush.bf16.msra.mxu1 %v5368_v17  ;;  %v111_v17 = vmul.f32 %v6104_v5, %v67_v4  ;;  %v6300_v4 = vpack.c.bf16 %v127_v54, %v124_v53  ;;  %v5308_v10 = vor.u32 %v5673_v0, %v5305_v1  ;;  %v143_v12 = vpack.c.bf16 %v119_v3, %v116_v2 }
  0x22   :  { %v144_v15 = vpack.c.bf16 %v120_v9, %v117_v8  ;;  %v125_v37 = vmul.f32 %v6100_v63, %v81_v30  ;;  %v131_v52 = vmul.f32 %v6100_v63, %v87_v48  ;;  %v132_v54 = vmul.f32 %v6104_v5, %v88_v50 }
  0x23   :  { %395 = vmatmul.bf16.vlgmr.msra.gmra.mxu0 %v6124_v18  ;;  %v6232_v24 = vpack.c.bf16 %v114_v20, %v111_v17  ;;  %507 = vmatpush.bf16.msra.mxu3 %v5340_v21  ;;  %v53_v17 = vld [vmem:[%s10125_s2 + $0x8c] sm:$0xf]  ;;  %v46_v20 = vld [vmem:[%s10125_s2 + $0x60] sm:$0xff]  ;;  %v86_v21 = vunpack.c.l.bf16 %v51_v16 }
  0x24   :  { %434 = vmatmul.bf16.vlgmr.msra.gmra.mxu1 %v6128_v19  ;;  %546 = vmatpush.bf16.msrb.mxu2 %v5404_v22  ;;  %v89_v22 = vunpack.c.l.bf16 %v53_v17  ;;  %v78_v29 = vunpack.c.l.bf16 %v46_v20  ;;  %v79_v34 = vunpack.c.h.bf16 %v46_v20 }
  0x25   :  { %588 = vmatpush.bf16.msrb.mxu0 %v5444_v60  ;;  %v130_v32 = vmul.f32 %v6038_v31, %v86_v21 }
  0x26   :  { %v133_v33 = vmul.f32 %v6038_v31, %v89_v22  ;;  %v123_v42 = vmul.f32 %v6104_v5, %v79_v34  ;;  %v50_v31 = vld [vmem:[%s10125_s2 + $0x78] sm:$0xff] }
  0x27   :  { %508 = vmatpush.bf16.msra.mxu3 %v5332_v36  ;;  %v82_v36 = vunpack.c.h.bf16 %v48_v25  ;;  %v85_v49 = vunpack.c.h.bf16 %v50_v31 }
  0x28   :  { %547 = vmatpush.bf16.msrb.mxu2 %v5396_v41  ;;  %v6335_v41 = vpack.c.bf16 %v133_v33, %v130_v32 }
  0x29   :  { %589 = vmatpush.bf16.msrb.mxu0 %v5436_v28  ;;  %v126_v43 = vmul.f32 %v6104_v5, %v82_v36  ;;  %v129_v53 = vmul.f32 %v6104_v5, %v85_v49 }
  0x2b   :  { %509 = vmatpush.bf16.msra.mxu3 %v5324_v45  ;;  %v147_v45 = vpack.c.bf16 %v126_v43, %v123_v42  ;;  %v150_v56 = vpack.c.bf16 %v132_v54, %v129_v53 }
  0x2c   :  { %548 = vmatpush.bf16.msrb.mxu2 %v5388_v47  ;;  %v84_v47 = vunpack.c.l.bf16 %v50_v31 }
  0x2e   :  { %v128_v51 = vmul.f32 %v6100_v63, %v84_v47 }
  0x2f   :  { %5447 = vmatmul.msk.bf16.gmra.mxu2 %vm368_vm0, %v6148_v35  ;;  %510 = vmatpush.bf16.msra.mxu3 %v5316_v61 }
  0x30   :  { %549 = vmatpush.bf16.msrb.mxu2 %v5380_v62  ;;  %v149_v55 = vpack.c.bf16 %v131_v52, %v128_v51 }
  0x33   :  { %400 = vmatmul.bf16.gmra.mxu0 %v6152_v39  ;;  %511 = vmatpush.bf16.msra.mxu3 %v5308_v10 }
  0x34   :  { %439 = vmatmul.bf16.gmra.mxu1 %v6156_v40  ;;  %550 = vmatpush.bf16.msrb.mxu2 %v5372_v11 }
  0x36   :  { %512 = vmatmul.bf16.vlgmr.msra.gmra.mxu3 %v6124_v18  ;;  %v122_v18 = vmul.f32 %v6100_v63, %v78_v29 }
  0x38   :  { %v146_v44 = vpack.c.bf16 %v125_v37, %v122_v18 }
  0x3f   :  { %5448 = vmatmul.msk.bf16.gmra.mxu2 %vm368_vm0, %v6218_v14 }
  0x43   :  { %405 = vmatmul.bf16.gmra.mxu0 %v6228_v23 }
  0x44   :  { %444 = vmatmul.bf16.gmra.mxu1 %v6232_v24 }
  0x46   :  { %517 = vmatmul.bf16.gmra.mxu3 %v6152_v39 }
  0x4f   :  { %5449 = vmatmul.msk.bf16.gmra.mxu2 %vm368_vm0, %v6300_v4 }
  0x53   :  { %410 = vmatmul.bf16.gmra.mxu0 %v143_v12 }
  0x54   :  { %449 = vmatmul.bf16.gmra.mxu1 %v144_v15 }
  0x56   :  { %522 = vmatmul.bf16.gmra.mxu3 %v6228_v23 }
  0x5f   :  { %5450 = vmatmul.msk.bf16.gmra.mxu2 %vm368_vm0, %v6335_v41 }
  0x63   :  { %415 = vmatmul.bf16.gmra.mxu0 %v146_v44 }
  0x64   :  { %454 = vmatmul.bf16.gmra.mxu1 %v147_v45 }
  0x66   :  { %527 = vmatmul.bf16.gmra.mxu3 %v143_v12 }
  0x6f   :  { %551 = vmatmul.bf16.vlgmr.msrb.gmra.mxu2 %v6128_v19 }
  0x73   :  { %420 = vmatmul.bf16.gmra.mxu0 %v149_v55 }
  0x74   :  { %459 = vmatmul.bf16.gmra.mxu1 %v150_v56 }
  0x76   :  { %532 = vmatmul.bf16.gmra.mxu3 %v146_v44 }
  0x7f   :  { %556 = vmatmul.bf16.gmra.mxu2 %v6156_v40 }
  0x83   :  { %5451 = vmatmul.msk.bf16.vlgmr.msrb.gmra.mxu0 %vm368_vm0, %v6048_v38 }
  0x86   :  { %537 = vmatmul.bf16.gmra.mxu3 %v149_v55 }
  0x8f   :  { %561 = vmatmul.bf16.gmra.mxu2 %v6232_v24 }
  0x92   :  { %v474_v63 = vpop.f32.mrf.mxu2 }
  0x93   :  { %5452 = vmatmul.msk.bf16.gmra.mxu0 %vm368_vm0, %v6120_v13 }
  0x9a   :  { %v6360_v5 = vpop.f32.mrf.mxu2 }
  0x9f   :  { %566 = vmatmul.bf16.gmra.mxu2 %v144_v15 }
  0xa0   :  { %v396_v19 = vpop.f32.mrf.mxu0 }
  0xa1   :  { %v435_v39 = vpop.f32.mrf.mxu1 }
  0xa2   :  { %v436_v57 = vadd.f32 %v435_v39, %v396_v19  ;;  %v479_v23 = vpop.f32.mrf.mxu2 }
  0xa3   :  { %5453 = vmatmul.msk.bf16.gmra.mxu0 %vm368_vm0, %v6148_v35 }
  0xa4   :  { %v6364_v40 = vadd.f32 %v474_v63, %v436_v57 }
  0xa6   :  { %v682_v57 = vmul.f32 %v6364_v40, %v6364_v40 }
  0xa8   :  { %v398_v38 = vpop.f32.mrf.mxu0 }
  0xa9   :  { %v437_v24 = vpop.f32.mrf.mxu1 }
  0xaa   :  { %v6366_v58 = vpop.f32.mrf.mxu2  ;;  %v438_v51 = vadd.f32 %v437_v24, %v398_v38 }
  0xac   :  { %v6418_v55 = vadd.f32 %v6360_v5, %v438_v51 }
  0xae   :  { %v684_v24 = vmul.f32 %v6418_v55, %v6418_v55 }
  0xaf   :  { %571 = vmatmul.bf16.gmra.mxu2 %v147_v45 }
  0xb0   :  { %v401_v13 = vpop.f32.mrf.mxu0 }
  0xb1   :  { %v440_v59 = vpop.f32.mrf.mxu1 }
  0xb2   :  { %v441_v60 = vadd.f32 %v440_v59, %v401_v13  ;;  %v484_v61 = vpop.f32.mrf.mxu2 }
  0xb3   :  { %5454 = vmatmul.msk.bf16.gmra.mxu0 %vm368_vm0, %v6218_v14 }
  0xb4   :  { %v6370_v62 = vadd.f32 %v479_v23, %v441_v60 }
  0xb8   :  { %v6372_v0 = vpop.f32.mrf.mxu0 }
  0xb9   :  { %v6374_v35 = vpop.f32.mrf.mxu1  ;;  %v513_v29 = vpop.f32.mrf.mxu3 }
  0xba   :  { %v6376_v1 = vpop.f32.mrf.mxu2 }
  0xbf   :  { %576 = vmatmul.bf16.gmra.mxu2 %v150_v56 }
  0xc0   :  { %v406_v2 = vpop.f32.mrf.mxu0 }
  0xc1   :  { %v445_v3 = vpop.f32.mrf.mxu1  ;;  %v515_v34 = vpop.f32.mrf.mxu3 }
  0xc2   :  { %v446_v6 = vadd.f32 %v445_v3, %v406_v2  ;;  %v489_v7 = vpop.f32.mrf.mxu2 }
  0xc3   :  { %5455 = vmatmul.msk.bf16.gmra.mxu0 %vm368_vm0, %v6300_v4 }
  0xc4   :  { %v6380_v8 = vadd.f32 %v484_v61, %v446_v6 }
  0xc8   :  { %v6382_v9 = vpop.f32.mrf.mxu0 }
  0xc9   :  { %v6384_v14 = vpop.f32.mrf.mxu1  ;;  %v518_v44 = vpop.f32.mrf.mxu3 }
  0xca   :  { %v6386_v10 = vpop.f32.mrf.mxu2 }
  0xd0   :  { %v411_v11 = vpop.f32.mrf.mxu0 }
  0xd1   :  { %v450_v12 = vpop.f32.mrf.mxu1  ;;  %v520_v50 = vpop.f32.mrf.mxu3 }
  0xd2   :  { %v451_v15 = vadd.f32 %v450_v12, %v411_v11  ;;  %v494_v16 = vpop.f32.mrf.mxu2  ;;  %v443_v12 = vadd.f32 %v6374_v35, %v6372_v0 }
  0xd3   :  { %5456 = vmatmul.msk.bf16.gmra.mxu0 %vm368_vm0, %v6335_v41 }
  0xd4   :  { %v6390_v17 = vadd.f32 %v489_v7, %v451_v15 }
  0xd8   :  { %v6392_v20 = vpop.f32.mrf.mxu0 }
  0xd9   :  { %v6394_v4 = vpop.f32.mrf.mxu1  ;;  %v523_v59 = vpop.f32.mrf.mxu3 }
  0xda   :  { %v6396_v21 = vpop.f32.mrf.mxu2 }
  0xe0   :  { %v416_v22 = vpop.f32.mrf.mxu0 }
  0xe1   :  { %v455_v25 = vpop.f32.mrf.mxu1 }
  0xe2   :  { %v456_v26 = vadd.f32 %v455_v25, %v416_v22  ;;  %v499_v27 = vpop.f32.mrf.mxu2 }
  0xe4   :  { %v6398_v28 = vadd.f32 %v494_v16, %v456_v26  ;;  %v686_v16 = vmul.f32 %v6370_v62, %v6370_v62 }
  0xe8   :  { %v6400_v30 = vpop.f32.mrf.mxu0 }
  0xe9   :  { %v6402_v32 = vpop.f32.mrf.mxu1 }
  0xea   :  { %v6404_v33 = vpop.f32.mrf.mxu2 }
  0xf0   :  { %v421_v36 = vpop.f32.mrf.mxu0 }
  0xf1   :  { %v460_v18 = vpop.f32.mrf.mxu1 }
  0xf2   :  { %v461_v37 = vadd.f32 %v460_v18, %v421_v36  ;;  %v552_v41 = vpop.f32.mrf.mxu2 }
  0xf3   :  { %v553_v31 = vadd.f32 %v552_v41, %v513_v29  ;;  %v525_v29 = vpop.f32.mrf.mxu3 }
  0xf4   :  { %v6406_v42 = vadd.f32 %v499_v27, %v461_v37 }
  0xf8   :  { %v6408_v43 = vpop.f32.mrf.mxu0 }
  0xfa   :  { %v554_v45 = vpop.f32.mrf.mxu2 }
  0xfb   :  { %v555_v54 = vadd.f32 %v554_v45, %v515_v34  ;;  %v6446_v34 = vadd.f32 %v6366_v58, %v443_v12 }
  0xfd   :  { %v688_v41 = vmul.f32 %v6446_v34, %v6446_v34 }
 0x100   :  { %v591_v46 = vpop.f32.mrf.mxu0 }
 0x101   :  { %v6410_v47 = vadd.f32 %v591_v46, %v553_v31 }
 0x102   :  { %v557_v48 = vpop.f32.mrf.mxu2 }
 0x103   :  { %v622_v49 = vsel %vm621_vm1, %v6410_v47, 0.0  ;;  %v683_v53 = vmul.f32 %v6410_v47, %v6410_v47  ;;  %v558_v13 = vadd.f32 %v557_v48, %v518_v44 }
 0x104   :  { %v623_v52 = vadd.f32 %v622_v49, %v6364_v40  ;;  %v528_v49 = vpop.f32.mrf.mxu3 }
 0x105   :  { %v706_v19 = vsel %vm621_vm1, %v683_v53, 0.0 }
 0x106   :  { %624 = vadd.xlane.f32.xlu0 %v623_v52  ;;  %v707_v38 = vadd.f32 %v706_v19, %v682_v57  ;;  %v448_v19 = vadd.f32 %v6384_v14, %v6382_v9 }
 0x108   :  { %v593_v56 = vpop.f32.mrf.mxu0 }
 0x109   :  { %v6420_v63 = vadd.f32 %v593_v56, %v555_v54  ;;  %v690_v54 = vmul.f32 %v6380_v8, %v6380_v8 }
 0x10a   :  { %v559_v39 = vpop.f32.mrf.mxu2 }
 0x10b   :  { %v685_v23 = vmul.f32 %v6420_v63, %v6420_v63  ;;  %v626_v3 = vsel %vm621_vm1, %v6420_v63, 0.0  ;;  %v560_v27 = vadd.f32 %v559_v39, %v520_v50 }
 0x10c   :  { %v627_v15 = vadd.f32 %v626_v3, %v6418_v55 }
 0x10d   :  { %v710_v5 = vsel %vm621_vm1, %v685_v23, 0.0 }
 0x10e   :  { %708 = vadd.xlane.f32.xlu0 %v707_v38  ;;  %v711_v60 = vadd.f32 %v710_v5, %v684_v24  ;;  %v6473_v24 = vadd.f32 %v6376_v1, %v448_v19  ;;  %v530_v5 = vpop.f32.mrf.mxu3 }
 0x110   :  { %v596_v61 = vpop.f32.mrf.mxu0  ;;  %712 = vadd.xlane.f32.xlu1 %v711_v60  ;;  %v692_v1 = vmul.f32 %v6473_v24, %v6473_v24 }
 0x111   :  { %v6430_v2 = vadd.f32 %v596_v61, %v558_v13 }
 0x112   :  { %v562_v6 = vpop.f32.mrf.mxu2 }
 0x113   :  { %v687_v7 = vmul.f32 %v6430_v2, %v6430_v2  ;;  %v630_v11 = vsel %vm621_vm1, %v6430_v2, 0.0  ;;  %v563_v44 = vadd.f32 %v562_v6, %v523_v59 }
 0x114   :  { %v631_v26 = vadd.f32 %v630_v11, %v6370_v62 }
 0x115   :  { %v714_v22 = vsel %vm621_vm1, %v687_v7, 0.0 }
 0x116   :  { %628 = vadd.xlane.f32.xlu0 %v627_v15  ;;  %v715_v25 = vadd.f32 %v714_v22, %v686_v16  ;;  %v533_v15 = vpop.f32.mrf.mxu3  ;;  %v453_v22 = vadd.f32 %v6394_v4, %v6392_v20 }
 0x118   :  { %v598_v36 = vpop.f32.mrf.mxu0  ;;  %716 = vadd.xlane.f32.xlu2 %v715_v25  ;;  %632 = vadd.xlane.f32.xlu1 %v631_v26 }
 0x119   :  { %v6448_v0 = vadd.f32 %v598_v36, %v560_v27 }
 0x11a   :  { %v564_v35 = vpop.f32.mrf.mxu2 }
 0x11b   :  { %v689_v18 = vmul.f32 %v6448_v0, %v6448_v0  ;;  %v634_v37 = vsel %vm621_vm1, %v6448_v0, 0.0  ;;  %v565_v57 = vadd.f32 %v564_v35, %v525_v29  ;;  %v6496_v35 = vadd.f32 %v6386_v10, %v453_v22 }
 0x11c   :  { %v635_v31 = vadd.f32 %v634_v37, %v6446_v34 }
 0x11d   :  { %v718_v45 = vsel %vm621_vm1, %v689_v18, 0.0  ;;  %v694_v18 = vmul.f32 %v6390_v17, %v6390_v17 }
 0x11e   :  { %v719_v58 = vadd.f32 %v718_v45, %v688_v41  ;;  %v535_v45 = vpop.f32.mrf.mxu3 }
 0x120   :  { %v601_v46 = vpop.f32.mrf.mxu0  ;;  %720 = vadd.xlane.f32.xlu0 %v719_v58  ;;  %636 = vadd.xlane.f32.xlu1 %v635_v31 }
 0x121   :  { %v6458_v48 = vadd.f32 %v601_v46, %v563_v44 }
 0x122   :  { %v567_v50 = vpop.f32.mrf.mxu2 }
 0x123   :  { %v638_v51 = vsel %vm621_vm1, %v6458_v48, 0.0  ;;  %v691_v52 = vmul.f32 %v6458_v48, %v6458_v48  ;;  %v568_v61 = vadd.f32 %v567_v50, %v528_v49  ;;  %v696_v49 = vmul.f32 %v6496_v35, %v6496_v35 }
 0x124   :  { %v639_v53 = vadd.f32 %v638_v51, %v6380_v8 }
 0x125   :  { %v722_v56 = vsel %vm621_vm1, %v691_v52, 0.0 }
 0x126   :  { %640 = vadd.xlane.f32.xlu2 %v639_v53  ;;  %v723_v39 = vadd.f32 %v722_v56, %v690_v54  ;;  %v458_v54 = vadd.f32 %v6402_v32, %v6400_v30 }
 0x128   :  { %v603_v23 = vpop.f32.mrf.mxu0  ;;  %724 = vadd.xlane.f32.xlu1 %v723_v39 }
 0x129   :  { %v6470_v38 = vadd.f32 %v603_v23, %v565_v57  ;;  %v6521_v23 = vadd.f32 %v6396_v21, %v458_v54 }
 0x12a   :  { %v569_v59 = vpop.f32.mrf.mxu2 }
 0x12b   :  { %v642_v13 = vsel %vm621_vm1, %v6470_v38, 0.0  ;;  %v693_v9 = vmul.f32 %v6470_v38, %v6470_v38  ;;  %v570_v26 = vadd.f32 %v569_v59, %v530_v5  ;;  %v538_v5 = vpop.f32.mrf.mxu3  ;;  %v698_v59 = vmul.f32 %v6398_v28, %v6398_v28 }
 0x12c   :  { %v643_v60 = vadd.f32 %v642_v13, %v6473_v24 }
 0x12d   :  { %v726_v6 = vsel %vm621_vm1, %v693_v9, 0.0 }
 0x12e   :  { %644 = vadd.xlane.f32.xlu2 %v643_v60  ;;  %v727_v11 = vadd.f32 %v726_v6, %v692_v1  ;;  %v700_v1 = vmul.f32 %v6521_v23, %v6521_v23 }
 0x130   :  { %v606_v14 = vpop.f32.mrf.mxu0 }
 0x131   :  { %v6480_v3 = vadd.f32 %v606_v14, %v568_v61 }
 0x132   :  { %v572_v25 = vpop.f32.mrf.mxu2 }
 0x133   :  { %v646_v7 = vsel %vm621_vm1, %v6480_v3, 0.0  ;;  %v695_v16 = vmul.f32 %v6480_v3, %v6480_v3  ;;  %v573_v4 = vadd.f32 %v572_v25, %v533_v15  ;;  %v540_v15 = vpop.f32.mrf.mxu3 }
 0x134   :  { %v647_v12 = vadd.f32 %v646_v7, %v6390_v17  ;;  %v462_v7 = vpop.f32.mrf.mxu1 }
 0x135   :  { %v730_v36 = vsel %vm621_vm1, %v695_v16, 0.0 }
 0x136   :  { %728 = vadd.xlane.f32.xlu2 %v727_v11  ;;  %648 = vadd.xlane.f32.xlu0 %v647_v12  ;;  %v731_v41 = vadd.f32 %v730_v36, %v694_v18 }
 0x138   :  { %v608_v27 = vpop.f32.mrf.mxu0 }
 0x139   :  { %v6492_v29 = vadd.f32 %v608_v27, %v570_v26  ;;  %v463_v26 = vadd.f32 %v462_v7, %v6408_v43 }
 0x13a   :  { %v574_v58 = vpop.f32.mrf.mxu2 }
 0x13b   :  { %v650_v37 = vsel %vm621_vm1, %v6492_v29, 0.0  ;;  %v697_v44 = vmul.f32 %v6492_v29, %v6492_v29  ;;  %v575_v56 = vadd.f32 %v574_v58, %v535_v45 }
 0x13c   :  { %v651_v20 = vadd.f32 %v650_v37, %v6496_v35 }
 0x13d   :  { %v734_v46 = vsel %vm621_vm1, %v697_v44, 0.0 }
 0x13e   :  { %732 = vadd.xlane.f32.xlu0 %v731_v41  ;;  %652 = vadd.xlane.f32.xlu1 %v651_v20  ;;  %v735_v51 = vadd.f32 %v734_v46, %v696_v49  ;;  %v6545_v41 = vadd.f32 %v6404_v33, %v463_v26  ;;  %v702_v20 = vmul.f32 %v6406_v42, %v6406_v42 }
 0x140   :  { %v611_v31 = vpop.f32.mrf.mxu0  ;;  %v704_v33 = vmul.f32 %v6545_v41, %v6545_v41 }
 0x141   :  { %v6505_v10 = vadd.f32 %v611_v31, %v573_v4 }
 0x142   :  { %v577_v13 = vpop.f32.mrf.mxu2 }
 0x143   :  { %v654_v50 = vsel %vm621_vm1, %v6505_v10, 0.0  ;;  %v699_v53 = vmul.f32 %v6505_v10, %v6505_v10  ;;  %v578_v61 = vadd.f32 %v577_v13, %v538_v5 }
 0x144   :  { %v655_v52 = vadd.f32 %v654_v50, %v6398_v28  ;;  %v5929_v50 = vmov 0  }
 0x145   :  { %v738_v57 = vsel %vm621_vm1, %v699_v53, 0.0  ;;  %5758 = vset.pattern.permute.xlu0 %v5929_v50  ;;  %5759 = vset.pattern.permute.xlu1 %v5929_v50 }
 0x146   :  { %736 = vadd.xlane.f32.xlu1 %v735_v51  ;;  %656 = vadd.xlane.f32.xlu2 %v655_v52  ;;  %v739_v30 = vadd.f32 %v738_v57, %v698_v59 }
 0x147   :  { %5760 = vset.pattern.permute.xlu2 %v5929_v50 }
 0x148   :  { %v613_v19 = vpop.f32.mrf.mxu0 }
 0x149   :  { %v6517_v39 = vadd.f32 %v613_v19, %v575_v56 }
 0x14a   :  { %v579_v12 = vpop.f32.mrf.mxu2 }
 0x14b   :  { %v658_v60 = vsel %vm621_vm1, %v6517_v39, 0.0  ;;  %v701_v9 = vmul.f32 %v6517_v39, %v6517_v39  ;;  %v580_v27 = vadd.f32 %v579_v12, %v540_v15 }
 0x14c   :  { %v659_v32 = vadd.f32 %v658_v60, %v6521_v23 }
 0x14d   :  { %v742_v6 = vsel %vm621_vm1, %v701_v9, 0.0 }
 0x14e   :  { %740 = vadd.xlane.f32.xlu2 %v739_v30  ;;  %660 = vadd.xlane.f32.xlu0 %v659_v32  ;;  %v743_v16 = vadd.f32 %v742_v6, %v700_v1 }
 0x150   :  { %v616_v14 = vpop.f32.mrf.mxu0 }
 0x151   :  { %v6530_v21 = vadd.f32 %v616_v14, %v578_v61 }
 0x153   :  { %v662_v11 = vsel %vm621_vm1, %v6530_v21, 0.0  ;;  %v703_v25 = vmul.f32 %v6530_v21, %v6530_v21 }
 0x154   :  { %v663_v22 = vadd.f32 %v662_v11, %v6406_v42 }
 0x155   :  { %v746_v37 = vsel %vm621_vm1, %v703_v25, 0.0 }
 0x156   :  { %744 = vadd.xlane.f32.xlu0 %v743_v16  ;;  %664 = vadd.xlane.f32.xlu1 %v663_v22  ;;  %v747_v44 = vadd.f32 %v746_v37, %v702_v20 }
 0x158   :  { %v618_v36 = vpop.f32.mrf.mxu0 }
 0x159   :  { %v6541_v18 = vadd.f32 %v618_v36, %v580_v27 }
 0x15b   :  { %v666_v4 = vsel %vm621_vm1, %v6541_v18, 0.0  ;;  %v705_v45 = vmul.f32 %v6541_v18, %v6541_v18 }
 0x15c   :  { %v667_v43 = vadd.f32 %v666_v4, %v6545_v41 }
 0x15d   :  { %v750_v58 = vsel %vm621_vm1, %v705_v45, 0.0 }
 0x15e   :  { %748 = vadd.xlane.f32.xlu1 %v747_v44  ;;  %668 = vadd.xlane.f32.xlu2 %v667_v43  ;;  %v751_v31 = vadd.f32 %v750_v58, %v704_v33  ;;  %v802_v58 = vld [vmem:[%s10127_s3] sm:$0xff] }
 0x166   :  { %752 = vadd.xlane.f32.xlu2 %v751_v31 }
 0x179   :  { %v625_v46 = vpop.xlane.xlu0 %624 }
 0x17a   :  { %v6557_v49 = vmul.f32 0.0051020407, %v625_v46 }
 0x17c   :  { %v766_v52 = vmul.f32 %v6557_v49, %v6557_v49 }
 0x181   :  { %v709_v51 = vpop.xlane.xlu0 %708 }
 0x182   :  { %v754_v53 = vmul.f32 0.0051020407, %v709_v51 }
 0x183   :  { %v713_v54 = vpop.xlane.xlu1 %712 }
 0x184   :  { %v778_v56 = vsub.f32 %v754_v53, %v766_v52  ;;  %v755_v30 = vmul.f32 0.0051020407, %v713_v54 }
 0x186   :  { %v790_v19 = vmax.f32 %v778_v56, 0.0 }
 0x188   :  { %v814_v57 = vadd.f32 1e-05, %v790_v19 }
 0x189   :  { %v629_v13 = vpop.xlane.xlu0 %628 }
 0x18a   :  { %5761 = vrsqrt.f32 %v814_v57  ;;  %v6561_v5 = vmul.f32 0.0051020407, %v629_v13  ;;  %vm832_vm3 = vweird.f32 %v814_v57 }
 0x18b   :  { %v717_v59 = vpop.xlane.xlu2 %716  ;;  %v633_v60 = vpop.xlane.xlu1 %632 }
 0x18c   :  { %v767_v32 = vmul.f32 %v6561_v5, %v6561_v5  ;;  %v6565_v61 = vmul.f32 0.0051020407, %v633_v60  ;;  %v756_v14 = vmul.f32 0.0051020407, %v717_v59 }
 0x18e   :  { %v779_v9 = vsub.f32 %v755_v30, %v767_v32  ;;  %v768_v6 = vmul.f32 %v6565_v61, %v6565_v61 }
 0x190   :  { %v5762_v1 = vpop.eup %5761  ;;  %v791_v7 = vmax.f32 %v779_v9, 0.0  ;;  %v780_v11 = vsub.f32 %v756_v14, %v768_v6 }
 0x191   :  { %v827_v12 = vmul.f32 %v5762_v1, %v814_v57  ;;  %vm833_vm2 = vweird.f32 %v5762_v1  ;;  %v958_v57 = vld [vmem:[%s10128_s4] sm:$0xff] }
 0x192   :  { %v815_v15 = vadd.f32 1e-05, %v791_v7  ;;  %v792_v16 = vmax.f32 %v780_v11, 0.0  ;;  %vm834_vm4 = vmor %vm832_vm3, %vm833_vm2 }
 0x193   :  { %v828_v22 = vmul.f32 %v5762_v1, %v827_v12  ;;  %v637_v25 = vpop.xlane.xlu1 %636  ;;  %v721_v27 = vpop.xlane.xlu0 %720 }
 0x194   :  { %5763 = vrsqrt.f32 %v815_v15  ;;  %v816_v26 = vadd.f32 1e-05, %v792_v16  ;;  %v6569_v37 = vmul.f32 0.0051020407, %v637_v25  ;;  %v757_v20 = vmul.f32 0.0051020407, %v721_v27 }
 0x195   :  { %v829_v36 = vmul.f32 0.5, %v828_v22  ;;  %v803_v25 = vld [vmem:[%s10127_s3 + $0x8] sm:$0xff]  ;;  %vm842_vm6 = vweird.f32 %v815_v15 }
 0x196   :  { %5765 = vrsqrt.f32 %v816_v26  ;;  %v769_v4 = vmul.f32 %v6569_v37, %v6569_v37  ;;  %vm852_vm9 = vweird.f32 %v816_v26 }
 0x197   :  { %v830_v44 = vsub.f32 1.5, %v829_v36 }
 0x198   :  { %v781_v43 = vsub.f32 %v757_v20, %v769_v4  ;;  %v804_v4 = vld [vmem:[%s10127_s3 + $0x10] sm:$0xff] }
 0x199   :  { %v641_v45 = vpop.xlane.xlu2 %640  ;;  %v831_v33 = vmul.f32 %v5762_v1, %v830_v44 }
 0x19a   :  { %v5764_v31 = vpop.eup %5763  ;;  %v6576_v46 = vmul.f32 0.0051020407, %v641_v45  ;;  %v793_v51 = vmax.f32 %v781_v43, 0.0 }
 0x19b   :  { %v837_v50 = vmul.f32 %v5764_v31, %v815_v15  ;;  %v725_v52 = vpop.xlane.xlu1 %724  ;;  %v835_v53 = vsel %vm834_vm4, %v5762_v1, %v831_v33  ;;  %vm843_vm5 = vweird.f32 %v5764_v31 }
 0x19c   :  { %v5766_v54 = vpop.eup %5765  ;;  %v770_v56 = vmul.f32 %v6576_v46, %v6576_v46  ;;  %v758_v19 = vmul.f32 0.0051020407, %v725_v52  ;;  %v946_v13 = vmul.f32 %v835_v53, %v802_v58  ;;  %v817_v30 = vadd.f32 1e-05, %v793_v51  ;;  %vm844_vm8 = vmor %vm842_vm6, %vm843_vm5 }
 0x19d   :  { %v838_v59 = vmul.f32 %v5764_v31, %v837_v50  ;;  %v847_v60 = vmul.f32 %v5766_v54, %v816_v26  ;;  %vm853_vm7 = vweird.f32 %v5766_v54 }
 0x19e   :  { %v782_v32 = vsub.f32 %v758_v19, %v770_v56  ;;  %996 = vperm.xlu0 %5758, %v946_v13   ;;  %v970_v9 = vmul.f32 %v946_v13, %v6557_v49  ;;  %5767 = vrsqrt.f32 %v817_v30  ;;  %vm854_vm10 = vmor %vm852_vm9, %vm853_vm7  ;;  %vm862_vm12 = vweird.f32 %v817_v30 }
 0x19f   :  { %v839_v14 = vmul.f32 0.5, %v838_v59  ;;  %v848_v6 = vmul.f32 %v5766_v54, %v847_v60 }
 0x1a0   :  { %v794_v1 = vmax.f32 %v782_v32, 0.0  ;;  %v982_v7 = vsub.f32 %v958_v57, %v970_v9  ;;  %v960_v9 = vld [vmem:[%s10128_s4 + $0x10] sm:$0xff] }
 0x1a1   :  { %v840_v11 = vsub.f32 1.5, %v839_v14  ;;  %v849_v12 = vmul.f32 0.5, %v848_v6  ;;  %v645_v16 = vpop.xlane.xlu2 %644  ;;  %v805_v14 = vld [vmem:[%s10127_s3 + $0x18] sm:$0xff] }
 0x1a2   :  { %v6584_v22 = vadd.f32 1e-05, %v794_v1  ;;  %1080 = vperm.xlu1 %5759, %v982_v7   ;;  %v6593_v58 = vmul.f32 0.0051020407, %v645_v16 }
 0x1a3   :  { %v841_v27 = vmul.f32 %v5764_v31, %v840_v11  ;;  %v850_v36 = vsub.f32 1.5, %v849_v12 }
 0x1a4   :  { %5769 = vrsqrt.f32 %v6584_v22  ;;  %v5768_v49 = vpop.eup %5767  ;;  %v771_v26 = vmul.f32 %v6593_v58, %v6593_v58  ;;  %vm872_vm15 = vweird.f32 %v6584_v22 }
 0x1a5   :  { %v845_v20 = vsel %vm844_vm8, %v5764_v31, %v841_v27  ;;  %v851_v44 = vmul.f32 %v5766_v54, %v850_v36  ;;  %v857_v45 = vmul.f32 %v5768_v49, %v817_v30  ;;  %v959_v31 = vld [vmem:[%s10128_s4 + $0x8] sm:$0xff]  ;;  %vm863_vm11 = vweird.f32 %v5768_v49  ;;  %v961_v30 = vld [vmem:[%s10128_s4 + $0x18] sm:$0xff] }
 0x1a6   :  { %v947_v43 = vmul.f32 %v845_v20, %v803_v25  ;;  %vm864_vm13 = vmor %vm862_vm12, %vm863_vm11 }
 0x1a7   :  { %v855_v33 = vsel %vm854_vm10, %v5766_v54, %v851_v44  ;;  %v858_v51 = vmul.f32 %v5768_v49, %v857_v45 }
 0x1a8   :  { %v971_v15 = vmul.f32 %v947_v43, %v6561_v5  ;;  %v948_v50 = vmul.f32 %v855_v33, %v804_v4 }
 0x1a9   :  { %v729_v52 = vpop.xlane.xlu2 %728  ;;  %v649_v53 = vpop.xlane.xlu0 %648  ;;  %v859_v19 = vmul.f32 0.5, %v858_v51 }
 0x1aa   :  { %v5770_v56 = vpop.eup %5769  ;;  %v759_v13 = vmul.f32 0.0051020407, %v729_v52  ;;  %1001 = vperm.xlu1 %5759, %v947_v43   ;;  %1006 = vperm.xlu2 %5760, %v948_v50   ;;  %v983_v59 = vsub.f32 %v959_v31, %v971_v15  ;;  %v972_v5 = vmul.f32 %v948_v50, %v6565_v61  ;;  %v6609_v7 = vmul.f32 0.0051020407, %v649_v53 }
 0x1ab   :  { %v867_v54 = vmul.f32 %v5770_v56, %v6584_v22  ;;  %v860_v60 = vsub.f32 1.5, %v859_v19  ;;  %vm873_vm14 = vweird.f32 %v5770_v56 }
 0x1ac   :  { %v783_v57 = vsub.f32 %v759_v13, %v771_v26  ;;  %1085 = vperm.xlu0 %5758, %v983_v59   ;;  %v984_v16 = vsub.f32 %v960_v9, %v972_v5  ;;  %v772_v4 = vmul.f32 %v6609_v7, %v6609_v7  ;;  %vm874_vm0 = vmor %vm872_vm15, %vm873_vm14 }
 0x1ad   :  { %v868_v32 = vmul.f32 %v5770_v56, %v867_v54  ;;  %v861_v6 = vmul.f32 %v5768_v49, %v860_v60 }
 0x1ae   :  { %v795_v1 = vmax.f32 %v783_v57, 0.0 }
 0x1af   :  { %v869_v61 = vmul.f32 0.5, %v868_v32  ;;  %v865_v11 = vsel %vm864_vm13, %v5768_v49, %v861_v6  ;;  %v806_v49 = vld [vmem:[%s10127_s3 + $0x20] sm:$0xff] }
 0x1b0   :  { %v819_v12 = vadd.f32 1e-05, %v795_v1  ;;  %v949_v25 = vmul.f32 %v865_v11, %v805_v14 }
 0x1b1   :  { %v870_v27 = vsub.f32 1.5, %v869_v61  ;;  %v733_v36 = vpop.xlane.xlu0 %732  ;;  %v653_v20 = vpop.xlane.xlu1 %652 }
 0x1b2   :  { %5771 = vrsqrt.f32 %v819_v12  ;;  %v760_v44 = vmul.f32 0.0051020407, %v733_v36  ;;  %1090 = vperm.xlu2 %5760, %v984_v16   ;;  %v973_v43 = vmul.f32 %v949_v25, %v6569_v37  ;;  %v6621_v31 = vmul.f32 0.0051020407, %v653_v20  ;;  %v962_v37 = vld [vmem:[%s10128_s4 + $0x20] sm:$0xff] }
 0x1b3   :  { %v871_v45 = vmul.f32 %v5770_v56, %v870_v27  ;;  %vm882_vm3 = vweird.f32 %v819_v12 }
 0x1b4   :  { %v784_v33 = vsub.f32 %v760_v44, %v772_v4  ;;  %v985_v15 = vsub.f32 %v961_v30, %v973_v43 }
 0x1b5   :  { %v875_v50 = vsel %vm874_vm0, %v5770_v56, %v871_v45  ;;  %v773_v56 = vmul.f32 %v6621_v31, %v6621_v31 }
 0x1b6   :  { %v796_v51 = vmax.f32 %v784_v33, 0.0  ;;  %v950_v52 = vmul.f32 %v875_v50, %v806_v49  ;;  %1095 = vperm.xlu1 %5759, %v985_v15  }
 0x1b8   :  { %v5772_v53 = vpop.eup %5771  ;;  %v820_v22 = vadd.f32 1e-05, %v796_v51  ;;  %v974_v19 = vmul.f32 %v950_v52, %v6576_v46 }
 0x1b9   :  { %v877_v26 = vmul.f32 %v5772_v53, %v819_v12  ;;  %v737_v13 = vpop.xlane.xlu1 %736  ;;  %v657_v54 = vpop.xlane.xlu2 %656  ;;  %vm883_vm2 = vweird.f32 %v5772_v53 }
 0x1ba   :  { %5773 = vrsqrt.f32 %v820_v22  ;;  %v761_v59 = vmul.f32 0.0051020407, %v737_v13  ;;  %1011 = vperm.xlu2 %5760, %v949_v25   ;;  %v986_v5 = vsub.f32 %v962_v37, %v974_v19  ;;  %v6629_v14 = vmul.f32 0.0051020407, %v657_v54  ;;  %v807_v25 = vld [vmem:[%s10127_s3 + $0x28] sm:$0xff]  ;;  %vm884_vm4 = vmor %vm882_vm3, %vm883_vm2 }
 0x1bb   :  { %v878_v60 = vmul.f32 %v5772_v53, %v877_v26  ;;  %vm892_vm6 = vweird.f32 %v820_v22  ;;  %v963_v13 = vld [vmem:[%s10128_s4 + $0x28] sm:$0xff] }
 0x1bc   :  { %v785_v57 = vsub.f32 %v761_v59, %v773_v56  ;;  %1100 = vperm.xlu0 %5758, %v986_v5   ;;  %v774_v36 = vmul.f32 %v6629_v14, %v6629_v14 }
 0x1bd   :  { %v879_v32 = vmul.f32 0.5, %v878_v60 }
 0x1be   :  { %v797_v9 = vmax.f32 %v785_v57, 0.0  ;;  %1016 = vperm.xlu1 %5759, %v950_v52  }
 0x1bf   :  { %v880_v6 = vsub.f32 1.5, %v879_v32 }
 0x1c0   :  { %v5774_v46 = vpop.eup %5773  ;;  %v821_v1 = vadd.f32 1e-05, %v797_v9 }
 0x1c1   :  { %v887_v61 = vmul.f32 %v5774_v46, %v820_v22  ;;  %v741_v11 = vpop.xlane.xlu2 %740  ;;  %v661_v16 = vpop.xlane.xlu0 %660  ;;  %v881_v27 = vmul.f32 %v5772_v53, %v880_v6  ;;  %vm893_vm5 = vweird.f32 %v5774_v46 }
 0x1c2   :  { %5775 = vrsqrt.f32 %v821_v1  ;;  %v762_v20 = vmul.f32 0.0051020407, %v741_v11  ;;  %v6636_v33 = vmul.f32 0.0051020407, %v661_v16  ;;  %vm894_vm7 = vmor %vm892_vm6, %vm893_vm5  ;;  %vm902_vm9 = vweird.f32 %v821_v1 }
 0x1c3   :  { %v888_v4 = vmul.f32 %v5774_v46, %v887_v61  ;;  %v885_v44 = vsel %vm884_vm4, %v5772_v53, %v881_v27  ;;  %v808_v53 = vld [vmem:[%s10127_s3 + $0x30] sm:$0xff] }
 0x1c4   :  { %v786_v30 = vsub.f32 %v762_v20, %v774_v36  ;;  %v951_v43 = vmul.f32 %v885_v44, %v807_v25  ;;  %v775_v54 = vmul.f32 %v6636_v33, %v6636_v33 }
 0x1c5   :  { %v889_v49 = vmul.f32 0.5, %v888_v4  ;;  %v964_v4 = vld [vmem:[%s10128_s4 + $0x30] sm:$0xff] }
 0x1c6   :  { %v798_v45 = vmax.f32 %v786_v30, 0.0  ;;  %1021 = vperm.xlu2 %5760, %v951_v43   ;;  %v975_v12 = vmul.f32 %v951_v43, %v6593_v58 }
 0x1c7   :  { %v890_v15 = vsub.f32 1.5, %v889_v49 }
 0x1c8   :  { %v5776_v50 = vpop.eup %5775  ;;  %v6638_v51 = vadd.f32 1e-05, %v798_v45  ;;  %v987_v57 = vsub.f32 %v963_v13, %v975_v12 }
 0x1c9   :  { %v897_v52 = vmul.f32 %v5776_v50, %v821_v1  ;;  %v745_v37 = vpop.xlane.xlu0 %744  ;;  %v665_v19 = vpop.xlane.xlu1 %664  ;;  %v891_v26 = vmul.f32 %v5774_v46, %v890_v15  ;;  %vm903_vm8 = vweird.f32 %v5776_v50 }
 0x1ca   :  { %5777 = vrsqrt.f32 %v6638_v51  ;;  %v763_v56 = vmul.f32 0.0051020407, %v745_v37  ;;  %v6650_v6 = vmul.f32 0.0051020407, %v665_v19  ;;  %vm904_vm10 = vmor %vm902_vm9, %vm903_vm8  ;;  %vm912_vm12 = vweird.f32 %v6638_v51 }
 0x1cb   :  { %v898_v58 = vmul.f32 %v5776_v50, %v897_v52  ;;  %v895_v59 = vsel %vm894_vm7, %v5774_v46, %v891_v26  ;;  %v809_v46 = vld [vmem:[%s10127_s3 + $0x38] sm:$0xff]  ;;  %vm1426_vm8 = vcmask 785408  }
 0x1cc   :  { %v787_v5 = vsub.f32 %v763_v56, %v775_v54  ;;  %v952_v60 = vmul.f32 %v895_v59, %v808_v53  ;;  %v776_v44 = vmul.f32 %v6650_v6, %v6650_v6  ;;  %v810_v56 = vld [vmem:[%s10127_s3 + $0x40] sm:$0xff] }
 0x1cd   :  { %v899_v32 = vmul.f32 0.5, %v898_v58 }
 0x1ce   :  { %v799_v9 = vmax.f32 %v787_v5, 0.0  ;;  %1026 = vperm.xlu1 %5759, %v952_v60   ;;  %1105 = vperm.xlu2 %5760, %v987_v57   ;;  %v976_v16 = vmul.f32 %v952_v60, %v6609_v7 }
 0x1cf   :  { %v900_v22 = vsub.f32 1.5, %v899_v32 }
 0x1d0   :  { %v5778_v61 = vpop.eup %5777  ;;  %v823_v11 = vadd.f32 1e-05, %v799_v9  ;;  %v988_v15 = vsub.f32 %v964_v4, %v976_v16 }
 0x1d1   :  { %v907_v25 = vmul.f32 %v5778_v61, %v6638_v51  ;;  %v749_v27 = vpop.xlane.xlu1 %748  ;;  %v669_v36 = vpop.xlane.xlu2 %668  ;;  %v901_v20 = vmul.f32 %v5776_v50, %v900_v22  ;;  %vm913_vm11 = vweird.f32 %v5778_v61 }
 0x1d2   :  { %5779 = vrsqrt.f32 %v823_v11  ;;  %v764_v30 = vmul.f32 0.0051020407, %v749_v27  ;;  %v6662_v37 = vmul.f32 0.0051020407, %v669_v36  ;;  %vm914_vm13 = vmor %vm912_vm12, %vm913_vm11  ;;  %vm922_vm15 = vweird.f32 %v823_v11 }
 0x1d3   :  { %v908_v7 = vmul.f32 %v5778_v61, %v907_v25  ;;  %v905_v43 = vsel %vm904_vm10, %v5776_v50, %v901_v20  ;;  %v965_v50 = vld [vmem:[%s10128_s4 + $0x38] sm:$0xff]  ;;  %v811_v20 = vld [vmem:[%s10127_s3 + $0x48] sm:$0xff] }
 0x1d4   :  { %v788_v49 = vsub.f32 %v764_v30, %v776_v44  ;;  %v953_v45 = vmul.f32 %v905_v43, %v809_v46  ;;  %v777_v59 = vmul.f32 %v6662_v37, %v6662_v37 }
 0x1d5   :  { %v909_v12 = vmul.f32 0.5, %v908_v7 }
 0x1d6   :  { %v800_v52 = vmax.f32 %v788_v49, 0.0  ;;  %1031 = vperm.xlu0 %5758, %v953_v45   ;;  %1110 = vperm.xlu1 %5759, %v988_v15   ;;  %v977_v26 = vmul.f32 %v953_v45, %v6621_v31 }
 0x1d7   :  { %v910_v1 = vsub.f32 1.5, %v909_v12 }
 0x1d8   :  { %v5780_v19 = vpop.eup %5779  ;;  %v824_v53 = vadd.f32 1e-05, %v800_v52  ;;  %v989_v32 = vsub.f32 %v965_v50, %v977_v26  ;;  %v812_v52 = vld [vmem:[%s10127_s3 + $0x50] sm:$0xff] }
 0x1d9   :  { %v917_v13 = vmul.f32 %v5780_v19, %v823_v11  ;;  %v753_v54 = vpop.xlane.xlu2 %752  ;;  %v911_v58 = vmul.f32 %v5778_v61, %v910_v1  ;;  %vm923_vm14 = vweird.f32 %v5780_v19  ;;  %v967_v11 = vld [vmem:[%s10128_s4 + $0x48] sm:$0xff] }
 0x1da   :  { %5781 = vrsqrt.f32 %v824_v53  ;;  %v765_v5 = vmul.f32 0.0051020407, %v753_v54  ;;  %vm924_vm0 = vmor %vm922_vm15, %vm923_vm14  ;;  %vm932_vm3 = vweird.f32 %v824_v53 }
 0x1db   :  { %v918_v31 = vmul.f32 %v5780_v19, %v917_v13  ;;  %v915_v60 = vsel %vm914_vm13, %v5778_v61, %v911_v58  ;;  %v966_v61 = vld [vmem:[%s10128_s4 + $0x40] sm:$0xff]  ;;  %v968_v58 = vld [vmem:[%s10128_s4 + $0x50] sm:$0xff] }
 0x1dc   :  { %v789_v57 = vsub.f32 %v765_v5, %v777_v59  ;;  %v954_v9 = vmul.f32 %v915_v60, %v810_v56 }
 0x1dd   :  { %v919_v22 = vmul.f32 0.5, %v918_v31 }
 0x1de   :  { %v801_v16 = vmax.f32 %v789_v57, 0.0  ;;  %1115 = vperm.xlu0 %5758, %v989_v32   ;;  %1036 = vperm.xlu2 %5760, %v954_v9   ;;  %v978_v51 = vmul.f32 %v954_v9, %v6629_v14 }
 0x1df   :  { %v920_v25 = vsub.f32 1.5, %v919_v22 }
 0x1e0   :  { %v5782_v27 = vpop.eup %5781  ;;  %v825_v36 = vadd.f32 1e-05, %v801_v16  ;;  %v990_v43 = vsub.f32 %v966_v61, %v978_v51 }
 0x1e1   :  { %v927_v46 = vmul.f32 %v5782_v27, %v824_v53  ;;  %v921_v4 = vmul.f32 %v5780_v19, %v920_v25  ;;  %vm933_vm2 = vweird.f32 %v5782_v27  ;;  %v813_v53 = vld [vmem:[%s10127_s3 + $0x58] sm:$0xff] }
 0x1e2   :  { %5783 = vrsqrt.f32 %v825_v36  ;;  %vm934_vm4 = vmor %vm932_vm3, %vm933_vm2  ;;  %vm942_vm6 = vweird.f32 %v825_v36 }
 0x1e3   :  { %v928_v44 = vmul.f32 %v5782_v27, %v927_v46  ;;  %v925_v30 = vsel %vm924_vm0, %v5780_v19, %v921_v4 }
 0x1e4   :  { %v955_v7 = vmul.f32 %v925_v30, %v811_v20 }
 0x1e5   :  { %v929_v49 = vmul.f32 0.5, %v928_v44 }
 0x1e6   :  { %1041 = vperm.xlu1 %5759, %v955_v7   ;;  %1120 = vperm.xlu2 %5760, %v990_v43   ;;  %v979_v15 = vmul.f32 %v955_v7, %v6636_v33 }
 0x1e7   :  { %v930_v14 = vsub.f32 1.5, %v929_v49 }
 0x1e8   :  { %v5784_v45 = vpop.eup %5783  ;;  %v991_v13 = vsub.f32 %v967_v11, %v979_v15 }
 0x1e9   :  { %v937_v12 = vmul.f32 %v5784_v45, %v825_v36  ;;  %v931_v1 = vmul.f32 %v5782_v27, %v930_v14  ;;  %vm943_vm5 = vweird.f32 %v5784_v45 }
 0x1ea   :  { %vm944_vm7 = vmor %vm942_vm6, %vm943_vm5 }
 0x1eb   :  { %v938_v19 = vmul.f32 %v5784_v45, %v937_v12  ;;  %v935_v26 = vsel %vm934_vm4, %v5782_v27, %v931_v1 }
 0x1ec   :  { %v956_v54 = vmul.f32 %v935_v26, %v812_v52 }
 0x1ed   :  { %v939_v50 = vmul.f32 0.5, %v938_v19 }
 0x1ee   :  { %1125 = vperm.xlu1 %5759, %v991_v13   ;;  %1046 = vperm.xlu0 %5758, %v956_v54   ;;  %v980_v56 = vmul.f32 %v956_v54, %v6650_v6  ;;  %v969_v6 = vld [vmem:[%s10128_s4 + $0x58] sm:$0xff] }
 0x1ef   :  { %v940_v33 = vsub.f32 1.5, %v939_v50 }
 0x1f0   :  { %v992_v31 = vsub.f32 %v968_v58, %v980_v56 }
 0x1f1   :  { %v941_v59 = vmul.f32 %v5784_v45, %v940_v33 }
 0x1f3   :  { %v945_v5 = vsel %vm944_vm7, %v5784_v45, %v941_v59 }
 0x1f4   :  { %v957_v60 = vmul.f32 %v945_v5, %v813_v53 }
 0x1f6   :  { %1130 = vperm.xlu0 %5758, %v992_v31   ;;  %1051 = vperm.xlu2 %5760, %v957_v60   ;;  %v981_v57 = vmul.f32 %v957_v60, %v6662_v37 }
 0x1f8   :  { %v993_v32 = vsub.f32 %v969_v6, %v981_v57 }
 0x1fe   :  { %1135 = vperm.xlu2 %5760, %v993_v32  }
 0x204   :  { %v6699_v9 = vpop.permute.xlu2 %1006 }
 0x20c   :  { %v6701_v22 = vpop.permute.xlu2 %1090 }
 0x210   :  { %v6709_v36 = vpop.permute.xlu0 %996 }
 0x214   :  { %v6703_v16 = vpop.permute.xlu1 %1080  ;;  %v6705_v25 = vpop.permute.xlu2 %1011 }
 0x21c   :  { %v6707_v27 = vpop.permute.xlu1 %1001 }
 0x21e   :  { %v6713_v46 = vpop.permute.xlu0 %1085 }
 0x220   :  { %v1022_v51 = vpop.permute.xlu2 %1021 }
 0x228   :  { %v6711_v37 = vpop.permute.xlu1 %1095  ;;  %v6715_v20 = vpop.permute.xlu2 %1105 }
 0x22e   :  { %v1101_v61 = vpop.permute.xlu0 %1100 }
 0x230   :  { %v1017_v4 = vpop.permute.xlu1 %1016 }
 0x238   :  { %v1037_v44 = vpop.permute.xlu2 %1036 }
 0x239   :  { %v1070_v5 = vmul.f32 %v1037_v44, %v6398_v28 }
 0x240   :  { %v1027_v30 = vpop.permute.xlu1 %1026  ;;  %v1121_v43 = vpop.permute.xlu2 %1120 }
 0x241   :  { %v1066_v28 = vmul.f32 %v1027_v30, %v6390_v17  ;;  %v1065_v17 = vmul.f32 %v1022_v51, %v6470_v38  ;;  %v1056_v38 = vmul.f32 %v6707_v27, %v6418_v55  ;;  %v1054_v55 = vmul.f32 %v6709_v36, %v6364_v40  ;;  %v5709_v40 = vld [vmem:[%s10129_s5] sm:$0xff] }
 0x248   :  { %v1032_v7 = vpop.permute.xlu0 %1031  ;;  %v1111_v49 = vpop.permute.xlu1 %1110 }
 0x249   :  { %v1069_v6 = vmul.f32 %v1032_v7, %v6492_v29  ;;  %v1064_v29 = vmul.f32 %v1022_v51, %v6473_v24  ;;  %v1058_v24 = vmul.f32 %v6699_v9, %v6370_v62 }
 0x250   :  { %v1116_v14 = vpop.permute.xlu0 %1115  ;;  %v1052_v45 = vpop.permute.xlu2 %1051 }
 0x251   :  { %v1076_v52 = vmul.f32 %v1052_v45, %v6545_v41  ;;  %v1077_v1 = vmul.f32 %v1052_v45, %v6541_v18  ;;  %v1071_v18 = vmul.f32 %v1037_v44, %v6505_v10  ;;  %v1067_v10 = vmul.f32 %v1027_v30, %v6480_v3 }
 0x252   :  { %v1153_v44 = vadd.f32 %v1116_v14, %v1069_v6  ;;  %v1148_v3 = vadd.f32 %v6715_v20, %v1064_v29  ;;  %v1149_v30 = vadd.f32 %v6715_v20, %v1065_v17  ;;  %v1142_v20 = vadd.f32 %v6701_v22, %v1058_v24 }
 0x253   :  { %v1155_v57 = vadd.f32 %v1121_v43, %v1071_v18 }
 0x258   :  { %v1042_v15 = vpop.permute.xlu1 %1041  ;;  %v1136_v11 = vpop.permute.xlu2 %1135 }
 0x259   :  { %v1072_v13 = vmul.f32 %v1042_v15, %v6521_v23  ;;  %v1161_v33 = vadd.f32 %v1136_v11, %v1077_v1  ;;  %v1160_v53 = vadd.f32 %v1136_v11, %v1076_v52  ;;  %v1073_v59 = vmul.f32 %v1042_v15, %v6517_v39 }
 0x25a   :  { %v1154_v23 = vadd.f32 %v1121_v43, %v1070_v5  ;;  %v1062_v39 = vmul.f32 %v1017_v4, %v6380_v8  ;;  %v1063_v15 = vmul.f32 %v1017_v4, %v6458_v48  ;;  %v1151_v43 = vadd.f32 %v1111_v49, %v1067_v10  ;;  %v5715_v5 = vld [vmem:[%s10129_s5 + $0x30] sm:$0xff] }
 0x25b   :  { %v1060_v48 = vmul.f32 %v6705_v25, %v6446_v34  ;;  %v1061_v4 = vmul.f32 %v6705_v25, %v6448_v0 }
 0x25c   :  { %v1146_v8 = vadd.f32 %v1101_v61, %v1062_v39  ;;  %v1147_v11 = vadd.f32 %v1101_v61, %v1063_v15  ;;  %v1169_v52 = vpack.c.bf16 %v1153_v44, %v1151_v43  ;;  %v1059_v61 = vmul.f32 %v6699_v9, %v6430_v2 }
 0x25d   :  { %v1144_v34 = vadd.f32 %v6711_v37, %v1060_v48  ;;  %v1145_v0 = vadd.f32 %v6711_v37, %v1061_v4  ;;  %v1140_v2 = vadd.f32 %v6713_v46, %v1056_v38  ;;  %v1138_v37 = vadd.f32 %v6703_v16, %v1054_v55 }
 0x25e   :  { %v1166_v51 = vpack.c.bf16 %v1148_v3, %v1146_v8  ;;  %v1167_v25 = vpack.c.bf16 %v1149_v30, %v1147_v11  ;;  %v1143_v62 = vadd.f32 %v6701_v22, %v1059_v61 }
 0x25f   :  { %v1162_v1 = vpack.c.bf16 %v1140_v2, %v1138_v37 }
 0x260   :  { %v1047_v12 = vpop.permute.xlu0 %1046  ;;  %v1126_v54 = vpop.permute.xlu1 %1125 }
 0x261   :  { %v1074_v19 = vmul.f32 %v1047_v12, %v6406_v42  ;;  %v1075_v26 = vmul.f32 %v1047_v12, %v6530_v21  ;;  %v1156_v60 = vadd.f32 %v1126_v54, %v1072_v13  ;;  %v1157_v42 = vadd.f32 %v1126_v54, %v1073_v59  ;;  %v5712_v13 = vld [vmem:[%s10129_s5 + $0x18] sm:$0xff]  ;;  %v6801_v54 = vld [vmem:[%s10129_s5 + $0x90] sm:$0xff] }
 0x262   :  { %v1068_v21 = vmul.f32 %v1032_v7, %v6496_v35  ;;  %v1150_v12 = vadd.f32 %v1111_v49, %v1066_v28  ;;  %v1057_v49 = vmul.f32 %v6707_v27, %v6420_v63  ;;  %v1055_v63 = vmul.f32 %v6709_v36, %v6410_v47  ;;  %v6765_v47 = vld [vmem:[%s10129_s5 + $0x78] sm:$0xff]  ;;  %v6777_v36 = vld [vmem:[%s10129_s5 + $0x80] sm:$0xff]  ;;  %v5731_v59 = vld [vmem:[%s10129_s5 + $0xb0] sm:$0xff] }
 0x263   :  { %v1170_v32 = vpack.c.bf16 %v1156_v60, %v1154_v23  ;;  %v1171_v35 = vpack.c.bf16 %v1157_v42, %v1155_v57  ;;  %v1165_v27 = vpack.c.bf16 %v1145_v0, %v1143_v62  ;;  %v5717_v60 = vld [vmem:[%s10129_s5 + $0x40] sm:$0xff] }
 0x264   :  { %v1152_v45 = vadd.f32 %v1116_v14, %v1068_v21  ;;  %v1164_v14 = vpack.c.bf16 %v1144_v34, %v1142_v20  ;;  %v1141_v9 = vadd.f32 %v6713_v46, %v1057_v49  ;;  %v1139_v22 = vadd.f32 %v6703_v16, %v1055_v63  ;;  %v5710_v16 = vld [vmem:[%s10129_s5 + $0x8] sm:$0xff]  ;;  %v5711_v46 = vld [vmem:[%s10129_s5 + $0x10] sm:$0xff] }
 0x266   :  { %v1168_v7 = vpack.c.bf16 %v1152_v45, %v1150_v12 }
 0x268   :  { %v1131_v50 = vpop.permute.xlu0 %1130 }
 0x269   :  { %v1159_v56 = vadd.f32 %v1131_v50, %v1075_v26  ;;  %v1158_v58 = vadd.f32 %v1131_v50, %v1074_v19  ;;  %v1163_v19 = vpack.c.bf16 %v1141_v9, %v1139_v22  ;;  %v6789_v26 = vld [vmem:[%s10129_s5 + $0x88] sm:$0xff]  ;;  %v5713_v50 = vld [vmem:[%s10129_s5 + $0x20] sm:$0xff] }
 0x26b   :  { %v1173_v31 = vpack.c.bf16 %v1161_v33, %v1159_v56  ;;  %v1172_v41 = vpack.c.bf16 %v1160_v53, %v1158_v58  ;;  %v6813_v33 = vld [vmem:[%s10129_s5 + $0x98] sm:$0xff]  ;;  %v5730_v56 = vld [vmem:[%s10129_s5 + $0xa8] sm:$0xff]  ;;  %v6829_v53 = vld [vmem:[%s10129_s5 + $0xa0] sm:$0xff] }
 0x26c   :  { %v5714_v58 = vld [vmem:[%s10129_s5 + $0x28] sm:$0xff] }
 0x26d   :  { %1537 = vmatpush.bf16.msrb.mxu1 %v1172_v41  ;;  %5745 = vmatpush.bf16.msra.mxu2 %v1172_v41  ;;  %v5732_v41 = vld [vmem:[%s10129_s5 + $0xb8] sm:$0xff] }
 0x26e   :  { %1726 = vmatpush.bf16.msra.mxu0 %v1173_v31  ;;  %5751 = vmatpush.bf16.msrb.mxu3 %v1173_v31  ;;  %v5716_v31 = vld [vmem:[%s10129_s5 + $0x38] sm:$0xff] }
 0x271   :  { %1538 = vmatpush.bf16.msrb.mxu1 %v1170_v32  ;;  %5746 = vmatpush.bf16.msra.mxu2 %v1170_v32 }
 0x272   :  { %1727 = vmatpush.bf16.msra.mxu0 %v1171_v35  ;;  %5752 = vmatpush.bf16.msrb.mxu3 %v1171_v35 }
 0x275   :  { %1539 = vmatpush.bf16.msrb.mxu1 %v1168_v7  ;;  %5747 = vmatpush.bf16.msra.mxu2 %v1168_v7  ;;  %v5718_v7 = vld [vmem:[%s10129_s5 + $0x48] sm:$0xff] }
 0x276   :  { %1728 = vmatpush.bf16.msra.mxu0 %v1169_v52  ;;  %5753 = vmatpush.bf16.msrb.mxu3 %v1169_v52 }
 0x279   :  { %1540 = vmatpush.bf16.msrb.mxu1 %v1166_v51  ;;  %5748 = vmatpush.bf16.msra.mxu2 %v1166_v51 }
 0x27a   :  { %1729 = vmatpush.bf16.msra.mxu0 %v1167_v25  ;;  %5754 = vmatpush.bf16.msrb.mxu3 %v1167_v25  ;;  %v5719_v25 = vld [vmem:[%s10129_s5 + $0x50] sm:$0xff] }
 0x27d   :  { %1541 = vmatpush.bf16.msrb.mxu1 %v1164_v14  ;;  %5749 = vmatpush.bf16.msra.mxu2 %v1164_v14 }
 0x27e   :  { %1730 = vmatpush.bf16.msra.mxu0 %v1165_v27  ;;  %5755 = vmatpush.bf16.msrb.mxu3 %v1165_v27 }
 0x281   :  { %1542 = vmatpush.bf16.msrb.mxu1 %v1162_v1  ;;  %5750 = vmatpush.bf16.msra.mxu2 %v1162_v1 }
 0x282   :  { %1731 = vmatpush.bf16.msra.mxu0 %v1163_v19  ;;  %5756 = vmatpush.bf16.msrb.mxu3 %v1163_v19 }
 0x284   :  { %5601 = vmatmul.msk.bf16.vlgmr.msrb.gmra.mxu1 %vm1426_vm8, %v5709_v40  ;;  %5622 = vmatmul.msk.bf16.vlgmr.msra.gmra.mxu2 %vm1426_vm8, %v5730_v56 }
 0x285   :  { %5637 = vmatmul.msk.bf16.vlgmr.msra.gmra.mxu0 %vm1426_vm8, %v5709_v40  ;;  %5652 = vmatmul.msk.bf16.vlgmr.msrb.gmra.mxu3 %vm1426_vm8, %v6765_v47 }
 0x294   :  { %5602 = vmatmul.msk.bf16.gmra.mxu1 %vm1426_vm8, %v5710_v16  ;;  %5623 = vmatmul.msk.bf16.gmra.mxu2 %vm1426_vm8, %v5731_v59 }
 0x295   :  { %5638 = vmatmul.msk.bf16.gmra.mxu0 %vm1426_vm8, %v5710_v16  ;;  %5653 = vmatmul.msk.bf16.gmra.mxu3 %vm1426_vm8, %v6777_v36 }
 0x2a4   :  { %5603 = vmatmul.msk.bf16.gmra.mxu1 %vm1426_vm8, %v5711_v46  ;;  %5624 = vmatmul.msk.bf16.gmra.mxu2 %vm1426_vm8, %v5732_v41 }
 0x2a5   :  { %5639 = vmatmul.msk.bf16.gmra.mxu0 %vm1426_vm8, %v5711_v46  ;;  %5654 = vmatmul.msk.bf16.gmra.mxu3 %vm1426_vm8, %v6789_v26 }
 0x2b4   :  { %5604 = vmatmul.msk.bf16.gmra.mxu1 %vm1426_vm8, %v5712_v13 }
 0x2b5   :  { %5640 = vmatmul.msk.bf16.gmra.mxu0 %vm1426_vm8, %v5712_v13  ;;  %5655 = vmatmul.msk.bf16.gmra.mxu3 %vm1426_vm8, %v6801_v54 }
 0x2c4   :  { %5605 = vmatmul.msk.bf16.gmra.mxu1 %vm1426_vm8, %v5713_v50 }
 0x2c5   :  { %5641 = vmatmul.msk.bf16.gmra.mxu0 %vm1426_vm8, %v5713_v50  ;;  %5656 = vmatmul.msk.bf16.gmra.mxu3 %vm1426_vm8, %v6813_v33 }
 0x2d4   :  { %5606 = vmatmul.msk.bf16.gmra.mxu1 %vm1426_vm8, %v5714_v58 }
 0x2d5   :  { %5642 = vmatmul.msk.bf16.gmra.mxu0 %vm1426_vm8, %v5714_v58  ;;  %5657 = vmatmul.msk.bf16.gmra.mxu3 %vm1426_vm8, %v6829_v53  ;;  %v5720_v58 = vld [vmem:[%s10129_s5 + $0x58] sm:$0xff] }
 0x2e4   :  { %5607 = vmatmul.msk.bf16.gmra.mxu1 %vm1426_vm8, %v5715_v5 }
 0x2e5   :  { %5643 = vmatmul.msk.bf16.gmra.mxu0 %vm1426_vm8, %v5715_v5  ;;  %5658 = vmatmul.msk.bf16.gmra.mxu3 %vm1426_vm8, %v5730_v56 }
 0x2f4   :  { %5608 = vmatmul.msk.bf16.gmra.mxu1 %vm1426_vm8, %v5716_v31 }
 0x2f5   :  { %5644 = vmatmul.msk.bf16.gmra.mxu0 %vm1426_vm8, %v5716_v31  ;;  %5659 = vmatmul.msk.bf16.gmra.mxu3 %vm1426_vm8, %v5731_v59 }
 0x301   :  { %v6858_v18 = vpop.f32.mrf.mxu1 }
 0x302   :  { %v6860_v42 = vpop.f32.mrf.mxu0  ;;  %v2273_v39 = vmul.f32 %v6858_v18, %v6858_v18 }
 0x303   :  { %v1913_v21 = vsel %vm621_vm1, %v6860_v42, 0.0  ;;  %v2274_v57 = vmul.f32 %v6860_v42, %v6860_v42 }
 0x304   :  { %5609 = vmatmul.msk.bf16.gmra.mxu1 %vm1426_vm8, %v5717_v60  ;;  %v1914_v23 = vadd.f32 %v1913_v21, %v6858_v18 }
 0x305   :  { %5645 = vmatmul.msk.bf16.gmra.mxu0 %vm1426_vm8, %v5717_v60  ;;  %5660 = vmatmul.msk.bf16.gmra.mxu3 %vm1426_vm8, %v5732_v41  ;;  %v2417_v32 = vsel %vm621_vm1, %v2274_v57, 0.0 }
 0x306   :  { %1915 = vadd.xlane.f32.xlu1 %v1914_v23  ;;  %v2418_v12 = vadd.f32 %v2417_v32, %v2273_v39 }
 0x308   :  { %v6870_v6 = vpop.f32.mrf.mxu3 }
 0x309   :  { %10257 = vst [vmem:[#allocation2_spill] sm:$0xff] %v6870_v6  ;;  %v6874_v28 = vpop.f32.mrf.mxu1 }
 0x30a   :  { %v6877_v45 = vpop.f32.mrf.mxu0  ;;  %v2275_v15 = vmul.f32 %v6874_v28, %v6874_v28 }
 0x30b   :  { %v1917_v10 = vsel %vm621_vm1, %v6877_v45, 0.0  ;;  %v2276_v44 = vmul.f32 %v6877_v45, %v6877_v45 }
 0x30c   :  { %v1918_v35 = vadd.f32 %v1917_v10, %v6874_v28 }
 0x30d   :  { %v2421_v43 = vsel %vm621_vm1, %v2276_v44, 0.0 }
 0x30e   :  { %1919 = vadd.xlane.f32.xlu0 %v1918_v35  ;;  %2419 = vadd.xlane.f32.xlu1 %v2418_v12  ;;  %v2422_v29 = vadd.f32 %v2421_v43, %v2275_v15 }
 0x310   :  { %v6890_v8 = vpop.f32.mrf.mxu3  ;;  %2423 = vadd.xlane.f32.xlu2 %v2422_v29 }
 0x311   :  { %10258 = vst [vmem:[#allocation3_spill] sm:$0xff] %v6890_v8  ;;  %v6892_v17 = vpop.f32.mrf.mxu1 }
 0x312   :  { %v6894_v11 = vpop.f32.mrf.mxu0  ;;  %v2277_v52 = vmul.f32 %v6892_v17, %v6892_v17 }
 0x313   :  { %v2278_v48 = vmul.f32 %v6894_v11, %v6894_v11  ;;  %v1921_v3 = vsel %vm621_vm1, %v6894_v11, 0.0 }
 0x314   :  { %5610 = vmatmul.msk.bf16.gmra.mxu1 %vm1426_vm8, %v5718_v7  ;;  %v1922_v30 = vadd.f32 %v1921_v3, %v6892_v17 }
 0x315   :  { %5646 = vmatmul.msk.bf16.gmra.mxu0 %vm1426_vm8, %v5718_v7  ;;  %v2425_v4 = vsel %vm621_vm1, %v2278_v48, 0.0 }
 0x316   :  { %v2426_v24 = vadd.f32 %v2425_v4, %v2277_v52  ;;  %v5721_v52 = vld [vmem:[%s10129_s5 + $0x60] sm:$0xff] }
 0x317   :  { %v5733_v4 = vld [vmem:[%s10129_s5 + $0xc0] sm:$0xff] }
 0x318   :  { %v6906_v38 = vpop.f32.mrf.mxu3  ;;  %1923 = vadd.xlane.f32.xlu2 %v1922_v30  ;;  %2427 = vadd.xlane.f32.xlu0 %v2426_v24 }
 0x319   :  { %10259 = vst [vmem:[#allocation4_spill] sm:$0xff] %v6906_v38  ;;  %v6908_v51 = vpop.f32.mrf.mxu1  ;;  %5661 = vmatmul.msk.bf16.gmra.mxu3 %vm1426_vm8, %v5733_v4  ;;  %5625 = vmatmul.msk.bf16.gmra.mxu2 %vm1426_vm8, %v5733_v4 }
 0x31a   :  { %v6910_v34 = vpop.f32.mrf.mxu0  ;;  %v2279_v62 = vmul.f32 %v6908_v51, %v6908_v51 }
 0x31b   :  { %v1925_v61 = vsel %vm621_vm1, %v6910_v34, 0.0  ;;  %v2280_v0 = vmul.f32 %v6910_v34, %v6910_v34 }
 0x31c   :  { %v1926_v49 = vadd.f32 %v1925_v61, %v6908_v51 }
 0x31d   :  { %v2429_v14 = vsel %vm621_vm1, %v2280_v0, 0.0 }
 0x31e   :  { %1927 = vadd.xlane.f32.xlu1 %v1926_v49  ;;  %v2430_v9 = vadd.f32 %v2429_v14, %v2279_v62 }
 0x320   :  { %v6920_v20 = vpop.f32.mrf.mxu3 }
 0x321   :  { %10260 = vst [vmem:[#allocation5_spill] sm:$0xff] %v6920_v20  ;;  %v6924_v55 = vpop.f32.mrf.mxu1 }
 0x322   :  { %v6927_v2 = vpop.f32.mrf.mxu0  ;;  %v2281_v1 = vmul.f32 %v6924_v55, %v6924_v55 }
 0x323   :  { %v1929_v63 = vsel %vm621_vm1, %v6927_v2, 0.0  ;;  %v2282_v37 = vmul.f32 %v6927_v2, %v6927_v2 }
 0x324   :  { %5611 = vmatmul.msk.bf16.gmra.mxu1 %vm1426_vm8, %v5719_v25  ;;  %v1930_v27 = vadd.f32 %v1929_v63, %v6924_v55 }
 0x325   :  { %5647 = vmatmul.msk.bf16.gmra.mxu0 %vm1426_vm8, %v5719_v25  ;;  %v2433_v40 = vsel %vm621_vm1, %v2282_v37, 0.0 }
 0x326   :  { %2431 = vadd.xlane.f32.xlu1 %v2430_v9  ;;  %1931 = vadd.xlane.f32.xlu2 %v1930_v27  ;;  %v2434_v13 = vadd.f32 %v2433_v40, %v2281_v1 }
 0x328   :  { %v6936_v22 = vpop.f32.mrf.mxu3 }
 0x329   :  { %10261 = vst [vmem:[#allocation6_spill] sm:$0xff] %v6936_v22  ;;  %v6940_v19 = vpop.f32.mrf.mxu1 }
 0x32a   :  { %v6943_v16 = vpop.f32.mrf.mxu0  ;;  %v2283_v5 = vmul.f32 %v6940_v19, %v6940_v19 }
 0x32b   :  { %v1933_v46 = vsel %vm621_vm1, %v6943_v16, 0.0  ;;  %v2284_v56 = vmul.f32 %v6943_v16, %v6943_v16 }
 0x32c   :  { %v1934_v50 = vadd.f32 %v1933_v46, %v6940_v19 }
 0x32d   :  { %v2437_v41 = vsel %vm621_vm1, %v2284_v56, 0.0 }
 0x32e   :  { %2435 = vadd.xlane.f32.xlu2 %v2434_v13  ;;  %1935 = vadd.xlane.f32.xlu0 %v1934_v50  ;;  %v2438_v57 = vadd.f32 %v2437_v41, %v2283_v5  ;;  %v5722_v50 = vld [vmem:[%s10129_s5 + $0x68] sm:$0xff] }
 0x330   :  { %v6953_v59 = vpop.f32.mrf.mxu3 }
 0x331   :  { %10262 = vst [vmem:[#allocation7_spill] sm:$0xff] %v6953_v59  ;;  %v6957_v31 = vpop.f32.mrf.mxu1 }
 0x332   :  { %10263 = vst [vmem:[#allocation8_spill] sm:$0xff] %v6957_v31  ;;  %v6960_v60 = vpop.f32.mrf.mxu0  ;;  %v2285_v15 = vmul.f32 %v6957_v31, %v6957_v31 }
 0x333   :  { %10264 = vst [vmem:[#allocation9_spill] sm:$0xff] %v6960_v60  ;;  %v1937_v21 = vsel %vm621_vm1, %v6960_v60, 0.0  ;;  %v2286_v39 = vmul.f32 %v6960_v60, %v6960_v60 }
 0x334   :  { %5612 = vmatmul.msk.bf16.gmra.mxu1 %vm1426_vm8, %v5720_v58  ;;  %v1938_v23 = vadd.f32 %v1937_v21, %v6957_v31 }
 0x335   :  { %5648 = vmatmul.msk.bf16.gmra.mxu0 %vm1426_vm8, %v5720_v58  ;;  %v2441_v44 = vsel %vm621_vm1, %v2286_v39, 0.0 }
 0x336   :  { %1939 = vadd.xlane.f32.xlu1 %v1938_v23  ;;  %2439 = vadd.xlane.f32.xlu0 %v2438_v57  ;;  %v2442_v43 = vadd.f32 %v2441_v44, %v2285_v15 }
 0x338   :  { %v6969_v32 = vpop.f32.mrf.mxu3 }
 0x339   :  { %10265 = vst [vmem:[#allocation10_spill] sm:$0xff] %v6969_v32  ;;  %v6973_v10 = vpop.f32.mrf.mxu1 }
 0x33a   :  { %v6976_v35 = vpop.f32.mrf.mxu0  ;;  %v2287_v3 = vmul.f32 %v6973_v10, %v6973_v10 }
 0x33b   :  { %v1941_v12 = vsel %vm621_vm1, %v6976_v35, 0.0  ;;  %v2288_v7 = vmul.f32 %v6976_v35, %v6976_v35 }
 0x33c   :  { %v1942_v29 = vadd.f32 %v1941_v12, %v6973_v10 }
 0x33d   :  { %v2445_v24 = vsel %vm621_vm1, %v2288_v7, 0.0 }
 0x33e   :  { %2443 = vadd.xlane.f32.xlu1 %v2442_v43  ;;  %1943 = vadd.xlane.f32.xlu2 %v1942_v29  ;;  %v2446_v0 = vadd.f32 %v2445_v24, %v2287_v3 }
 0x340   :  { %v6986_v48 = vpop.f32.mrf.mxu3 }
 0x341   :  { %10266 = vst [vmem:[#allocation11_spill] sm:$0xff] %v6986_v48  ;;  %v6993_v30 = vpop.f32.mrf.mxu1 }
 0x342   :  { %v6996_v61 = vpop.f32.mrf.mxu0  ;;  %v2289_v63 = vmul.f32 %v6993_v30, %v6993_v30 }
 0x343   :  { %v1945_v49 = vsel %vm621_vm1, %v6996_v61, 0.0  ;;  %v2290_v62 = vmul.f32 %v6996_v61, %v6996_v61 }
 0x344   :  { %5613 = vmatmul.msk.bf16.gmra.mxu1 %vm1426_vm8, %v5721_v52  ;;  %v1946_v25 = vadd.f32 %v1945_v49, %v6993_v30  ;;  %v5723_v49 = vld [vmem:[%s10129_s5 + $0x70] sm:$0xff] }
 0x345   :  { %5649 = vmatmul.msk.bf16.gmra.mxu0 %vm1426_vm8, %v5721_v52  ;;  %v2449_v27 = vsel %vm621_vm1, %v2290_v62, 0.0 }
 0x346   :  { %2447 = vadd.xlane.f32.xlu2 %v2446_v0  ;;  %1947 = vadd.xlane.f32.xlu0 %v1946_v25  ;;  %v2450_v46 = vadd.f32 %v2449_v27, %v2289_v63 }
 0x348   :  { %v7007_v14 = vpop.f32.mrf.mxu3 }
 0x349   :  { %10267 = vst [vmem:[#allocation12_spill] sm:$0xff] %v7007_v14  ;;  %v7011_v9 = vpop.f32.mrf.mxu1 }
 0x34a   :  { %10268 = vst [vmem:[#allocation13_spill] sm:$0xff] %v7011_v9  ;;  %v7014_v37 = vpop.f32.mrf.mxu0  ;;  %v2291_v58 = vmul.f32 %v7011_v9, %v7011_v9 }
 0x34b   :  { %10269 = vst [vmem:[#allocation14_spill] sm:$0xff] %v7014_v37  ;;  %v1949_v1 = vsel %vm621_vm1, %v7014_v37, 0.0  ;;  %v2292_v13 = vmul.f32 %v7014_v37, %v7014_v37 }
 0x34c   :  { %v1950_v40 = vadd.f32 %v1949_v1, %v7011_v9 }
 0x34d   :  { %v2453_v41 = vsel %vm621_vm1, %v2292_v13, 0.0 }
 0x34e   :  { %1951 = vadd.xlane.f32.xlu1 %v1950_v40  ;;  %2451 = vadd.xlane.f32.xlu0 %v2450_v46  ;;  %v2454_v57 = vadd.f32 %v2453_v41, %v2291_v58 }
 0x350   :  { %v7024_v56 = vpop.f32.mrf.mxu3 }
 0x351   :  { %10270 = vst [vmem:[#allocation15_spill] sm:$0xff] %v7024_v56  ;;  %v7028_v5 = vpop.f32.mrf.mxu1 }
 0x352   :  { %10271 = vst [vmem:[#allocation16_spill] sm:$0xff] %v7028_v5  ;;  %v7031_v21 = vpop.f32.mrf.mxu0  ;;  %v2293_v12 = vmul.f32 %v7028_v5, %v7028_v5 }
 0x353   :  { %10272 = vst [vmem:[#allocation17_spill] sm:$0xff] %v7031_v21  ;;  %v1953_v23 = vsel %vm621_vm1, %v7031_v21, 0.0  ;;  %v2294_v15 = vmul.f32 %v7031_v21, %v7031_v21 }
 0x354   :  { %5614 = vmatmul.msk.bf16.gmra.mxu1 %vm1426_vm8, %v5722_v50  ;;  %v1954_v39 = vadd.f32 %v1953_v23, %v7028_v5 }
 0x355   :  { %5650 = vmatmul.msk.bf16.gmra.mxu0 %vm1426_vm8, %v5722_v50  ;;  %v2457_v29 = vsel %vm621_vm1, %v2294_v15, 0.0 }
 0x356   :  { %2455 = vadd.xlane.f32.xlu1 %v2454_v57  ;;  %1955 = vadd.xlane.f32.xlu2 %v1954_v39  ;;  %v2458_v3 = vadd.f32 %v2457_v29, %v2293_v12 }
 0x358   :  { %v7040_v44 = vpop.f32.mrf.mxu3 }
 0x359   :  { %10273 = vst [vmem:[#allocation18_spill] sm:$0xff] %v7040_v44  ;;  %v7044_v43 = vpop.f32.mrf.mxu1 }
 0x35a   :  { %10274 = vst [vmem:[#allocation19_spill] sm:$0xff] %v7044_v43  ;;  %v7047_v7 = vpop.f32.mrf.mxu0  ;;  %v2295_v0 = vmul.f32 %v7044_v43, %v7044_v43 }
 0x35b   :  { %10275 = vst [vmem:[#allocation20_spill] sm:$0xff] %v7047_v7  ;;  %v1957_v52 = vsel %vm621_vm1, %v7047_v7, 0.0  ;;  %v2296_v24 = vmul.f32 %v7047_v7, %v7047_v7 }
 0x35c   :  { %v1958_v4 = vadd.f32 %v1957_v52, %v7044_v43  ;;  %v7087_v52 = vpop.f32.mrf.mxu2 }
 0x35d   :  { %v2461_v63 = vsel %vm621_vm1, %v2296_v24, 0.0  ;;  %10282 = vst [vmem:[#allocation27_spill] sm:$0xff] %v7087_v52 }
 0x35e   :  { %2459 = vadd.xlane.f32.xlu2 %v2458_v3  ;;  %1959 = vadd.xlane.f32.xlu0 %v1958_v4  ;;  %v2462_v46 = vadd.f32 %v2461_v63, %v2295_v0 }
 0x360   :  { %v7061_v62 = vpop.f32.mrf.mxu3 }
 0x361   :  { %v7059_v25 = vpop.f32.mrf.mxu1  ;;  %10277 = vst [vmem:[#allocation22_spill] sm:$0xff] %v7061_v62 }
 0x362   :  { %10276 = vst [vmem:[#allocation21_spill] sm:$0xff] %v7059_v25  ;;  %v7064_v27 = vpop.f32.mrf.mxu0  ;;  %v2297_v50 = vmul.f32 %v7059_v25, %v7059_v25 }
 0x363   :  { %10278 = vst [vmem:[#allocation23_spill] sm:$0xff] %v7064_v27  ;;  %v1961_v1 = vsel %vm621_vm1, %v7064_v27, 0.0  ;;  %v2298_v13 = vmul.f32 %v7064_v27, %v7064_v27 }
 0x364   :  { %5615 = vmatmul.msk.bf16.gmra.mxu1 %vm1426_vm8, %v5723_v49  ;;  %v1962_v40 = vadd.f32 %v1961_v1, %v7059_v25 }
 0x365   :  { %5651 = vmatmul.msk.bf16.gmra.mxu0 %vm1426_vm8, %v5723_v49  ;;  %v2465_v41 = vsel %vm621_vm1, %v2298_v13, 0.0 }
 0x366   :  { %1963 = vadd.xlane.f32.xlu1 %v1962_v40  ;;  %2463 = vadd.xlane.f32.xlu0 %v2462_v46  ;;  %v2466_v15 = vadd.f32 %v2465_v41, %v2297_v50 }
 0x368   :  { %v7082_v39 = vpop.f32.mrf.mxu3 }
 0x369   :  { %v7075_v58 = vpop.f32.mrf.mxu1  ;;  %10281 = vst [vmem:[#allocation26_spill] sm:$0xff] %v7082_v39  ;;  %v2081_v3 = vsel %vm621_vm1, %v7082_v39, 0.0  ;;  %v2358_v50 = vmul.f32 %v7082_v39, %v7082_v39 }
 0x36a   :  { %10279 = vst [vmem:[#allocation24_spill] sm:$0xff] %v7075_v58  ;;  %v7078_v23 = vpop.f32.mrf.mxu0  ;;  %v2299_v4 = vmul.f32 %v7075_v58, %v7075_v58  ;;  %v2082_v63 = vadd.f32 %v2081_v3, %v7087_v52 }
 0x36b   :  { %10280 = vst [vmem:[#allocation25_spill] sm:$0xff] %v7078_v23  ;;  %v1965_v57 = vsel %vm621_vm1, %v7078_v23, 0.0  ;;  %v2300_v29 = vmul.f32 %v7078_v23, %v7078_v23 }
 0x36c   :  { %v1966_v12 = vadd.f32 %v1965_v57, %v7075_v58 }
 0x36d   :  { %v2469_v49 = vsel %vm621_vm1, %v2300_v29, 0.0  ;;  %v2585_v29 = vsel %vm621_vm1, %v2358_v50, 0.0 }
 0x36e   :  { %2467 = vadd.xlane.f32.xlu1 %v2466_v15  ;;  %1967 = vadd.xlane.f32.xlu2 %v1966_v12  ;;  %v2470_v46 = vadd.f32 %v2469_v49, %v2299_v4  ;;  %v7112_v15 = vpop.f32.mrf.mxu2  ;;  %v2357_v12 = vmul.f32 %v7087_v52, %v7087_v52 }
 0x36f   :  { %10286 = vst [vmem:[#allocation31_spill] sm:$0xff] %v7112_v15  ;;  %v2359_v50 = vmul.f32 %v7112_v15, %v7112_v15 }
 0x370   :  { %v7108_v41 = vpop.f32.mrf.mxu3 }
 0x371   :  { %v7093_v24 = vpop.f32.mrf.mxu1  ;;  %10285 = vst [vmem:[#allocation30_spill] sm:$0xff] %v7108_v41  ;;  %v2085_v3 = vsel %vm621_vm1, %v7108_v41, 0.0  ;;  %v2360_v56 = vmul.f32 %v7108_v41, %v7108_v41 }
 0x372   :  { %10283 = vst [vmem:[#allocation28_spill] sm:$0xff] %v7093_v24  ;;  %v7096_v0 = vpop.f32.mrf.mxu0  ;;  %v2301_v57 = vmul.f32 %v7093_v24, %v7093_v24 }
 0x373   :  { %10284 = vst [vmem:[#allocation29_spill] sm:$0xff] %v7096_v0  ;;  %v1969_v1 = vsel %vm621_vm1, %v7096_v0, 0.0  ;;  %v2302_v40 = vmul.f32 %v7096_v0, %v7096_v0 }
 0x374   :  { %5616 = vmatmul.msk.bf16.gmra.mxu1 %vm1426_vm8, %v6765_v47  ;;  %v1970_v13 = vadd.f32 %v1969_v1, %v7093_v24  ;;  %v2586_v1 = vadd.f32 %v2585_v29, %v2357_v12  ;;  %v2589_v12 = vsel %vm621_vm1, %v2360_v56, 0.0 }
 0x375   :  { %v2473_v47 = vsel %vm621_vm1, %v2302_v40, 0.0  ;;  %v2590_v14 = vadd.f32 %v2589_v12, %v2359_v50 }
 0x376   :  { %2083 = vadd.xlane.f32.xlu1 %v2082_v63  ;;  %2471 = vadd.xlane.f32.xlu2 %v2470_v46  ;;  %v2474_v49 = vadd.f32 %v2473_v47, %v2301_v57  ;;  %v2086_v46 = vadd.f32 %v2085_v3, %v7112_v15  ;;  %v7129_v40 = vpop.f32.mrf.mxu2 }
 0x377   :  { %1971 = vadd.xlane.f32.xlu0 %v1970_v13  ;;  %10290 = vst [vmem:[#allocation35_spill] sm:$0xff] %v7129_v40  ;;  %v2361_v25 = vmul.f32 %v7129_v40, %v7129_v40 }
 0x378   :  { %v7123_v13 = vpop.f32.mrf.mxu3 }
 0x379   :  { %v1916_v4 = vpop.xlane.xlu1 %1915  ;;  %10288 = vst [vmem:[#allocation33_spill] sm:$0xff] %v7123_v13  ;;  %v7127_v62 = vpop.f32.mrf.mxu1  ;;  %v2089_v57 = vsel %vm621_vm1, %v7123_v13, 0.0  ;;  %v2362_v32 = vmul.f32 %v7123_v13, %v7123_v13 }
 0x37a   :  { %v7120_v63 = vpop.f32.mrf.mxu0  ;;  %10289 = vst [vmem:[#allocation34_spill] sm:$0xff] %v7127_v62  ;;  %v7138_v29 = vmul.f32 0.0051020407, %v1916_v4 }
 0x37b   :  { %10287 = vst [vmem:[#allocation32_spill] sm:$0xff] %v7120_v63  ;;  %v1973_v47 = vsel %vm621_vm1, %v7120_v63, 0.0  ;;  %v2304_v39 = vmul.f32 %v7120_v63, %v7120_v63  ;;  %v5734_v63 = vld [vmem:[%s10129_s5 + $0xc8] sm:$0xff] }
 0x37c   :  { %v1974_v56 = vadd.f32 %v1973_v47, %v7127_v62  ;;  %v2593_v47 = vsel %vm621_vm1, %v2362_v32, 0.0  ;;  %5662 = vmatmul.msk.bf16.gmra.mxu3 %vm1426_vm8, %v5734_v63  ;;  %5626 = vmatmul.msk.bf16.gmra.mxu2 %vm1426_vm8, %v5734_v63 }
 0x37d   :  { %v2594_v32 = vadd.f32 %v2593_v47, %v2361_v25 }
 0x37e   :  { %2587 = vadd.xlane.f32.xlu1 %v2586_v1  ;;  %2087 = vadd.xlane.f32.xlu2 %v2086_v46  ;;  %v2090_v1 = vadd.f32 %v2089_v57, %v7129_v40  ;;  %v2777_v57 = vmul.f32 %v7138_v29, %v7138_v29  ;;  %v7178_v44 = vpop.f32.mrf.mxu2 }
 0x37f   :  { %2475 = vadd.xlane.f32.xlu0 %v2474_v49  ;;  %10295 = vst [vmem:[#allocation40_spill] sm:$0xff] %v7178_v44 }
 0x380   :  { %v7172_v20 = vpop.f32.mrf.mxu3 }
 0x381   :  { %v1920_v3 = vpop.xlane.xlu0 %1919  ;;  %v2420_v49 = vpop.xlane.xlu1 %2419  ;;  %10293 = vst [vmem:[#allocation38_spill] sm:$0xff] %v7172_v20  ;;  %v2093_v63 = vsel %vm621_vm1, %v7172_v20, 0.0 }
 0x382   :  { %v7141_v46 = vpop.f32.mrf.mxu0  ;;  %v7150_v4 = vmul.f32 0.0051020407, %v1920_v3  ;;  %v2705_v52 = vmul.f32 0.0051020407, %v2420_v49  ;;  %v7158_v12 = vpop.f32.mrf.mxu1  ;;  %v2303_v3 = vmul.f32 %v7127_v62, %v7127_v62  ;;  %v2477_v49 = vsel %vm621_vm1, %v2304_v39, 0.0 }
 0x383   :  { %10291 = vst [vmem:[#allocation36_spill] sm:$0xff] %v7141_v46  ;;  %v2424_v27 = vpop.xlane.xlu2 %2423 }
 0x384   :  { %5617 = vmatmul.msk.bf16.gmra.mxu1 %vm1426_vm8, %v6777_v36  ;;  %v1977_v36 = vsel %vm621_vm1, %v7141_v46, 0.0  ;;  %v2849_v50 = vsub.f32 %v2705_v52, %v2777_v57  ;;  %10292 = vst [vmem:[#allocation37_spill] sm:$0xff] %v7158_v12  ;;  %v2306_v57 = vmul.f32 %v7141_v46, %v7141_v46  ;;  %v2478_v39 = vadd.f32 %v2477_v49, %v2303_v3 }
 0x385   :  { %v1978_v52 = vadd.f32 %v1977_v36, %v7158_v12  ;;  %v2305_v36 = vmul.f32 %v7158_v12, %v7158_v12  ;;  %v2364_v46 = vmul.f32 %v7172_v20, %v7172_v20 }
 0x386   :  { %2591 = vadd.xlane.f32.xlu2 %v2590_v14  ;;  %1975 = vadd.xlane.f32.xlu1 %v1974_v56  ;;  %v2778_v14 = vmul.f32 %v7150_v4, %v7150_v4  ;;  %v2921_v56 = vmax.f32 %v2849_v50, 0.0  ;;  %v2481_v25 = vsel %vm621_vm1, %v2306_v57, 0.0  ;;  %v2094_v57 = vadd.f32 %v2093_v63, %v7178_v44 }
 0x387   :  { %2091 = vadd.xlane.f32.xlu0 %v2090_v1  ;;  %v2706_v1 = vmul.f32 0.0051020407, %v2424_v27  ;;  %v2363_v63 = vmul.f32 %v7178_v44, %v7178_v44 }
 0x388   :  { %v3065_v62 = vadd.f32 1e-05, %v2921_v56 }
 0x389   :  { %v2850_v50 = vsub.f32 %v2706_v1, %v2778_v14  ;;  %v2482_v1 = vadd.f32 %v2481_v25, %v2305_v36  ;;  %v7201_v36 = vpop.f32.mrf.mxu2 }
 0x38a   :  { %v7176_v27 = vpop.f32.mrf.mxu0  ;;  %5785 = vrsqrt.f32 %v3065_v62  ;;  %v7187_v14 = vpop.f32.mrf.mxu1  ;;  %10298 = vst [vmem:[#allocation43_spill] sm:$0xff] %v7201_v36  ;;  %vm3143_vm10 = vweird.f32 %v3065_v62 }
 0x38b   :  { %10294 = vst [vmem:[#allocation39_spill] sm:$0xff] %v7176_v27  ;;  %v1981_v47 = vsel %vm621_vm1, %v7176_v27, 0.0  ;;  %v2922_v3 = vmax.f32 %v2850_v50, 0.0  ;;  %v2308_v50 = vmul.f32 %v7176_v27, %v7176_v27  ;;  %v2307_v27 = vmul.f32 %v7187_v14, %v7187_v14  ;;  %v7278_v15 = vpop.xlane.xlu0 %2427 }
 0x38c   :  { %10296 = vst [vmem:[#allocation41_spill] sm:$0xff] %v7187_v14 }
 0x38d   :  { %v7197_v12 = vadd.f32 1e-05, %v2922_v3  ;;  %v2597_v3 = vsel %vm621_vm1, %v2364_v46, 0.0 }
 0x38e   :  { %2479 = vadd.xlane.f32.xlu1 %v2478_v39  ;;  %1979 = vadd.xlane.f32.xlu2 %v1978_v52  ;;  %v1982_v52 = vadd.f32 %v1981_v47, %v7187_v14  ;;  %v7190_v39 = vpop.f32.mrf.mxu3  ;;  %v2598_v46 = vadd.f32 %v2597_v3, %v2363_v63  ;;  %v2993_v14 = vld [vmem:[%s10130_s6] sm:$0xff] }
 0x38f   :  { %2595 = vadd.xlane.f32.xlu0 %v2594_v32  ;;  %10297 = vst [vmem:[#allocation42_spill] sm:$0xff] %v7190_v39  ;;  %5787 = vrsqrt.f32 %v7197_v12  ;;  %vm3153_vm0 = vweird.f32 %v7197_v12 }
 0x390   :  { %v5786_v56 = vpop.eup %5785 }
 0x391   :  { %v1928_v49 = vpop.xlane.xlu1 %1927  ;;  %v3138_v32 = vmul.f32 %v5786_v56, %v3065_v62  ;;  %vm3144_vm9 = vweird.f32 %v5786_v56 }
 0x392   :  { %v7205_v47 = vmul.f32 0.0051020407, %v1928_v49  ;;  %v2366_v49 = vmul.f32 %v7190_v39, %v7190_v39  ;;  %v7219_v59 = vpop.f32.mrf.mxu0  ;;  %vm3145_vm11 = vmor %vm3143_vm10, %vm3144_vm9 }
 0x393   :  { %v3139_v25 = vmul.f32 %v5786_v56, %v3138_v32  ;;  %10299 = vst [vmem:[#allocation44_spill] sm:$0xff] %v7219_v59 }
 0x394   :  { %5618 = vmatmul.msk.bf16.gmra.mxu1 %vm1426_vm8, %v6789_v26  ;;  %v2097_v26 = vsel %vm621_vm1, %v7190_v39, 0.0  ;;  %v2365_v39 = vmul.f32 %v7201_v36, %v7201_v36  ;;  %v2601_v3 = vsel %vm621_vm1, %v2366_v49, 0.0 }
 0x395   :  { %v3140_v20 = vmul.f32 0.5, %v3139_v25  ;;  %v2780_v25 = vmul.f32 %v7205_v47, %v7205_v47  ;;  %v7228_v63 = vpop.eup %5787 }
 0x396   :  { %2095 = vadd.xlane.f32.xlu1 %v2094_v57  ;;  %2483 = vadd.xlane.f32.xlu2 %v2482_v1  ;;  %v2098_v1 = vadd.f32 %v2097_v26, %v7201_v36  ;;  %v7224_v41 = vpop.f32.mrf.mxu3  ;;  %v3148_v49 = vmul.f32 %v7228_v63, %v7197_v12  ;;  %vm3154_vm13 = vweird.f32 %v7228_v63 }
 0x397   :  { %1983 = vadd.xlane.f32.xlu0 %v1982_v52  ;;  %v2485_v52 = vsel %vm621_vm1, %v2308_v50, 0.0  ;;  %v3141_v32 = vsub.f32 1.5, %v3140_v20  ;;  %10300 = vst [vmem:[#allocation45_spill] sm:$0xff] %v7224_v41  ;;  %vm3155_vm2 = vmor %vm3153_vm0, %vm3154_vm13 }
 0x398   :  { %v2486_v50 = vadd.f32 %v2485_v52, %v2307_v27  ;;  %v7235_v52 = vpop.f32.mrf.mxu2 }
 0x399   :  { %v2432_v57 = vpop.xlane.xlu1 %2431  ;;  %v3142_v26 = vmul.f32 %v5786_v56, %v3141_v32  ;;  %v1985_v32 = vsel %vm621_vm1, %v7219_v59, 0.0  ;;  %10301 = vst [vmem:[#allocation46_spill] sm:$0xff] %v7235_v52 }
 0x39a   :  { %v2708_v44 = vmul.f32 0.0051020407, %v2432_v57 }
 0x39b   :  { %v3146_v57 = vsel %vm3145_vm11, %v5786_v56, %v3142_v26 }
 0x39c   :  { %v2852_v20 = vsub.f32 %v2708_v44, %v2780_v25  ;;  %v7233_v27 = vmul.f32 %v3146_v57, %v2993_v14  ;;  %v2101_v44 = vsel %vm621_vm1, %v7224_v41, 0.0  ;;  %v3149_v57 = vmul.f32 %v7228_v63, %v3148_v49 }
 0x39d   :  { %v2102_v14 = vadd.f32 %v2101_v44, %v7235_v52 }
 0x39e   :  { %2599 = vadd.xlane.f32.xlu1 %v2598_v46  ;;  %2099 = vadd.xlane.f32.xlu2 %v2098_v1  ;;  %v2924_v62 = vmax.f32 %v2852_v20, 0.0  ;;  %v7239_v1 = vpop.f32.mrf.mxu1  ;;  %v7243_v56 = vmul.f32 %v7233_v27, %v7138_v29  ;;  %v2602_v46 = vadd.f32 %v2601_v3, %v2365_v39  ;;  %v2368_v20 = vmul.f32 %v7224_v41, %v7224_v41  ;;  %v7258_v39 = vpop.f32.mrf.mxu0 }
 0x39f   :  { %2487 = vadd.xlane.f32.xlu0 %v2486_v50  ;;  %10302 = vst [vmem:[#allocation47_spill] sm:$0xff] %v7239_v1  ;;  %v1986_v26 = vadd.f32 %v1985_v32, %v7239_v1  ;;  %v7249_v50 = vpop.xlane.xlu2 %1923  ;;  %v2310_v29 = vmul.f32 %v7219_v59, %v7219_v59  ;;  %v2367_v3 = vmul.f32 %v7235_v52, %v7235_v52 }
 0x3a0   :  { %v3068_v25 = vadd.f32 1e-05, %v2924_v62  ;;  %10303 = vst [vmem:[#allocation48_spill] sm:$0xff] %v7258_v39  ;;  %v2605_v32 = vsel %vm621_vm1, %v2368_v20, 0.0  ;;  %v2309_v62 = vmul.f32 %v7239_v1, %v7239_v1  ;;  %v2312_v48 = vmul.f32 %v7258_v39, %v7258_v39 }
 0x3a1   :  { %v2489_v49 = vsel %vm621_vm1, %v2310_v29, 0.0  ;;  %v2606_v41 = vadd.f32 %v2605_v32, %v2367_v3 }
 0x3a2   :  { %5789 = vrsqrt.f32 %v3068_v25  ;;  %v2490_v52 = vadd.f32 %v2489_v49, %v2309_v62  ;;  %v2493_v62 = vsel %vm621_vm1, %v2312_v48, 0.0  ;;  %vm3173_vm14 = vweird.f32 %v3068_v25 }
 0x3a4   :  { %5619 = vmatmul.msk.bf16.gmra.mxu1 %vm1426_vm8, %v6801_v54  ;;  %v5735_v54 = vld [vmem:[%s10129_s5 + $0xd0] sm:$0xff] }
 0x3a5   :  { %5663 = vmatmul.msk.bf16.gmra.mxu3 %vm1426_vm8, %v5735_v54  ;;  %5627 = vmatmul.msk.bf16.gmra.mxu2 %vm1426_vm8, %v5735_v54 }
 0x3a6   :  { %2603 = vadd.xlane.f32.xlu2 %v2602_v46  ;;  %1987 = vadd.xlane.f32.xlu1 %v1986_v26  ;;  %v1989_v46 = vsel %vm621_vm1, %v7258_v39, 0.0  ;;  %v7273_v36 = vpop.f32.mrf.mxu1 }
 0x3a7   :  { %2103 = vadd.xlane.f32.xlu0 %v2102_v14  ;;  %v3150_v14 = vmul.f32 0.5, %v3149_v57  ;;  %10304 = vst [vmem:[#allocation49_spill] sm:$0xff] %v7273_v36  ;;  %v7275_v20 = vpop.xlane.xlu2 %1931  ;;  %v1990_v1 = vadd.f32 %v1989_v46, %v7273_v36  ;;  %v2311_v3 = vmul.f32 %v7273_v36, %v7273_v36 }
 0x3a8   :  { %v5790_v44 = vpop.eup %5789 }
 0x3a9   :  { %v1940_v26 = vpop.xlane.xlu1 %1939  ;;  %v3168_v59 = vmul.f32 %v5790_v44, %v3068_v25  ;;  %v3151_v37 = vsub.f32 1.5, %v3150_v14  ;;  %vm3174_vm12 = vweird.f32 %v5790_v44  ;;  %v2494_v48 = vadd.f32 %v2493_v62, %v2311_v3  ;;  %v2994_v25 = vld [vmem:[%s10130_s6 + $0x8] sm:$0xff] }
 0x3aa   :  { %v7282_v57 = vmul.f32 0.0051020407, %v1940_v26  ;;  %vm3175_vm15 = vmor %vm3173_vm14, %vm3174_vm12  ;;  %v7297_v26 = vpop.xlane.xlu0 %1935 }
 0x3ab   :  { %v3169_v29 = vmul.f32 %v5790_v44, %v3168_v59  ;;  %v3152_v59 = vmul.f32 %v7228_v63, %v3151_v37 }
 0x3ad   :  { %v3170_v54 = vmul.f32 0.5, %v3169_v29  ;;  %v3156_v12 = vsel %vm3155_vm2, %v7228_v63, %v3152_v59 }
 0x3ae   :  { %2491 = vadd.xlane.f32.xlu1 %v2490_v52  ;;  %1991 = vadd.xlane.f32.xlu2 %v1990_v1  ;;  %v2996_v52 = vld [vmem:[%s10130_s6 + $0x18] sm:$0xff]  ;;  %v3858_v3 = vmul.f32 %v3156_v12, %v2994_v25  ;;  %v7376_v23 = vpop.f32.mrf.mxu1 }
 0x3af   :  { %2607 = vadd.xlane.f32.xlu0 %v2606_v41  ;;  %v3171_v32 = vsub.f32 1.5, %v3170_v54  ;;  %v2783_v41 = vmul.f32 %v7282_v57, %v7282_v57  ;;  %v7299_v14 = vpop.xlane.xlu2 %2435  ;;  %10310 = vst [vmem:[#allocation55_spill] sm:$0xff] %v7376_v23  ;;  %v2313_v58 = vmul.f32 %v7376_v23, %v7376_v23 }
 0x3b1   :  { %v2444_v49 = vpop.xlane.xlu1 %2443  ;;  %v3172_v1 = vmul.f32 %v5790_v44, %v3171_v32 }
 0x3b2   :  { %v2711_v46 = vmul.f32 0.0051020407, %v2444_v49  ;;  %v4002_v49 = vmul.f32 %v3858_v3, %v7150_v4 }
 0x3b3   :  { %v3176_v37 = vsel %vm3175_vm15, %v5790_v44, %v3172_v1  ;;  %v7317_v1 = vpop.xlane.xlu0 %2439 }
 0x3b4   :  { %5620 = vmatmul.msk.bf16.gmra.mxu1 %vm1426_vm8, %v6813_v33  ;;  %v2855_v29 = vsub.f32 %v2711_v46, %v2783_v41  ;;  %v7301_v54 = vmul.f32 %v3176_v37, %v2996_v52  ;;  %v3930_v52 = vld [vmem:[%s10131_s7 + $0x8] sm:$0xff] }
 0x3b5   :  { %v4074_v63 = vsub.f32 %v3930_v52, %v4002_v49 }
 0x3b6   :  { %2495 = vadd.xlane.f32.xlu2 %v2494_v48  ;;  %v2927_v32 = vmax.f32 %v2855_v29, 0.0  ;;  %v7309_v33 = vmul.f32 %v7301_v54, %v7205_v47 }
 0x3b7   :  { %v7311_v62 = vpop.xlane.xlu2 %1943 }
 0x3b8   :  { %v3071_v44 = vadd.f32 1e-05, %v2927_v32  ;;  %v2999_v32 = vld [vmem:[%s10130_s6 + $0x30] sm:$0xff] }
 0x3ba   :  { %5791 = vrsqrt.f32 %v3071_v44  ;;  %vm3203_vm4 = vweird.f32 %v3071_v44 }
 0x3bb   :  { %v7321_v37 = vpop.xlane.xlu0 %1947 }
 0x3bf   :  { %v7324_v4 = vpop.xlane.xlu2 %2447 }
 0x3c0   :  { %v5792_v41 = vpop.eup %5791 }
 0x3c1   :  { %v1952_v59 = vpop.xlane.xlu1 %1951  ;;  %v3198_v46 = vmul.f32 %v5792_v41, %v3071_v44  ;;  %vm3204_vm3 = vweird.f32 %v5792_v41  ;;  %v7340_v44 = vmul.f32 0.0051020407, %v7249_v50 }
 0x3c2   :  { %v2210_v29 = vmul.f32 0.0051020407, %v1952_v59  ;;  %vm3205_vm5 = vmor %vm3203_vm4, %vm3204_vm3 }
 0x3c3   :  { %4656 = vperm.xlu0 %5758, %v4074_v63   ;;  %v3199_v47 = vmul.f32 %v5792_v41, %v3198_v46  ;;  %v7337_v39 = vpop.xlane.xlu0 %2451 }
 0x3c4   :  { %5621 = vmatmul.msk.bf16.gmra.mxu1 %vm1426_vm8, %v6829_v53  ;;  %v2786_v52 = vmul.f32 %v2210_v29, %v2210_v29 }
 0x3c5   :  { %v3200_v48 = vmul.f32 0.5, %v3199_v47 }
 0x3c7   :  { %4147 = vperm.xlu1 %5759, %v7233_v27   ;;  %v3201_v25 = vsub.f32 1.5, %v3200_v48 }
 0x3c9   :  { %v2456_v12 = vpop.xlane.xlu1 %2455  ;;  %v3202_v49 = vmul.f32 %v5792_v41, %v3201_v25  ;;  %v7331_v27 = vpop.xlane.xlu2 %1955 }
 0x3ca   :  { %v2714_v53 = vmul.f32 0.0051020407, %v2456_v12  ;;  %v2707_v12 = vmul.f32 0.0051020407, %v7278_v15  ;;  %v3002_v15 = vld [vmem:[%s10130_s6 + $0x48] sm:$0xff] }
 0x3cb   :  { %v3206_v63 = vsel %vm3205_vm5, %v5792_v41, %v3202_v49  ;;  %v2779_v41 = vmul.f32 %v7340_v44, %v7340_v44 }
 0x3cc   :  { %v2858_v46 = vsub.f32 %v2714_v53, %v2786_v52  ;;  %v7329_v47 = vmul.f32 %v3206_v63, %v2999_v32 }
 0x3cd   :  { %v2851_v52 = vsub.f32 %v2707_v12, %v2779_v41  ;;  %v7360_v41 = vpop.f32.mrf.mxu0 }
 0x3ce   :  { %4152 = vperm.xlu2 %5760, %v3858_v3   ;;  %v2930_v59 = vmax.f32 %v2858_v46, 0.0  ;;  %v7335_v48 = vmul.f32 %v7329_v47, %v7282_v57  ;;  %10305 = vst [vmem:[#allocation50_spill] sm:$0xff] %v7360_v41 }
 0x3cf   :  { %v2923_v46 = vmax.f32 %v2851_v52, 0.0  ;;  %v7364_v52 = vpop.f32.mrf.mxu3 }
 0x3d0   :  { %v3074_v36 = vadd.f32 1e-05, %v2930_v59  ;;  %10306 = vst [vmem:[#allocation51_spill] sm:$0xff] %v7364_v52 }
 0x3d1   :  { %v7344_v25 = vpop.xlane.xlu0 %1959  ;;  %v7347_v32 = vpop.xlane.xlu2 %2459  ;;  %v7358_v24 = vadd.f32 1e-05, %v2923_v46 }
 0x3d2   :  { %5793 = vrsqrt.f32 %v3074_v36  ;;  %vm3233_vm7 = vweird.f32 %v3074_v36  ;;  %v7371_v46 = vpop.f32.mrf.mxu2 }
 0x3d3   :  { %5795 = vrsqrt.f32 %v7358_v24  ;;  %10308 = vst [vmem:[#allocation53_spill] sm:$0xff] %v7371_v46  ;;  %vm3163_vm14 = vweird.f32 %v7358_v24 }
 0x3d8   :  { %v5794_v3 = vpop.eup %5793 }
 0x3d9   :  { %v1964_v49 = vpop.xlane.xlu1 %1963  ;;  %v3228_v57 = vmul.f32 %v5794_v3, %v3074_v36  ;;  %vm3234_vm6 = vweird.f32 %v5794_v3  ;;  %v7353_v13 = vpop.xlane.xlu0 %2463 }
 0x3da   :  { %v7349_v59 = vmul.f32 0.0051020407, %v1964_v49  ;;  %vm3235_vm9 = vmor %vm3233_vm7, %vm3234_vm6  ;;  %v7398_v60 = vpop.f32.mrf.mxu2 }
 0x3db   :  { %v3229_v53 = vmul.f32 %v5794_v3, %v3228_v57  ;;  %10313 = vst [vmem:[#allocation58_spill] sm:$0xff] %v7398_v60 }
 0x3dc   :  { %v2789_v12 = vmul.f32 %v7349_v59, %v7349_v59 }
 0x3dd   :  { %v3230_v63 = vmul.f32 0.5, %v3229_v53 }
 0x3df   :  { %v3231_v50 = vsub.f32 1.5, %v3230_v63  ;;  %v1993_v63 = vsel %vm621_vm1, %v7360_v41, 0.0 }
 0x3e1   :  { %v7351_v9 = vpop.xlane.xlu2 %1967  ;;  %v2468_v40 = vpop.xlane.xlu1 %2467  ;;  %v3232_v0 = vmul.f32 %v5794_v3, %v3231_v50 }
 0x3e2   :  { %v2717_v49 = vmul.f32 0.0051020407, %v2468_v40 }
 0x3e3   :  { %v3236_v57 = vsel %vm3235_vm9, %v5794_v3, %v3232_v0  ;;  %v1994_v0 = vadd.f32 %v1993_v63, %v7376_v23 }
 0x3e4   :  { %v2861_v36 = vsub.f32 %v2717_v49, %v2789_v12  ;;  %v7366_v53 = vmul.f32 %v3236_v57, %v3002_v15  ;;  %v2314_v15 = vmul.f32 %v7360_v41, %v7360_v41  ;;  %v2105_v12 = vsel %vm621_vm1, %v7364_v52, 0.0 }
 0x3e6   :  { %10307 = vst [vmem:[#allocation52_spill] sm:$0xff] %v7366_v53  ;;  %v2933_v50 = vmax.f32 %v2861_v36, 0.0  ;;  %v7374_v6 = vmul.f32 %v7366_v53, %v2210_v29  ;;  %v5796_v29 = vpop.eup %5795  ;;  %v2106_v36 = vadd.f32 %v2105_v12, %v7371_v46  ;;  %v2497_v63 = vsel %vm621_vm1, %v2314_v15, 0.0 }
 0x3e7   :  { %v3158_v41 = vmul.f32 %v5796_v29, %v7358_v24  ;;  %vm3164_vm13 = vweird.f32 %v5796_v29 }
 0x3e8   :  { %10309 = vst [vmem:[#allocation54_spill] sm:$0xff] %v7374_v6  ;;  %v3077_v3 = vadd.f32 1e-05, %v2933_v50  ;;  %v7393_v50 = vpop.f32.mrf.mxu3  ;;  %vm3165_vm15 = vmor %vm3163_vm14, %vm3164_vm13 }
 0x3e9   :  { %v7378_v40 = vpop.xlane.xlu2 %2471  ;;  %v7387_v57 = vpop.xlane.xlu1 %2083  ;;  %10312 = vst [vmem:[#allocation57_spill] sm:$0xff] %v7393_v50  ;;  %v3159_v15 = vmul.f32 %v5796_v29, %v3158_v41 }
 0x3ea   :  { %v7385_v49 = vpop.xlane.xlu0 %1971  ;;  %10311 = vst [vmem:[#allocation56_spill] sm:$0xff] %v7387_v57  ;;  %5797 = vrsqrt.f32 %v3077_v3  ;;  %v2498_v57 = vadd.f32 %v2497_v63, %v2313_v58  ;;  %v2371_v63 = vmul.f32 %v7398_v60, %v7398_v60  ;;  %vm3263_vm11 = vweird.f32 %v3077_v3 }
 0x3eb   :  { %v3160_v53 = vmul.f32 0.5, %v3159_v15 }
 0x3ed   :  { %1995 = vadd.xlane.f32.xlu0 %v1994_v0  ;;  %v2109_v0 = vsel %vm621_vm1, %v7393_v50, 0.0 }
 0x3ee   :  { %v2110_v43 = vadd.f32 %v2109_v0, %v7398_v60 }
 0x3f0   :  { %v5798_v22 = vpop.eup %5797 }
 0x3f1   :  { %v7396_v6 = vpop.xlane.xlu2 %2087  ;;  %2107 = vadd.xlane.f32.xlu1 %v2106_v36  ;;  %v3258_v31 = vmul.f32 %v5798_v22, %v3077_v3  ;;  %v7404_v23 = vpop.xlane.xlu1 %2587  ;;  %v2372_v36 = vmul.f32 %v7393_v50, %v7393_v50  ;;  %vm3264_vm10 = vweird.f32 %v5798_v22 }
 0x3f2   :  { %v7402_v12 = vpop.xlane.xlu0 %2475  ;;  %10314 = vst [vmem:[#allocation59_spill] sm:$0xff] %v7404_v23  ;;  %vm3265_vm12 = vmor %vm3263_vm11, %vm3264_vm10 }
 0x3f3   :  { %v3259_v7 = vmul.f32 %v5798_v22, %v3258_v31  ;;  %v2613_v5 = vsel %vm621_vm1, %v2372_v36, 0.0  ;;  %v3161_v31 = vsub.f32 1.5, %v3160_v53 }
 0x3f5   :  { %2499 = vadd.xlane.f32.xlu0 %v2498_v57  ;;  %v3260_v38 = vmul.f32 0.5, %v3259_v7  ;;  %v2614_v57 = vadd.f32 %v2613_v5, %v2371_v63  ;;  %v3162_v0 = vmul.f32 %v5796_v29, %v3161_v31  ;;  %v2995_v5 = vld [vmem:[%s10130_s6 + $0x10] sm:$0xff] }
 0x3f7   :  { %2111 = vadd.xlane.f32.xlu2 %v2110_v43  ;;  %v3261_v21 = vsub.f32 1.5, %v3260_v38  ;;  %v3005_v43 = vld [vmem:[%s10130_s6 + $0x60] sm:$0xff]  ;;  %v3166_v53 = vsel %vm3165_vm15, %v5796_v29, %v3162_v0 }
 0x3f8   :  { %v3859_v63 = vmul.f32 %v3166_v53, %v2995_v5 }
 0x3f9   :  { %v7409_v58 = vpop.xlane.xlu2 %2591  ;;  %v1976_v23 = vpop.xlane.xlu1 %1975  ;;  %v3262_v7 = vmul.f32 %v5798_v22, %v3261_v21  ;;  %v3929_v21 = vld [vmem:[%s10131_s7] sm:$0xff] }
 0x3fa   :  { %10315 = vst [vmem:[#allocation60_spill] sm:$0xff] %v7409_v58  ;;  %v7414_v41 = vpop.xlane.xlu0 %2091  ;;  %v4073_v29 = vsub.f32 %v3929_v21, %v7243_v56  ;;  %v4003_v53 = vmul.f32 %v3859_v63, %v7340_v44  ;;  %v3931_v56 = vld [vmem:[%s10131_s7 + $0x10] sm:$0xff]  ;;  %v2709_v44 = vmul.f32 0.0051020407, %v7299_v14 }
 0x3fb   :  { %v3266_v15 = vsel %vm3265_vm12, %v5798_v22, %v3262_v7  ;;  %v5736_v22 = vld [vmem:[%s10129_s5 + $0xd8] sm:$0xff] }
 0x3fc   :  { %v7421_v36 = vmul.f32 %v3266_v15, %v3005_v43  ;;  %5664 = vmatmul.msk.bf16.gmra.mxu3 %vm1426_vm8, %v5736_v22  ;;  %5628 = vmatmul.msk.bf16.gmra.mxu2 %vm1426_vm8, %v5736_v22  ;;  %v4075_v22 = vsub.f32 %v3931_v56, %v4003_v53 }
 0x3fe   :  { %10317 = vst [vmem:[#allocation62_spill] sm:$0xff] %v7421_v36  ;;  %v7437_v24 = vmul.f32 %v7421_v36, %v7349_v59 }
 0x3ff   :  { %2615 = vadd.xlane.f32.xlu2 %v2614_v57  ;;  %v7444_v57 = vmul.f32 0.0051020407, %v1976_v23 }
 0x400   :  { %10318 = vst [vmem:[#allocation63_spill] sm:$0xff] %v7437_v24 }
 0x401   :  { %v7419_v38 = vpop.xlane.xlu2 %1979  ;;  %v2480_v50 = vpop.xlane.xlu1 %2479  ;;  %v2792_v59 = vmul.f32 %v7444_v57, %v7444_v57 }
 0x402   :  { %10316 = vst [vmem:[#allocation61_spill] sm:$0xff] %v7419_v38  ;;  %v7430_v3 = vpop.xlane.xlu0 %2595  ;;  %v2720_v7 = vmul.f32 0.0051020407, %v2480_v50 }
 0x404   :  { %v2864_v15 = vsub.f32 %v2720_v7, %v2792_v59  ;;  %v7465_v7 = vmul.f32 0.0051020407, %v7275_v20 }
 0x406   :  { %v2936_v21 = vmax.f32 %v2864_v15, 0.0 }
 0x408   :  { %v3080_v50 = vadd.f32 1e-05, %v2936_v21 }
 0x409   :  { %4157 = vperm.xlu0 %5758, %v3859_v63   ;;  %v7442_v31 = vpop.xlane.xlu2 %2483  ;;  %v7446_v43 = vpop.xlane.xlu1 %2095  ;;  %v2781_v63 = vmul.f32 %v7465_v7, %v7465_v7 }
 0x40a   :  { %10319 = vst [vmem:[#allocation64_spill] sm:$0xff] %v7442_v31  ;;  %4651 = vperm.xlu1 %5759, %v4073_v29   ;;  %v7450_v0 = vpop.xlane.xlu0 %1983  ;;  %5799 = vrsqrt.f32 %v3080_v50  ;;  %vm3293_vm2 = vweird.f32 %v3080_v50 }
 0x40b   :  { %10320 = vst [vmem:[#allocation65_spill] sm:$0xff] %v7446_v43  ;;  %v2853_v43 = vsub.f32 %v2709_v44, %v2781_v63  ;;  %v2370_v63 = vmul.f32 %v7364_v52, %v7364_v52 }
 0x40c   :  { %10321 = vst [vmem:[#allocation66_spill] sm:$0xff] %v7450_v0 }
 0x410   :  { %v5800_v56 = vpop.eup %5799 }
 0x411   :  { %v7452_v5 = vpop.xlane.xlu2 %2099  ;;  %v7458_v23 = vpop.xlane.xlu1 %2599  ;;  %vm3294_vm0 = vweird.f32 %v5800_v56 }
 0x412   :  { %10322 = vst [vmem:[#allocation67_spill] sm:$0xff] %v7452_v5  ;;  %v7462_v60 = vpop.xlane.xlu0 %2487  ;;  %vm3295_vm3 = vmor %vm3293_vm2, %vm3294_vm0 }
 0x413   :  { %10323 = vst [vmem:[#allocation68_spill] sm:$0xff] %v7458_v23 }
 0x414   :  { %10325 = vst [vmem:[#allocation70_spill] sm:$0xff] %v7462_v60 }
 0x417   :  { %4661 = vperm.xlu2 %5760, %v4075_v22   ;;  %v2925_v22 = vmax.f32 %v2853_v43, 0.0 }
 0x419   :  { %v7460_v29 = vpop.xlane.xlu2 %2603  ;;  %v1988_v59 = vpop.xlane.xlu1 %1987  ;;  %v7478_v5 = vadd.f32 1e-05, %v2925_v22 }
 0x41a   :  { %10324 = vst [vmem:[#allocation69_spill] sm:$0xff] %v7460_v29  ;;  %v7470_v23 = vmul.f32 0.0051020407, %v1988_v59  ;;  %v7474_v53 = vpop.xlane.xlu0 %2103  ;;  %v3288_v29 = vmul.f32 %v5800_v56, %v3080_v50  ;;  %v7482_v59 = vpop.f32.mrf.mxu3 }
 0x41b   :  { %10327 = vst [vmem:[#allocation72_spill] sm:$0xff] %v7474_v53  ;;  %5801 = vrsqrt.f32 %v7478_v5  ;;  %v2374_v52 = vmul.f32 %v7482_v59, %v7482_v59  ;;  %vm3183_vm9 = vweird.f32 %v7478_v5 }
 0x41c   :  { %v2795_v20 = vmul.f32 %v7470_v23, %v7470_v23  ;;  %v3289_v31 = vmul.f32 %v5800_v56, %v3288_v29  ;;  %10329 = vst [vmem:[#allocation74_spill] sm:$0xff] %v7482_v59  ;;  %v7496_v29 = vpop.f32.mrf.mxu0 }
 0x41d   :  { %10332 = vst [vmem:[#allocation77_spill] sm:$0xff] %v7496_v29 }
 0x41e   :  { %v3290_v22 = vmul.f32 0.5, %v3289_v31 }
 0x420   :  { %v3291_v38 = vsub.f32 1.5, %v3290_v22 }
 0x421   :  { %v7472_v15 = vpop.xlane.xlu2 %1991  ;;  %v2492_v21 = vpop.xlane.xlu1 %2491 }
 0x422   :  { %10326 = vst [vmem:[#allocation71_spill] sm:$0xff] %v7472_v15  ;;  %v2723_v24 = vmul.f32 0.0051020407, %v2492_v21  ;;  %v7486_v15 = vpop.xlane.xlu0 %2607  ;;  %v7491_v21 = vpop.f32.mrf.mxu2 }
 0x423   :  { %10330 = vst [vmem:[#allocation75_spill] sm:$0xff] %v7486_v15  ;;  %v7506_v53 = vpop.eup %5801 }
 0x424   :  { %v2867_v14 = vsub.f32 %v2723_v24, %v2795_v20  ;;  %10331 = vst [vmem:[#allocation76_spill] sm:$0xff] %v7491_v21  ;;  %v2113_v24 = vsel %vm621_vm1, %v7482_v59, 0.0  ;;  %v2369_v20 = vmul.f32 %v7371_v46, %v7371_v46  ;;  %v2617_v59 = vsel %vm621_vm1, %v2374_v52, 0.0 }
 0x425   :  { %v1997_v52 = vsel %vm621_vm1, %v7496_v29, 0.0  ;;  %vm3184_vm7 = vweird.f32 %v7506_v53 }
 0x426   :  { %v2939_v36 = vmax.f32 %v2867_v14, 0.0  ;;  %v2114_v14 = vadd.f32 %v2113_v24, %v7491_v21  ;;  %vm3185_vm10 = vmor %vm3183_vm9, %vm3184_vm7 }
 0x428   :  { %v7488_v43 = vadd.f32 1e-05, %v2939_v36  ;;  %v2609_v36 = vsel %vm621_vm1, %v2370_v63, 0.0  ;;  %v2373_v63 = vmul.f32 %v7491_v21, %v7491_v21  ;;  %v7519_v21 = vpop.f32.mrf.mxu0 }
 0x429   :  { %v7480_v44 = vpop.xlane.xlu2 %2495  ;;  %v2610_v31 = vadd.f32 %v2609_v36, %v2369_v20  ;;  %v3008_v20 = vld [vmem:[%s10130_s6 + $0x78] sm:$0xff]  ;;  %v3292_v36 = vmul.f32 %v5800_v56, %v3291_v38  ;;  %10334 = vst [vmem:[#allocation79_spill] sm:$0xff] %v7519_v21 }
 0x42a   :  { %10328 = vst [vmem:[#allocation73_spill] sm:$0xff] %v7480_v44  ;;  %5803 = vrsqrt.f32 %v7488_v43  ;;  %v7504_v44 = vpop.f32.mrf.mxu1  ;;  %v2618_v58 = vadd.f32 %v2617_v59, %v2373_v63  ;;  %vm3323_vm5 = vweird.f32 %v7488_v43 }
 0x42b   :  { %10333 = vst [vmem:[#allocation78_spill] sm:$0xff] %v7504_v44  ;;  %v3296_v50 = vsel %vm3295_vm3, %v5800_v56, %v3292_v36  ;;  %v1998_v56 = vadd.f32 %v1997_v52, %v7504_v44 }
 0x42c   :  { %v7526_v38 = vmul.f32 %v3296_v50, %v3008_v20  ;;  %v7545_v20 = vmul.f32 0.0051020407, %v7297_v26  ;;  %v2315_v26 = vmul.f32 %v7504_v44, %v7504_v44  ;;  %v7560_v50 = vpop.f32.mrf.mxu2 }
 0x42d   :  { %10337 = vst [vmem:[#allocation82_spill] sm:$0xff] %v7560_v50 }
 0x430   :  { %v5804_v60 = vpop.eup %5803 }
 0x431   :  { %v4153_v15 = vpop.permute.xlu2 %4152  ;;  %v3318_v24 = vmul.f32 %v5804_v60, %v7488_v43  ;;  %vm3324_vm4 = vweird.f32 %v5804_v60 }
 0x432   :  { %v4507_v0 = vmul.f32 %v4153_v15, %v6874_v28  ;;  %v4508_v46 = vmul.f32 %v4153_v15, %v6877_v45  ;;  %v3178_v28 = vmul.f32 %v7506_v53, %v7478_v5  ;;  %v7536_v63 = vpop.f32.mrf.mxu1  ;;  %vm3325_vm6 = vmor %vm3323_vm5, %vm3324_vm4 }
 0x433   :  { %2115 = vadd.xlane.f32.xlu0 %v2114_v14  ;;  %v3319_v45 = vmul.f32 %v5804_v60, %v3318_v24  ;;  %10335 = vst [vmem:[#allocation80_spill] sm:$0xff] %v7536_v63  ;;  %v2316_v24 = vmul.f32 %v7496_v29, %v7496_v29  ;;  %v2317_v43 = vmul.f32 %v7536_v63, %v7536_v63 }
 0x434   :  { %2611 = vadd.xlane.f32.xlu1 %v2610_v31 }
 0x435   :  { %v4657_v22 = vpop.permute.xlu0 %4656  ;;  %v3320_v31 = vmul.f32 0.5, %v3319_v45  ;;  %v2710_v45 = vmul.f32 0.0051020407, %v7317_v1  ;;  %v2501_v52 = vsel %vm621_vm1, %v2316_v24, 0.0  ;;  %v2782_v1 = vmul.f32 %v7545_v20, %v7545_v20 }
 0x436   :  { %v5011_v15 = vadd.f32 %v4657_v22, %v4507_v0  ;;  %v5012_v14 = vadd.f32 %v4657_v22, %v4508_v46  ;;  %v2001_v46 = vsel %vm621_vm1, %v7519_v21, 0.0  ;;  %v3179_v0 = vmul.f32 %v7506_v53, %v3178_v28  ;;  %v7548_v28 = vpop.f32.mrf.mxu3 }
 0x437   :  { %v3321_v59 = vsub.f32 1.5, %v3320_v31  ;;  %v7542_v22 = vmul.f32 %v7526_v38, %v7444_v57  ;;  %v2002_v36 = vadd.f32 %v2001_v46, %v7536_v63  ;;  %10336 = vst [vmem:[#allocation81_spill] sm:$0xff] %v7548_v28  ;;  %v3011_v31 = vld [vmem:[%s10130_s6 + $0x90] sm:$0xff]  ;;  %v2502_v24 = vadd.f32 %v2501_v52, %v2315_v26 }
 0x438   :  { %5155 = vst [vmem:[%s10132_s8 + $0x10] sm:$0xff] %v5011_v15  ;;  %v2318_v15 = vmul.f32 %v7519_v21, %v7519_v21  ;;  %v3180_v57 = vmul.f32 0.5, %v3179_v0 }
 0x439   :  { %5156 = vst.msk [vmem:[%s10132_s8 + $0x18] sm:$0xff] %vm621_vm1, %v5012_v14  ;;  %v3322_v14 = vmul.f32 %v5804_v60, %v3321_v59 }
 0x43a   :  { %v2505_v0 = vsel %vm621_vm1, %v2318_v15, 0.0  ;;  %v3181_v29 = vsub.f32 1.5, %v3180_v57  ;;  %v2997_v15 = vld [vmem:[%s10130_s6 + $0x20] sm:$0xff] }
 0x43b   :  { %2619 = vadd.xlane.f32.xlu0 %v2618_v58  ;;  %v5737_v58 = vld [vmem:[%s10129_s5 + $0xe0] sm:$0xff]  ;;  %v3326_v46 = vsel %vm3325_vm6, %v5804_v60, %v3322_v14  ;;  %v7583_v60 = vpop.f32.mrf.mxu2 }
 0x43c   :  { %1999 = vadd.xlane.f32.xlu1 %v1998_v56  ;;  %5665 = vmatmul.msk.bf16.gmra.mxu3 %vm1426_vm8, %v5737_v58  ;;  %v7572_v59 = vmul.f32 %v3326_v46, %v3011_v31  ;;  %v2854_v56 = vsub.f32 %v2710_v45, %v2782_v1  ;;  %v3182_v63 = vmul.f32 %v7506_v53, %v3181_v29 }
 0x43d   :  { %5629 = vmatmul.msk.bf16.gmra.mxu2 %vm1426_vm8, %v5737_v58  ;;  %10341 = vst [vmem:[#allocation86_spill] sm:$0xff] %v7583_v60  ;;  %v2377_v5 = vmul.f32 %v7583_v60, %v7583_v60 }
 0x43e   :  { %10338 = vst [vmem:[#allocation83_spill] sm:$0xff] %v7572_v59  ;;  %v7576_v58 = vmul.f32 %v7572_v59, %v7470_v23  ;;  %v2926_v44 = vmax.f32 %v2854_v56, 0.0  ;;  %v7578_v21 = vpop.f32.mrf.mxu3  ;;  %v3186_v57 = vsel %vm3185_vm10, %v7506_v53, %v3182_v63  ;;  %v3933_v53 = vld [vmem:[%s10131_s7 + $0x20] sm:$0xff] }
 0x43f   :  { %10340 = vst [vmem:[#allocation85_spill] sm:$0xff] %v7578_v21  ;;  %v2121_v45 = vsel %vm621_vm1, %v7578_v21, 0.0  ;;  %v2378_v26 = vmul.f32 %v7578_v21, %v7578_v21  ;;  %v3861_v14 = vmul.f32 %v3186_v57, %v2997_v15  ;;  %v2998_v15 = vld [vmem:[%s10130_s6 + $0x28] sm:$0xff] }
 0x440   :  { %2003 = vadd.xlane.f32.xlu2 %v2002_v36  ;;  %10339 = vst [vmem:[#allocation84_spill] sm:$0xff] %v7576_v58  ;;  %v2506_v36 = vadd.f32 %v2505_v0, %v2317_v43  ;;  %v3070_v23 = vadd.f32 1e-05, %v2926_v44  ;;  %v2122_v29 = vadd.f32 %v2121_v45, %v7583_v60 }
 0x441   :  { %v4005_v44 = vmul.f32 %v3861_v14, %v7465_v7  ;;  %v2625_v52 = vsel %vm621_vm1, %v2378_v26, 0.0 }
 0x442   :  { %5805 = vrsqrt.f32 %v3070_v23  ;;  %v2626_v1 = vadd.f32 %v2625_v52, %v2377_v5  ;;  %vm3193_vm12 = vweird.f32 %v3070_v23  ;;  %v3934_v5 = vld [vmem:[%s10131_s7 + $0x28] sm:$0xff] }
 0x443   :  { %v4077_v43 = vsub.f32 %v3933_v53, %v4005_v44  ;;  %v7624_v53 = vpop.f32.mrf.mxu0 }
 0x444   :  { %2503 = vadd.xlane.f32.xlu1 %v2502_v24 }
 0x448   :  { %2507 = vadd.xlane.f32.xlu2 %v2506_v36  ;;  %v5806_v63 = vpop.eup %5805  ;;  %v5738_v36 = vld [vmem:[%s10129_s5 + $0xe8] sm:$0xff] }
 0x449   :  { %v3188_v31 = vmul.f32 %v5806_v63, %v3070_v23  ;;  %vm3194_vm11 = vweird.f32 %v5806_v63 }
 0x44a   :  { %vm3195_vm13 = vmor %vm3193_vm12, %vm3194_vm11 }
 0x44b   :  { %v3189_v46 = vmul.f32 %v5806_v63, %v3188_v31 }
 0x44c   :  { %5666 = vmatmul.msk.bf16.gmra.mxu3 %vm1426_vm8, %v5738_v36 }
 0x44d   :  { %v3190_v0 = vmul.f32 0.5, %v3189_v46  ;;  %5630 = vmatmul.msk.bf16.gmra.mxu2 %vm1426_vm8, %v5738_v36  ;;  %v7633_v46 = vpop.f32.mrf.mxu1 }
 0x44f   :  { %4167 = vperm.xlu0 %5758, %v3861_v14   ;;  %v3191_v56 = vsub.f32 1.5, %v3190_v0 }
 0x450   :  { %2123 = vadd.xlane.f32.xlu2 %v2122_v29 }
 0x451   :  { %v3192_v7 = vmul.f32 %v5806_v63, %v3191_v56 }
 0x453   :  { %v3196_v57 = vsel %vm3195_vm13, %v5806_v63, %v3192_v7  ;;  %v7627_v63 = vmul.f32 0.0051020407, %v7311_v62 }
 0x454   :  { %v3862_v29 = vmul.f32 %v3196_v57, %v2998_v15 }
 0x455   :  { %v2784_v62 = vmul.f32 %v7627_v63, %v7627_v63 }
 0x456   :  { %v4006_v26 = vmul.f32 %v3862_v29, %v7545_v20  ;;  %v2712_v20 = vmul.f32 0.0051020407, %v7324_v4 }
 0x457   :  { %4671 = vperm.xlu0 %5758, %v4077_v43  }
 0x458   :  { %2627 = vadd.xlane.f32.xlu2 %v2626_v1  ;;  %v4078_v52 = vsub.f32 %v3934_v5, %v4006_v26  ;;  %v2005_v1 = vsel %vm621_vm1, %v7624_v53, 0.0 }
 0x45d   :  { %4162 = vperm.xlu1 %5759, %v7301_v54   ;;  %v4148_v54 = vpop.permute.xlu1 %4147 }
 0x45e   :  { %v4505_v43 = vmul.f32 %v4148_v54, %v6858_v18  ;;  %v4506_v0 = vmul.f32 %v4148_v54, %v6860_v42  ;;  %v2320_v18 = vmul.f32 %v7624_v53, %v7624_v53  ;;  %v2319_v42 = vmul.f32 %v7633_v46, %v7633_v46 }
 0x460   :  { %v7602_v24 = vpop.xlane.xlu0 %1995 }
 0x465   :  { %v7622_v44 = vpop.xlane.xlu1 %2107 }
 0x466   :  { %10342 = vst [vmem:[#allocation87_spill] sm:$0xff] %v7622_v44 }
 0x468   :  { %v7614_v23 = vpop.xlane.xlu0 %2499 }
 0x46a   :  { %v7607_v45 = vpop.xlane.xlu2 %2111 }
 0x470   :  { %4172 = vperm.xlu2 %5760, %v3862_v29   ;;  %v2006_v29 = vadd.f32 %v2005_v1, %v7633_v46 }
 0x472   :  { %v7617_v14 = vpop.xlane.xlu2 %2615 }
 0x478   :  { %4676 = vperm.xlu2 %5760, %v4078_v52   ;;  %v2856_v52 = vsub.f32 %v2712_v20, %v2784_v62 }
 0x47a   :  { %v4662_v15 = vpop.permute.xlu2 %4661  ;;  %v2928_v54 = vmax.f32 %v2856_v52, 0.0 }
 0x47b   :  { %v4158_v31 = vpop.permute.xlu0 %4157 }
 0x47c   :  { %v4509_v56 = vmul.f32 %v4158_v31, %v6892_v17  ;;  %v4510_v7 = vmul.f32 %v4158_v31, %v6894_v11  ;;  %v4652_v36 = vpop.permute.xlu1 %4651  ;;  %v2117_v17 = vsel %vm621_vm1, %v7548_v28, 0.0  ;;  %v2509_v11 = vsel %vm621_vm1, %v2320_v18, 0.0  ;;  %v7663_v31 = vpop.f32.mrf.mxu3 }
 0x47d   :  { %v5009_v57 = vadd.f32 %v4652_v36, %v4505_v43  ;;  %v5010_v5 = vadd.f32 %v4652_v36, %v4506_v0  ;;  %v2118_v1 = vadd.f32 %v2117_v17, %v7560_v50  ;;  %v2510_v20 = vadd.f32 %v2509_v11, %v2319_v42  ;;  %v7665_v0 = vpop.f32.mrf.mxu2  ;;  %v7670_v36 = vpop.f32.mrf.mxu0  ;;  %v3932_v17 = vld [vmem:[%s10131_s7 + $0x18] sm:$0xff] }
 0x47e   :  { %v5013_v4 = vadd.f32 %v4662_v15, %v4509_v56  ;;  %v5014_v26 = vadd.f32 %v4662_v15, %v4510_v7  ;;  %v3072_v43 = vadd.f32 1e-05, %v2928_v54  ;;  %v2125_v56 = vsel %vm621_vm1, %v7663_v31, 0.0  ;;  %10343 = vst [vmem:[#allocation88_spill] sm:$0xff] %v7670_v36 }
 0x47f   :  { %5153 = vst [vmem:[%s10132_s8] sm:$0xff] %v5009_v57  ;;  %v2126_v7 = vadd.f32 %v2125_v56, %v7665_v0  ;;  %v2380_v62 = vmul.f32 %v7663_v31, %v7663_v31  ;;  %v2379_v57 = vmul.f32 %v7665_v0, %v7665_v0 }
 0x480   :  { %5157 = vst [vmem:[%s10132_s8 + $0x20] sm:$0xff] %v5013_v4  ;;  %5807 = vrsqrt.f32 %v3072_v43  ;;  %vm3213_vm15 = vweird.f32 %v3072_v43 }
 0x481   :  { %5158 = vst.msk [vmem:[%s10132_s8 + $0x28] sm:$0xff] %vm621_vm1, %v5014_v26  ;;  %2007 = vadd.xlane.f32.xlu0 %v2006_v29  ;;  %v7676_v29 = vpop.f32.mrf.mxu1  ;;  %v2629_v4 = vsel %vm621_vm1, %v2380_v62, 0.0  ;;  %v4076_v62 = vsub.f32 %v3932_v17, %v7309_v33 }
 0x482   :  { %5154 = vst.msk [vmem:[%s10132_s8 + $0x8] sm:$0xff] %vm621_vm1, %v5010_v5  ;;  %v2630_v18 = vadd.f32 %v2629_v4, %v2379_v57  ;;  %v2713_v57 = vmul.f32 0.0051020407, %v7337_v39 }
 0x483   :  { %10344 = vst [vmem:[#allocation89_spill] sm:$0xff] %v7676_v29 }
 0x484   :  { %v7692_v56 = vpop.f32.mrf.mxu3 }
 0x485   :  { %v7679_v5 = vpop.f32.mrf.mxu0  ;;  %10347 = vst [vmem:[#allocation92_spill] sm:$0xff] %v7692_v56  ;;  %v7698_v4 = vpop.f32.mrf.mxu2 }
 0x486   :  { %v5808_v15 = vpop.eup %5807  ;;  %10345 = vst [vmem:[#allocation90_spill] sm:$0xff] %v7679_v5  ;;  %v2013_v42 = vsel %vm621_vm1, %v7679_v5, 0.0 }
 0x487   :  { %2119 = vadd.xlane.f32.xlu1 %v2118_v1  ;;  %v3208_v26 = vmul.f32 %v5808_v15, %v3072_v43  ;;  %v7689_v1 = vmul.f32 0.0051020407, %v7321_v37  ;;  %10348 = vst [vmem:[#allocation93_spill] sm:$0xff] %v7698_v4  ;;  %vm3214_vm14 = vweird.f32 %v5808_v15 }
 0x488   :  { %vm3215_vm0 = vmor %vm3213_vm15, %vm3214_vm14 }
 0x489   :  { %2511 = vadd.xlane.f32.xlu0 %v2510_v20  ;;  %v3209_v52 = vmul.f32 %v5808_v15, %v3208_v26  ;;  %v7686_v54 = vpop.f32.mrf.mxu1 }
 0x48a   :  { %10346 = vst [vmem:[#allocation91_spill] sm:$0xff] %v7686_v54  ;;  %v2014_v20 = vadd.f32 %v2013_v42, %v7686_v54  ;;  %v2323_v37 = vmul.f32 %v7686_v54, %v7686_v54 }
 0x48b   :  { %v3210_v11 = vmul.f32 0.5, %v3209_v52 }
 0x48c   :  { %v7707_v17 = vpop.f32.mrf.mxu3 }
 0x48d   :  { %v3211_v26 = vsub.f32 1.5, %v3210_v11  ;;  %10350 = vst [vmem:[#allocation95_spill] sm:$0xff] %v7707_v17  ;;  %v3000_v11 = vld [vmem:[%s10130_s6 + $0x38] sm:$0xff] }
 0x48f   :  { %v3212_v21 = vmul.f32 %v5808_v15, %v3211_v26 }
 0x491   :  { %2127 = vadd.xlane.f32.xlu0 %v2126_v7  ;;  %v2324_v7 = vmul.f32 %v7679_v5, %v7679_v5 }
 0x493   :  { %v2517_v52 = vsel %vm621_vm1, %v2324_v7, 0.0  ;;  %v2133_v7 = vsel %vm621_vm1, %v7707_v17, 0.0 }
 0x494   :  { %v2518_v5 = vadd.f32 %v2517_v52, %v2323_v37  ;;  %v2384_v37 = vmul.f32 %v7707_v17, %v7707_v17 }
 0x499   :  { %2631 = vadd.xlane.f32.xlu0 %v2630_v18  ;;  %v2785_v18 = vmul.f32 %v7689_v1, %v7689_v1 }
 0x49b   :  { %v2857_v42 = vsub.f32 %v2713_v57, %v2785_v18 }
 0x49d   :  { %v2929_v33 = vmax.f32 %v2857_v42, 0.0  ;;  %v2637_v42 = vsel %vm621_vm1, %v2384_v37, 0.0 }
 0x49f   :  { %v3073_v57 = vadd.f32 1e-05, %v2929_v33 }
 0x4a0   :  { %4666 = vperm.xlu1 %5759, %v4076_v62   ;;  %v7712_v62 = vpop.f32.mrf.mxu2 }
 0x4a1   :  { %2015 = vadd.xlane.f32.xlu2 %v2014_v20  ;;  %v3216_v20 = vsel %vm3215_vm0, %v5808_v15, %v3212_v21  ;;  %10351 = vst [vmem:[#allocation96_spill] sm:$0xff] %v7712_v62  ;;  %v2134_v18 = vadd.f32 %v2133_v7, %v7712_v62  ;;  %5809 = vrsqrt.f32 %v3073_v57  ;;  %v3936_v15 = vld [vmem:[%s10131_s7 + $0x38] sm:$0xff]  ;;  %vm3223_vm3 = vweird.f32 %v3073_v57 }
 0x4a2   :  { %v3864_v26 = vmul.f32 %v3216_v20, %v3000_v11 }
 0x4a4   :  { %v4008_v52 = vmul.f32 %v3864_v26, %v7627_v63 }
 0x4a6   :  { %v7716_v43 = vpop.xlane.xlu0 %2115  ;;  %v4080_v11 = vsub.f32 %v3936_v15, %v4008_v52  ;;  %v2376_v15 = vmul.f32 %v7548_v28, %v7548_v28 }
 0x4a7   :  { %v7705_v39 = vpop.xlane.xlu1 %2611  ;;  %v5810_v7 = vpop.eup %5809 }
 0x4a8   :  { %10349 = vst [vmem:[#allocation94_spill] sm:$0xff] %v7705_v39  ;;  %v3218_v54 = vmul.f32 %v5810_v7, %v3073_v57  ;;  %vm3224_vm2 = vweird.f32 %v5810_v7 }
 0x4a9   :  { %2519 = vadd.xlane.f32.xlu2 %v2518_v5  ;;  %v2383_v5 = vmul.f32 %v7712_v62, %v7712_v62  ;;  %vm3225_vm4 = vmor %vm3223_vm3, %vm3224_vm2 }
 0x4aa   :  { %v3219_v37 = vmul.f32 %v5810_v7, %v3218_v54  ;;  %v2621_v54 = vsel %vm621_vm1, %v2376_v15, 0.0  ;;  %v2009_v15 = vsel %vm621_vm1, %v7670_v36, 0.0 }
 0x4ab   :  { %v2638_v17 = vadd.f32 %v2637_v42, %v2383_v5  ;;  %v5739_v42 = vld [vmem:[%s10129_s5 + $0xf0] sm:$0xff]  ;;  %v2010_v57 = vadd.f32 %v2009_v15, %v7676_v29 }
 0x4ac   :  { %5667 = vmatmul.msk.bf16.gmra.mxu3 %vm1426_vm8, %v5739_v42  ;;  %5631 = vmatmul.msk.bf16.gmra.mxu2 %vm1426_vm8, %v5739_v42 }
 0x4ad   :  { %4182 = vperm.xlu0 %5758, %v3864_v26  }
 0x4ae   :  { %v7732_v63 = vpop.xlane.xlu0 %2619 }
 0x4af   :  { %v2000_v21 = vpop.xlane.xlu1 %1999 }
 0x4b0   :  { %v7730_v20 = vmul.f32 0.0051020407, %v2000_v21  ;;  %v3220_v21 = vmul.f32 0.5, %v3219_v37 }
 0x4b1   :  { %2135 = vadd.xlane.f32.xlu2 %v2134_v18 }
 0x4b2   :  { %v2798_v18 = vmul.f32 %v7730_v20, %v7730_v20 }
 0x4b3   :  { %v7728_v33 = vpop.xlane.xlu2 %2003 }
 0x4b4   :  { %10352 = vst [vmem:[#allocation97_spill] sm:$0xff] %v7728_v33 }
 0x4b5   :  { %4686 = vperm.xlu0 %5758, %v4080_v11  }
 0x4b7   :  { %v2504_v26 = vpop.xlane.xlu1 %2503 }
 0x4b8   :  { %v2726_v60 = vmul.f32 0.0051020407, %v2504_v26 }
 0x4b9   :  { %2639 = vadd.xlane.f32.xlu2 %v2638_v17 }
 0x4ba   :  { %v2870_v62 = vsub.f32 %v2726_v60, %v2798_v18  ;;  %v3221_v60 = vsub.f32 1.5, %v3220_v21 }
 0x4bb   :  { %v7736_v39 = vpop.xlane.xlu2 %2507 }
 0x4bc   :  { %10353 = vst [vmem:[#allocation98_spill] sm:$0xff] %v7736_v39  ;;  %v2942_v44 = vmax.f32 %v2870_v62, 0.0  ;;  %v3222_v28 = vmul.f32 %v5810_v7, %v3221_v60  ;;  %v2322_v60 = vmul.f32 %v7670_v36, %v7670_v36 }
 0x4be   :  { %v3086_v52 = vadd.f32 1e-05, %v2942_v44  ;;  %v2375_v44 = vmul.f32 %v7560_v50, %v7560_v50 }
 0x4c0   :  { %5811 = vrsqrt.f32 %v3086_v52  ;;  %v2622_v37 = vadd.f32 %v2621_v54, %v2375_v44  ;;  %vm3353_vm6 = vweird.f32 %v3086_v52 }
 0x4c1   :  { %v4168_v5 = vpop.permute.xlu0 %4167 }
 0x4c2   :  { %v4513_v26 = vmul.f32 %v4168_v5, %v6924_v55  ;;  %v4514_v18 = vmul.f32 %v4168_v5, %v6927_v2  ;;  %v3001_v55 = vld [vmem:[%s10130_s6 + $0x40] sm:$0xff]  ;;  %v3226_v2 = vsel %vm3225_vm4, %v5810_v7, %v3222_v28  ;;  %v7775_v7 = vpop.f32.mrf.mxu0 }
 0x4c3   :  { %v7743_v11 = vpop.xlane.xlu2 %2123  ;;  %v3937_v28 = vld [vmem:[%s10131_s7 + $0x40] sm:$0xff] }
 0x4c4   :  { %10354 = vst [vmem:[#allocation99_spill] sm:$0xff] %v7743_v11 }
 0x4c6   :  { %v5812_v17 = vpop.eup %5811 }
 0x4c7   :  { %v3348_v62 = vmul.f32 %v5812_v17, %v3086_v52  ;;  %vm3354_vm5 = vweird.f32 %v5812_v17 }
 0x4c8   :  { %vm3355_vm7 = vmor %vm3353_vm6, %vm3354_vm5 }
 0x4c9   :  { %v3349_v58 = vmul.f32 %v5812_v17, %v3348_v62  ;;  %v4672_v11 = vpop.permute.xlu0 %4671  ;;  %v2513_v62 = vsel %vm621_vm1, %v2322_v60, 0.0 }
 0x4ca   :  { %v5017_v59 = vadd.f32 %v4672_v11, %v4513_v26  ;;  %v5018_v42 = vadd.f32 %v4672_v11, %v4514_v18  ;;  %2623 = vadd.xlane.f32.xlu1 %v2622_v37  ;;  %v3865_v11 = vmul.f32 %v3226_v2, %v3001_v55  ;;  %v3014_v18 = vld [vmem:[%s10130_s6 + $0xa8] sm:$0xff]  ;;  %v2017_v55 = vsel %vm621_vm1, %v7775_v7, 0.0 }
 0x4cb   :  { %v7752_v21 = vpop.xlane.xlu2 %2627  ;;  %v3350_v5 = vmul.f32 0.5, %v3349_v58  ;;  %v2321_v58 = vmul.f32 %v7676_v29, %v7676_v29  ;;  %v2715_v2 = vmul.f32 0.0051020407, %v7347_v32  ;;  %v2326_v32 = vmul.f32 %v7775_v7, %v7775_v7 }
 0x4cc   :  { %10355 = vst [vmem:[#allocation100_spill] sm:$0xff] %v7752_v21  ;;  %v4009_v54 = vmul.f32 %v3865_v11, %v7689_v1  ;;  %v7782_v1 = vmul.f32 0.0051020407, %v7331_v27 }
 0x4cd   :  { %5161 = vst [vmem:[%s10132_s8 + $0x40] sm:$0xff] %v5017_v59  ;;  %v3351_v44 = vsub.f32 1.5, %v3350_v5  ;;  %v2514_v15 = vadd.f32 %v2513_v62, %v2321_v58  ;;  %v7789_v5 = vpop.f32.mrf.mxu1 }
 0x4ce   :  { %5162 = vst.msk [vmem:[%s10132_s8 + $0x48] sm:$0xff] %vm621_vm1, %v5018_v42  ;;  %v4081_v37 = vsub.f32 %v3937_v28, %v4009_v54 }
 0x4cf   :  { %v3352_v26 = vmul.f32 %v5812_v17, %v3351_v44  ;;  %v2018_v44 = vadd.f32 %v2017_v55, %v7789_v5  ;;  %v7821_v55 = vpop.f32.mrf.mxu0 }
 0x4d0   :  { %10358 = vst [vmem:[#allocation103_spill] sm:$0xff] %v7821_v55 }
 0x4d1   :  { %4187 = vperm.xlu2 %5760, %v3865_v11   ;;  %v3356_v42 = vsel %vm3355_vm7, %v5812_v17, %v3352_v26  ;;  %v2787_v17 = vmul.f32 %v7782_v1, %v7782_v1  ;;  %v7812_v26 = vpop.f32.mrf.mxu3 }
 0x4d2   :  { %2011 = vadd.xlane.f32.xlu1 %v2010_v57  ;;  %v7786_v52 = vmul.f32 %v3356_v42, %v3014_v18  ;;  %v7814_v18 = vpop.f32.mrf.mxu2 }
 0x4d3   :  { %v4173_v59 = vpop.permute.xlu2 %4172  ;;  %v2859_v58 = vsub.f32 %v2715_v2, %v2787_v17 }
 0x4d4   :  { %10356 = vst [vmem:[#allocation101_spill] sm:$0xff] %v7786_v52  ;;  %v4515_v57 = vmul.f32 %v4173_v59, %v6940_v19  ;;  %v4516_v11 = vmul.f32 %v4173_v59, %v6943_v16  ;;  %v7795_v27 = vmul.f32 %v7786_v52, %v7730_v20  ;;  %v2325_v19 = vmul.f32 %v7789_v5, %v7789_v5 }
 0x4d5   :  { %v2521_v16 = vsel %vm621_vm1, %v2326_v32, 0.0  ;;  %v2931_v20 = vmax.f32 %v2859_v58, 0.0 }
 0x4d6   :  { %10357 = vst [vmem:[#allocation102_spill] sm:$0xff] %v7795_v27  ;;  %v2522_v59 = vadd.f32 %v2521_v16, %v2325_v19 }
 0x4d7   :  { %v3075_v62 = vadd.f32 1e-05, %v2931_v20 }
 0x4d9   :  { %4691 = vperm.xlu2 %5760, %v4081_v37   ;;  %v2137_v37 = vsel %vm621_vm1, %v7812_v26, 0.0  ;;  %5813 = vrsqrt.f32 %v3075_v62  ;;  %vm3243_vm10 = vweird.f32 %v3075_v62 }
 0x4da   :  { %2515 = vadd.xlane.f32.xlu1 %v2514_v15  ;;  %v2138_v42 = vadd.f32 %v2137_v37, %v7814_v18  ;;  %v2386_v15 = vmul.f32 %v7812_v26, %v7812_v26 }
 0x4db   :  { %v4677_v60 = vpop.permute.xlu2 %4676 }
 0x4dc   :  { %v5019_v54 = vadd.f32 %v4677_v60, %v4515_v57  ;;  %v5020_v28 = vadd.f32 %v4677_v60, %v4516_v11  ;;  %v2385_v57 = vmul.f32 %v7814_v18, %v7814_v18  ;;  %v2641_v11 = vsel %vm621_vm1, %v2386_v15, 0.0  ;;  %v7826_v60 = vpop.f32.mrf.mxu1 }
 0x4dd   :  { %10359 = vst [vmem:[#allocation104_spill] sm:$0xff] %v7826_v60  ;;  %v2716_v15 = vmul.f32 0.0051020407, %v7353_v13  ;;  %v3003_v13 = vld [vmem:[%s10130_s6 + $0x50] sm:$0xff] }
 0x4de   :  { %5163 = vst [vmem:[%s10132_s8 + $0x50] sm:$0xff] %v5019_v54 }
 0x4df   :  { %5164 = vst.msk [vmem:[%s10132_s8 + $0x58] sm:$0xff] %vm621_vm1, %v5020_v28  ;;  %2019 = vadd.xlane.f32.xlu0 %v2018_v44  ;;  %v5814_v2 = vpop.eup %5813  ;;  %v2642_v44 = vadd.f32 %v2641_v11, %v2385_v57  ;;  %v7831_v28 = vpop.f32.mrf.mxu0 }
 0x4e0   :  { %v3238_v17 = vmul.f32 %v5814_v2, %v3075_v62  ;;  %10360 = vst [vmem:[#allocation105_spill] sm:$0xff] %v7831_v28  ;;  %v2025_v19 = vsel %vm621_vm1, %v7831_v28, 0.0  ;;  %v7848_v11 = vpop.f32.mrf.mxu2  ;;  %vm3244_vm9 = vweird.f32 %v5814_v2 }
 0x4e1   :  { %10363 = vst [vmem:[#allocation108_spill] sm:$0xff] %v7848_v11  ;;  %vm3245_vm11 = vmor %vm3243_vm10, %vm3244_vm9 }
 0x4e2   :  { %v3239_v32 = vmul.f32 %v5814_v2, %v3238_v17 }
 0x4e4   :  { %v3240_v58 = vmul.f32 0.5, %v3239_v32  ;;  %v7835_v16 = vpop.f32.mrf.mxu1 }
 0x4e5   :  { %10361 = vst [vmem:[#allocation106_spill] sm:$0xff] %v7835_v16  ;;  %v2026_v37 = vadd.f32 %v2025_v19, %v7835_v16  ;;  %v2329_v17 = vmul.f32 %v7835_v16, %v7835_v16 }
 0x4e6   :  { %v3241_v20 = vsub.f32 1.5, %v3240_v58 }
 0x4e7   :  { %2523 = vadd.xlane.f32.xlu0 %v2522_v59  ;;  %v7838_v59 = vmul.f32 0.0051020407, %v7344_v25 }
 0x4e8   :  { %v3242_v32 = vmul.f32 %v5814_v2, %v3241_v20 }
 0x4e9   :  { %v2788_v25 = vmul.f32 %v7838_v59, %v7838_v59 }
 0x4ea   :  { %v3246_v36 = vsel %vm3245_vm11, %v5814_v2, %v3242_v32 }
 0x4eb   :  { %v2860_v19 = vsub.f32 %v2716_v15, %v2788_v25  ;;  %v3867_v16 = vmul.f32 %v3246_v36, %v3003_v13  ;;  %v3939_v36 = vld [vmem:[%s10131_s7 + $0x50] sm:$0xff] }
 0x4ed   :  { %v2932_v50 = vmax.f32 %v2860_v19, 0.0  ;;  %v4011_v15 = vmul.f32 %v3867_v16, %v7782_v1 }
 0x4ef   :  { %2139 = vadd.xlane.f32.xlu0 %v2138_v42  ;;  %v2330_v42 = vmul.f32 %v7831_v28, %v7831_v28  ;;  %v4083_v32 = vsub.f32 %v3939_v36, %v4011_v15 }
 0x4f1   :  { %v2529_v58 = vsel %vm621_vm1, %v2330_v42, 0.0  ;;  %v3076_v42 = vadd.f32 1e-05, %v2932_v50 }
 0x4f2   :  { %v2530_v29 = vadd.f32 %v2529_v58, %v2329_v17 }
 0x4f3   :  { %4177 = vperm.xlu1 %5759, %v7329_v47   ;;  %v7841_v47 = vpop.f32.mrf.mxu3  ;;  %5815 = vrsqrt.f32 %v3076_v42  ;;  %vm3253_vm13 = vweird.f32 %v3076_v42 }
 0x4f4   :  { %v7829_v54 = vpop.xlane.xlu0 %2007  ;;  %10362 = vst [vmem:[#allocation107_spill] sm:$0xff] %v7841_v47 }
 0x4f7   :  { %2643 = vadd.xlane.f32.xlu0 %v2642_v44  ;;  %v4163_v44 = vpop.permute.xlu1 %4162 }
 0x4f8   :  { %v4511_v17 = vmul.f32 %v4163_v44, %v6908_v51  ;;  %v4512_v25 = vmul.f32 %v4163_v44, %v6910_v34 }
 0x4f9   :  { %v5816_v34 = vpop.eup %5815 }
 0x4fa   :  { %v3248_v15 = vmul.f32 %v5816_v34, %v3076_v42  ;;  %vm3254_vm12 = vweird.f32 %v5816_v34  ;;  %v3935_v42 = vld [vmem:[%s10131_s7 + $0x30] sm:$0xff] }
 0x4fb   :  { %v7858_v28 = vpop.f32.mrf.mxu3  ;;  %vm3255_vm14 = vmor %vm3253_vm13, %vm3254_vm12 }
 0x4fc   :  { %v7846_v57 = vpop.xlane.xlu0 %2511  ;;  %10364 = vst [vmem:[#allocation109_spill] sm:$0xff] %v7858_v28  ;;  %v2145_v20 = vsel %vm621_vm1, %v7858_v28, 0.0 }
 0x4ff   :  { %v7860_v27 = vpop.xlane.xlu1 %2119 }
 0x500   :  { %10365 = vst [vmem:[#allocation110_spill] sm:$0xff] %v7860_v27 }
 0x502   :  { %2027 = vadd.xlane.f32.xlu2 %v2026_v37  ;;  %v7866_v37 = vpop.f32.mrf.mxu2 }
 0x503   :  { %10366 = vst [vmem:[#allocation111_spill] sm:$0xff] %v7866_v37  ;;  %v2146_v2 = vadd.f32 %v2145_v20, %v7866_v37  ;;  %v2389_v50 = vmul.f32 %v7866_v37, %v7866_v37  ;;  %v2129_v20 = vsel %vm621_vm1, %v7692_v56, 0.0 }
 0x504   :  { %v7864_v62 = vpop.xlane.xlu0 %2127 }
 0x50a   :  { %2531 = vadd.xlane.f32.xlu2 %v2530_v29  ;;  %v2390_v29 = vmul.f32 %v7858_v28, %v7858_v28 }
 0x50b   :  { %4197 = vperm.xlu0 %5758, %v3867_v16  }
 0x50c   :  { %v2649_v19 = vsel %vm621_vm1, %v2390_v29, 0.0  ;;  %v7885_v51 = vpop.xlane.xlu0 %2631  ;;  %v3249_v29 = vmul.f32 %v5816_v34, %v3248_v15  ;;  %v5740_v15 = vld [vmem:[%s10129_s5 + $0xf8] sm:$0xff] }
 0x50d   :  { %v2650_v44 = vadd.f32 %v2649_v19, %v2389_v50  ;;  %5668 = vmatmul.msk.bf16.gmra.mxu3 %vm1426_vm8, %v5740_v15  ;;  %5632 = vmatmul.msk.bf16.gmra.mxu2 %vm1426_vm8, %v5740_v15 }
 0x512   :  { %v4667_v58 = vpop.permute.xlu1 %4666  ;;  %2147 = vadd.xlane.f32.xlu2 %v2146_v2  ;;  %v2130_v2 = vadd.f32 %v2129_v20, %v7698_v4 }
 0x513   :  { %v5015_v1 = vadd.f32 %v4667_v58, %v4511_v17  ;;  %v5016_v16 = vadd.f32 %v4667_v58, %v4512_v25  ;;  %4701 = vperm.xlu0 %5758, %v4083_v32   ;;  %v3250_v25 = vmul.f32 0.5, %v3249_v29  ;;  %v4079_v29 = vsub.f32 %v3935_v42, %v7335_v48 }
 0x514   :  { %v7880_v13 = vpop.xlane.xlu2 %2015 }
 0x515   :  { %10367 = vst [vmem:[#allocation112_spill] sm:$0xff] %v7880_v13  ;;  %v3251_v58 = vsub.f32 1.5, %v3250_v25 }
 0x516   :  { %5159 = vst [vmem:[%s10132_s8 + $0x30] sm:$0xff] %v5015_v1 }
 0x517   :  { %5160 = vst.msk [vmem:[%s10132_s8 + $0x38] sm:$0xff] %vm621_vm1, %v5016_v16  ;;  %v3252_v37 = vmul.f32 %v5816_v34, %v3251_v58  ;;  %v2718_v58 = vmul.f32 0.0051020407, %v7378_v40 }
 0x51a   :  { %2651 = vadd.xlane.f32.xlu2 %v2650_v44 }
 0x51c   :  { %v7894_v36 = vpop.xlane.xlu2 %2519 }
 0x51d   :  { %10368 = vst [vmem:[#allocation113_spill] sm:$0xff] %v7894_v36  ;;  %2131 = vadd.xlane.f32.xlu1 %v2130_v2 }
 0x51f   :  { %v4183_v17 = vpop.permute.xlu0 %4182 }
 0x520   :  { %v4519_v1 = vmul.f32 %v4183_v17, %v6973_v10  ;;  %v4520_v50 = vmul.f32 %v4183_v17, %v6976_v35  ;;  %v3004_v10 = vld [vmem:[%s10130_s6 + $0x58] sm:$0xff]  ;;  %v3256_v35 = vsel %vm3255_vm14, %v5816_v34, %v3252_v37  ;;  %v7925_v34 = vmul.f32 0.0051020407, %v7351_v9 }
 0x521   :  { %v3868_v20 = vmul.f32 %v3256_v35, %v3004_v10  ;;  %v3940_v17 = vld [vmem:[%s10131_s7 + $0x58] sm:$0xff] }
 0x522   :  { %v2790_v48 = vmul.f32 %v7925_v34, %v7925_v34 }
 0x523   :  { %v4012_v37 = vmul.f32 %v3868_v20, %v7838_v59 }
 0x524   :  { %v7896_v32 = vpop.xlane.xlu2 %2135 }
 0x525   :  { %10369 = vst [vmem:[#allocation114_spill] sm:$0xff] %v7896_v32 }
 0x527   :  { %v4687_v16 = vpop.permute.xlu0 %4686 }
 0x528   :  { %v5023_v19 = vadd.f32 %v4687_v16, %v4519_v1  ;;  %v5024_v28 = vadd.f32 %v4687_v16, %v4520_v50  ;;  %v7933_v1 = vpop.f32.mrf.mxu1  ;;  %v4084_v50 = vsub.f32 %v3940_v17, %v4012_v37  ;;  %v2862_v16 = vsub.f32 %v2718_v58, %v2790_v48 }
 0x529   :  { %10372 = vst [vmem:[#allocation117_spill] sm:$0xff] %v7933_v1  ;;  %v2331_v40 = vmul.f32 %v7933_v1, %v7933_v1 }
 0x52a   :  { %5167 = vst [vmem:[%s10132_s8 + $0x70] sm:$0xff] %v5023_v19  ;;  %v2934_v37 = vmax.f32 %v2862_v16, 0.0 }
 0x52b   :  { %5168 = vst.msk [vmem:[%s10132_s8 + $0x78] sm:$0xff] %vm621_vm1, %v5024_v28  ;;  %v7919_v28 = vpop.f32.mrf.mxu0 }
 0x52c   :  { %v7907_v44 = vpop.xlane.xlu2 %2639  ;;  %10371 = vst [vmem:[#allocation116_spill] sm:$0xff] %v7919_v28  ;;  %v2029_v25 = vsel %vm621_vm1, %v7919_v28, 0.0  ;;  %v2332_v9 = vmul.f32 %v7919_v28, %v7919_v28 }
 0x52d   :  { %10370 = vst [vmem:[#allocation115_spill] sm:$0xff] %v7907_v44  ;;  %v2030_v59 = vadd.f32 %v2029_v25, %v7933_v1  ;;  %v7961_v25 = vpop.f32.mrf.mxu2 }
 0x52e   :  { %v2533_v42 = vsel %vm621_vm1, %v2332_v9, 0.0  ;;  %10374 = vst [vmem:[#allocation119_spill] sm:$0xff] %v7961_v25 }
 0x532   :  { %4202 = vperm.xlu2 %5760, %v3868_v20  }
 0x534   :  { %v4188_v2 = vpop.permute.xlu2 %4187 }
 0x535   :  { %v4521_v19 = vmul.f32 %v4188_v2, %v6993_v30  ;;  %v4522_v10 = vmul.f32 %v4188_v2, %v6996_v61  ;;  %v2534_v30 = vadd.f32 %v2533_v42, %v2331_v40  ;;  %v3078_v61 = vadd.f32 1e-05, %v2934_v37  ;;  %v7956_v2 = vpop.f32.mrf.mxu3 }
 0x536   :  { %4681 = vperm.xlu1 %5759, %v4079_v29   ;;  %v5741_v29 = vld [vmem:[%s10129_s5 + $0x100] sm:$0xff]  ;;  %10373 = vst [vmem:[#allocation118_spill] sm:$0xff] %v7956_v2  ;;  %v2149_v17 = vsel %vm621_vm1, %v7956_v2, 0.0  ;;  %v2381_v42 = vmul.f32 %v7698_v4, %v7698_v4 }
 0x537   :  { %5669 = vmatmul.msk.bf16.gmra.mxu3 %vm1426_vm8, %v5741_v29  ;;  %5633 = vmatmul.msk.bf16.gmra.mxu2 %vm1426_vm8, %v5741_v29  ;;  %5817 = vrsqrt.f32 %v3078_v61  ;;  %v2150_v58 = vadd.f32 %v2149_v17, %v7961_v25  ;;  %vm3273_vm0 = vweird.f32 %v3078_v61 }
 0x53a   :  { %4706 = vperm.xlu2 %5760, %v4084_v50   ;;  %v2392_v50 = vmul.f32 %v7956_v2, %v7956_v2 }
 0x53c   :  { %v4692_v35 = vpop.permute.xlu2 %4691  ;;  %v2653_v9 = vsel %vm621_vm1, %v2392_v50, 0.0 }
 0x53d   :  { %v5025_v20 = vadd.f32 %v4692_v35, %v4521_v19  ;;  %v5026_v15 = vadd.f32 %v4692_v35, %v4522_v10  ;;  %2031 = vadd.xlane.f32.xlu0 %v2030_v59  ;;  %v5818_v48 = vpop.eup %5817  ;;  %v2391_v59 = vmul.f32 %v7961_v25, %v7961_v25  ;;  %v7969_v35 = vpop.f32.mrf.mxu1 }
 0x53e   :  { %v3268_v16 = vmul.f32 %v5818_v48, %v3078_v61  ;;  %10375 = vst [vmem:[#allocation120_spill] sm:$0xff] %v7969_v35  ;;  %vm3274_vm15 = vweird.f32 %v5818_v48 }
 0x53f   :  { %5169 = vst [vmem:[%s10132_s8 + $0x80] sm:$0xff] %v5025_v20  ;;  %v2654_v19 = vadd.f32 %v2653_v9, %v2391_v59  ;;  %v2382_v20 = vmul.f32 %v7692_v56, %v7692_v56  ;;  %v7985_v59 = vpop.f32.mrf.mxu3  ;;  %v2037_v9 = vsel %vm621_vm1, %v6890_v8, 0.0  ;;  %vm3275_vm2 = vmor %vm3273_vm0, %vm3274_vm15 }
 0x540   :  { %5170 = vst.msk [vmem:[%s10132_s8 + $0x88] sm:$0xff] %vm621_vm1, %v5026_v15  ;;  %v3269_v10 = vmul.f32 %v5818_v48, %v3268_v16 }
 0x541   :  { %v2633_v29 = vsel %vm621_vm1, %v2382_v20, 0.0  ;;  %10377 = vst [vmem:[#allocation122_spill] sm:$0xff] %v7985_v59  ;;  %v7993_v20 = vpop.f32.mrf.mxu2 }
 0x542   :  { %v3270_v15 = vmul.f32 0.5, %v3269_v10  ;;  %10378 = vst [vmem:[#allocation123_spill] sm:$0xff] %v7993_v20 }
 0x544   :  { %v3271_v37 = vsub.f32 1.5, %v3270_v15  ;;  %v2021_v15 = vsel %vm621_vm1, %v7821_v55, 0.0 }
 0x545   :  { %2535 = vadd.xlane.f32.xlu0 %v2534_v30  ;;  %v7979_v30 = vmul.f32 0.0051020407, %v7385_v49  ;;  %v7981_v17 = vpop.f32.mrf.mxu1  ;;  %v2719_v49 = vmul.f32 0.0051020407, %v7402_v12  ;;  %v2022_v61 = vadd.f32 %v2021_v15, %v7826_v60 }
 0x546   :  { %10376 = vst [vmem:[#allocation121_spill] sm:$0xff] %v7981_v17  ;;  %v3272_v16 = vmul.f32 %v5818_v48, %v3271_v37  ;;  %v2038_v10 = vadd.f32 %v2037_v9, %v7981_v17  ;;  %v2328_v9 = vmul.f32 %v7821_v55, %v7821_v55 }
 0x547   :  { %v8010_v52 = vpop.f32.mrf.mxu3 }
 0x548   :  { %v3276_v37 = vsel %vm3275_vm2, %v5818_v48, %v3272_v16  ;;  %10379 = vst [vmem:[#allocation124_spill] sm:$0xff] %v8010_v52  ;;  %v2327_v48 = vmul.f32 %v7826_v60, %v7826_v60  ;;  %v2525_v16 = vsel %vm621_vm1, %v2328_v9, 0.0 }
 0x549   :  { %v8018_v15 = vpop.f32.mrf.mxu2 }
 0x54a   :  { %10380 = vst [vmem:[#allocation125_spill] sm:$0xff] %v8018_v15 }
 0x54d   :  { %2151 = vadd.xlane.f32.xlu0 %v2150_v58  ;;  %v2634_v58 = vadd.f32 %v2633_v29, %v2381_v42  ;;  %v2336_v42 = vmul.f32 %v6890_v8, %v6890_v8  ;;  %v3006_v29 = vld [vmem:[%s10130_s6 + $0x68] sm:$0xff] }
 0x54e   :  { %v3870_v56 = vmul.f32 %v3276_v37, %v3006_v29  ;;  %v8024_v37 = vmul.f32 0.0051020407, %v7414_v41 }
 0x552   :  { %v7971_v40 = vpop.xlane.xlu0 %2019 }
 0x555   :  { %2655 = vadd.xlane.f32.xlu0 %v2654_v19  ;;  %v2791_v19 = vmul.f32 %v7979_v30, %v7979_v30 }
 0x557   :  { %v2863_v12 = vsub.f32 %v2719_v49, %v2791_v19  ;;  %v4014_v19 = vmul.f32 %v3870_v56, %v7925_v34  ;;  %v2157_v49 = vsel %vm621_vm1, %v8010_v52, 0.0  ;;  %v2821_v34 = vmul.f32 %v8024_v37, %v8024_v37 }
 0x559   :  { %v2935_v4 = vmax.f32 %v2863_v12, 0.0 }
 0x55a   :  { %v7983_v50 = vpop.xlane.xlu0 %2523 }
 0x55b   :  { %v3079_v29 = vadd.f32 1e-05, %v2935_v4  ;;  %v2395_v4 = vmul.f32 %v8018_v15, %v8018_v15 }
 0x55d   :  { %5819 = vrsqrt.f32 %v3079_v29  ;;  %vm3283_vm4 = vweird.f32 %v3079_v29 }
 0x560   :  { %2635 = vadd.xlane.f32.xlu1 %v2634_v58  ;;  %v2335_v58 = vmul.f32 %v7981_v17, %v7981_v17 }
 0x562   :  { %v8008_v27 = vpop.xlane.xlu0 %2139 }
 0x563   :  { %2039 = vadd.xlane.f32.xlu2 %v2038_v10  ;;  %v2541_v10 = vsel %vm621_vm1, %v2336_v42, 0.0  ;;  %v3942_v42 = vld [vmem:[%s10131_s7 + $0x68] sm:$0xff] }
 0x564   :  { %v2542_v8 = vadd.f32 %v2541_v10, %v2335_v58  ;;  %v2526_v58 = vadd.f32 %v2525_v16, %v2327_v48  ;;  %v4086_v12 = vsub.f32 %v3942_v42, %v4014_v19  ;;  %v5820_v16 = vpop.eup %5819 }
 0x565   :  { %v3278_v42 = vmul.f32 %v5820_v16, %v3079_v29  ;;  %vm3284_vm3 = vweird.f32 %v5820_v16 }
 0x566   :  { %vm3285_vm5 = vmor %vm3283_vm4, %vm3284_vm3 }
 0x568   :  { %2023 = vadd.xlane.f32.xlu1 %v2022_v61  ;;  %v2749_v61 = vmul.f32 0.0051020407, %v7430_v3  ;;  %v8042_v3 = vpop.xlane.xlu1 %2623 }
 0x569   :  { %4212 = vperm.xlu0 %5758, %v3870_v56   ;;  %v2396_v56 = vmul.f32 %v8010_v52, %v8010_v52  ;;  %10382 = vst [vmem:[#allocation127_spill] sm:$0xff] %v8042_v3 }
 0x56a   :  { %v8034_v41 = vpop.xlane.xlu0 %2643  ;;  %v2893_v10 = vsub.f32 %v2749_v61, %v2821_v34 }
 0x56b   :  { %2543 = vadd.xlane.f32.xlu2 %v2542_v8  ;;  %v2158_v8 = vadd.f32 %v2157_v49, %v8018_v15  ;;  %v2661_v9 = vsel %vm621_vm1, %v2396_v56, 0.0  ;;  %v3279_v56 = vmul.f32 %v5820_v16, %v3278_v42 }
 0x56c   :  { %v2662_v19 = vadd.f32 %v2661_v9, %v2395_v4  ;;  %v2965_v49 = vmax.f32 %v2893_v10, 0.0  ;;  %v10385_v9 = vld [vmem:[#allocation16_spill] sm:$0xff] }
 0x56d   :  { %v3280_v4 = vmul.f32 0.5, %v3279_v56 }
 0x570   :  { %2527 = vadd.xlane.f32.xlu1 %v2526_v58  ;;  %v8040_v58 = vmul.f32 0.0051020407, %v7396_v6  ;;  %v10386_v6 = vld [vmem:[#allocation17_spill] sm:$0xff] }
 0x571   :  { %4716 = vperm.xlu0 %5758, %v4086_v12   ;;  %v10383_v12 = vld [vmem:[#allocation60_spill] sm:$0xff] }
 0x572   :  { %v2748_v55 = vmul.f32 0.0051020407, %v10383_v12  ;;  %v2820_v34 = vmul.f32 %v8040_v58, %v8040_v58  ;;  %v3281_v12 = vsub.f32 1.5, %v3280_v4 }
 0x573   :  { %2159 = vadd.xlane.f32.xlu2 %v2158_v8  ;;  %v3109_v8 = vadd.f32 1e-05, %v2965_v49  ;;  %v8053_v49 = vpop.xlane.xlu1 %2011 }
 0x574   :  { %v2892_v61 = vsub.f32 %v2748_v55, %v2820_v34  ;;  %10388 = vst [vmem:[#allocation17_spill] sm:$0xff] %v8053_v49  ;;  %v3282_v34 = vmul.f32 %v5820_v16, %v3281_v12  ;;  %v8071_v12 = vpop.f32.mrf.mxu1  ;;  %v10393_v49 = vld [vmem:[#allocation4_spill] sm:$0xff] }
 0x575   :  { %v8037_v48 = vpop.xlane.xlu2 %2027  ;;  %5821 = vrsqrt.f32 %v3109_v8  ;;  %10392 = vst [vmem:[#allocation129_spill] sm:$0xff] %v8071_v12  ;;  %vm3583_vm7 = vweird.f32 %v3109_v8 }
 0x576   :  { %10381 = vst [vmem:[#allocation126_spill] sm:$0xff] %v8037_v48 }
 0x57b   :  { %2663 = vadd.xlane.f32.xlu2 %v2662_v19  ;;  %v2964_v19 = vmax.f32 %v2892_v61, 0.0  ;;  %v5822_v42 = vpop.eup %5821  ;;  %v3286_v61 = vsel %vm3285_vm5, %v5820_v16, %v3282_v34  ;;  %v8068_v4 = vpop.xlane.xlu1 %2515  ;;  %v2041_v16 = vsel %vm621_vm1, %v10393_v49, 0.0 }
 0x57c   :  { %v3578_v56 = vmul.f32 %v5822_v42, %v3109_v8  ;;  %10391 = vst [vmem:[#allocation128_spill] sm:$0xff] %v8068_v4  ;;  %vm3584_vm6 = vweird.f32 %v5822_v42 }
 0x57d   :  { %v4198_v60 = vpop.permute.xlu0 %4197  ;;  %v8045_v52 = vpop.xlane.xlu2 %2531  ;;  %v3108_v55 = vadd.f32 1e-05, %v2964_v19  ;;  %vm3585_vm9 = vmor %vm3583_vm7, %vm3584_vm6 }
 0x57e   :  { %10384 = vst [vmem:[#allocation60_spill] sm:$0xff] %v8045_v52  ;;  %v4525_v10 = vmul.f32 %v4198_v60, %v10385_v9  ;;  %v4526_v15 = vmul.f32 %v4198_v60, %v10386_v6  ;;  %v10389_v60 = vld [vmem:[#allocation52_spill] sm:$0xff] }
 0x57f   :  { %5823 = vrsqrt.f32 %v3108_v55  ;;  %vm3573_vm11 = vweird.f32 %v3108_v55 }
 0x583   :  { %v4178_v34 = vpop.permute.xlu1 %4177 }
 0x585   :  { %v4702_v17 = vpop.permute.xlu0 %4701  ;;  %v8051_v3 = vpop.xlane.xlu2 %2147 }
 0x586   :  { %10387 = vst [vmem:[#allocation16_spill] sm:$0xff] %v8051_v3  ;;  %v5029_v48 = vadd.f32 %v4702_v17, %v4525_v10  ;;  %v5030_v52 = vadd.f32 %v4702_v17, %v4526_v15  ;;  %v3579_v15 = vmul.f32 %v5822_v42, %v3578_v56  ;;  %v5824_v10 = vpop.eup %5823  ;;  %v3943_v56 = vld [vmem:[%s10131_s7 + $0x70] sm:$0xff] }
 0x587   :  { %v3568_v29 = vmul.f32 %v5824_v10, %v3108_v55  ;;  %vm3574_vm10 = vweird.f32 %v5824_v10 }
 0x588   :  { %5173 = vst [vmem:[%s10132_s8 + $0xa0] sm:$0xff] %v5029_v48  ;;  %v3007_v48 = vld [vmem:[%s10130_s6 + $0x70] sm:$0xff]  ;;  %vm3575_vm12 = vmor %vm3573_vm11, %vm3574_vm10 }
 0x589   :  { %5174 = vst.msk [vmem:[%s10132_s8 + $0xa8] sm:$0xff] %vm621_vm1, %v5030_v52  ;;  %4192 = vperm.xlu1 %5759, %v10389_v60   ;;  %v3871_v9 = vmul.f32 %v3286_v61, %v3007_v48  ;;  %v3580_v52 = vmul.f32 0.5, %v3579_v15  ;;  %v2042_v48 = vadd.f32 %v2041_v16, %v8071_v12  ;;  %v3569_v61 = vmul.f32 %v5824_v10, %v3568_v29  ;;  %v3037_v16 = vld [vmem:[%s10130_s6 + $0x160] sm:$0xff] }
 0x58b   :  { %v4015_v19 = vmul.f32 %v3871_v9, %v7979_v30  ;;  %v3581_v60 = vsub.f32 1.5, %v3580_v52  ;;  %v10394_v30 = vld [vmem:[#allocation19_spill] sm:$0xff]  ;;  %v10395_v52 = vld [vmem:[#allocation20_spill] sm:$0xff]  ;;  %v3570_v44 = vmul.f32 0.5, %v3569_v61 }
 0x58d   :  { %v8063_v17 = vpop.xlane.xlu2 %2651  ;;  %v4087_v15 = vsub.f32 %v3943_v56, %v4015_v19  ;;  %v3582_v4 = vmul.f32 %v5822_v42, %v3581_v60  ;;  %v10398_v60 = vld [vmem:[#allocation9_spill] sm:$0xff] }
 0x58e   :  { %10390 = vst [vmem:[#allocation52_spill] sm:$0xff] %v8063_v17  ;;  %v4518_v56 = vmul.f32 %v4178_v34, %v10398_v60 }
 0x58f   :  { %v3586_v19 = vsel %vm3585_vm9, %v5822_v42, %v3582_v4  ;;  %v3973_v42 = vld [vmem:[%s10131_s7 + $0x160] sm:$0xff]  ;;  %v10397_v4 = vld [vmem:[#allocation8_spill] sm:$0xff] }
 0x590   :  { %v8087_v29 = vpop.xlane.xlu1 %2131  ;;  %v3901_v8 = vmul.f32 %v3586_v19, %v3037_v16  ;;  %v8124_v16 = vpop.f32.mrf.mxu1 }
 0x591   :  { %10396 = vst [vmem:[#allocation19_spill] sm:$0xff] %v8087_v29  ;;  %v8126_v19 = vpop.f32.mrf.mxu3 }
 0x592   :  { %10399 = vst [vmem:[#allocation20_spill] sm:$0xff] %v8126_v19 }
 0x593   :  { %4217 = vperm.xlu2 %5760, %v3871_v9  }
 0x595   :  { %v4203_v6 = vpop.permute.xlu2 %4202 }
 0x596   :  { %v4527_v9 = vmul.f32 %v4203_v6, %v10394_v30  ;;  %v4528_v17 = vmul.f32 %v4203_v6, %v10395_v52  ;;  %v3571_v6 = vsub.f32 1.5, %v3570_v44  ;;  %v3036_v44 = vld [vmem:[%s10130_s6 + $0x158] sm:$0xff]  ;;  %v5742_v30 = vld [vmem:[%s10129_s5 + $0x108] sm:$0xff] }
 0x597   :  { %5670 = vmatmul.msk.bf16.gmra.mxu3 %vm1426_vm8, %v5742_v30  ;;  %5634 = vmatmul.msk.bf16.gmra.mxu2 %vm1426_vm8, %v5742_v30  ;;  %v2337_v30 = vmul.f32 %v8071_v12, %v8071_v12 }
 0x59b   :  { %2043 = vadd.xlane.f32.xlu0 %v2042_v48  ;;  %4721 = vperm.xlu2 %5760, %v4087_v15  }
 0x59d   :  { %v4707_v3 = vpop.permute.xlu2 %4706 }
 0x59e   :  { %v5031_v32 = vadd.f32 %v4707_v3, %v4527_v9  ;;  %v5032_v36 = vadd.f32 %v4707_v3, %v4528_v17  ;;  %v4045_v3 = vmul.f32 %v3901_v8, %v8024_v37  ;;  %v3572_v17 = vmul.f32 %v5824_v10, %v3571_v6  ;;  %v3938_v6 = vld [vmem:[%s10131_s7 + $0x48] sm:$0xff] }
 0x5a0   :  { %5175 = vst [vmem:[%s10132_s8 + $0xb0] sm:$0xff] %v5031_v32  ;;  %v4517_v32 = vmul.f32 %v4178_v34, %v10397_v4  ;;  %v4117_v61 = vsub.f32 %v3973_v42, %v4045_v3  ;;  %v3576_v37 = vsel %vm3575_vm12, %v5824_v10, %v3572_v17  ;;  %v2141_v34 = vsel %vm621_vm1, %v7841_v47, 0.0  ;;  %v8133_v3 = vpop.f32.mrf.mxu2  ;;  %v10401_v42 = vld [vmem:[#allocation54_spill] sm:$0xff]  ;;  %v8136_v4 = vpop.f32.mrf.mxu1 }
 0x5a1   :  { %5176 = vst.msk [vmem:[%s10132_s8 + $0xb8] sm:$0xff] %vm621_vm1, %v5032_v36  ;;  %v8109_v55 = vmul.f32 %v3576_v37, %v3036_v44  ;;  %v2142_v10 = vadd.f32 %v2141_v34, %v7848_v11  ;;  %v4082_v17 = vsub.f32 %v3938_v6, %v10401_v42  ;;  %v2338_v37 = vmul.f32 %v10393_v49, %v10393_v49 }
 0x5a2   :  { %10400 = vst [vmem:[#allocation8_spill] sm:$0xff] %v8133_v3 }
 0x5a3   :  { %4367 = vperm.xlu2 %5760, %v3901_v8   ;;  %10402 = vst [vmem:[#allocation9_spill] sm:$0xff] %v8136_v4 }
 0x5a8   :  { %v4682_v48 = vpop.permute.xlu1 %4681  ;;  %v8155_v6 = vpop.f32.mrf.mxu2 }
 0x5a9   :  { %v5021_v15 = vadd.f32 %v4682_v48, %v4517_v32  ;;  %v5022_v36 = vadd.f32 %v4682_v48, %v4518_v56  ;;  %v10403_v32 = vld [vmem:[#allocation66_spill] sm:$0xff]  ;;  %v8141_v56 = vpop.f32.mrf.mxu3 }
 0x5aa   :  { %v8139_v60 = vmul.f32 0.0051020407, %v10403_v32  ;;  %v10404_v48 = vld [vmem:[#allocation6_spill] sm:$0xff]  ;;  %v2341_v32 = vmul.f32 %v8136_v4, %v8136_v4 }
 0x5ab   :  { %5165 = vst [vmem:[%s10132_s8 + $0x60] sm:$0xff] %v5021_v15  ;;  %4871 = vperm.xlu2 %5760, %v4117_v61   ;;  %v2049_v15 = vsel %vm621_vm1, %v10404_v48, 0.0  ;;  %v2342_v42 = vmul.f32 %v10404_v48, %v10404_v48  ;;  %v10409_v48 = vld [vmem:[#allocation72_spill] sm:$0xff] }
 0x5ac   :  { %5166 = vst.msk [vmem:[%s10132_s8 + $0x68] sm:$0xff] %vm621_vm1, %v5022_v36  ;;  %v10405_v36 = vld [vmem:[#allocation70_spill] sm:$0xff]  ;;  %v2050_v34 = vadd.f32 %v2049_v15, %v8136_v4  ;;  %v2545_v15 = vsel %vm621_vm1, %v2338_v37, 0.0  ;;  %v8172_v4 = vmul.f32 0.0051020407, %v10409_v48 }
 0x5ad   :  { %v2722_v61 = vmul.f32 0.0051020407, %v10405_v36  ;;  %v2546_v29 = vadd.f32 %v2545_v15, %v2337_v30  ;;  %v2553_v21 = vsel %vm621_vm1, %v2342_v42, 0.0  ;;  %v10412_v42 = vld [vmem:[#allocation24_spill] sm:$0xff] }
 0x5ae   :  { %v2554_v49 = vadd.f32 %v2553_v21, %v2341_v32  ;;  %v10413_v32 = vld [vmem:[#allocation25_spill] sm:$0xff] }
 0x5af   :  { %4362 = vperm.xlu0 %5758, %v8109_v55  }
 0x5b0   :  { %v8120_v9 = vpop.xlane.xlu0 %2031 }
 0x5b3   :  { %2143 = vadd.xlane.f32.xlu1 %v2142_v10  ;;  %v2794_v10 = vmul.f32 %v8139_v60, %v8139_v60 }
 0x5b8   :  { %v8122_v52 = vpop.xlane.xlu0 %2535 }
 0x5ba   :  { %v8165_v12 = vpop.f32.mrf.mxu3 }
 0x5bb   :  { %10407 = vst [vmem:[#allocation66_spill] sm:$0xff] %v8165_v12  ;;  %v2402_v21 = vmul.f32 %v8165_v12, %v8165_v12 }
 0x5c0   :  { %v8128_v8 = vpop.xlane.xlu0 %2151 }
 0x5c8   :  { %v8146_v44 = vpop.xlane.xlu0 %2655 }
 0x5cc   :  { %4696 = vperm.xlu1 %5759, %v4082_v17   ;;  %v2866_v17 = vsub.f32 %v2722_v61, %v2794_v10  ;;  %v2169_v61 = vsel %vm621_vm1, %v8165_v12, 0.0  ;;  %v8169_v10 = vpop.f32.mrf.mxu2 }
 0x5cd   :  { %10408 = vst [vmem:[#allocation70_spill] sm:$0xff] %v8169_v10  ;;  %v2401_v48 = vmul.f32 %v8169_v10, %v8169_v10 }
 0x5ce   :  { %v2938_v13 = vmax.f32 %v2866_v17, 0.0 }
 0x5d0   :  { %v3082_v2 = vadd.f32 1e-05, %v2938_v13  ;;  %v10411_v13 = vld [vmem:[#allocation75_spill] sm:$0xff] }
 0x5d1   :  { %v2752_v30 = vmul.f32 0.0051020407, %v10411_v13 }
 0x5d2   :  { %5825 = vrsqrt.f32 %v3082_v2  ;;  %vm3313_vm14 = vweird.f32 %v3082_v2 }
 0x5d4   :  { %2051 = vadd.xlane.f32.xlu2 %v2050_v34 }
 0x5d6   :  { %v8161_v36 = vpop.xlane.xlu2 %2039 }
 0x5d7   :  { %10406 = vst [vmem:[#allocation54_spill] sm:$0xff] %v8161_v36 }
 0x5d8   :  { %v5826_v13 = vpop.eup %5825 }
 0x5d9   :  { %2547 = vadd.xlane.f32.xlu0 %v2546_v29  ;;  %v2170_v29 = vadd.f32 %v2169_v61, %v8169_v10  ;;  %v2673_v61 = vsel %vm621_vm1, %v2402_v21, 0.0  ;;  %vm3314_vm13 = vweird.f32 %v5826_v13 }
 0x5da   :  { %vm3315_vm15 = vmor %vm3313_vm14, %vm3314_vm13 }
 0x5db   :  { %v4213_v34 = vpop.permute.xlu0 %4212 }
 0x5dc   :  { %2555 = vadd.xlane.f32.xlu2 %v2554_v49  ;;  %v2824_v49 = vmul.f32 %v8172_v4, %v8172_v4  ;;  %v4531_v17 = vmul.f32 %v4213_v34, %v10412_v42  ;;  %v4532_v15 = vmul.f32 %v4213_v34, %v10413_v32  ;;  %v4044_v34 = vmul.f32 %v8109_v55, %v8040_v58 }
 0x5dd   :  { %v2387_v58 = vmul.f32 %v7848_v11, %v7848_v11 }
 0x5de   :  { %v8174_v37 = vpop.xlane.xlu2 %2543  ;;  %v2896_v39 = vsub.f32 %v2752_v30, %v2824_v49  ;;  %v3308_v49 = vmul.f32 %v5826_v13, %v3082_v2  ;;  %v2333_v2 = vmul.f32 %v7969_v35, %v7969_v35 }
 0x5df   :  { %10410 = vst [vmem:[#allocation72_spill] sm:$0xff] %v8174_v37 }
 0x5e0   :  { %v2968_v21 = vmax.f32 %v2896_v39, 0.0 }
 0x5e2   :  { %v3112_v42 = vadd.f32 1e-05, %v2968_v21 }
 0x5e3   :  { %v4717_v36 = vpop.permute.xlu0 %4716 }
 0x5e4   :  { %v5035_v37 = vadd.f32 %v4717_v36, %v4531_v17  ;;  %v5036_v25 = vadd.f32 %v4717_v36, %v4532_v15  ;;  %2171 = vadd.xlane.f32.xlu2 %v2170_v29  ;;  %v3972_v36 = vld [vmem:[%s10131_s7 + $0x158] sm:$0xff]  ;;  %v2674_v29 = vadd.f32 %v2673_v61, %v2401_v48  ;;  %5827 = vrsqrt.f32 %v3112_v42 }
 0x5e5   :  { %v4116_v30 = vsub.f32 %v3972_v36, %v4044_v34  ;;  %v10416_v34 = vld [vmem:[#allocation2_spill] sm:$0xff]  ;;  %vm3613_vm0 = vweird.f32 %v3112_v42 }
 0x5e6   :  { %5179 = vst [vmem:[%s10132_s8 + $0xd0] sm:$0xff] %v5035_v37  ;;  %v8190_v12 = vpop.xlane.xlu2 %2159  ;;  %v2388_v37 = vmul.f32 %v7841_v47, %v7841_v47  ;;  %v2033_v36 = vsel %vm621_vm1, %v10416_v34, 0.0 }
 0x5e7   :  { %10414 = vst [vmem:[#allocation75_spill] sm:$0xff] %v8190_v12 }
 0x5e8   :  { %5180 = vst.msk [vmem:[%s10132_s8 + $0xd8] sm:$0xff] %vm621_vm1, %v5036_v25  ;;  %v3309_v25 = vmul.f32 %v5826_v13, %v3308_v49  ;;  %v2645_v55 = vsel %vm621_vm1, %v2388_v37, 0.0  ;;  %v2034_v49 = vadd.f32 %v2033_v36, %v7969_v35  ;;  %v10418_v37 = vld [vmem:[#allocation28_spill] sm:$0xff] }
 0x5e9   :  { %v2646_v15 = vadd.f32 %v2645_v55, %v2387_v58  ;;  %v2334_v55 = vmul.f32 %v10416_v34, %v10416_v34 }
 0x5ea   :  { %v3310_v32 = vmul.f32 0.5, %v3309_v25  ;;  %v5828_v61 = vpop.eup %5827  ;;  %v10419_v25 = vld [vmem:[#allocation29_spill] sm:$0xff] }
 0x5eb   :  { %vm3614_vm2 = vweird.f32 %v5828_v61 }
 0x5ec   :  { %2675 = vadd.xlane.f32.xlu2 %v2674_v29  ;;  %v3311_v48 = vsub.f32 1.5, %v3310_v32  ;;  %v3608_v29 = vmul.f32 %v5828_v61, %v3112_v42  ;;  %vm3615_vm3 = vmor %vm3613_vm0, %vm3614_vm2  ;;  %v2161_v42 = vsel %vm621_vm1, %v8126_v19, 0.0 }
 0x5ed   :  { %4866 = vperm.xlu0 %5758, %v4116_v30   ;;  %v10417_v30 = vld [vmem:[#allocation61_spill] sm:$0xff] }
 0x5ee   :  { %v8203_v17 = vpop.xlane.xlu2 %2663  ;;  %v3312_v21 = vmul.f32 %v5826_v13, %v3311_v48  ;;  %v8212_v47 = vmul.f32 0.0051020407, %v10417_v30  ;;  %v3010_v48 = vld [vmem:[%s10130_s6 + $0x88] sm:$0xff]  ;;  %v10420_v30 = vld [vmem:[#allocation64_spill] sm:$0xff] }
 0x5ef   :  { %10415 = vst [vmem:[#allocation24_spill] sm:$0xff] %v8203_v17 }
 0x5f0   :  { %v3316_v36 = vsel %vm3315_vm15, %v5826_v13, %v3312_v21  ;;  %v5743_v13 = vld [vmem:[%s10129_s5 + $0x110] sm:$0xff]  ;;  %v2537_v21 = vsel %vm621_vm1, %v2334_v55, 0.0 }
 0x5f1   :  { %5671 = vmatmul.msk.bf16.gmra.mxu3 %vm1426_vm8, %v5743_v13  ;;  %5635 = vmatmul.msk.bf16.gmra.mxu2 %vm1426_vm8, %v5743_v13 }
 0x5f6   :  { %2647 = vadd.xlane.f32.xlu1 %v2646_v15  ;;  %v4218_v39 = vpop.permute.xlu2 %4217  ;;  %v3609_v15 = vmul.f32 %v5828_v61, %v3608_v29 }
 0x5f7   :  { %v4533_v11 = vmul.f32 %v4218_v39, %v10418_v37  ;;  %v4534_v58 = vmul.f32 %v4218_v39, %v10419_v25  ;;  %v2793_v39 = vmul.f32 %v8212_v47, %v8212_v47  ;;  %v2721_v37 = vmul.f32 0.0051020407, %v10420_v30  ;;  %v10422_v30 = vld [vmem:[#allocation33_spill] sm:$0xff] }
 0x5f8   :  { %v3610_v29 = vmul.f32 0.5, %v3609_v15 }
 0x5f9   :  { %v2865_v25 = vsub.f32 %v2721_v37, %v2793_v39 }
 0x5fe   :  { %2035 = vadd.xlane.f32.xlu1 %v2034_v49  ;;  %v4722_v32 = vpop.permute.xlu2 %4721  ;;  %v2538_v49 = vadd.f32 %v2537_v21, %v2333_v2  ;;  %v10421_v2 = vld [vmem:[#allocation35_spill] sm:$0xff] }
 0x5ff   :  { %v5037_v10 = vadd.f32 %v4722_v32, %v4533_v11  ;;  %v5038_v17 = vadd.f32 %v4722_v32, %v4534_v58  ;;  %v3874_v11 = vmul.f32 %v3316_v36, %v3010_v48  ;;  %v3946_v32 = vld [vmem:[%s10131_s7 + $0x88] sm:$0xff]  ;;  %v2937_v48 = vmax.f32 %v2865_v25, 0.0 }
 0x601   :  { %5181 = vst [vmem:[%s10132_s8 + $0xe0] sm:$0xff] %v5037_v10  ;;  %v4018_v58 = vmul.f32 %v3874_v11, %v8139_v60  ;;  %v3081_v36 = vadd.f32 1e-05, %v2937_v48  ;;  %v3976_v48 = vld [vmem:[%s10131_s7 + $0x178] sm:$0xff] }
 0x602   :  { %5182 = vst.msk [vmem:[%s10132_s8 + $0xe8] sm:$0xff] %vm621_vm1, %v5038_v17  ;;  %v3611_v17 = vsub.f32 1.5, %v3610_v29 }
 0x603   :  { %v4090_v55 = vsub.f32 %v3946_v32, %v4018_v58  ;;  %5829 = vrsqrt.f32 %v3081_v36  ;;  %v2397_v32 = vmul.f32 %v8133_v3, %v8133_v3  ;;  %vm3303_vm5 = vweird.f32 %v3081_v36 }
 0x604   :  { %4232 = vperm.xlu2 %5760, %v3874_v11   ;;  %v3612_v15 = vmul.f32 %v5828_v61, %v3611_v17  ;;  %v3040_v11 = vld [vmem:[%s10130_s6 + $0x178] sm:$0xff] }
 0x606   :  { %2539 = vadd.xlane.f32.xlu1 %v2538_v49  ;;  %v4368_v10 = vpop.permute.xlu2 %4367  ;;  %v3616_v29 = vsel %vm3615_vm3, %v5828_v61, %v3612_v15  ;;  %v8253_v49 = vpop.xlane.xlu1 %2635  ;;  %v2398_v61 = vmul.f32 %v8126_v19, %v8126_v19 }
 0x607   :  { %v4593_v39 = vmul.f32 %v4368_v10, %v10421_v2  ;;  %v4594_v37 = vmul.f32 %v4368_v10, %v10422_v30  ;;  %10423 = vst [vmem:[#allocation25_spill] sm:$0xff] %v8253_v49  ;;  %v3904_v25 = vmul.f32 %v3616_v29, %v3040_v11  ;;  %v2162_v10 = vadd.f32 %v2161_v42, %v8133_v3  ;;  %v8279_v42 = vpop.f32.mrf.mxu1 }
 0x609   :  { %v4048_v58 = vmul.f32 %v3904_v25, %v8172_v4  ;;  %v5830_v17 = vpop.eup %5829  ;;  %v10425_v4 = vld [vmem:[#allocation62_spill] sm:$0xff] }
 0x60a   :  { %v3298_v15 = vmul.f32 %v5830_v17, %v3081_v36  ;;  %vm3304_vm4 = vweird.f32 %v5830_v17  ;;  %v3945_v36 = vld [vmem:[%s10131_s7 + $0x80] sm:$0xff] }
 0x60b   :  { %v4120_v2 = vsub.f32 %v3976_v48, %v4048_v58  ;;  %vm3305_vm6 = vmor %vm3303_vm5, %vm3304_vm4 }
 0x60c   :  { %4736 = vperm.xlu2 %5760, %v4090_v55   ;;  %v2665_v55 = vsel %vm621_vm1, %v2398_v61, 0.0 }
 0x60e   :  { %v4872_v13 = vpop.permute.xlu2 %4871  ;;  %v8269_v30 = vpop.xlane.xlu1 %2023 }
 0x60f   :  { %v5097_v21 = vadd.f32 %v4872_v13, %v4593_v39  ;;  %v5098_v60 = vadd.f32 %v4872_v13, %v4594_v37  ;;  %v2666_v39 = vadd.f32 %v2665_v55, %v2397_v32  ;;  %10424 = vst [vmem:[#allocation61_spill] sm:$0xff] %v8269_v30  ;;  %v3299_v37 = vmul.f32 %v5830_v17, %v3298_v15  ;;  %v8285_v48 = vpop.f32.mrf.mxu1  ;;  %v8292_v15 = vpop.f32.mrf.mxu3 }
 0x610   :  { %10427 = vst [vmem:[#allocation29_spill] sm:$0xff] %v8285_v48  ;;  %v8333_v35 = vpop.xlane.xlu0 %2043  ;;  %v10443_v48 = vld [vmem:[#allocation63_spill] sm:$0xff] }
 0x611   :  { %5241 = vst [vmem:[%s10132_s8 + $0x2c0] sm:$0xff] %v5097_v21  ;;  %v3300_v13 = vmul.f32 0.5, %v3299_v37  ;;  %v5744_v21 = vld [vmem:[%s10129_s5 + $0x118] sm:$0xff] }
 0x612   :  { %5242 = vst.msk [vmem:[%s10132_s8 + $0x2c8] sm:$0xff] %vm621_vm1, %v5098_v60  ;;  %5672 = vmatmul.msk.bf16.gmra.mxu3 %vm1426_vm8, %v5744_v21  ;;  %5636 = vmatmul.msk.bf16.gmra.mxu2 %vm1426_vm8, %v5744_v21  ;;  %v10429_v37 = vld [vmem:[#allocation13_spill] sm:$0xff] }
 0x613   :  { %v3301_v60 = vsub.f32 1.5, %v3300_v13 }
 0x614   :  { %4382 = vperm.xlu2 %5760, %v3904_v25  }
 0x615   :  { %v3302_v29 = vmul.f32 %v5830_v17, %v3301_v60 }
 0x616   :  { %v8277_v11 = vpop.xlane.xlu1 %2527 }
 0x617   :  { %2163 = vadd.xlane.f32.xlu0 %v2162_v10  ;;  %10426 = vst [vmem:[#allocation28_spill] sm:$0xff] %v8277_v11  ;;  %v3009_v10 = vld [vmem:[%s10130_s6 + $0x80] sm:$0xff]  ;;  %v3306_v61 = vsel %vm3305_vm6, %v5830_v17, %v3302_v29 }
 0x618   :  { %v3873_v58 = vmul.f32 %v3306_v61, %v3009_v10  ;;  %v8301_v10 = vpop.f32.mrf.mxu1 }
 0x619   :  { %10431 = vst [vmem:[#allocation35_spill] sm:$0xff] %v8301_v10 }
 0x61a   :  { %v4017_v32 = vmul.f32 %v3873_v58, %v8212_v47  ;;  %v8299_v47 = vmul.f32 0.0051020407, %v7602_v24  ;;  %v8306_v61 = vpop.f32.mrf.mxu3  ;;  %v2153_v24 = vsel %vm621_vm1, %v7985_v59, 0.0 }
 0x61b   :  { %10432 = vst [vmem:[#allocation33_spill] sm:$0xff] %v8306_v61 }
 0x61c   :  { %4886 = vperm.xlu2 %5760, %v4120_v2   ;;  %v4089_v2 = vsub.f32 %v3945_v36, %v4017_v32  ;;  %v10434_v36 = vld [vmem:[#allocation11_spill] sm:$0xff] }
 0x61e   :  { %v4193_v25 = vpop.permute.xlu1 %4192 }
 0x61f   :  { %2667 = vadd.xlane.f32.xlu0 %v2666_v39  ;;  %4207 = vperm.xlu1 %5759, %v10425_v4   ;;  %v8294_v39 = vpop.f32.mrf.mxu2  ;;  %v4523_v17 = vmul.f32 %v4193_v25, %v10429_v37  ;;  %v10430_v4 = vld [vmem:[#allocation14_spill] sm:$0xff]  ;;  %v2797_v37 = vmul.f32 %v8299_v47, %v8299_v47 }
 0x620   :  { %v4524_v13 = vmul.f32 %v4193_v25, %v10430_v4  ;;  %v2061_v25 = vsel %vm621_vm1, %v10434_v36, 0.0 }
 0x622   :  { %v8336_v30 = vpop.f32.mrf.mxu3 }
 0x623   :  { %10437 = vst [vmem:[#allocation13_spill] sm:$0xff] %v8336_v30 }
 0x626   :  { %v8287_v55 = vpop.xlane.xlu1 %2143 }
 0x627   :  { %10428 = vst [vmem:[#allocation64_spill] sm:$0xff] %v8287_v55  ;;  %v8323_v4 = vpop.f32.mrf.mxu2 }
 0x628   :  { %10435 = vst [vmem:[#allocation62_spill] sm:$0xff] %v8323_v4 }
 0x633   :  { %4227 = vperm.xlu0 %5758, %v3873_v58   ;;  %v10433_v58 = vld [vmem:[#allocation67_spill] sm:$0xff] }
 0x634   :  { %v8309_v32 = vmul.f32 0.0051020407, %v10433_v58  ;;  %v10436_v58 = vld [vmem:[#allocation69_spill] sm:$0xff] }
 0x63b   :  { %4731 = vperm.xlu0 %5758, %v4089_v2   ;;  %v2062_v2 = vadd.f32 %v2061_v25, %v8301_v10  ;;  %v2347_v25 = vmul.f32 %v8301_v10, %v8301_v10  ;;  %v8342_v10 = vpop.f32.mrf.mxu2 }
 0x63c   :  { %10438 = vst [vmem:[#allocation14_spill] sm:$0xff] %v8342_v10 }
 0x63e   :  { %v4697_v21 = vpop.permute.xlu1 %4696 }
 0x63f   :  { %v5027_v60 = vadd.f32 %v4697_v21, %v4523_v17  ;;  %v5028_v29 = vadd.f32 %v4697_v21, %v4524_v13  ;;  %v2725_v17 = vmul.f32 0.0051020407, %v7614_v23  ;;  %v2154_v13 = vadd.f32 %v2153_v24, %v7993_v20 }
 0x640   :  { %v2348_v21 = vmul.f32 %v10434_v36, %v10434_v36 }
 0x641   :  { %5171 = vst [vmem:[%s10132_s8 + $0x90] sm:$0xff] %v5027_v60  ;;  %v2823_v60 = vmul.f32 %v8309_v32, %v8309_v32  ;;  %v2869_v34 = vsub.f32 %v2725_v17, %v2797_v37  ;;  %v8347_v17 = vmul.f32 0.0051020407, %v7716_v43 }
 0x642   :  { %5172 = vst.msk [vmem:[%s10132_s8 + $0x98] sm:$0xff] %vm621_vm1, %v5028_v29  ;;  %v2751_v29 = vmul.f32 0.0051020407, %v10436_v58  ;;  %v2565_v24 = vsel %vm621_vm1, %v2348_v21, 0.0  ;;  %v2181_v58 = vsel %vm621_vm1, %v8336_v30, 0.0 }
 0x643   :  { %v2566_v11 = vadd.f32 %v2565_v24, %v2347_v25  ;;  %v2408_v25 = vmul.f32 %v8336_v30, %v8336_v30  ;;  %v2827_v43 = vmul.f32 %v8347_v17, %v8347_v17 }
 0x644   :  { %v2895_v55 = vsub.f32 %v2751_v29, %v2823_v60  ;;  %v2182_v29 = vadd.f32 %v2181_v58, %v8342_v10 }
 0x645   :  { %2063 = vadd.xlane.f32.xlu2 %v2062_v2  ;;  %v2941_v2 = vmax.f32 %v2869_v34, 0.0  ;;  %v2685_v58 = vsel %vm621_vm1, %v2408_v25, 0.0  ;;  %v3941_v25 = vld [vmem:[%s10131_s7 + $0x60] sm:$0xff] }
 0x646   :  { %v2967_v49 = vmax.f32 %v2895_v55, 0.0  ;;  %v4085_v33 = vsub.f32 %v3941_v25, %v10443_v48 }
 0x647   :  { %v2052_v23 = vpop.xlane.xlu2 %2051  ;;  %v8344_v37 = vadd.f32 1e-05, %v2941_v2  ;;  %v2407_v2 = vmul.f32 %v8342_v10, %v8342_v10  ;;  %v10441_v10 = vld [vmem:[#allocation30_spill] sm:$0xff] }
 0x648   :  { %v8338_v36 = vmul.f32 0.0051020407, %v2052_v23  ;;  %v2755_v23 = vmul.f32 0.0051020407, %v7732_v63 }
 0x649   :  { %2155 = vadd.xlane.f32.xlu1 %v2154_v13  ;;  %v4363_v13 = vpop.permute.xlu0 %4362  ;;  %5831 = vrsqrt.f32 %v8344_v37  ;;  %v2686_v12 = vadd.f32 %v2685_v58, %v2407_v2  ;;  %vm3343_vm8 = vweird.f32 %v8344_v37 }
 0x64a   :  { %v2811_v34 = vmul.f32 %v8338_v36, %v8338_v36  ;;  %v4592_v61 = vmul.f32 %v4363_v13, %v10441_v10 }
 0x64d   :  { %2567 = vadd.xlane.f32.xlu2 %v2566_v11  ;;  %v8352_v11 = vadd.f32 1e-05, %v2967_v49 }
 0x64f   :  { %v2556_v21 = vpop.xlane.xlu2 %2555  ;;  %5833 = vrsqrt.f32 %v8352_v11  ;;  %v8366_v30 = vpop.eup %5831  ;;  %vm3603_vm11 = vweird.f32 %v8352_v11 }
 0x650   :  { %v2739_v60 = vmul.f32 0.0051020407, %v2556_v21  ;;  %v2899_v21 = vsub.f32 %v2755_v23, %v2827_v43  ;;  %v10440_v23 = vld [vmem:[#allocation31_spill] sm:$0xff]  ;;  %vm3344_vm7 = vweird.f32 %v8366_v30 }
 0x651   :  { %vm8412_vm9 = vmor %vm3343_vm8, %vm3344_vm7 }
 0x652   :  { %v2883_v55 = vsub.f32 %v2739_v60, %v2811_v34  ;;  %v8364_v34 = vpop.xlane.xlu0 %2547  ;;  %v2971_v63 = vmax.f32 %v2899_v21, 0.0 }
 0x654   :  { %v2955_v24 = vmax.f32 %v2883_v55, 0.0  ;;  %v8385_v21 = vadd.f32 1e-05, %v2971_v63 }
 0x655   :  { %2183 = vadd.xlane.f32.xlu2 %v2182_v29  ;;  %v8370_v55 = vpop.eup %5833  ;;  %v3338_v29 = vmul.f32 %v8366_v30, %v8344_v37 }
 0x656   :  { %v3099_v49 = vadd.f32 1e-05, %v2955_v24  ;;  %v4591_v24 = vmul.f32 %v4363_v13, %v10440_v23  ;;  %v3598_v58 = vmul.f32 %v8370_v55, %v8352_v11  ;;  %v10445_v13 = vld [vmem:[#allocation7_spill] sm:$0xff]  ;;  %vm3604_vm12 = vweird.f32 %v8370_v55  ;;  %v3039_v11 = vld [vmem:[%s10130_s6 + $0x170] sm:$0xff] }
 0x657   :  { %v2172_v60 = vpop.xlane.xlu2 %2171  ;;  %vm3605_vm15 = vmor %vm3603_vm11, %vm3604_vm12  ;;  %vm3643_vm0 = vweird.f32 %v8385_v21 }
 0x658   :  { %5835 = vrsqrt.f32 %v3099_v49  ;;  %v8368_v4 = vmul.f32 0.0051020407, %v2172_v60  ;;  %v3599_v48 = vmul.f32 %v8370_v55, %v3598_v58  ;;  %vm3483_vm13 = vweird.f32 %v3099_v49 }
 0x659   :  { %5837 = vrsqrt.f32 %v8385_v21 }
 0x65a   :  { %10439 = vst [vmem:[#allocation67_spill] sm:$0xff] %v8368_v4  ;;  %v8381_v2 = vmul.f32 %v8368_v4, %v8368_v4  ;;  %v2053_v4 = vsel %vm621_vm1, %v10445_v13, 0.0 }
 0x65c   :  { %10442 = vst [vmem:[#allocation69_spill] sm:$0xff] %v8381_v2  ;;  %v3013_v2 = vld [vmem:[%s10130_s6 + $0xa0] sm:$0xff] }
 0x65d   :  { %2687 = vadd.xlane.f32.xlu2 %v2686_v12  ;;  %v3339_v12 = vmul.f32 %v8366_v30, %v3338_v29  ;;  %v2054_v29 = vadd.f32 %v2053_v4, %v8279_v42 }
 0x65e   :  { %v5836_v43 = vpop.eup %5835 }
 0x65f   :  { %v3478_v60 = vmul.f32 %v5836_v43, %v3099_v49  ;;  %v4867_v19 = vpop.permute.xlu0 %4866  ;;  %v2676_v3 = vpop.xlane.xlu2 %2675  ;;  %vm3484_vm10 = vweird.f32 %v5836_v43 }
 0x660   :  { %v5095_v28 = vadd.f32 %v4867_v19, %v4591_v24  ;;  %v5096_v23 = vadd.f32 %v4867_v19, %v4592_v61  ;;  %v8389_v1 = vmul.f32 0.0051020407, %v2676_v3  ;;  %v3340_v19 = vmul.f32 0.5, %v3339_v12  ;;  %v8405_v24 = vpop.eup %5837  ;;  %vm3485_vm14 = vmor %vm3483_vm13, %vm3484_vm10 }
 0x661   :  { %v3479_v10 = vmul.f32 %v5836_v43, %v3478_v60  ;;  %v3600_v61 = vmul.f32 0.5, %v3599_v48  ;;  %v3638_v58 = vmul.f32 %v8405_v24, %v8385_v21  ;;  %v10449_v48 = vld [vmem:[#allocation39_spill] sm:$0xff]  ;;  %vm3644_vm2 = vweird.f32 %v8405_v24  ;;  %v3043_v21 = vld [vmem:[%s10130_s6 + $0x190] sm:$0xff] }
 0x662   :  { %10444 = vst [vmem:[#allocation31_spill] sm:$0xff] %v8389_v1  ;;  %4711 = vperm.xlu1 %5759, %v4085_v33   ;;  %v3341_v25 = vsub.f32 1.5, %v3340_v19  ;;  %vm3645_vm3 = vmor %vm3643_vm0, %vm3644_vm2 }
 0x663   :  { %5239 = vst [vmem:[%s10132_s8 + $0x2b0] sm:$0xff] %v5095_v28  ;;  %v3480_v3 = vmul.f32 0.5, %v3479_v10  ;;  %v3601_v4 = vsub.f32 1.5, %v3600_v61  ;;  %v10448_v10 = vld [vmem:[#allocation41_spill] sm:$0xff]  ;;  %v3027_v61 = vld [vmem:[%s10130_s6 + $0x110] sm:$0xff] }
 0x664   :  { %5240 = vst.msk [vmem:[%s10132_s8 + $0x2b8] sm:$0xff] %vm621_vm1, %v5096_v23  ;;  %v3342_v60 = vmul.f32 %v8366_v30, %v3341_v25  ;;  %v3639_v25 = vmul.f32 %v8405_v24, %v3638_v58 }
 0x665   :  { %2055 = vadd.xlane.f32.xlu0 %v2054_v29  ;;  %v3481_v33 = vsub.f32 1.5, %v3480_v3  ;;  %v3602_v3 = vmul.f32 %v8370_v55, %v3601_v4 }
 0x666   :  { %v3346_v49 = vsel %vm8412_vm9, %v8366_v30, %v3342_v60  ;;  %v3640_v60 = vmul.f32 0.5, %v3639_v25  ;;  %v3949_v25 = vld [vmem:[%s10131_s7 + $0xa0] sm:$0xff] }
 0x667   :  { %v4233_v28 = vpop.permute.xlu2 %4232  ;;  %v3482_v23 = vmul.f32 %v5836_v43, %v3481_v33  ;;  %v3877_v30 = vmul.f32 %v3346_v49, %v3013_v2 }
 0x668   :  { %v4539_v37 = vmul.f32 %v4233_v28, %v10448_v10  ;;  %v4540_v29 = vmul.f32 %v4233_v28, %v10449_v48  ;;  %v10450_v28 = vld [vmem:[#allocation56_spill] sm:$0xff] }
 0x669   :  { %v8432_v10 = vmul.f32 0.0051020407, %v10450_v28  ;;  %v3486_v4 = vsel %vm3485_vm14, %v5836_v43, %v3482_v23  ;;  %v3606_v43 = vsel %vm3605_vm15, %v8370_v55, %v3602_v3  ;;  %v4021_v2 = vmul.f32 %v3877_v30, %v8299_v47  ;;  %v10455_v47 = vld [vmem:[#allocation45_spill] sm:$0xff] }
 0x66a   :  { %v8439_v58 = vmul.f32 %v3486_v4, %v3027_v61  ;;  %v8456_v61 = vmul.f32 %v3606_v43, %v3039_v11  ;;  %v2394_v11 = vmul.f32 %v7985_v59, %v7985_v59 }
 0x66b   :  { %v2819_v23 = vmul.f32 %v8432_v10, %v8432_v10  ;;  %v4093_v55 = vsub.f32 %v3949_v25, %v4021_v2 }
 0x66c   :  { %10451 = vst [vmem:[#allocation30_spill] sm:$0xff] %v8439_v58  ;;  %v8452_v12 = vmul.f32 %v8439_v58, %v8338_v36  ;;  %v10474_v58 = vld [vmem:[#allocation23_spill] sm:$0xff] }
 0x66e   :  { %10453 = vst [vmem:[#allocation63_spill] sm:$0xff] %v8452_v12 }
 0x66f   :  { %v4737_v19 = vpop.permute.xlu2 %4736 }
 0x670   :  { %v5043_v33 = vadd.f32 %v4737_v19, %v4539_v37  ;;  %v5044_v63 = vadd.f32 %v4737_v19, %v4540_v29  ;;  %v10452_v37 = vld [vmem:[#allocation59_spill] sm:$0xff] }
 0x671   :  { %v2747_v48 = vmul.f32 0.0051020407, %v10452_v37 }
 0x672   :  { %5187 = vst [vmem:[%s10132_s8 + $0x110] sm:$0xff] %v5043_v33  ;;  %v10454_v33 = vld [vmem:[#allocation46_spill] sm:$0xff] }
 0x673   :  { %5188 = vst.msk [vmem:[%s10132_s8 + $0x118] sm:$0xff] %vm621_vm1, %v5044_v63  ;;  %v2891_v29 = vsub.f32 %v2747_v48, %v2819_v23  ;;  %v3641_v63 = vsub.f32 1.5, %v3640_v60  ;;  %v2393_v23 = vmul.f32 %v7993_v20, %v7993_v20 }
 0x675   :  { %4247 = vperm.xlu2 %5760, %v3877_v30   ;;  %v2963_v36 = vmax.f32 %v2891_v29, 0.0  ;;  %v3642_v3 = vmul.f32 %v8405_v24, %v3641_v63 }
 0x677   :  { %v4383_v19 = vpop.permute.xlu2 %4382  ;;  %v3107_v4 = vadd.f32 1e-05, %v2963_v36  ;;  %v3646_v60 = vsel %vm3645_vm3, %v8405_v24, %v3642_v3  ;;  %v2657_v24 = vsel %vm621_vm1, %v2394_v11, 0.0 }
 0x678   :  { %v4599_v49 = vmul.f32 %v4383_v19, %v10454_v33  ;;  %v4600_v28 = vmul.f32 %v4383_v19, %v10455_v47  ;;  %v3907_v43 = vmul.f32 %v3646_v60, %v3043_v21  ;;  %v3979_v19 = vld [vmem:[%s10131_s7 + $0x190] sm:$0xff]  ;;  %v2658_v63 = vadd.f32 %v2657_v24, %v2393_v23 }
 0x679   :  { %4377 = vperm.xlu0 %5758, %v8456_v61   ;;  %5839 = vrsqrt.f32 %v3107_v4  ;;  %vm3563_vm5 = vweird.f32 %v3107_v4  ;;  %v3035_v21 = vld [vmem:[%s10130_s6 + $0x150] sm:$0xff] }
 0x67a   :  { %v4051_v29 = vmul.f32 %v3907_v43, %v8347_v17  ;;  %v2344_v17 = vmul.f32 %v10445_v13, %v10445_v13 }
 0x67c   :  { %v4123_v25 = vsub.f32 %v3979_v19, %v4051_v29  ;;  %v8505_v19 = vpop.xlane.xlu1 %2647 }
 0x67d   :  { %4751 = vperm.xlu2 %5760, %v4093_v55   ;;  %10457 = vst [vmem:[#allocation39_spill] sm:$0xff] %v8505_v19 }
 0x67f   :  { %v4887_v37 = vpop.permute.xlu2 %4886  ;;  %v5840_v2 = vpop.eup %5839 }
 0x680   :  { %v5103_v48 = vadd.f32 %v4887_v37, %v4599_v49  ;;  %v5104_v30 = vadd.f32 %v4887_v37, %v4600_v28  ;;  %v3558_v36 = vmul.f32 %v5840_v2, %v3107_v4  ;;  %vm3564_vm4 = vweird.f32 %v5840_v2  ;;  %v3971_v4 = vld [vmem:[%s10131_s7 + $0x150] sm:$0xff] }
 0x681   :  { %v2343_v37 = vmul.f32 %v8279_v42, %v8279_v42  ;;  %vm3565_vm6 = vmor %vm3563_vm5, %vm3564_vm4 }
 0x682   :  { %5247 = vst [vmem:[%s10132_s8 + $0x2f0] sm:$0xff] %v5103_v48  ;;  %v3559_v55 = vmul.f32 %v5840_v2, %v3558_v36  ;;  %v8496_v48 = vpop.f32.mrf.mxu1  ;;  %v8512_v36 = vpop.f32.mrf.mxu2 }
 0x683   :  { %5248 = vst.msk [vmem:[%s10132_s8 + $0x2f8] sm:$0xff] %vm621_vm1, %v5104_v30  ;;  %v2557_v30 = vsel %vm621_vm1, %v2344_v17, 0.0 }
 0x684   :  { %v3560_v33 = vmul.f32 0.5, %v3559_v55  ;;  %v2558_v11 = vadd.f32 %v2557_v30, %v2343_v37 }
 0x685   :  { %4397 = vperm.xlu2 %5760, %v3907_v43  }
 0x686   :  { %v3561_v49 = vsub.f32 1.5, %v3560_v33  ;;  %v10459_v33 = vld [vmem:[#allocation36_spill] sm:$0xff] }
 0x688   :  { %v3562_v28 = vmul.f32 %v5840_v2, %v3561_v49 }
 0x68a   :  { %v8488_v3 = vpop.xlane.xlu0 %2163  ;;  %v3566_v60 = vsel %vm3565_vm6, %v5840_v2, %v3562_v28  ;;  %v8502_v24 = vpop.f32.mrf.mxu1  ;;  %v10458_v2 = vld [vmem:[#allocation37_spill] sm:$0xff] }
 0x68b   :  { %v3899_v43 = vmul.f32 %v3566_v60, %v3035_v21  ;;  %10456 = vst [vmem:[#allocation41_spill] sm:$0xff] %v8502_v24  ;;  %v4047_v21 = vmul.f32 %v8456_v61, %v8309_v32  ;;  %v8530_v60 = vpop.xlane.xlu1 %2035  ;;  %v8543_v32 = vpop.f32.mrf.mxu2 }
 0x68c   :  { %2659 = vadd.xlane.f32.xlu1 %v2658_v63  ;;  %v8510_v63 = vpop.f32.mrf.mxu3  ;;  %10461 = vst [vmem:[#allocation59_spill] sm:$0xff] %v8530_v60 }
 0x68d   :  { %4901 = vperm.xlu2 %5760, %v4123_v25   ;;  %v4043_v29 = vmul.f32 %v3899_v43, %v8432_v10  ;;  %v8517_v10 = vmul.f32 0.0051020407, %v7829_v54  ;;  %v3975_v54 = vld [vmem:[%s10131_s7 + $0x170] sm:$0xff]  ;;  %10464 = vst [vmem:[#allocation45_spill] sm:$0xff] %v8543_v32 }
 0x68f   :  { %v4115_v25 = vsub.f32 %v3971_v4, %v4043_v29  ;;  %v2800_v4 = vmul.f32 %v8517_v10, %v8517_v10 }
 0x692   :  { %v8490_v47 = vpop.xlane.xlu0 %2667  ;;  %v8522_v30 = vpop.f32.mrf.mxu1 }
 0x693   :  { %10460 = vst [vmem:[#allocation56_spill] sm:$0xff] %v8522_v30 }
 0x6a3   :  { %2559 = vadd.xlane.f32.xlu0 %v2558_v11  ;;  %v8535_v11 = vpop.f32.mrf.mxu3 }
 0x6a4   :  { %10462 = vst [vmem:[#allocation46_spill] sm:$0xff] %v8535_v11 }
 0x6a5   :  { %v4228_v23 = vpop.permute.xlu0 %4227  ;;  %4357 = vperm.xlu1 %5759, %v3899_v43   ;;  %v10463_v43 = vld [vmem:[#allocation18_spill] sm:$0xff] }
 0x6a6   :  { %v4537_v55 = vmul.f32 %v4228_v23, %v10458_v2  ;;  %v4538_v49 = vmul.f32 %v4228_v23, %v10459_v33  ;;  %v2073_v23 = vsel %vm621_vm1, %v10463_v43, 0.0  ;;  %v4119_v2 = vsub.f32 %v3975_v54, %v4047_v21 }
 0x6a7   :  { %v2074_v29 = vadd.f32 %v2073_v23, %v8522_v30  ;;  %v2354_v61 = vmul.f32 %v10463_v43, %v10463_v43  ;;  %v8557_v54 = vmul.f32 0.0051020407, %v7864_v62  ;;  %v2758_v62 = vmul.f32 0.0051020407, %v7885_v51 }
 0x6ad   :  { %v4732_v17 = vpop.permute.xlu0 %4731  ;;  %4861 = vperm.xlu1 %5759, %v4115_v25   ;;  %v2728_v25 = vmul.f32 0.0051020407, %v7846_v57  ;;  %v8552_v57 = vpop.f32.mrf.mxu3 }
 0x6ae   :  { %v5041_v28 = vadd.f32 %v4732_v17, %v4537_v55  ;;  %v5042_v37 = vadd.f32 %v4732_v17, %v4538_v49  ;;  %v2353_v55 = vmul.f32 %v8522_v30, %v8522_v30  ;;  %v2577_v17 = vsel %vm621_vm1, %v2354_v61, 0.0  ;;  %10466 = vst [vmem:[#allocation36_spill] sm:$0xff] %v8552_v57  ;;  %v10468_v30 = vld [vmem:[#allocation71_spill] sm:$0xff] }
 0x6af   :  { %v2872_v33 = vsub.f32 %v2728_v25, %v2800_v4 }
 0x6b0   :  { %5185 = vst [vmem:[%s10132_s8 + $0x100] sm:$0xff] %v5041_v28  ;;  %v2578_v23 = vadd.f32 %v2577_v17, %v2353_v55 }
 0x6b1   :  { %5186 = vst.msk [vmem:[%s10132_s8 + $0x108] sm:$0xff] %vm621_vm1, %v5042_v37  ;;  %v2944_v28 = vmax.f32 %v2872_v33, 0.0  ;;  %v8550_v37 = vpop.xlane.xlu1 %2539 }
 0x6b2   :  { %10465 = vst [vmem:[#allocation37_spill] sm:$0xff] %v8550_v37  ;;  %v8580_v37 = vmul.f32 0.0051020407, %v10468_v30 }
 0x6b3   :  { %v8563_v4 = vadd.f32 1e-05, %v2944_v28 }
 0x6b5   :  { %5841 = vrsqrt.f32 %v8563_v4  ;;  %vm3373_vm8 = vweird.f32 %v8563_v4 }
 0x6b6   :  { %2075 = vadd.xlane.f32.xlu2 %v2074_v29  ;;  %v2193_v29 = vsel %vm621_vm1, %v8552_v57, 0.0 }
 0x6b7   :  { %4881 = vperm.xlu0 %5758, %v4119_v2   ;;  %v8561_v2 = vpop.f32.mrf.mxu2 }
 0x6b8   :  { %v2064_v49 = vpop.xlane.xlu2 %2063  ;;  %10467 = vst [vmem:[#allocation130_spill] sm:$0xff] %v8561_v2  ;;  %v2194_v33 = vadd.f32 %v2193_v29, %v8561_v2  ;;  %v2413_v20 = vmul.f32 %v8561_v2, %v8561_v2 }
 0x6b9   :  { %v8554_v21 = vmul.f32 0.0051020407, %v2064_v49  ;;  %v2830_v49 = vmul.f32 %v8557_v54, %v8557_v54  ;;  %v4208_v28 = vpop.permute.xlu1 %4207 }
 0x6ba   :  { %v4530_v32 = vmul.f32 %v4208_v28, %v10474_v58 }
 0x6bb   :  { %v2814_v61 = vmul.f32 %v8554_v21, %v8554_v21 }
 0x6be   :  { %2579 = vadd.xlane.f32.xlu2 %v2578_v23  ;;  %v2414_v23 = vmul.f32 %v8552_v57, %v8552_v57 }
 0x6c0   :  { %v2568_v25 = vpop.xlane.xlu2 %2567  ;;  %v2697_v29 = vsel %vm621_vm1, %v2414_v23, 0.0 }
 0x6c1   :  { %v2742_v55 = vmul.f32 0.0051020407, %v2568_v25  ;;  %v2902_v25 = vsub.f32 %v2758_v62, %v2830_v49 }
 0x6c3   :  { %v2886_v17 = vsub.f32 %v2742_v55, %v2814_v61  ;;  %v8583_v61 = vpop.eup %5841  ;;  %v10469_v55 = vld [vmem:[#allocation73_spill] sm:$0xff]  ;;  %v2974_v60 = vmax.f32 %v2902_v25, 0.0 }
 0x6c4   :  { %v2724_v57 = vmul.f32 0.0051020407, %v10469_v55  ;;  %v3368_v30 = vmul.f32 %v8583_v61, %v8563_v4  ;;  %vm3374_vm7 = vweird.f32 %v8583_v61 }
 0x6c5   :  { %v2958_v59 = vmax.f32 %v2886_v17, 0.0  ;;  %v2698_v17 = vadd.f32 %v2697_v29, %v2413_v20  ;;  %v8594_v23 = vadd.f32 1e-05, %v2974_v60  ;;  %v8601_v20 = vmul.f32 0.0051020407, %v7971_v40  ;;  %vm8641_vm10 = vmor %vm3373_vm8, %vm3374_vm7 }
 0x6c6   :  { %2195 = vadd.xlane.f32.xlu2 %v2194_v33  ;;  %v8590_v33 = vpop.xlane.xlu1 %2155 }
 0x6c7   :  { %v8576_v43 = vadd.f32 1e-05, %v2958_v59  ;;  %v2796_v59 = vmul.f32 %v8580_v37, %v8580_v37  ;;  %10471 = vst [vmem:[#allocation73_spill] sm:$0xff] %v8590_v33  ;;  %v10472_v33 = vld [vmem:[#allocation5_spill] sm:$0xff]  ;;  %vm3673_vm13 = vweird.f32 %v8594_v23 }
 0x6c8   :  { %v2184_v51 = vpop.xlane.xlu2 %2183  ;;  %v2340_v58 = vmul.f32 %v10472_v33, %v10472_v33 }
 0x6c9   :  { %5843 = vrsqrt.f32 %v8576_v43  ;;  %v8586_v19 = vmul.f32 0.0051020407, %v2184_v51  ;;  %v2868_v49 = vsub.f32 %v2724_v57, %v2796_v59  ;;  %v3369_v51 = vmul.f32 %v8583_v61, %v3368_v30  ;;  %v10473_v59 = vld [vmem:[#allocation21_spill] sm:$0xff] }
 0x6ca   :  { %v2045_v57 = vsel %vm621_vm1, %v10472_v33, 0.0  ;;  %5845 = vrsqrt.f32 %v8594_v23  ;;  %v4529_v12 = vmul.f32 %v4208_v28, %v10473_v59  ;;  %v2803_v30 = vmul.f32 %v8601_v20, %v8601_v20 }
 0x6cb   :  { %10470 = vst [vmem:[#allocation71_spill] sm:$0xff] %v8586_v19  ;;  %v8598_v55 = vmul.f32 %v8586_v19, %v8586_v19  ;;  %v2046_v11 = vadd.f32 %v2045_v57, %v8124_v16  ;;  %v3370_v19 = vmul.f32 0.5, %v3369_v51  ;;  %v2339_v28 = vmul.f32 %v8124_v16, %v8124_v16 }
 0x6cc   :  { %v2549_v51 = vsel %vm621_vm1, %v2340_v58, 0.0  ;;  %vm3513_vm11 = vweird.f32 %v8576_v43  ;;  %v10478_v58 = vld [vmem:[#allocation50_spill] sm:$0xff] }
 0x6ce   :  { %2699 = vadd.xlane.f32.xlu2 %v2698_v17  ;;  %v2940_v17 = vmax.f32 %v2868_v49, 0.0 }
 0x6cf   :  { %v5844_v62 = vpop.eup %5843 }
 0x6d0   :  { %v3508_v25 = vmul.f32 %v5844_v62, %v8576_v43  ;;  %v2688_v29 = vpop.xlane.xlu2 %2687  ;;  %v8618_v13 = vadd.f32 1e-05, %v2940_v17  ;;  %vm3514_vm9 = vweird.f32 %v5844_v62 }
 0x6d1   :  { %v8605_v2 = vmul.f32 0.0051020407, %v2688_v29  ;;  %v2731_v29 = vmul.f32 0.0051020407, %v7983_v50  ;;  %vm3515_vm12 = vmor %vm3513_vm11, %vm3514_vm9 }
 0x6d2   :  { %v3509_v60 = vmul.f32 %v5844_v62, %v3508_v25  ;;  %5847 = vrsqrt.f32 %v8618_v13  ;;  %vm3333_vm2 = vweird.f32 %v8618_v13 }
 0x6d3   :  { %v2875_v57 = vsub.f32 %v2731_v29, %v2803_v30  ;;  %v2404_v29 = vmul.f32 %v8292_v15, %v8292_v15 }
 0x6d4   :  { %v4712_v24 = vpop.permute.xlu1 %4711  ;;  %v3510_v49 = vmul.f32 0.5, %v3509_v60  ;;  %v2550_v60 = vadd.f32 %v2549_v51, %v2339_v28  ;;  %v3030_v28 = vld [vmem:[%s10130_s6 + $0x128] sm:$0xff] }
 0x6d5   :  { %v5033_v25 = vadd.f32 %v4712_v24, %v4529_v12  ;;  %v5034_v1 = vadd.f32 %v4712_v24, %v4530_v32  ;;  %v8631_v12 = vpop.eup %5845  ;;  %v3371_v24 = vsub.f32 1.5, %v3370_v19  ;;  %v2947_v17 = vmax.f32 %v2875_v57, 0.0 }
 0x6d6   :  { %v3511_v32 = vsub.f32 1.5, %v3510_v49  ;;  %v10477_v49 = vld [vmem:[#allocation55_spill] sm:$0xff]  ;;  %vm3674_vm14 = vweird.f32 %v8631_v12 }
 0x6d7   :  { %5177 = vst [vmem:[%s10132_s8 + $0xc0] sm:$0xff] %v5033_v25  ;;  %2047 = vadd.xlane.f32.xlu1 %v2046_v11  ;;  %v2173_v11 = vsel %vm621_vm1, %v8292_v15, 0.0  ;;  %v3372_v4 = vmul.f32 %v8583_v61, %v3371_v24  ;;  %v8658_v24 = vadd.f32 1e-05, %v2947_v17  ;;  %vm8703_vm15 = vmor %vm3673_vm13, %vm3674_vm14 }
 0x6d8   :  { %5178 = vst.msk [vmem:[%s10132_s8 + $0xc8] sm:$0xff] %vm621_vm1, %v5034_v1  ;;  %v4248_v50 = vpop.permute.xlu2 %4247  ;;  %v3668_v1 = vmul.f32 %v8631_v12, %v8594_v23  ;;  %v2174_v59 = vadd.f32 %v2173_v11, %v8294_v39  ;;  %v3512_v30 = vmul.f32 %v5844_v62, %v3511_v32  ;;  %v8655_v11 = vpop.eup %5847  ;;  %v8661_v32 = vmul.f32 0.0051020407, %v8008_v27 }
 0x6d9   :  { %v4545_v25 = vmul.f32 %v4248_v50, %v10477_v49  ;;  %v4546_v57 = vmul.f32 %v4248_v50, %v10478_v58  ;;  %v2403_v50 = vmul.f32 %v8294_v39, %v8294_v39  ;;  %v2677_v27 = vsel %vm621_vm1, %v2404_v29, 0.0 }
 0x6da   :  { %v3516_v51 = vsel %vm3515_vm12, %v5844_v62, %v3512_v30  ;;  %v3669_v43 = vmul.f32 %v8631_v12, %v3668_v1  ;;  %v3016_v62 = vld [vmem:[%s10130_s6 + $0xb8] sm:$0xff]  ;;  %v3376_v1 = vsel %vm8641_vm10, %v8583_v61, %v3372_v4  ;;  %v3328_v30 = vmul.f32 %v8655_v11, %v8618_v13 }
 0x6db   :  { %v8663_v33 = vmul.f32 %v3516_v51, %v3030_v28  ;;  %5849 = vrsqrt.f32 %v8658_v24  ;;  %v2761_v61 = vmul.f32 0.0051020407, %v8034_v41  ;;  %v3952_v41 = vld [vmem:[%s10131_s7 + $0xb8] sm:$0xff]  ;;  %vm3334_vm0 = vweird.f32 %v8655_v11 }
 0x6dc   :  { %v3670_v19 = vmul.f32 0.5, %v3669_v43  ;;  %v3329_v4 = vmul.f32 %v8655_v11, %v3328_v30  ;;  %v10482_v30 = vld [vmem:[#allocation74_spill] sm:$0xff]  ;;  %vm3335_vm3 = vmor %vm3333_vm2, %vm3334_vm0  ;;  %vm3403_vm4 = vweird.f32 %v8658_v24 }
 0x6dd   :  { %v8676_v17 = vmul.f32 %v8663_v33, %v8554_v21  ;;  %v3880_v21 = vmul.f32 %v3376_v1, %v3016_v62  ;;  %v10481_v1 = vld [vmem:[#allocation76_spill] sm:$0xff] }
 0x6de   :  { %v3330_v51 = vmul.f32 0.5, %v3329_v4 }
 0x6df   :  { %2551 = vadd.xlane.f32.xlu1 %v2550_v60  ;;  %v4024_v58 = vmul.f32 %v3880_v21, %v8517_v10 }
 0x6e0   :  { %v4752_v40 = vpop.permute.xlu2 %4751  ;;  %v3331_v62 = vsub.f32 1.5, %v3330_v51 }
 0x6e1   :  { %2175 = vadd.xlane.f32.xlu0 %v2174_v59  ;;  %v5049_v60 = vadd.f32 %v4752_v40, %v4545_v25  ;;  %v5050_v49 = vadd.f32 %v4752_v40, %v4546_v57  ;;  %v2833_v40 = vmul.f32 %v8661_v32, %v8661_v32  ;;  %v2678_v59 = vadd.f32 %v2677_v27, %v2403_v50  ;;  %v8696_v28 = vpop.eup %5849 }
 0x6e2   :  { %v3671_v57 = vsub.f32 1.5, %v3670_v19  ;;  %v4096_v50 = vsub.f32 %v3952_v41, %v4024_v58  ;;  %vm3404_vm5 = vweird.f32 %v8696_v28 }
 0x6e3   :  { %5193 = vst [vmem:[%s10132_s8 + $0x140] sm:$0xff] %v5049_v60  ;;  %v2905_v29 = vsub.f32 %v2761_v61, %v2833_v40  ;;  %v3398_v60 = vmul.f32 %v8696_v28, %v8658_v24  ;;  %v8712_v61 = vmul.f32 0.0051020407, %v8120_v9  ;;  %v3332_v9 = vmul.f32 %v8655_v11, %v3331_v62  ;;  %vm3405_vm6 = vmor %vm3403_vm4, %vm3404_vm5  ;;  %v3948_v24 = vld [vmem:[%s10131_s7 + $0x98] sm:$0xff] }
 0x6e4   :  { %5194 = vst.msk [vmem:[%s10132_s8 + $0x148] sm:$0xff] %vm621_vm1, %v5050_v49  ;;  %v3672_v10 = vmul.f32 %v8631_v12, %v3671_v57  ;;  %v2734_v57 = vmul.f32 0.0051020407, %v8122_v52 }
 0x6e5   :  { %v2977_v43 = vmax.f32 %v2905_v29, 0.0  ;;  %v3399_v19 = vmul.f32 %v8696_v28, %v3398_v60  ;;  %v3046_v29 = vld [vmem:[%s10130_s6 + $0x1a8] sm:$0xff]  ;;  %v3336_v52 = vsel %vm3335_vm3, %v8655_v11, %v3332_v9 }
 0x6e6   :  { %4262 = vperm.xlu2 %5760, %v3880_v21   ;;  %v3676_v58 = vsel %vm8703_vm15, %v8631_v12, %v3672_v10  ;;  %v3982_v10 = vld [vmem:[%s10131_s7 + $0x1a8] sm:$0xff] }
 0x6e7   :  { %v8709_v23 = vadd.f32 1e-05, %v2977_v43  ;;  %v3910_v12 = vmul.f32 %v3676_v58, %v3046_v29  ;;  %v3400_v41 = vmul.f32 0.5, %v3399_v19  ;;  %v3012_v43 = vld [vmem:[%s10130_s6 + $0x98] sm:$0xff] }
 0x6e8   :  { %v4398_v25 = vpop.permute.xlu2 %4397  ;;  %v3876_v13 = vmul.f32 %v3336_v52, %v3012_v43  ;;  %v8771_v43 = vmul.f32 0.0051020407, %v7607_v45 }
 0x6e9   :  { %2679 = vadd.xlane.f32.xlu0 %v2678_v59  ;;  %v4605_v27 = vmul.f32 %v4398_v25, %v10481_v1  ;;  %v4606_v40 = vmul.f32 %v4398_v25, %v10482_v30  ;;  %5851 = vrsqrt.f32 %v8709_v23  ;;  %v2806_v25 = vmul.f32 %v8712_v61, %v8712_v61 }
 0x6ea   :  { %v3401_v60 = vsub.f32 1.5, %v3400_v41  ;;  %v8750_v30 = vmul.f32 0.0051020407, %v8128_v8  ;;  %vm3703_vm8 = vweird.f32 %v8709_v23  ;;  %v2826_v45 = vmul.f32 %v8771_v43, %v8771_v43 }
 0x6eb   :  { %v2878_v51 = vsub.f32 %v2734_v57, %v2806_v25  ;;  %v3955_v57 = vld [vmem:[%s10131_s7 + $0xd0] sm:$0xff] }
 0x6ec   :  { %v3402_v11 = vmul.f32 %v8696_v28, %v3401_v60 }
 0x6ee   :  { %4766 = vperm.xlu2 %5760, %v4096_v50   ;;  %v4054_v50 = vmul.f32 %v3910_v12, %v8557_v54  ;;  %v4020_v54 = vmul.f32 %v3876_v13, %v8580_v37  ;;  %v3406_v19 = vsel %vm3405_vm6, %v8696_v28, %v3402_v11  ;;  %v2836_v37 = vmul.f32 %v8750_v30, %v8750_v30 }
 0x6ef   :  { %v5852_v49 = vpop.eup %5851 }
 0x6f0   :  { %v4902_v21 = vpop.permute.xlu2 %4901  ;;  %v4126_v62 = vsub.f32 %v3982_v10, %v4054_v50  ;;  %v3698_v1 = vmul.f32 %v5852_v49, %v8709_v23  ;;  %vm3704_vm7 = vweird.f32 %v5852_v49  ;;  %v2754_v50 = vmul.f32 0.0051020407, %v7617_v14  ;;  %v8779_v23 = vpop.xlane.xlu0 %2055  ;;  %v3049_v10 = vld [vmem:[%s10130_s6 + $0x1c0] sm:$0xff] }
 0x6f1   :  { %v5109_v59 = vadd.f32 %v4902_v21, %v4605_v27  ;;  %v5110_v4 = vadd.f32 %v4902_v21, %v4606_v40  ;;  %v3019_v21 = vld [vmem:[%s10130_s6 + $0xd0] sm:$0xff]  ;;  %vm3705_vm9 = vmor %vm3703_vm8, %vm3704_vm7 }
 0x6f2   :  { %v3699_v40 = vmul.f32 %v5852_v49, %v3698_v1  ;;  %v3883_v8 = vmul.f32 %v3406_v19, %v3019_v21  ;;  %v2898_v1 = vsub.f32 %v2754_v50, %v2826_v45  ;;  %v8817_v50 = vmul.f32 0.0051020407, %v8488_v3 }
 0x6f3   :  { %5253 = vst [vmem:[%s10132_s8 + $0x320] sm:$0xff] %v5109_v59  ;;  %v4092_v59 = vsub.f32 %v3948_v24, %v4020_v54 }
 0x6f4   :  { %5254 = vst.msk [vmem:[%s10132_s8 + $0x328] sm:$0xff] %vm621_vm1, %v5110_v4  ;;  %v2764_v4 = vmul.f32 0.0051020407, %v8146_v44  ;;  %v3700_v29 = vmul.f32 0.5, %v3699_v40  ;;  %v4027_v9 = vmul.f32 %v3883_v8, %v8601_v20  ;;  %v2839_v3 = vmul.f32 %v8817_v50, %v8817_v50 }
 0x6f6   :  { %4412 = vperm.xlu2 %5760, %v3910_v12   ;;  %v2908_v58 = vsub.f32 %v2764_v4, %v2836_v37  ;;  %v3701_v25 = vsub.f32 1.5, %v3700_v29  ;;  %v4099_v41 = vsub.f32 %v3955_v57, %v4027_v9  ;;  %v10486_v57 = vld [vmem:[#allocation26_spill] sm:$0xff] }
 0x6f8   :  { %4222 = vperm.xlu1 %5759, %v7526_v38   ;;  %v2950_v38 = vmax.f32 %v2878_v51, 0.0  ;;  %v2980_v12 = vmax.f32 %v2908_v58, 0.0  ;;  %v3702_v51 = vmul.f32 %v5852_v49, %v3701_v25  ;;  %v4378_v19 = vpop.permute.xlu0 %4377  ;;  %v10485_v25 = vld [vmem:[#allocation27_spill] sm:$0xff] }
 0x6fa   :  { %v3094_v27 = vadd.f32 1e-05, %v2950_v38  ;;  %v8775_v52 = vadd.f32 1e-05, %v2980_v12  ;;  %v8785_v38 = vmul.f32 0.0051020407, %v8333_v35 }
 0x6fb   :  { %v2970_v35 = vmax.f32 %v2898_v1, 0.0  ;;  %v2767_v1 = vmul.f32 0.0051020407, %v8490_v47 }
 0x6fc   :  { %5853 = vrsqrt.f32 %v3094_v27  ;;  %v2809_v54 = vmul.f32 %v8785_v38, %v8785_v38  ;;  %vm3433_vm10 = vweird.f32 %v3094_v27  ;;  %vm3733_vm13 = vweird.f32 %v8775_v52 }
 0x6fd   :  { %4242 = vperm.xlu0 %5758, %v3876_v13   ;;  %v3706_v13 = vsel %vm3705_vm9, %v5852_v49, %v3702_v51  ;;  %5855 = vrsqrt.f32 %v8775_v52  ;;  %v8802_v29 = vadd.f32 1e-05, %v2970_v35  ;;  %v10488_v35 = vld [vmem:[#allocation42_spill] sm:$0xff] }
 0x6fe   :  { %4916 = vperm.xlu2 %5760, %v4126_v62   ;;  %v2737_v62 = vmul.f32 0.0051020407, %v8364_v34  ;;  %v3913_v14 = vmul.f32 %v3706_v13, %v3049_v10  ;;  %v2165_v34 = vsel %vm621_vm1, %v8141_v56, 0.0 }
 0x6ff   :  { %v8773_v20 = vpop.xlane.xlu1 %2659  ;;  %5857 = vrsqrt.f32 %v8802_v29  ;;  %vm3633_vm2 = vweird.f32 %v8802_v29 }
 0x700   :  { %v2881_v40 = vsub.f32 %v2737_v62, %v2809_v54  ;;  %v4057_v49 = vmul.f32 %v3913_v14, %v8661_v32  ;;  %v3022_v62 = vld [vmem:[%s10130_s6 + $0xe8] sm:$0xff] }
 0x702   :  { %v8766_v28 = vpop.eup %5853  ;;  %v2953_v4 = vmax.f32 %v2881_v40, 0.0  ;;  %v10487_v40 = vld [vmem:[#allocation43_spill] sm:$0xff] }
 0x703   :  { %v3428_v44 = vmul.f32 %v8766_v28, %v3094_v27  ;;  %v8797_v37 = vpop.eup %5855  ;;  %vm3434_vm11 = vweird.f32 %v8766_v28 }
 0x704   :  { %v3728_v32 = vmul.f32 %v8797_v37, %v8775_v52  ;;  %vm8807_vm12 = vmor %vm3433_vm10, %vm3434_vm11  ;;  %v8814_v51 = vadd.f32 1e-05, %v2953_v4  ;;  %vm3734_vm14 = vweird.f32 %v8797_v37 }
 0x705   :  { %4746 = vperm.xlu0 %5758, %v4092_v59   ;;  %v3429_v60 = vmul.f32 %v8766_v28, %v3428_v44  ;;  %v3985_v59 = vld [vmem:[%s10131_s7 + $0x1c0] sm:$0xff]  ;;  %vm8866_vm15 = vmor %vm3733_vm13, %vm3734_vm14 }
 0x706   :  { %4277 = vperm.xlu2 %5760, %v3883_v8   ;;  %v4129_v8 = vsub.f32 %v3985_v59, %v4057_v49  ;;  %v3729_v13 = vmul.f32 %v8797_v37, %v3728_v32  ;;  %5859 = vrsqrt.f32 %v8814_v51  ;;  %v4597_v49 = vmul.f32 %v4378_v19, %v10487_v40  ;;  %v3958_v32 = vld [vmem:[%s10131_s7 + $0xe8] sm:$0xff] }
 0x707   :  { %v3430_v11 = vmul.f32 0.5, %v3429_v60  ;;  %vm3463_vm5 = vweird.f32 %v8814_v51 }
 0x708   :  { %v3730_v54 = vmul.f32 0.5, %v3729_v13 }
 0x709   :  { %v3431_v21 = vsub.f32 1.5, %v3430_v11 }
 0x70b   :  { %v3432_v58 = vmul.f32 %v8766_v28, %v3431_v21  ;;  %v4598_v21 = vmul.f32 %v4378_v19, %v10488_v35  ;;  %v10489_v19 = vld [vmem:[#allocation12_spill] sm:$0xff] }
 0x70e   :  { %4781 = vperm.xlu2 %5760, %v4099_v41   ;;  %v2166_v41 = vadd.f32 %v2165_v34, %v8155_v6  ;;  %v3731_v34 = vsub.f32 1.5, %v3730_v54  ;;  %v8882_v54 = vmul.f32 0.0051020407, %v8779_v23  ;;  %v3944_v23 = vld [vmem:[%s10131_s7 + $0x78] sm:$0xff] }
 0x710   :  { %v3732_v52 = vmul.f32 %v8797_v37, %v3731_v34 }
 0x716   :  { %4427 = vperm.xlu2 %5760, %v3913_v14   ;;  %v2560_v45 = vpop.xlane.xlu0 %2559  ;;  %v3436_v14 = vsel %vm8807_vm12, %v8766_v28, %v3432_v58  ;;  %v8838_v28 = vpop.eup %5857 }
 0x717   :  { %v4358_v24 = vpop.permute.xlu1 %4357  ;;  %v3886_v11 = vmul.f32 %v3436_v14, %v3022_v62  ;;  %v8846_v47 = vpop.eup %5859  ;;  %v3628_v58 = vmul.f32 %v8838_v28, %v8802_v29  ;;  %vm3634_vm0 = vweird.f32 %v8838_v28 }
 0x718   :  { %v4589_v27 = vmul.f32 %v4358_v24, %v10485_v25  ;;  %v4590_v12 = vmul.f32 %v4358_v24, %v10486_v57  ;;  %v2911_v24 = vsub.f32 %v2767_v1, %v2839_v3  ;;  %v3052_v3 = vld [vmem:[%s10130_s6 + $0x1d8] sm:$0xff]  ;;  %v3736_v1 = vsel %vm8866_vm15, %v8797_v37, %v3732_v52  ;;  %vm3635_vm3 = vmor %vm3633_vm2, %vm3634_vm0 }
 0x719   :  { %v4030_v59 = vmul.f32 %v3886_v11, %v8712_v61  ;;  %v2065_v61 = vsel %vm621_vm1, %v10489_v19, 0.0  ;;  %vm3464_vm4 = vweird.f32 %v8846_v47 }
 0x71a   :  { %vm3465_vm6 = vmor %vm3463_vm5, %vm3464_vm4 }
 0x71b   :  { %v4102_v57 = vsub.f32 %v3958_v32, %v4030_v59 }
 0x71e   :  { %4931 = vperm.xlu2 %5760, %v4129_v8  }
 0x71f   :  { %v4862_v44 = vpop.permute.xlu1 %4861 }
 0x720   :  { %v5093_v60 = vadd.f32 %v4862_v44, %v4589_v27  ;;  %v5094_v10 = vadd.f32 %v4862_v44, %v4590_v12  ;;  %v2983_v27 = vmax.f32 %v2911_v24, 0.0  ;;  %v2066_v12 = vadd.f32 %v2065_v61, %v8496_v48  ;;  %v3988_v61 = vld [vmem:[%s10131_s7 + $0x1d8] sm:$0xff] }
 0x721   :  { %v3629_v44 = vmul.f32 %v8838_v28, %v3628_v58 }
 0x722   :  { %5237 = vst [vmem:[%s10132_s8 + $0x2a0] sm:$0xff] %v5093_v60  ;;  %2167 = vadd.xlane.f32.xlu1 %v2166_v41  ;;  %v3458_v41 = vmul.f32 %v8846_v47, %v8814_v51  ;;  %v8872_v13 = vadd.f32 1e-05, %v2983_v27 }
 0x723   :  { %5238 = vst.msk [vmem:[%s10132_s8 + $0x2a8] sm:$0xff] %vm621_vm1, %v5094_v10 }
 0x724   :  { %v3459_v62 = vmul.f32 %v8846_v47, %v3458_v41  ;;  %5861 = vrsqrt.f32 %v8872_v13  ;;  %vm3763_vm8 = vweird.f32 %v8872_v13 }
 0x726   :  { %4292 = vperm.xlu2 %5760, %v3886_v11   ;;  %v3630_v11 = vmul.f32 0.5, %v3629_v44  ;;  %v3460_v59 = vmul.f32 0.5, %v3459_v62  ;;  %v3042_v44 = vld [vmem:[%s10130_s6 + $0x188] sm:$0xff] }
 0x728   :  { %v3631_v34 = vsub.f32 1.5, %v3630_v11 }
 0x729   :  { %v4882_v4 = vpop.permute.xlu0 %4881  ;;  %v2076_v8 = vpop.xlane.xlu2 %2075 }
 0x72a   :  { %v5101_v9 = vadd.f32 %v4882_v4, %v4597_v49  ;;  %v5102_v25 = vadd.f32 %v4882_v4, %v4598_v21  ;;  %v8870_v10 = vmul.f32 0.0051020407, %v2076_v8  ;;  %v2740_v49 = vmul.f32 0.0051020407, %v2560_v45  ;;  %v8897_v27 = vpop.eup %5861 }
 0x72b   :  { %v3916_v21 = vmul.f32 %v3736_v1, %v3052_v3  ;;  %v2812_v4 = vmul.f32 %v8882_v54, %v8882_v54  ;;  %v4088_v45 = vsub.f32 %v3944_v23, %v7542_v22  ;;  %v3758_v22 = vmul.f32 %v8897_v27, %v8872_v13 }
 0x72c   :  { %5245 = vst [vmem:[%s10132_s8 + $0x2e0] sm:$0xff] %v5101_v9  ;;  %v2817_v24 = vmul.f32 %v8870_v10, %v8870_v10  ;;  %v3461_v9 = vsub.f32 1.5, %v3460_v59  ;;  %vm3764_vm7 = vweird.f32 %v8897_v27 }
 0x72d   :  { %5246 = vst.msk [vmem:[%s10132_s8 + $0x2e8] sm:$0xff] %vm621_vm1, %v5102_v25  ;;  %v2884_v37 = vsub.f32 %v2740_v49, %v2812_v4  ;;  %v4060_v58 = vmul.f32 %v3916_v21, %v8750_v30  ;;  %v3759_v3 = vmul.f32 %v8897_v27, %v3758_v22  ;;  %vm8949_vm10 = vmor %vm3763_vm8, %vm3764_vm7 }
 0x72e   :  { %4796 = vperm.xlu2 %5760, %v4102_v57   ;;  %v3632_v57 = vmul.f32 %v8838_v28, %v3631_v34  ;;  %v3462_v52 = vmul.f32 %v8846_v47, %v3461_v9 }
 0x72f   :  { %2067 = vadd.xlane.f32.xlu0 %v2066_v12  ;;  %v2956_v12 = vmax.f32 %v2884_v37, 0.0  ;;  %v4132_v41 = vsub.f32 %v3988_v61, %v4060_v58  ;;  %v3760_v59 = vmul.f32 0.5, %v3759_v3  ;;  %v10492_v58 = vld [vmem:[#allocation65_spill] sm:$0xff]  ;;  %v10493_v61 = vld [vmem:[#allocation68_spill] sm:$0xff] }
 0x730   :  { %v3636_v60 = vsel %vm3635_vm3, %v8838_v28, %v3632_v57  ;;  %v3025_v28 = vld [vmem:[%s10130_s6 + $0x100] sm:$0xff]  ;;  %v3466_v51 = vsel %vm3465_vm6, %v8846_v47, %v3462_v52  ;;  %v8939_v9 = vmul.f32 0.0051020407, %v10492_v58  ;;  %v2750_v57 = vmul.f32 0.0051020407, %v10493_v61 }
 0x731   :  { %v2580_v14 = vpop.xlane.xlu2 %2579  ;;  %v8913_v62 = vadd.f32 1e-05, %v2956_v12  ;;  %v3961_v47 = vld [vmem:[%s10131_s7 + $0x100] sm:$0xff] }
 0x732   :  { %v2745_v40 = vmul.f32 0.0051020407, %v2580_v14  ;;  %v2822_v22 = vmul.f32 %v8939_v9, %v8939_v9 }
 0x733   :  { %vm3493_vm14 = vweird.f32 %v8913_v62 }
 0x734   :  { %v2889_v35 = vsub.f32 %v2745_v40, %v2817_v24  ;;  %v8920_v24 = vmul.f32 %v3636_v60, %v3042_v44  ;;  %v2894_v60 = vsub.f32 %v2750_v57, %v2822_v22  ;;  %v3991_v22 = vld [vmem:[%s10131_s7 + $0x1f0] sm:$0xff] }
 0x736   :  { %v2961_v8 = vmax.f32 %v2889_v35, 0.0  ;;  %4442 = vperm.xlu2 %5760, %v3916_v21   ;;  %v3889_v21 = vmul.f32 %v3466_v51, %v3025_v28 }
 0x738   :  { %v3105_v32 = vadd.f32 1e-05, %v2961_v8  ;;  %v4033_v4 = vmul.f32 %v3889_v21, %v8785_v38  ;;  %v3761_v8 = vsub.f32 1.5, %v3760_v59 }
 0x739   :  { %v2196_v25 = vpop.xlane.xlu2 %2195 }
 0x73a   :  { %5863 = vrsqrt.f32 %v3105_v32  ;;  %v8902_v30 = vmul.f32 0.0051020407, %v2196_v25  ;;  %v4105_v38 = vsub.f32 %v3961_v47, %v4033_v4  ;;  %vm3543_vm11 = vweird.f32 %v3105_v32 }
 0x73b   :  { %4726 = vperm.xlu1 %5759, %v4088_v45   ;;  %5865 = vrsqrt.f32 %v8913_v62 }
 0x73c   :  { %v8917_v14 = vmul.f32 %v8902_v30, %v8902_v30 }
 0x73e   :  { %4946 = vperm.xlu2 %5760, %v4132_v41   ;;  %v3762_v41 = vmul.f32 %v8897_v27, %v3761_v8 }
 0x740   :  { %v5864_v29 = vpop.eup %5863 }
 0x741   :  { %v3538_v1 = vmul.f32 %v5864_v29, %v3105_v32  ;;  %v2700_v11 = vpop.xlane.xlu2 %2699  ;;  %v8936_v37 = vpop.eup %5865  ;;  %vm3544_vm9 = vweird.f32 %v5864_v29  ;;  %v3055_v32 = vld [vmem:[%s10130_s6 + $0x1f0] sm:$0xff] }
 0x742   :  { %v8926_v40 = vmul.f32 0.0051020407, %v2700_v11  ;;  %v3488_v12 = vmul.f32 %v8936_v37, %v8913_v62  ;;  %vm3545_vm12 = vmor %vm3543_vm11, %vm3544_vm9  ;;  %v3033_v11 = vld [vmem:[%s10130_s6 + $0x140] sm:$0xff]  ;;  %vm3494_vm13 = vweird.f32 %v8936_v37 }
 0x743   :  { %v3539_v49 = vmul.f32 %v5864_v29, %v3538_v1  ;;  %4392 = vperm.xlu0 %5758, %v8920_v24   ;;  %vm9000_vm15 = vmor %vm3493_vm14, %vm3494_vm13 }
 0x744   :  { %v2919_v35 = vsub.f32 %v8926_v40, %v8917_v14  ;;  %v3489_v51 = vmul.f32 %v8936_v37, %v3488_v12 }
 0x745   :  { %v3540_v34 = vmul.f32 0.5, %v3539_v49 }
 0x746   :  { %4307 = vperm.xlu2 %5760, %v3889_v21   ;;  %v3766_v21 = vsel %vm8949_vm10, %v8897_v27, %v3762_v41  ;;  %v3490_v58 = vmul.f32 0.5, %v3489_v51 }
 0x747   :  { %v3541_v25 = vsub.f32 1.5, %v3540_v34  ;;  %v3919_v27 = vmul.f32 %v3766_v21, %v3055_v32 }
 0x749   :  { %v4263_v23 = vpop.permute.xlu2 %4262  ;;  %v3542_v13 = vmul.f32 %v5864_v29, %v3541_v25  ;;  %v4063_v57 = vmul.f32 %v3919_v27, %v8817_v50 }
 0x74a   :  { %v2048_v45 = vpop.xlane.xlu1 %2047  ;;  %v4551_v3 = vmul.f32 %v4263_v23, %v7633_v46  ;;  %v4552_v1 = vmul.f32 %v4263_v23, %v7624_v53  ;;  %v2966_v23 = vmax.f32 %v2894_v60, 0.0 }
 0x74b   :  { %v8953_v44 = vmul.f32 0.0051020407, %v2048_v45  ;;  %v3546_v28 = vsel %vm3545_vm12, %v5864_v29, %v3542_v13  ;;  %v2400_v13 = vmul.f32 %v8141_v56, %v8141_v56 }
 0x74c   :  { %v8967_v59 = vmul.f32 %v3546_v28, %v3033_v11  ;;  %v2399_v11 = vmul.f32 %v8155_v6, %v8155_v6 }
 0x74d   :  { %v2810_v4 = vmul.f32 %v8953_v44, %v8953_v44  ;;  %v2669_v21 = vsel %vm621_vm1, %v2400_v13, 0.0  ;;  %v3964_v13 = vld [vmem:[%s10131_s7 + $0x118] sm:$0xff] }
 0x74e   :  { %4811 = vperm.xlu2 %5760, %v4105_v38   ;;  %v8973_v8 = vmul.f32 %v8967_v59, %v8870_v10  ;;  %v8984_v10 = vadd.f32 1e-05, %v2966_v23  ;;  %v3491_v38 = vsub.f32 1.5, %v3490_v58 }
 0x750   :  { %vm3593_vm7 = vweird.f32 %v8984_v10 }
 0x751   :  { %v4767_v49 = vpop.permute.xlu2 %4766 }
 0x752   :  { %v5055_v46 = vadd.f32 %v4767_v49, %v4551_v3  ;;  %v5056_v53 = vadd.f32 %v4767_v49, %v4552_v1  ;;  %v2552_v34 = vpop.xlane.xlu1 %2551  ;;  %v4135_v3 = vsub.f32 %v3991_v22, %v4063_v57  ;;  %v3492_v1 = vmul.f32 %v8936_v37, %v3491_v38 }
 0x753   :  { %v2738_v29 = vmul.f32 0.0051020407, %v2552_v34  ;;  %v2349_v57 = vmul.f32 %v8496_v48, %v8496_v48 }
 0x754   :  { %5199 = vst [vmem:[%s10132_s8 + $0x170] sm:$0xff] %v5055_v46  ;;  %v2176_v47 = vpop.xlane.xlu0 %2175  ;;  %v3496_v62 = vsel %vm9000_vm15, %v8936_v37, %v3492_v1  ;;  %v2350_v37 = vmul.f32 %v10489_v19, %v10489_v19 }
 0x755   :  { %5200 = vst.msk [vmem:[%s10132_s8 + $0x178] sm:$0xff] %vm621_vm1, %v5056_v53  ;;  %v2882_v25 = vsub.f32 %v2738_v29, %v2810_v4  ;;  %v8982_v61 = vmul.f32 0.0051020407, %v2176_v47  ;;  %v3028_v4 = vld [vmem:[%s10130_s6 + $0x118] sm:$0xff] }
 0x756   :  { %4457 = vperm.xlu2 %5760, %v3919_v27  }
 0x757   :  { %v2954_v45 = vmax.f32 %v2882_v25, 0.0  ;;  %v2842_v52 = vmul.f32 %v8982_v61, %v8982_v61  ;;  %v3892_v25 = vmul.f32 %v3496_v62, %v3028_v4 }
 0x759   :  { %v3098_v12 = vadd.f32 1e-05, %v2954_v45  ;;  %v4413_v41 = vpop.permute.xlu2 %4412 }
 0x75a   :  { %v4611_v49 = vmul.f32 %v4413_v41, %v7665_v0  ;;  %v4612_v32 = vmul.f32 %v4413_v41, %v7663_v31  ;;  %v2670_v31 = vadd.f32 %v2669_v21, %v2399_v11  ;;  %v4036_v41 = vmul.f32 %v3892_v25, %v8882_v54 }
 0x75b   :  { %5867 = vrsqrt.f32 %v3098_v12  ;;  %vm3473_vm2 = vweird.f32 %v3098_v12 }
 0x75c   :  { %5869 = vrsqrt.f32 %v8984_v10  ;;  %v2680_v60 = vpop.xlane.xlu0 %2679 }
 0x75d   :  { %v2770_v50 = vmul.f32 0.0051020407, %v2680_v60  ;;  %v2569_v60 = vsel %vm621_vm1, %v2350_v37, 0.0  ;;  %v10499_v37 = vld [vmem:[#allocation48_spill] sm:$0xff] }
 0x75e   :  { %4961 = vperm.xlu2 %5760, %v4135_v3   ;;  %v2570_v1 = vadd.f32 %v2569_v60, %v2349_v57  ;;  %v3038_v60 = vld [vmem:[%s10130_s6 + $0x168] sm:$0xff] }
 0x75f   :  { %v2914_v28 = vsub.f32 %v2770_v50, %v2842_v52 }
 0x761   :  { %v5868_v46 = vpop.eup %5867  ;;  %v2986_v53 = vmax.f32 %v2914_v28, 0.0  ;;  %v4917_v34 = vpop.permute.xlu2 %4916  ;;  %v4108_v28 = vsub.f32 %v3964_v13, %v4036_v41 }
 0x762   :  { %v9013_v29 = vpop.eup %5869  ;;  %v3468_v23 = vmul.f32 %v5868_v46, %v3098_v12  ;;  %v5115_v47 = vadd.f32 %v4917_v34, %v4611_v49  ;;  %v5116_v0 = vadd.f32 %v4917_v34, %v4612_v32  ;;  %vm3474_vm0 = vweird.f32 %v5868_v46 }
 0x763   :  { %v3130_v27 = vadd.f32 1e-05, %v2986_v53  ;;  %v3588_v45 = vmul.f32 %v9013_v29, %v8984_v10  ;;  %vm3475_vm4 = vmor %vm3473_vm2, %vm3474_vm0  ;;  %vm3594_vm8 = vweird.f32 %v9013_v29  ;;  %v3994_v10 = vld [vmem:[%s10131_s7 + $0x208] sm:$0xff] }
 0x764   :  { %v3469_v58 = vmul.f32 %v5868_v46, %v3468_v23  ;;  %5259 = vst [vmem:[%s10132_s8 + $0x350] sm:$0xff] %v5115_v47  ;;  %v3026_v23 = vld [vmem:[%s10130_s6 + $0x108] sm:$0xff]  ;;  %vm3595_vm9 = vmor %vm3593_vm7, %vm3594_vm8 }
 0x765   :  { %5871 = vrsqrt.f32 %v3130_v27  ;;  %5260 = vst.msk [vmem:[%s10132_s8 + $0x358] sm:$0xff] %vm621_vm1, %v5116_v0  ;;  %2671 = vadd.xlane.f32.xlu1 %v2670_v31  ;;  %v3589_v22 = vmul.f32 %v9013_v29, %v3588_v45  ;;  %vm3793_vm3 = vweird.f32 %v3130_v27 }
 0x766   :  { %4322 = vperm.xlu2 %5760, %v3892_v25   ;;  %v3470_v38 = vmul.f32 0.5, %v3469_v58 }
 0x767   :  { %v3590_v51 = vmul.f32 0.5, %v3589_v22 }
 0x768   :  { %v3471_v50 = vsub.f32 1.5, %v3470_v38 }
 0x769   :  { %v4278_v52 = vpop.permute.xlu2 %4277  ;;  %v3591_v4 = vsub.f32 1.5, %v3590_v51 }
 0x76a   :  { %v3472_v32 = vmul.f32 %v5868_v46, %v3471_v50  ;;  %v4557_v53 = vmul.f32 %v4278_v52, %v7789_v5  ;;  %v4558_v34 = vmul.f32 %v4278_v52, %v7775_v7  ;;  %v3058_v7 = vld [vmem:[%s10130_s6 + $0x208] sm:$0xff] }
 0x76b   :  { %v5872_v3 = vpop.eup %5871 }
 0x76c   :  { %v3788_v11 = vmul.f32 %v5872_v3, %v3130_v27  ;;  %vm3794_vm5 = vweird.f32 %v5872_v3  ;;  %v3476_v47 = vsel %vm3475_vm4, %v5868_v46, %v3472_v32  ;;  %v3592_v46 = vmul.f32 %v9013_v29, %v3591_v4  ;;  %v10498_v27 = vld [vmem:[#allocation49_spill] sm:$0xff] }
 0x76d   :  { %2571 = vadd.xlane.f32.xlu0 %v2570_v1  ;;  %v9039_v58 = vmul.f32 %v3476_v47, %v3026_v23  ;;  %vm3795_vm6 = vmor %vm3793_vm3, %vm3794_vm5 }
 0x76e   :  { %v3789_v49 = vmul.f32 %v5872_v3, %v3788_v11  ;;  %4826 = vperm.xlu2 %5760, %v4108_v28   ;;  %v3596_v50 = vsel %vm3595_vm9, %v9013_v29, %v3592_v46 }
 0x76f   :  { %v4243_v54 = vpop.permute.xlu0 %4242  ;;  %v9050_v25 = vmul.f32 %v9039_v58, %v8953_v44  ;;  %v3902_v11 = vmul.f32 %v3596_v50, %v3038_v60  ;;  %v2185_v50 = vsel %vm621_vm1, %v8510_v63, 0.0 }
 0x770   :  { %v3790_v21 = vmul.f32 0.5, %v3789_v49  ;;  %v4543_v45 = vmul.f32 %v4243_v54, %v10498_v27  ;;  %v4544_v57 = vmul.f32 %v4243_v54, %v10499_v37  ;;  %v4223_v37 = vpop.permute.xlu1 %4222 }
 0x771   :  { %v4782_v62 = vpop.permute.xlu2 %4781  ;;  %v4046_v54 = vmul.f32 %v3902_v11, %v8939_v9 }
 0x772   :  { %v3791_v0 = vsub.f32 1.5, %v3790_v21  ;;  %v5061_v31 = vadd.f32 %v4782_v62, %v4557_v53  ;;  %v5062_v12 = vadd.f32 %v4782_v62, %v4558_v34  ;;  %v10501_v34 = vld [vmem:[#allocation116_spill] sm:$0xff]  ;;  %v10502_v62 = vld [vmem:[#allocation97_spill] sm:$0xff] }
 0x773   :  { %v9097_v23 = vmul.f32 0.0051020407, %v10502_v62  ;;  %v10510_v62 = vld [vmem:[#allocation129_spill] sm:$0xff] }
 0x774   :  { %5205 = vst [vmem:[%s10132_s8 + $0x1a0] sm:$0xff] %v5061_v31  ;;  %v3792_v5 = vmul.f32 %v5872_v3, %v3791_v0 }
 0x775   :  { %5206 = vst.msk [vmem:[%s10132_s8 + $0x1a8] sm:$0xff] %vm621_vm1, %v5062_v12  ;;  %v2799_v12 = vmul.f32 %v9097_v23, %v9097_v23 }
 0x776   :  { %v3796_v38 = vsel %vm3795_vm6, %v5872_v3, %v3792_v5  ;;  %v4050_v3 = vmul.f32 %v8920_v24, %v8771_v43  ;;  %v3974_v43 = vld [vmem:[%s10131_s7 + $0x168] sm:$0xff] }
 0x777   :  { %v4747_v41 = vpop.permute.xlu0 %4746  ;;  %v3922_v22 = vmul.f32 %v3796_v38, %v3058_v7  ;;  %v4118_v53 = vsub.f32 %v3974_v43, %v4046_v54  ;;  %v10503_v7 = vld [vmem:[#allocation98_spill] sm:$0xff] }
 0x778   :  { %v5047_v44 = vadd.f32 %v4747_v41, %v4543_v45  ;;  %v5048_v52 = vadd.f32 %v4747_v41, %v4544_v57  ;;  %v2727_v5 = vmul.f32 0.0051020407, %v10503_v7  ;;  %v10504_v57 = vld [vmem:[#allocation119_spill] sm:$0xff]  ;;  %v10505_v41 = vld [vmem:[#allocation118_spill] sm:$0xff] }
 0x779   :  { %4472 = vperm.xlu2 %5760, %v3922_v22   ;;  %v4428_v13 = vpop.permute.xlu2 %4427  ;;  %v4066_v1 = vmul.f32 %v3922_v22, %v8982_v61  ;;  %v3978_v61 = vld [vmem:[%s10131_s7 + $0x188] sm:$0xff]  ;;  %v10508_v43 = vld [vmem:[#allocation10_spill] sm:$0xff] }
 0x77a   :  { %5191 = vst [vmem:[%s10132_s8 + $0x130] sm:$0xff] %v5047_v44  ;;  %v4122_v28 = vsub.f32 %v3978_v61, %v4050_v3  ;;  %v4617_v51 = vmul.f32 %v4428_v13, %v7814_v18  ;;  %v4618_v49 = vmul.f32 %v4428_v13, %v7812_v26  ;;  %v10500_v18 = vld [vmem:[#allocation117_spill] sm:$0xff]  ;;  %v2871_v46 = vsub.f32 %v2727_v5, %v2799_v12 }
 0x77b   :  { %5192 = vst.msk [vmem:[%s10132_s8 + $0x138] sm:$0xff] %vm621_vm1, %v5048_v52  ;;  %v4138_v29 = vsub.f32 %v3994_v10, %v4066_v1  ;;  %v2186_v10 = vadd.f32 %v2185_v50, %v8512_v36  ;;  %v2410_v3 = vmul.f32 %v8510_v63, %v8510_v63  ;;  %v2346_v12 = vmul.f32 %v10508_v43, %v10508_v43  ;;  %v10513_v50 = vld [vmem:[#allocation20_spill] sm:$0xff] }
 0x77c   :  { %v2943_v45 = vmax.f32 %v2871_v46, 0.0 }
 0x77e   :  { %4372 = vperm.xlu1 %5759, %v3902_v11   ;;  %v3087_v44 = vadd.f32 1e-05, %v2943_v45 }
 0x780   :  { %5873 = vrsqrt.f32 %v3087_v44  ;;  %vm3363_vm10 = vweird.f32 %v3087_v44 }
 0x781   :  { %4896 = vperm.xlu0 %5758, %v4122_v28   ;;  %4976 = vperm.xlu2 %5760, %v4138_v29   ;;  %v4932_v32 = vpop.permute.xlu2 %4931  ;;  %v2409_v29 = vmul.f32 %v8512_v36, %v8512_v36  ;;  %v10506_v28 = vld [vmem:[#allocation34_spill] sm:$0xff] }
 0x782   :  { %v5121_v24 = vadd.f32 %v4932_v32, %v4617_v51  ;;  %v5122_v21 = vadd.f32 %v4932_v32, %v4618_v49  ;;  %v4535_v51 = vmul.f32 %v4223_v37, %v10506_v28  ;;  %v10507_v49 = vld [vmem:[#allocation32_spill] sm:$0xff]  ;;  %v2689_v32 = vsel %vm621_vm1, %v2410_v3, 0.0 }
 0x783   :  { %v4536_v54 = vmul.f32 %v4223_v37, %v10507_v49  ;;  %v2561_v37 = vsel %vm621_vm1, %v2346_v12, 0.0  ;;  %v3015_v28 = vld [vmem:[%s10130_s6 + $0xb0] sm:$0xff] }
 0x784   :  { %5265 = vst [vmem:[%s10132_s8 + $0x380] sm:$0xff] %v5121_v24  ;;  %v2057_v24 = vsel %vm621_vm1, %v10508_v43, 0.0 }
 0x785   :  { %5266 = vst.msk [vmem:[%s10132_s8 + $0x388] sm:$0xff] %vm621_vm1, %v5122_v21 }
 0x786   :  { %4876 = vperm.xlu1 %5759, %v4118_v53   ;;  %v5874_v61 = vpop.eup %5873  ;;  %v10509_v53 = vld [vmem:[#allocation29_spill] sm:$0xff] }
 0x787   :  { %v2345_v5 = vmul.f32 %v10509_v53, %v10509_v53  ;;  %vm3364_vm11 = vweird.f32 %v5874_v61 }
 0x788   :  { %vm3365_vm12 = vmor %vm3363_vm10, %vm3364_vm11 }
 0x789   :  { %v4293_v26 = vpop.permute.xlu2 %4292 }
 0x78a   :  { %v4563_v9 = vmul.f32 %v4293_v26, %v10500_v18  ;;  %v4564_v4 = vmul.f32 %v4293_v26, %v10501_v34  ;;  %v2058_v26 = vadd.f32 %v2057_v24, %v10509_v53  ;;  %v3358_v18 = vmul.f32 %v5874_v61, %v3087_v44 }
 0x78c   :  { %v3359_v46 = vmul.f32 %v5874_v61, %v3358_v18 }
 0x791   :  { %v4797_v47 = vpop.permute.xlu2 %4796 }
 0x792   :  { %v5067_v0 = vadd.f32 %v4797_v47, %v4563_v9  ;;  %v5068_v31 = vadd.f32 %v4797_v47, %v4564_v4  ;;  %v2690_v4 = vadd.f32 %v2689_v32, %v2409_v29  ;;  %v3951_v32 = vld [vmem:[%s10131_s7 + $0xb0] sm:$0xff] }
 0x794   :  { %5211 = vst [vmem:[%s10132_s8 + $0x1d0] sm:$0xff] %v5067_v0  ;;  %v10511_v0 = vld [vmem:[#allocation4_spill] sm:$0xff] }
 0x795   :  { %5212 = vst.msk [vmem:[%s10132_s8 + $0x1d8] sm:$0xff] %vm621_vm1, %v5068_v31  ;;  %v9116_v1 = vpop.xlane.xlu1 %2167 }
 0x799   :  { %v4443_v27 = vpop.permute.xlu2 %4442 }
 0x79a   :  { %v4623_v38 = vmul.f32 %v4443_v27, %v10504_v57  ;;  %v4624_v22 = vmul.f32 %v4443_v27, %v10505_v41  ;;  %v3360_v57 = vmul.f32 0.5, %v3359_v46 }
 0x7a1   :  { %v4947_v52 = vpop.permute.xlu2 %4946 }
 0x7a2   :  { %v5127_v13 = vadd.f32 %v4947_v52, %v4623_v38  ;;  %v5128_v60 = vadd.f32 %v4947_v52, %v4624_v22  ;;  %v2562_v38 = vadd.f32 %v2561_v37, %v2345_v5  ;;  %v3361_v22 = vsub.f32 1.5, %v3360_v57  ;;  %v10518_v37 = vld [vmem:[#allocation31_spill] sm:$0xff]  ;;  %v10519_v57 = vld [vmem:[#allocation69_spill] sm:$0xff] }
 0x7a4   :  { %5271 = vst [vmem:[%s10132_s8 + $0x3b0] sm:$0xff] %v5127_v13  ;;  %v3362_v52 = vmul.f32 %v5874_v61, %v3361_v22  ;;  %v10512_v13 = vld [vmem:[#allocation8_spill] sm:$0xff] }
 0x7a5   :  { %5272 = vst.msk [vmem:[%s10132_s8 + $0x3b8] sm:$0xff] %vm621_vm1, %v5128_v60 }
 0x7a9   :  { %v4308_v11 = vpop.permute.xlu2 %4307 }
 0x7aa   :  { %v4569_v47 = vmul.f32 %v4308_v11, %v10510_v62  ;;  %v4570_v31 = vmul.f32 %v4308_v11, %v10511_v0 }
 0x7ab   :  { %2187 = vadd.xlane.f32.xlu0 %v2186_v10 }
 0x7ad   :  { %v4727_v21 = vpop.permute.xlu1 %4726 }
 0x7ae   :  { %v5039_v9 = vadd.f32 %v4727_v21, %v4535_v51  ;;  %v5040_v34 = vadd.f32 %v4727_v21, %v4536_v54  ;;  %v3366_v51 = vsel %vm3365_vm12, %v5874_v61, %v3362_v52  ;;  %v2068_v61 = vpop.xlane.xlu0 %2067 }
 0x7af   :  { %v3879_v44 = vmul.f32 %v3366_v51, %v3015_v28  ;;  %v9194_v22 = vmul.f32 0.0051020407, %v2068_v61 }
 0x7b0   :  { %5183 = vst [vmem:[%s10132_s8 + $0xf0] sm:$0xff] %v5039_v9  ;;  %2059 = vadd.xlane.f32.xlu1 %v2058_v26  ;;  %v10514_v26 = vld [vmem:[#allocation7_spill] sm:$0xff] }
 0x7b1   :  { %5184 = vst.msk [vmem:[%s10132_s8 + $0xf8] sm:$0xff] %vm621_vm1, %v5040_v34  ;;  %v4812_v7 = vpop.permute.xlu2 %4811  ;;  %v4023_v54 = vmul.f32 %v3879_v44, %v9097_v23  ;;  %v10515_v9 = vld [vmem:[#allocation83_spill] sm:$0xff]  ;;  %v9177_v23 = vmul.f32 0.0051020407, %v9116_v1  ;;  %v10517_v1 = vld [vmem:[#allocation100_spill] sm:$0xff] }
 0x7b2   :  { %v5073_v27 = vadd.f32 %v4812_v7, %v4569_v47  ;;  %v5074_v45 = vadd.f32 %v4812_v7, %v4570_v31 }
 0x7b3   :  { %2691 = vadd.xlane.f32.xlu0 %v2690_v4  ;;  %v4095_v24 = vsub.f32 %v3951_v32, %v4023_v54  ;;  %v2840_v12 = vmul.f32 %v9177_v23, %v9177_v23 }
 0x7b4   :  { %5217 = vst [vmem:[%s10132_s8 + $0x200] sm:$0xff] %v5073_v27  ;;  %v2757_v27 = vmul.f32 0.0051020407, %v10517_v1  ;;  %v10522_v1 = vld [vmem:[#allocation57_spill] sm:$0xff] }
 0x7b5   :  { %5218 = vst.msk [vmem:[%s10132_s8 + $0x208] sm:$0xff] %vm621_vm1, %v5074_v45 }
 0x7b6   :  { %v4393_v0 = vpop.permute.xlu0 %4392 }
 0x7b8   :  { %2563 = vadd.xlane.f32.xlu1 %v2562_v38  ;;  %v10520_v38 = vsub.f32 %v10518_v37, %v10519_v57  ;;  %v9222_v37 = vpop.f32.mrf.mxu1 }
 0x7b9   :  { %v4458_v41 = vpop.permute.xlu2 %4457 }
 0x7ba   :  { %v4629_v60 = vmul.f32 %v4458_v41, %v10512_v13  ;;  %v4630_v10 = vmul.f32 %v4458_v41, %v10513_v50  ;;  %v2985_v41 = vmax.f32 %v10520_v38, 0.0 }
 0x7c1   :  { %v4962_v3 = vpop.permute.xlu2 %4961 }
 0x7c2   :  { %v5133_v11 = vadd.f32 %v4962_v3, %v4629_v60  ;;  %v5134_v29 = vadd.f32 %v4962_v3, %v4630_v10 }
 0x7c4   :  { %5277 = vst [vmem:[%s10132_s8 + $0x3e0] sm:$0xff] %v5133_v11  ;;  %v9198_v11 = vadd.f32 1e-05, %v2985_v41  ;;  %v10523_v41 = vld [vmem:[#allocation33_spill] sm:$0xff] }
 0x7c5   :  { %5278 = vst.msk [vmem:[%s10132_s8 + $0x3e8] sm:$0xff] %vm621_vm1, %v5134_v29  ;;  %v2815_v29 = vmul.f32 %v9194_v22, %v9194_v22 }
 0x7c6   :  { %vm3783_vm3 = vweird.f32 %v9198_v11 }
 0x7c7   :  { %4257 = vperm.xlu0 %5758, %v3879_v44  }
 0x7c9   :  { %v4323_v49 = vpop.permute.xlu2 %4322 }
 0x7ca   :  { %v4575_v21 = vmul.f32 %v4323_v49, %v8279_v42  ;;  %v4576_v18 = vmul.f32 %v4323_v49, %v10514_v26  ;;  %v10516_v42 = vld [vmem:[#allocation99_spill] sm:$0xff] }
 0x7cb   :  { %v9184_v47 = vmul.f32 0.0051020407, %v10516_v42 }
 0x7cd   :  { %v2829_v46 = vmul.f32 %v9184_v47, %v9184_v47 }
 0x7cf   :  { %4761 = vperm.xlu0 %5758, %v4095_v24   ;;  %v2901_v13 = vsub.f32 %v2757_v27, %v2829_v46  ;;  %v4604_v27 = vmul.f32 %v4393_v0, %v10522_v1 }
 0x7d1   :  { %4237 = vperm.xlu1 %5759, %v10515_v9   ;;  %v4827_v34 = vpop.permute.xlu2 %4826  ;;  %v2973_v44 = vmax.f32 %v2901_v13, 0.0 }
 0x7d2   :  { %v5079_v4 = vadd.f32 %v4827_v34, %v4575_v21  ;;  %v5080_v62 = vadd.f32 %v4827_v34, %v4576_v18 }
 0x7d4   :  { %5223 = vst [vmem:[%s10132_s8 + $0x230] sm:$0xff] %v5079_v4 }
 0x7d5   :  { %5224 = vst.msk [vmem:[%s10132_s8 + $0x238] sm:$0xff] %vm621_vm1, %v5080_v62 }
 0x7d8   :  { %v2672_v31 = vpop.xlane.xlu1 %2671 }
 0x7d9   :  { %v2768_v7 = vmul.f32 0.0051020407, %v2672_v31  ;;  %v4473_v5 = vpop.permute.xlu2 %4472 }
 0x7da   :  { %v4635_v50 = vmul.f32 %v4473_v5, %v8294_v39  ;;  %v4636_v10 = vmul.f32 %v4473_v5, %v8292_v15  ;;  %v9210_v39 = vadd.f32 1e-05, %v2973_v44  ;;  %v10521_v5 = vld [vmem:[#allocation58_spill] sm:$0xff] }
 0x7db   :  { %v2912_v45 = vsub.f32 %v2768_v7, %v2840_v12  ;;  %v4603_v46 = vmul.f32 %v4393_v0, %v10521_v5 }
 0x7dc   :  { %vm3663_vm8 = vweird.f32 %v9210_v39 }
 0x7dd   :  { %v2984_v52 = vmax.f32 %v2912_v45, 0.0 }
 0x7df   :  { %v3128_v60 = vadd.f32 1e-05, %v2984_v52  ;;  %v2177_v52 = vsel %vm621_vm1, %v10523_v41, 0.0 }
 0x7e0   :  { %v2572_v3 = vpop.xlane.xlu0 %2571 }
 0x7e1   :  { %5875 = vrsqrt.f32 %v3128_v60  ;;  %v2743_v28 = vmul.f32 0.0051020407, %v2572_v3  ;;  %v4977_v51 = vpop.permute.xlu2 %4976  ;;  %v10524_v3 = vld [vmem:[#allocation22_spill] sm:$0xff]  ;;  %vm3773_vm14 = vweird.f32 %v3128_v60 }
 0x7e2   :  { %v5139_v49 = vadd.f32 %v4977_v51, %v4635_v50  ;;  %v5140_v54 = vadd.f32 %v4977_v51, %v4636_v10  ;;  %5877 = vrsqrt.f32 %v9198_v11 }
 0x7e3   :  { %v2887_v32 = vsub.f32 %v2743_v28, %v2815_v29  ;;  %v2077_v29 = vsel %vm621_vm1, %v10524_v3, 0.0 }
 0x7e4   :  { %5283 = vst [vmem:[%s10132_s8 + $0x410] sm:$0xff] %v5139_v49  ;;  %v2078_v0 = vadd.f32 %v2077_v29, %v9222_v37  ;;  %v10525_v49 = vld [vmem:[#allocation62_spill] sm:$0xff] }
 0x7e5   :  { %v2959_v15 = vmax.f32 %v2887_v32, 0.0  ;;  %5284 = vst.msk [vmem:[%s10132_s8 + $0x418] sm:$0xff] %vm621_vm1, %v5140_v54  ;;  %v2178_v54 = vadd.f32 %v2177_v52, %v10525_v49  ;;  %v10526_v32 = vld [vmem:[#allocation40_spill] sm:$0xff] }
 0x7e7   :  { %v5876_v24 = vpop.eup %5875  ;;  %v3103_v61 = vadd.f32 1e-05, %v2959_v15 }
 0x7e8   :  { %v3768_v21 = vmul.f32 %v5876_v24, %v3128_v60  ;;  %v9213_v18 = vpop.eup %5877  ;;  %vm3774_vm13 = vweird.f32 %v5876_v24  ;;  %v3056_v60 = vld [vmem:[%s10130_s6 + $0x1f8] sm:$0xff] }
 0x7e9   :  { %5879 = vrsqrt.f32 %v3103_v61  ;;  %v3778_v34 = vmul.f32 %v9213_v18, %v9198_v11  ;;  %vm3775_vm15 = vmor %vm3773_vm14, %vm3774_vm13  ;;  %vm3523_vm2 = vweird.f32 %v3103_v61  ;;  %vm3784_vm5 = vweird.f32 %v9213_v18 }
 0x7ea   :  { %5881 = vrsqrt.f32 %v9210_v39  ;;  %v3769_v26 = vmul.f32 %v5876_v24, %v3768_v21  ;;  %v10527_v21 = vld [vmem:[#allocation38_spill] sm:$0xff]  ;;  %vm3785_vm6 = vmor %vm3783_vm3, %vm3784_vm5 }
 0x7eb   :  { %v3779_v7 = vmul.f32 %v9213_v18, %v3778_v34 }
 0x7ec   :  { %v3770_v9 = vmul.f32 0.5, %v3769_v26 }
 0x7ed   :  { %v3780_v51 = vmul.f32 0.5, %v3779_v7 }
 0x7ee   :  { %v3771_v12 = vsub.f32 1.5, %v3770_v9 }
 0x7ef   :  { %v5880_v4 = vpop.eup %5879  ;;  %v3781_v1 = vsub.f32 1.5, %v3780_v51  ;;  %v10529_v51 = vld [vmem:[#allocation84_spill] sm:$0xff] }
 0x7f0   :  { %v9217_v62 = vpop.eup %5881  ;;  %v3518_v42 = vmul.f32 %v5880_v4, %v3103_v61  ;;  %v4373_v31 = vpop.permute.xlu1 %4372  ;;  %v3772_v28 = vmul.f32 %v5876_v24, %v3771_v12  ;;  %vm3524_vm0 = vweird.f32 %v5880_v4  ;;  %v3031_v12 = vld [vmem:[%s10130_s6 + $0x130] sm:$0xff] }
 0x7f1   :  { %v3658_v57 = vmul.f32 %v9217_v62, %v9210_v39  ;;  %v4595_v15 = vmul.f32 %v4373_v31, %v10526_v32  ;;  %v4596_v26 = vmul.f32 %v4373_v31, %v10527_v21  ;;  %vm3525_vm4 = vmor %vm3523_vm2, %vm3524_vm0  ;;  %vm3664_vm7 = vweird.f32 %v9217_v62  ;;  %v3947_v39 = vld [vmem:[%s10131_s7 + $0x90] sm:$0xff] }
 0x7f2   :  { %v3519_v45 = vmul.f32 %v5880_v4, %v3518_v42  ;;  %v3776_v9 = vsel %vm3775_vm15, %v5876_v24, %v3772_v28  ;;  %vm3665_vm9 = vmor %vm3663_vm8, %vm3664_vm7  ;;  %v3045_v28 = vld [vmem:[%s10130_s6 + $0x1a0] sm:$0xff] }
 0x7f3   :  { %v4897_v38 = vpop.permute.xlu0 %4896  ;;  %v3659_v34 = vmul.f32 %v9217_v62, %v3658_v57  ;;  %v9248_v31 = vmul.f32 %v3776_v9, %v3056_v60  ;;  %v3967_v57 = vld [vmem:[%s10131_s7 + $0x130] sm:$0xff]  ;;  %v10531_v60 = vld [vmem:[#allocation94_spill] sm:$0xff] }
 0x7f4   :  { %v3520_v13 = vmul.f32 0.5, %v3519_v45  ;;  %v5107_v50 = vadd.f32 %v4897_v38, %v4603_v46  ;;  %v5108_v10 = vadd.f32 %v4897_v38, %v4604_v27  ;;  %v3057_v38 = vld [vmem:[%s10130_s6 + $0x200] sm:$0xff]  ;;  %v2753_v9 = vmul.f32 0.0051020407, %v10531_v60 }
 0x7f5   :  { %v9255_v61 = vmul.f32 %v9248_v31, %v9177_v23  ;;  %v3660_v11 = vmul.f32 0.5, %v3659_v34 }
 0x7f6   :  { %v3521_v44 = vsub.f32 1.5, %v3520_v13  ;;  %5251 = vst [vmem:[%s10132_s8 + $0x310] sm:$0xff] %v5107_v50 }
 0x7f7   :  { %5252 = vst.msk [vmem:[%s10132_s8 + $0x318] sm:$0xff] %vm621_vm1, %v5108_v10  ;;  %v3661_v23 = vsub.f32 1.5, %v3660_v11  ;;  %v10528_v10 = vld [vmem:[#allocation67_spill] sm:$0xff] }
 0x7f8   :  { %v4877_v42 = vpop.permute.xlu1 %4876  ;;  %v3522_v7 = vmul.f32 %v5880_v4, %v3521_v44  ;;  %v4091_v44 = vsub.f32 %v3947_v39, %v10529_v51  ;;  %v2406_v39 = vmul.f32 %v10523_v41, %v10523_v41 }
 0x7f9   :  { %v5099_v5 = vadd.f32 %v4877_v42, %v4595_v15  ;;  %v5100_v46 = vadd.f32 %v4877_v42, %v4596_v26  ;;  %2079 = vadd.xlane.f32.xlu0 %v2078_v0  ;;  %v3662_v29 = vmul.f32 %v9217_v62, %v3661_v23  ;;  %v10530_v15 = vld [vmem:[#allocation87_spill] sm:$0xff] }
 0x7fa   :  { %v3526_v24 = vsel %vm3525_vm4, %v5880_v4, %v3522_v7  ;;  %v3782_v4 = vmul.f32 %v9213_v18, %v3781_v1  ;;  %v9294_v21 = vmul.f32 0.0051020407, %v10530_v15 }
 0x7fb   :  { %5243 = vst [vmem:[%s10132_s8 + $0x2d0] sm:$0xff] %v5099_v5  ;;  %2179 = vadd.xlane.f32.xlu1 %v2178_v54  ;;  %v3895_v27 = vmul.f32 %v3526_v24, %v3031_v12 }
 0x7fc   :  { %5244 = vst.msk [vmem:[%s10132_s8 + $0x2d8] sm:$0xff] %vm621_vm1, %v5100_v46  ;;  %v3786_v52 = vsel %vm3785_vm6, %v9213_v18, %v3782_v4  ;;  %v3666_v18 = vsel %vm3665_vm9, %v9217_v62, %v3662_v29  ;;  %v2825_v42 = vmul.f32 %v9294_v21, %v9294_v21 }
 0x7fd   :  { %4337 = vperm.xlu2 %5760, %v3895_v27   ;;  %v4039_v45 = vmul.f32 %v3895_v27, %v9194_v22  ;;  %v9273_v13 = vmul.f32 %v3786_v52, %v3057_v38  ;;  %v9286_v0 = vmul.f32 %v3666_v18, %v3045_v28  ;;  %v2355_v52 = vmul.f32 %v9222_v37, %v9222_v37 }
 0x7fe   :  { %v2897_v5 = vsub.f32 %v2753_v9, %v2825_v42 }
 0x7ff   :  { %v4111_v50 = vsub.f32 %v3967_v57, %v4039_v45  ;;  %v9279_v22 = vmul.f32 %v9273_v13, %v10528_v10  ;;  %v2356_v57 = vmul.f32 %v10524_v3, %v10524_v3 }
 0x800   :  { %v2969_v4 = vmax.f32 %v2897_v5, 0.0 }
 0x801   :  { %v2581_v29 = vsel %vm621_vm1, %v2356_v57, 0.0 }
 0x802   :  { %v2582_v18 = vadd.f32 %v2581_v29, %v2355_v52 }
 0x805   :  { %4841 = vperm.xlu2 %5760, %v4111_v50   ;;  %v9307_v50 = vadd.f32 1e-05, %v2969_v4 }
 0x807   :  { %vm3623_vm2 = vweird.f32 %v9307_v50 }
 0x80d   :  { %4407 = vperm.xlu0 %5758, %v9286_v0  }
 0x814   :  { %4741 = vperm.xlu1 %5759, %v4091_v44   ;;  %v2405_v44 = vmul.f32 %v10525_v49, %v10525_v49 }
 0x81e   :  { %v2188_v54 = vpop.xlane.xlu0 %2187 }
 0x81f   :  { %v2269_v32 = vmul.f32 0.0051020407, %v2188_v54 }
 0x821   :  { %v2845_v62 = vmul.f32 %v2269_v32, %v2269_v32 }
 0x823   :  { %v2060_v26 = vpop.xlane.xlu1 %2059 }
 0x824   :  { %v9299_v7 = vmul.f32 0.0051020407, %v2060_v26  ;;  %v2681_v26 = vsel %vm621_vm1, %v2406_v39, 0.0 }
 0x826   :  { %v2692_v34 = vpop.xlane.xlu0 %2691  ;;  %v2813_v27 = vmul.f32 %v9299_v7, %v9299_v7 }
 0x827   :  { %v2773_v12 = vmul.f32 0.0051020407, %v2692_v34 }
 0x829   :  { %v2917_v46 = vsub.f32 %v2773_v12, %v2845_v62  ;;  %v2682_v12 = vadd.f32 %v2681_v26, %v2405_v44 }
 0x82b   :  { %v2989_v1 = vmax.f32 %v2917_v46, 0.0  ;;  %v2564_v24 = vpop.xlane.xlu1 %2563 }
 0x82c   :  { %v2741_v11 = vmul.f32 0.0051020407, %v2564_v24 }
 0x82d   :  { %v3133_v45 = vadd.f32 1e-05, %v2989_v1  ;;  %v3061_v1 = vld [vmem:[%s10130_s6 + $0x220] sm:$0xff] }
 0x82e   :  { %v2885_v23 = vsub.f32 %v2741_v11, %v2813_v27  ;;  %v10532_v11 = vld [vmem:[#allocation80_spill] sm:$0xff] }
 0x82f   :  { %5883 = vrsqrt.f32 %v3133_v45  ;;  %vm3823_vm10 = vweird.f32 %v3133_v45 }
 0x830   :  { %v2957_v38 = vmax.f32 %v2885_v23, 0.0  ;;  %v10533_v23 = vld [vmem:[#allocation79_spill] sm:$0xff] }
 0x832   :  { %v3101_v10 = vadd.f32 1e-05, %v2957_v38 }
 0x834   :  { %5885 = vrsqrt.f32 %v3101_v10  ;;  %vm3503_vm14 = vweird.f32 %v3101_v10 }
 0x835   :  { %v5884_v28 = vpop.eup %5883  ;;  %5887 = vrsqrt.f32 %v9307_v50 }
 0x836   :  { %v3818_v51 = vmul.f32 %v5884_v28, %v3133_v45  ;;  %vm3824_vm11 = vweird.f32 %v5884_v28 }
 0x837   :  { %2583 = vadd.xlane.f32.xlu0 %v2582_v18  ;;  %vm3825_vm12 = vmor %vm3823_vm10, %vm3824_vm11 }
 0x838   :  { %v3819_v54 = vmul.f32 %v5884_v28, %v3818_v51 }
 0x839   :  { %v4258_v15 = vpop.permute.xlu0 %4257 }
 0x83a   :  { %v5886_v60 = vpop.eup %5885  ;;  %v3820_v9 = vmul.f32 0.5, %v3819_v54  ;;  %v4549_v4 = vmul.f32 %v4258_v15, %v10532_v11  ;;  %v4550_v45 = vmul.f32 %v4258_v15, %v10533_v23  ;;  %v3997_v54 = vld [vmem:[%s10131_s7 + $0x220] sm:$0xff]  ;;  %v10535_v23 = vld [vmem:[#allocation112_spill] sm:$0xff] }
 0x83b   :  { %v5888_v62 = vpop.eup %5887  ;;  %v3498_v34 = vmul.f32 %v5886_v60, %v3101_v10  ;;  %vm3504_vm13 = vweird.f32 %v5886_v60  ;;  %v10534_v10 = vsub.f32 %v8605_v2, %v8598_v55  ;;  %v9358_v2 = vmul.f32 0.0051020407, %v10535_v23 }
 0x83c   :  { %v3821_v42 = vsub.f32 1.5, %v3820_v9  ;;  %v3618_v46 = vmul.f32 %v5888_v62, %v9307_v50  ;;  %vm3505_vm15 = vmor %vm3503_vm14, %vm3504_vm13  ;;  %vm3624_vm0 = vweird.f32 %v5888_v62  ;;  %v3977_v50 = vld [vmem:[%s10131_s7 + $0x180] sm:$0xff] }
 0x83d   :  { %v3499_v5 = vmul.f32 %v5886_v60, %v3498_v34  ;;  %vm3625_vm3 = vmor %vm3623_vm2, %vm3624_vm0 }
 0x83e   :  { %2683 = vadd.xlane.f32.xlu1 %v2682_v12  ;;  %v3822_v24 = vmul.f32 %v5884_v28, %v3821_v42  ;;  %v3619_v29 = vmul.f32 %v5888_v62, %v3618_v46  ;;  %v3029_v12 = vld [vmem:[%s10130_s6 + $0x120] sm:$0xff] }
 0x83f   :  { %v3500_v27 = vmul.f32 0.5, %v3499_v5 }
 0x840   :  { %v3826_v57 = vsel %vm3825_vm12, %v5884_v28, %v3822_v24  ;;  %v4053_v28 = vmul.f32 %v9286_v0, %v9184_v47  ;;  %v3620_v15 = vmul.f32 0.5, %v3619_v29 }
 0x841   :  { %v4762_v38 = vpop.permute.xlu0 %4761  ;;  %v3925_v52 = vmul.f32 %v3826_v57, %v3061_v1  ;;  %v3501_v44 = vsub.f32 1.5, %v3500_v27  ;;  %v2988_v1 = vmax.f32 %v10534_v10, 0.0 }
 0x842   :  { %v5053_v18 = vadd.f32 %v4762_v38, %v4549_v4  ;;  %v5054_v39 = vadd.f32 %v4762_v38, %v4550_v45  ;;  %v3621_v42 = vsub.f32 1.5, %v3620_v15  ;;  %v2802_v38 = vmul.f32 %v9358_v2, %v9358_v2  ;;  %v10537_v15 = vld [vmem:[#allocation114_spill] sm:$0xff] }
 0x843   :  { %4487 = vperm.xlu2 %5760, %v3925_v52   ;;  %v4069_v51 = vmul.f32 %v3925_v52, %v2269_v32  ;;  %v3981_v32 = vld [vmem:[%s10131_s7 + $0x1a0] sm:$0xff]  ;;  %v3502_v9 = vmul.f32 %v5886_v60, %v3501_v44  ;;  %v3132_v27 = vadd.f32 1e-05, %v2988_v1  ;;  %v10536_v52 = vld [vmem:[#allocation113_spill] sm:$0xff]  ;;  %v4238_v23 = vpop.permute.xlu1 %4237 }
 0x844   :  { %5197 = vst [vmem:[%s10132_s8 + $0x160] sm:$0xff] %v5053_v18  ;;  %v4125_v34 = vsub.f32 %v3981_v32, %v4053_v28  ;;  %v3622_v46 = vmul.f32 %v5888_v62, %v3621_v42  ;;  %v2730_v29 = vmul.f32 0.0051020407, %v10536_v52  ;;  %v9373_v32 = vmul.f32 0.0051020407, %v10537_v15  ;;  %v9379_v42 = vpop.f32.mrf.mxu2 }
 0x845   :  { %5198 = vst.msk [vmem:[%s10132_s8 + $0x168] sm:$0xff] %vm621_vm1, %v5054_v39  ;;  %v4141_v26 = vsub.f32 %v3997_v54, %v4069_v51  ;;  %v3506_v5 = vsel %vm3505_vm15, %v5886_v60, %v3502_v9  ;;  %v3041_v60 = vld [vmem:[%s10130_s6 + $0x180] sm:$0xff]  ;;  %5889 = vrsqrt.f32 %v3132_v27  ;;  %vm3813_vm4 = vweird.f32 %v3132_v27 }
 0x846   :  { %v9340_v47 = vmul.f32 %v3506_v5, %v3029_v12  ;;  %v3626_v24 = vsel %vm3625_vm3, %v5888_v62, %v3622_v46  ;;  %v2874_v44 = vsub.f32 %v2730_v29, %v2802_v38  ;;  %v2832_v12 = vmul.f32 %v9373_v32, %v9373_v32  ;;  %v10538_v5 = vld [vmem:[#allocation115_spill] sm:$0xff] }
 0x847   :  { %v3905_v11 = vmul.f32 %v3626_v24, %v3041_v60  ;;  %v2760_v46 = vmul.f32 0.0051020407, %v10538_v5 }
 0x848   :  { %v9344_v0 = vmul.f32 %v9340_v47, %v9299_v7 }
 0x849   :  { %v4049_v7 = vmul.f32 %v3905_v11, %v9294_v21  ;;  %v2904_v24 = vsub.f32 %v2760_v46, %v2832_v12  ;;  %v10542_v12 = vld [vmem:[#allocation47_spill] sm:$0xff]  ;;  %v10543_v46 = vld [vmem:[#allocation44_spill] sm:$0xff] }
 0x84a   :  { %v4541_v5 = vmul.f32 %v4238_v23, %v10542_v12  ;;  %v10547_v12 = vld [vmem:[#allocation52_spill] sm:$0xff] }
 0x84b   :  { %4991 = vperm.xlu2 %5760, %v4141_v26   ;;  %4911 = vperm.xlu0 %5758, %v4125_v34   ;;  %v4121_v55 = vsub.f32 %v3977_v50, %v4049_v7  ;;  %v5890_v45 = vpop.eup %5889  ;;  %v9375_v26 = vpop.f32.mrf.mxu3  ;;  %v2415_v50 = vmul.f32 %v9379_v42, %v9379_v42  ;;  %v2976_v38 = vmax.f32 %v2904_v24, 0.0 }
 0x84c   :  { %v3808_v51 = vmul.f32 %v5890_v45, %v3132_v27  ;;  %vm3814_vm5 = vweird.f32 %v5890_v45  ;;  %v2197_v34 = vsel %vm621_vm1, %v9375_v26, 0.0  ;;  %v2416_v60 = vmul.f32 %v9375_v26, %v9375_v26  ;;  %v3060_v27 = vld [vmem:[%s10130_s6 + $0x218] sm:$0xff] }
 0x84d   :  { %vm3815_vm6 = vmor %vm3813_vm4, %vm3814_vm5  ;;  %v2198_v10 = vadd.f32 %v2197_v34, %v9379_v42 }
 0x857   :  { %v4338_v4 = vpop.permute.xlu2 %4337  ;;  %4387 = vperm.xlu1 %5759, %v3905_v11  }
 0x858   :  { %v4581_v57 = vmul.f32 %v4338_v4, %v8496_v48  ;;  %v4582_v62 = vmul.f32 %v4338_v4, %v10489_v19  ;;  %v3809_v48 = vmul.f32 %v5890_v45, %v3808_v51  ;;  %v2946_v19 = vmax.f32 %v2874_v44, 0.0 }
 0x85a   :  { %v3810_v54 = vmul.f32 0.5, %v3809_v48  ;;  %v3090_v28 = vadd.f32 1e-05, %v2946_v19  ;;  %v10541_v48 = vld [vmem:[#allocation60_spill] sm:$0xff] }
 0x85b   :  { %v2733_v19 = vmul.f32 0.0051020407, %v10541_v48  ;;  %v3018_v48 = vld [vmem:[%s10130_s6 + $0xc8] sm:$0xff] }
 0x85c   :  { %v3811_v9 = vsub.f32 1.5, %v3810_v54  ;;  %5891 = vrsqrt.f32 %v3090_v28  ;;  %vm3393_vm8 = vweird.f32 %v3090_v28 }
 0x85e   :  { %v3812_v1 = vmul.f32 %v5890_v45, %v3811_v9 }
 0x85f   :  { %v4842_v18 = vpop.permute.xlu2 %4841  ;;  %4891 = vperm.xlu1 %5759, %v4121_v55   ;;  %v2701_v55 = vsel %vm621_vm1, %v2416_v60, 0.0 }
 0x860   :  { %v5085_v21 = vadd.f32 %v4842_v18, %v4581_v57  ;;  %v5086_v39 = vadd.f32 %v4842_v18, %v4582_v62  ;;  %v3816_v11 = vsel %vm3815_vm6, %v5890_v45, %v3812_v1  ;;  %v10539_v57 = vld [vmem:[#allocation71_spill] sm:$0xff]  ;;  %v2702_v29 = vadd.f32 %v2701_v55, %v2415_v50 }
 0x861   :  { %v9390_v4 = vmul.f32 %v3816_v11, %v3060_v27  ;;  %v3120_v18 = vadd.f32 1e-05, %v2976_v38  ;;  %v10544_v1 = vld [vmem:[#allocation15_spill] sm:$0xff]  ;;  %v10545_v27 = vld [vmem:[#allocation41_spill] sm:$0xff] }
 0x862   :  { %5229 = vst [vmem:[%s10132_s8 + $0x260] sm:$0xff] %v5085_v21  ;;  %v5892_v7 = vpop.eup %5891  ;;  %v10540_v21 = vld [vmem:[#allocation126_spill] sm:$0xff]  ;;  %v2069_v60 = vsel %vm621_vm1, %v10544_v1, 0.0 }
 0x863   :  { %5230 = vst.msk [vmem:[%s10132_s8 + $0x268] sm:$0xff] %vm621_vm1, %v5086_v39  ;;  %v9397_v62 = vmul.f32 %v9390_v4, %v10539_v57  ;;  %v3388_v52 = vmul.f32 %v5892_v7, %v3090_v28  ;;  %v9400_v45 = vmul.f32 0.0051020407, %v10540_v21  ;;  %5893 = vrsqrt.f32 %v3120_v18  ;;  %v10546_v21 = vld [vmem:[#allocation16_spill] sm:$0xff] }
 0x864   :  { %vm3394_vm7 = vweird.f32 %v5892_v7  ;;  %v2070_v11 = vadd.f32 %v2069_v60, %v10545_v27  ;;  %v2351_v28 = vmul.f32 %v10545_v27, %v10545_v27  ;;  %vm3693_vm10 = vweird.f32 %v3120_v18 }
 0x865   :  { %v3389_v39 = vmul.f32 %v5892_v7, %v3388_v52  ;;  %v2805_v44 = vmul.f32 %v9400_v45, %v9400_v45  ;;  %vm3395_vm9 = vmor %vm3393_vm8, %vm3394_vm7 }
 0x867   :  { %v3390_v54 = vmul.f32 0.5, %v3389_v39  ;;  %v2877_v15 = vsub.f32 %v2733_v19, %v2805_v44  ;;  %v9424_v39 = vmul.f32 0.0051020407, %v10546_v21 }
 0x869   :  { %v3391_v9 = vsub.f32 1.5, %v3390_v54  ;;  %v5894_v34 = vpop.eup %5893  ;;  %v2949_v50 = vmax.f32 %v2877_v15, 0.0 }
 0x86a   :  { %v3688_v38 = vmul.f32 %v5894_v34, %v3120_v18  ;;  %vm3694_vm11 = vweird.f32 %v5894_v34 }
 0x86b   :  { %v3392_v52 = vmul.f32 %v5892_v7, %v3391_v9  ;;  %v2835_v9 = vmul.f32 %v9424_v39, %v9424_v39  ;;  %vm3695_vm12 = vmor %vm3693_vm10, %vm3694_vm11 }
 0x86c   :  { %v3689_v44 = vmul.f32 %v5894_v34, %v3688_v38 }
 0x86d   :  { %v3396_v19 = vsel %vm3395_vm9, %v5892_v7, %v3392_v52  ;;  %v3954_v7 = vld [vmem:[%s10131_s7 + $0xc8] sm:$0xff] }
 0x86e   :  { %v9402_v51 = vpop.xlane.xlu1 %2179 }
 0x875   :  { %2199 = vadd.xlane.f32.xlu0 %v2198_v10  ;;  %v4542_v10 = vmul.f32 %v4238_v23, %v10543_v46  ;;  %v3093_v23 = vadd.f32 1e-05, %v2949_v50  ;;  %v3882_v46 = vmul.f32 %v3396_v19, %v3018_v48  ;;  %v3048_v48 = vld [vmem:[%s10130_s6 + $0x1b8] sm:$0xff] }
 0x877   :  { %5895 = vrsqrt.f32 %v3093_v23  ;;  %vm3423_vm13 = vweird.f32 %v3093_v23 }
 0x87d   :  { %2703 = vadd.xlane.f32.xlu0 %v2702_v29  ;;  %v2352_v29 = vmul.f32 %v10544_v1, %v10544_v1  ;;  %v5896_v50 = vpop.eup %5895 }
 0x87e   :  { %v3418_v38 = vmul.f32 %v5896_v50, %v3093_v23  ;;  %vm3424_vm14 = vweird.f32 %v5896_v50 }
 0x87f   :  { %v2573_v54 = vsel %vm621_vm1, %v2352_v29, 0.0  ;;  %v2080_v29 = vpop.xlane.xlu0 %2079  ;;  %vm9466_vm15 = vmor %vm3423_vm13, %vm3424_vm14 }
 0x880   :  { %v2574_v15 = vadd.f32 %v2573_v54, %v2351_v28  ;;  %v3419_v21 = vmul.f32 %v5896_v50, %v3418_v38  ;;  %v10549_v54 = vld [vmem:[#allocation72_spill] sm:$0xff] }
 0x886   :  { %v4742_v24 = vpop.permute.xlu1 %4741 }
 0x887   :  { %v5045_v55 = vadd.f32 %v4742_v24, %v4541_v5  ;;  %v5046_v57 = vadd.f32 %v4742_v24, %v4542_v10  ;;  %v2763_v5 = vmul.f32 0.0051020407, %v10547_v12  ;;  %v3690_v10 = vmul.f32 0.5, %v3689_v44  ;;  %v10548_v44 = vld [vmem:[#allocation54_spill] sm:$0xff] }
 0x888   :  { %v4026_v24 = vmul.f32 %v3882_v46, %v9358_v2  ;;  %v9440_v2 = vmul.f32 0.0051020407, %v10548_v44  ;;  %v3420_v12 = vmul.f32 0.5, %v3419_v21  ;;  %v9459_v44 = vmul.f32 0.0051020407, %v2080_v29 }
 0x889   :  { %5189 = vst [vmem:[%s10132_s8 + $0x120] sm:$0xff] %v5045_v55  ;;  %2071 = vadd.xlane.f32.xlu1 %v2070_v11  ;;  %v2907_v60 = vsub.f32 %v2763_v5, %v2835_v9  ;;  %v3691_v11 = vsub.f32 1.5, %v3690_v10  ;;  %v9449_v10 = vpop.permute.xlu0 %4407 }
 0x88a   :  { %5190 = vst.msk [vmem:[%s10132_s8 + $0x128] sm:$0xff] %vm621_vm1, %v5046_v57  ;;  %v4098_v57 = vsub.f32 %v3954_v7, %v4026_v24  ;;  %v2808_v5 = vmul.f32 %v9440_v2, %v9440_v2  ;;  %v3421_v24 = vsub.f32 1.5, %v3420_v12  ;;  %v3984_v7 = vld [vmem:[%s10131_s7 + $0x1b8] sm:$0xff] }
 0x88b   :  { %v2979_v55 = vmax.f32 %v2907_v60, 0.0  ;;  %v3692_v52 = vmul.f32 %v5894_v34, %v3691_v11 }
 0x88d   :  { %v9437_v28 = vadd.f32 1e-05, %v2979_v55  ;;  %v3696_v19 = vsel %vm3695_vm12, %v5894_v34, %v3692_v52 }
 0x88e   :  { %v3912_v9 = vmul.f32 %v3696_v19, %v3048_v48  ;;  %v10552_v19 = vld [vmem:[#allocation101_spill] sm:$0xff] }
 0x88f   :  { %5897 = vrsqrt.f32 %v9437_v28  ;;  %vm3723_vm0 = vweird.f32 %v9437_v28 }
 0x890   :  { %v4056_v60 = vmul.f32 %v3912_v9, %v9373_v32 }
 0x891   :  { %4272 = vperm.xlu0 %5758, %v3882_v46   ;;  %2575 = vadd.xlane.f32.xlu1 %v2574_v15  ;;  %v2736_v15 = vmul.f32 0.0051020407, %v10549_v54 }
 0x892   :  { %v4128_v32 = vsub.f32 %v3984_v7, %v4056_v60 }
 0x893   :  { %v2880_v46 = vsub.f32 %v2736_v15, %v2808_v5  ;;  %v2818_v15 = vmul.f32 %v9459_v44, %v9459_v44  ;;  %v3021_v5 = vld [vmem:[%s10130_s6 + $0xe0] sm:$0xff] }
 0x895   :  { %v9457_v55 = vpop.eup %5897  ;;  %v2952_v38 = vmax.f32 %v2880_v46, 0.0 }
 0x896   :  { %vm3724_vm2 = vweird.f32 %v9457_v55 }
 0x897   :  { %v9474_v23 = vadd.f32 1e-05, %v2952_v38  ;;  %vm9508_vm3 = vmor %vm3723_vm0, %vm3724_vm2 }
 0x899   :  { %4776 = vperm.xlu0 %5758, %v4098_v57   ;;  %5899 = vrsqrt.f32 %v9474_v23  ;;  %vm3453_vm7 = vweird.f32 %v9474_v23 }
 0x89d   :  { %v4488_v18 = vpop.permute.xlu2 %4487 }
 0x89e   :  { %v4641_v11 = vmul.f32 %v4488_v18, %v8512_v36  ;;  %v4642_v34 = vmul.f32 %v4488_v18, %v8510_v63  ;;  %v3718_v36 = vmul.f32 %v9457_v55, %v9437_v28  ;;  %v3422_v63 = vmul.f32 %v5896_v50, %v3421_v24  ;;  %v10553_v18 = vld [vmem:[#allocation75_spill] sm:$0xff] }
 0x89f   :  { %v9478_v54 = vmul.f32 0.0051020407, %v10553_v18  ;;  %v9490_v24 = vmul.f32 0.0051020407, %v9402_v51  ;;  %v9498_v48 = vpop.eup %5899  ;;  %v3957_v18 = vld [vmem:[%s10131_s7 + $0xe0] sm:$0xff] }
 0x8a0   :  { %v3719_v12 = vmul.f32 %v9457_v55, %v3718_v36  ;;  %v3426_v46 = vsel %vm9466_vm15, %v5896_v50, %v3422_v63  ;;  %vm3454_vm8 = vweird.f32 %v9498_v48 }
 0x8a1   :  { %4422 = vperm.xlu0 %5758, %v3912_v9   ;;  %v3885_v38 = vmul.f32 %v3426_v46, %v3021_v5  ;;  %v2843_v50 = vmul.f32 %v9490_v24, %v9490_v24  ;;  %vm3455_vm9 = vmor %vm3453_vm7, %vm3454_vm8 }
 0x8a3   :  { %v4029_v51 = vmul.f32 %v3885_v38, %v9400_v45 }
 0x8a5   :  { %v4992_v57 = vpop.permute.xlu2 %4991  ;;  %v4101_v5 = vsub.f32 %v3957_v18, %v4029_v51 }
 0x8a6   :  { %v5145_v52 = vadd.f32 %v4992_v57, %v4641_v11  ;;  %v5146_v21 = vadd.f32 %v4992_v57, %v4642_v34  ;;  %v2838_v11 = vmul.f32 %v9478_v54, %v9478_v54  ;;  %v10554_v34 = vld [vmem:[#allocation24_spill] sm:$0xff] }
 0x8a7   :  { %v2766_v7 = vmul.f32 0.0051020407, %v10554_v34 }
 0x8a8   :  { %5289 = vst [vmem:[%s10132_s8 + $0x440] sm:$0xff] %v5145_v52  ;;  %v3720_v52 = vmul.f32 0.5, %v3719_v12 }
 0x8a9   :  { %5290 = vst.msk [vmem:[%s10132_s8 + $0x448] sm:$0xff] %vm621_vm1, %v5146_v21  ;;  %4926 = vperm.xlu0 %5758, %v4128_v32   ;;  %v2910_v63 = vsub.f32 %v2766_v7, %v2838_v11 }
 0x8aa   :  { %v2584_v29 = vpop.xlane.xlu0 %2583  ;;  %4252 = vperm.xlu1 %5759, %v10552_v19  }
 0x8ab   :  { %v2746_v9 = vmul.f32 0.0051020407, %v2584_v29  ;;  %v3721_v29 = vsub.f32 1.5, %v3720_v52  ;;  %v2982_v12 = vmax.f32 %v2910_v63, 0.0  ;;  %v10558_v52 = vld [vmem:[#allocation85_spill] sm:$0xff] }
 0x8ad   :  { %v2890_v60 = vsub.f32 %v2746_v9, %v2818_v15  ;;  %v3448_v9 = vmul.f32 %v9498_v48, %v9474_v23  ;;  %v3722_v45 = vmul.f32 %v9457_v55, %v3721_v29  ;;  %v9513_v7 = vadd.f32 1e-05, %v2982_v12 }
 0x8af   :  { %v2962_v57 = vmax.f32 %v2890_v60, 0.0  ;;  %v3449_v28 = vmul.f32 %v9498_v48, %v3448_v9  ;;  %v3726_v63 = vsel %vm9508_vm3, %v9457_v55, %v3722_v45  ;;  %v3034_v55 = vld [vmem:[%s10130_s6 + $0x148] sm:$0xff]  ;;  %vm3753_vm13 = vweird.f32 %v9513_v7 }
 0x8b1   :  { %v3106_v21 = vadd.f32 1e-05, %v2962_v57  ;;  %4287 = vperm.xlu0 %5758, %v3885_v38   ;;  %v2684_v32 = vpop.xlane.xlu1 %2683  ;;  %v10557_v57 = vld [vmem:[#allocation86_spill] sm:$0xff]  ;;  %v3450_v12 = vmul.f32 0.5, %v3449_v28 }
 0x8b2   :  { %v2771_v36 = vmul.f32 0.0051020407, %v2684_v32  ;;  %v4609_v38 = vmul.f32 %v9449_v10, %v10557_v57  ;;  %v4610_v32 = vmul.f32 %v9449_v10, %v10558_v52 }
 0x8b3   :  { %5901 = vrsqrt.f32 %v3106_v21  ;;  %vm3553_vm5 = vweird.f32 %v3106_v21  ;;  %v3451_v28 = vsub.f32 1.5, %v3450_v12 }
 0x8b4   :  { %v2915_v19 = vsub.f32 %v2771_v36, %v2843_v50  ;;  %v3051_v36 = vld [vmem:[%s10130_s6 + $0x1d0] sm:$0xff] }
 0x8b6   :  { %v2987_v15 = vmax.f32 %v2915_v19, 0.0 }
 0x8b8   :  { %v3131_v46 = vadd.f32 1e-05, %v2987_v15  ;;  %v3915_v15 = vmul.f32 %v3726_v63, %v3051_v36  ;;  %v3452_v63 = vmul.f32 %v9498_v48, %v3451_v28 }
 0x8b9   :  { %v5902_v60 = vpop.eup %5901  ;;  %4791 = vperm.xlu0 %5758, %v4101_v5  }
 0x8ba   :  { %v3548_v34 = vmul.f32 %v5902_v60, %v3106_v21  ;;  %5903 = vrsqrt.f32 %v3131_v46  ;;  %vm3554_vm4 = vweird.f32 %v5902_v60  ;;  %vm3803_vm11 = vweird.f32 %v3131_v46 }
 0x8bb   :  { %5905 = vrsqrt.f32 %v9513_v7  ;;  %vm3555_vm6 = vmor %vm3553_vm5, %vm3554_vm4 }
 0x8bc   :  { %v3549_v50 = vmul.f32 %v5902_v60, %v3548_v34  ;;  %v4059_v34 = vmul.f32 %v3915_v15, %v9424_v39 }
 0x8bd   :  { %v4912_v51 = vpop.permute.xlu0 %4911 }
 0x8be   :  { %v3550_v29 = vmul.f32 0.5, %v3549_v50  ;;  %v5113_v19 = vadd.f32 %v4912_v51, %v4609_v38  ;;  %v5114_v18 = vadd.f32 %v4912_v51, %v4610_v32  ;;  %v3987_v38 = vld [vmem:[%s10131_s7 + $0x1d0] sm:$0xff] }
 0x8bf   :  { %v4131_v21 = vsub.f32 %v3987_v38, %v4059_v34  ;;  %v10561_v34 = vld [vmem:[#allocation51_spill] sm:$0xff] }
 0x8c0   :  { %v5904_v9 = vpop.eup %5903  ;;  %v3551_v5 = vsub.f32 1.5, %v3550_v29  ;;  %5257 = vst [vmem:[%s10132_s8 + $0x340] sm:$0xff] %v5113_v19  ;;  %v3970_v29 = vld [vmem:[%s10131_s7 + $0x148] sm:$0xff] }
 0x8c1   :  { %v3798_v10 = vmul.f32 %v5904_v9, %v3131_v46  ;;  %5258 = vst.msk [vmem:[%s10132_s8 + $0x348] sm:$0xff] %vm621_vm1, %v5114_v18  ;;  %4437 = vperm.xlu0 %5758, %v3915_v15   ;;  %v5906_v52 = vpop.eup %5905  ;;  %vm3804_vm10 = vweird.f32 %v5904_v9  ;;  %v3024_v18 = vld [vmem:[%s10130_s6 + $0xf8] sm:$0xff]  ;;  %v3456_v15 = vsel %vm3455_vm9, %v9498_v48, %v3452_v63 }
 0x8c2   :  { %v3552_v45 = vmul.f32 %v5902_v60, %v3551_v5  ;;  %v3748_v36 = vmul.f32 %v5906_v52, %v9513_v7  ;;  %vm3805_vm12 = vmor %vm3803_vm11, %vm3804_vm10  ;;  %vm3754_vm14 = vweird.f32 %v5906_v52 }
 0x8c3   :  { %v3799_v11 = vmul.f32 %v5904_v9, %v3798_v10  ;;  %v3888_v10 = vmul.f32 %v3456_v15, %v3024_v18  ;;  %vm3755_vm15 = vmor %vm3753_vm13, %vm3754_vm14  ;;  %v3990_v15 = vld [vmem:[%s10131_s7 + $0x1e8] sm:$0xff] }
 0x8c4   :  { %v3556_v57 = vsel %vm3555_vm6, %v5902_v60, %v3552_v45  ;;  %v3749_v19 = vmul.f32 %v5906_v52, %v3748_v36  ;;  %v10560_v45 = vld [vmem:[#allocation53_spill] sm:$0xff] }
 0x8c5   :  { %v3898_v32 = vmul.f32 %v3556_v57, %v3034_v55  ;;  %v3800_v50 = vmul.f32 0.5, %v3799_v11  ;;  %v3059_v57 = vld [vmem:[%s10130_s6 + $0x210] sm:$0xff]  ;;  %v4032_v63 = vmul.f32 %v3888_v10, %v9440_v2 }
 0x8c6   :  { %v3750_v55 = vmul.f32 0.5, %v3749_v19 }
 0x8c7   :  { %4352 = vperm.xlu2 %5760, %v3898_v32   ;;  %v4042_v39 = vmul.f32 %v3898_v32, %v9459_v44  ;;  %v3801_v60 = vsub.f32 1.5, %v3800_v50  ;;  %v10559_v44 = vld [vmem:[#allocation46_spill] sm:$0xff]  ;;  %v10562_v32 = vld [vmem:[#allocation45_spill] sm:$0xff] }
 0x8c8   :  { %v2189_v23 = vsel %vm621_vm1, %v10559_v44, 0.0 }
 0x8c9   :  { %4941 = vperm.xlu0 %5758, %v4131_v21   ;;  %v4388_v51 = vpop.permute.xlu1 %4387  ;;  %v4114_v12 = vsub.f32 %v3970_v29, %v4042_v39  ;;  %v3802_v5 = vmul.f32 %v5904_v9, %v3801_v60  ;;  %v2190_v50 = vadd.f32 %v2189_v23, %v10562_v32  ;;  %v3054_v60 = vld [vmem:[%s10130_s6 + $0x1e8] sm:$0xff] }
 0x8ca   :  { %v4601_v11 = vmul.f32 %v4388_v51, %v10560_v45  ;;  %v4602_v28 = vmul.f32 %v4388_v51, %v10561_v34  ;;  %v3751_v51 = vsub.f32 1.5, %v3750_v55  ;;  %v10564_v34 = vld [vmem:[#allocation30_spill] sm:$0xff] }
 0x8cb   :  { %v3806_v38 = vsel %vm3805_vm12, %v5904_v9, %v3802_v5  ;;  %v3960_v9 = vld [vmem:[%s10131_s7 + $0xf8] sm:$0xff]  ;;  %v3950_v5 = vld [vmem:[%s10131_s7 + $0xa8] sm:$0xff] }
 0x8cc   :  { %v9559_v46 = vmul.f32 %v3806_v38, %v3059_v57  ;;  %v4104_v2 = vsub.f32 %v3960_v9, %v4032_v63 }
 0x8ce   :  { %v9565_v39 = vmul.f32 %v9559_v46, %v9490_v24  ;;  %v3752_v24 = vmul.f32 %v5906_v52, %v3751_v51  ;;  %v10567_v51 = vld [vmem:[#allocation127_spill] sm:$0xff] }
 0x8cf   :  { %4856 = vperm.xlu2 %5760, %v4114_v12   ;;  %v2756_v9 = vmul.f32 0.0051020407, %v10567_v51 }
 0x8d0   :  { %v3756_v29 = vsel %vm3755_vm15, %v5906_v52, %v3752_v24 }
 0x8d1   :  { %4302 = vperm.xlu0 %5758, %v3888_v10   ;;  %v4892_v48 = vpop.permute.xlu1 %4891  ;;  %v3918_v19 = vmul.f32 %v3756_v29, %v3054_v60  ;;  %v10563_v10 = vld [vmem:[#allocation102_spill] sm:$0xff]  ;;  %v2991_v60 = vmax.f32 %v2919_v35, 0.0 }
 0x8d2   :  { %v5105_v21 = vadd.f32 %v4892_v48, %v4601_v11  ;;  %v5106_v36 = vadd.f32 %v4892_v48, %v4602_v28  ;;  %v4094_v55 = vsub.f32 %v3950_v5, %v10563_v10  ;;  %v3963_v28 = vld [vmem:[%s10131_s7 + $0x110] sm:$0xff]  ;;  %v10565_v48 = vld [vmem:[#allocation63_spill] sm:$0xff] }
 0x8d3   :  { %v4062_v18 = vmul.f32 %v3918_v19, %v9478_v54 }
 0x8d4   :  { %5249 = vst [vmem:[%s10132_s8 + $0x300] sm:$0xff] %v5105_v21  ;;  %2191 = vadd.xlane.f32.xlu1 %v2190_v50  ;;  %v4107_v50 = vsub.f32 %v3963_v28, %v10565_v48  ;;  %v10566_v21 = vld [vmem:[#allocation110_spill] sm:$0xff] }
 0x8d5   :  { %5250 = vst.msk [vmem:[%s10132_s8 + $0x308] sm:$0xff] %vm621_vm1, %v5106_v36  ;;  %v4134_v12 = vsub.f32 %v3990_v15, %v4062_v18  ;;  %v9595_v36 = vmul.f32 0.0051020407, %v10566_v21  ;;  %v10569_v48 = vld [vmem:[#allocation90_spill] sm:$0xff] }
 0x8d7   :  { %v2828_v24 = vmul.f32 %v9595_v36, %v9595_v36 }
 0x8d9   :  { %4806 = vperm.xlu0 %5758, %v4104_v2   ;;  %v2900_v18 = vsub.f32 %v2756_v9, %v2828_v24  ;;  %v10570_v9 = vld [vmem:[#allocation17_spill] sm:$0xff] }
 0x8da   :  { %v9625_v24 = vmul.f32 0.0051020407, %v10570_v9 }
 0x8db   :  { %v2972_v35 = vmax.f32 %v2900_v18, 0.0 }
 0x8dd   :  { %v9618_v28 = vadd.f32 1e-05, %v2972_v35 }
 0x8df   :  { %vm3653_vm11 = vweird.f32 %v9618_v28 }
 0x8e1   :  { %4452 = vperm.xlu0 %5758, %v3918_v19  }
 0x8e8   :  { %v2200_v7 = vpop.xlane.xlu0 %2199 }
 0x8e9   :  { %4956 = vperm.xlu0 %5758, %v4134_v12   ;;  %v2272_v23 = vmul.f32 0.0051020407, %v2200_v7  ;;  %v9606_v7 = vadd.f32 1e-05, %v2991_v60 }
 0x8eb   :  { %v2848_v52 = vmul.f32 %v2272_v23, %v2272_v23  ;;  %vm3843_vm4 = vweird.f32 %v9606_v7 }
 0x8ed   :  { %4756 = vperm.xlu1 %5759, %v4094_v55   ;;  %v3993_v55 = vld [vmem:[%s10131_s7 + $0x200] sm:$0xff] }
 0x8f0   :  { %v2704_v45 = vpop.xlane.xlu0 %2703 }
 0x8f1   :  { %v2776_v11 = vmul.f32 0.0051020407, %v2704_v45  ;;  %4317 = vperm.xlu0 %5758, %v10564_v34   ;;  %v4137_v45 = vsub.f32 %v3993_v55, %v9279_v22  ;;  %v2411_v55 = vmul.f32 %v10562_v32, %v10562_v32 }
 0x8f3   :  { %v2920_v54 = vsub.f32 %v2776_v11, %v2848_v52  ;;  %v3064_v11 = vld [vmem:[%s10130_s6 + $0x238] sm:$0xff] }
 0x8f5   :  { %v2992_v57 = vmax.f32 %v2920_v54, 0.0 }
 0x8f7   :  { %v3136_v38 = vadd.f32 1e-05, %v2992_v57  ;;  %v10568_v57 = vld [vmem:[#allocation91_spill] sm:$0xff] }
 0x8f9   :  { %5907 = vrsqrt.f32 %v3136_v38  ;;  %4821 = vperm.xlu0 %5758, %v4107_v50   ;;  %vm3853_vm0 = vweird.f32 %v3136_v38 }
 0x8fa   :  { %5909 = vrsqrt.f32 %v9606_v7 }
 0x8fc   :  { %v2072_v63 = vpop.xlane.xlu1 %2071 }
 0x8fd   :  { %v9603_v19 = vmul.f32 0.0051020407, %v2072_v63 }
 0x8ff   :  { %v5908_v2 = vpop.eup %5907  ;;  %v2816_v14 = vmul.f32 %v9603_v19, %v9603_v19 }
 0x900   :  { %v3848_v29 = vmul.f32 %v5908_v2, %v3136_v38  ;;  %vm3854_vm2 = vweird.f32 %v5908_v2 }
 0x901   :  { %4467 = vperm.xlu0 %5758, %v9273_v13   ;;  %vm3855_vm3 = vmor %vm3853_vm0, %vm3854_vm2 }
 0x902   :  { %v3849_v15 = vmul.f32 %v5908_v2, %v3848_v29 }
 0x903   :  { %v4273_v12 = vpop.permute.xlu0 %4272 }
 0x904   :  { %v3850_v5 = vmul.f32 0.5, %v3849_v15  ;;  %v2576_v10 = vpop.xlane.xlu1 %2575  ;;  %v4555_v38 = vmul.f32 %v4273_v12, %v10568_v57  ;;  %v4556_v50 = vmul.f32 %v4273_v12, %v10569_v48  ;;  %v9628_v15 = vpop.eup %5909 }
 0x905   :  { %v2744_v40 = vmul.f32 0.0051020407, %v2576_v10  ;;  %v4000_v10 = vld [vmem:[%s10131_s7 + $0x238] sm:$0xff]  ;;  %vm3844_vm5 = vweird.f32 %v9628_v15 }
 0x906   :  { %v3851_v52 = vsub.f32 1.5, %v3850_v5  ;;  %v10571_v5 = vld [vmem:[#allocation128_spill] sm:$0xff]  ;;  %vm9683_vm8 = vmor %vm3843_vm4, %vm3844_vm5 }
 0x907   :  { %v2888_v13 = vsub.f32 %v2744_v40, %v2816_v14  ;;  %v2729_v12 = vmul.f32 0.0051020407, %v10571_v5  ;;  %v3838_v14 = vmul.f32 %v9628_v15, %v9606_v7 }
 0x908   :  { %v3852_v34 = vmul.f32 %v5908_v2, %v3851_v52 }
 0x909   :  { %v2960_v54 = vmax.f32 %v2888_v13, 0.0  ;;  %4971 = vperm.xlu0 %5758, %v4137_v45   ;;  %v3839_v57 = vmul.f32 %v9628_v15, %v3838_v14 }
 0x90a   :  { %v3856_v21 = vsel %vm3855_vm3, %v5908_v2, %v3852_v34  ;;  %v2412_v2 = vmul.f32 %v10559_v44, %v10559_v44 }
 0x90b   :  { %v9622_v63 = vadd.f32 1e-05, %v2960_v54  ;;  %v4777_v51 = vpop.permute.xlu0 %4776  ;;  %v3928_v22 = vmul.f32 %v3856_v21, %v3064_v11  ;;  %v3966_v54 = vld [vmem:[%s10131_s7 + $0x128] sm:$0xff] }
 0x90c   :  { %v5059_v60 = vadd.f32 %v4777_v51, %v4555_v38  ;;  %v5060_v29 = vadd.f32 %v4777_v51, %v4556_v50  ;;  %v2693_v52 = vsel %vm621_vm1, %v2412_v2, 0.0  ;;  %v4110_v21 = vsub.f32 %v3966_v54, %v8676_v17  ;;  %v10574_v2 = vld [vmem:[#allocation19_spill] sm:$0xff] }
 0x90d   :  { %5911 = vrsqrt.f32 %v9622_v63  ;;  %4502 = vperm.xlu2 %5760, %v3928_v22   ;;  %v4072_v18 = vmul.f32 %v3928_v22, %v2272_v23  ;;  %v2801_v23 = vmul.f32 %v9625_v24, %v9625_v24  ;;  %v2694_v38 = vadd.f32 %v2693_v52, %v2411_v55 }
 0x90e   :  { %5913 = vrsqrt.f32 %v9618_v28  ;;  %5203 = vst [vmem:[%s10132_s8 + $0x190] sm:$0xff] %v5059_v60  ;;  %v3840_v51 = vmul.f32 0.5, %v3839_v57  ;;  %v10572_v60 = vld [vmem:[#allocation96_spill] sm:$0xff]  ;;  %vm3533_vm7 = vweird.f32 %v9622_v63 }
 0x90f   :  { %5204 = vst.msk [vmem:[%s10132_s8 + $0x198] sm:$0xff] %vm621_vm1, %v5060_v29  ;;  %v4144_v40 = vsub.f32 %v4000_v10, %v4072_v18  ;;  %v2873_v35 = vsub.f32 %v2729_v12, %v2801_v23  ;;  %v10573_v18 = vld [vmem:[#allocation95_spill] sm:$0xff]  ;;  %v9668_v10 = vmul.f32 0.0051020407, %v10574_v2 }
 0x910   :  { %v3841_v17 = vsub.f32 1.5, %v3840_v51 }
 0x911   :  { %4332 = vperm.xlu0 %5758, %v8663_v33   ;;  %v2945_v48 = vmax.f32 %v2873_v35, 0.0 }
 0x913   :  { %v5912_v13 = vpop.eup %5911  ;;  %v4423_v45 = vpop.permute.xlu0 %4422  ;;  %v9662_v9 = vadd.f32 1e-05, %v2945_v48 }
 0x914   :  { %v9652_v11 = vpop.eup %5913  ;;  %v3528_v34 = vmul.f32 %v5912_v13, %v9622_v63  ;;  %v4615_v29 = vmul.f32 %v4423_v45, %v10572_v60  ;;  %v4616_v5 = vmul.f32 %v4423_v45, %v10573_v18  ;;  %vm3534_vm6 = vweird.f32 %v5912_v13  ;;  %v3996_v63 = vld [vmem:[%s10131_s7 + $0x218] sm:$0xff] }
 0x915   :  { %5006 = vperm.xlu2 %5760, %v4144_v40   ;;  %v3648_v50 = vmul.f32 %v9652_v11, %v9618_v28  ;;  %v10575_v40 = vld [vmem:[#allocation25_spill] sm:$0xff]  ;;  %5915 = vrsqrt.f32 %v9662_v9  ;;  %vm3535_vm9 = vmor %vm3533_vm7, %vm3534_vm6  ;;  %vm3654_vm10 = vweird.f32 %v9652_v11  ;;  %vm3383_vm14 = vweird.f32 %v9662_v9 }
 0x916   :  { %v3529_v33 = vmul.f32 %v5912_v13, %v3528_v34  ;;  %v2759_v35 = vmul.f32 0.0051020407, %v10575_v40  ;;  %v2831_v34 = vmul.f32 %v9668_v10, %v9668_v10  ;;  %vm9723_vm12 = vmor %vm3653_vm11, %vm3654_vm10 }
 0x917   :  { %2695 = vadd.xlane.f32.xlu1 %v2694_v38  ;;  %v3649_v12 = vmul.f32 %v9652_v11, %v3648_v50  ;;  %v3842_v38 = vmul.f32 %v9628_v15, %v3841_v17 }
 0x918   :  { %v3530_v22 = vmul.f32 0.5, %v3529_v33  ;;  %v2903_v54 = vsub.f32 %v2759_v35, %v2831_v34  ;;  %v10582_v34 = vld [vmem:[#allocation61_spill] sm:$0xff] }
 0x919   :  { %4836 = vperm.xlu0 %5758, %v4110_v21   ;;  %v3650_v45 = vmul.f32 0.5, %v3649_v12  ;;  %v3032_v21 = vld [vmem:[%s10130_s6 + $0x138] sm:$0xff]  ;;  %v3846_v18 = vsel %vm9683_vm8, %v9628_v15, %v3842_v38  ;;  %v4140_v12 = vsub.f32 %v3996_v63, %v9397_v62 }
 0x91a   :  { %v3531_v52 = vsub.f32 1.5, %v3530_v22  ;;  %v10581_v62 = vld [vmem:[#allocation105_spill] sm:$0xff] }
 0x91b   :  { %v4927_v23 = vpop.permute.xlu0 %4926  ;;  %v3651_v33 = vsub.f32 1.5, %v3650_v45  ;;  %v9693_v22 = vpop.eup %5915 }
 0x91c   :  { %v5119_v55 = vadd.f32 %v4927_v23, %v4615_v29  ;;  %v5120_v14 = vadd.f32 %v4927_v23, %v4616_v5  ;;  %v3532_v48 = vmul.f32 %v5912_v13, %v3531_v52  ;;  %v3063_v29 = vld [vmem:[%s10130_s6 + $0x230] sm:$0xff]  ;;  %v3378_v5 = vmul.f32 %v9693_v22, %v9662_v9 }
 0x91d   :  { %v3652_v2 = vmul.f32 %v9652_v11, %v3651_v33  ;;  %v10583_v33 = vld [vmem:[#allocation28_spill] sm:$0xff]  ;;  %vm3384_vm13 = vweird.f32 %v9693_v22 }
 0x91e   :  { %5263 = vst [vmem:[%s10132_s8 + $0x370] sm:$0xff] %v5119_v55  ;;  %v3536_v51 = vsel %vm3535_vm9, %v5912_v13, %v3532_v48  ;;  %v3379_v28 = vmul.f32 %v9693_v22, %v3378_v5  ;;  %v3980_v5 = vld [vmem:[%s10131_s7 + $0x198] sm:$0xff]  ;;  %vm3385_vm15 = vmor %vm3383_vm14, %vm3384_vm13 }
 0x91f   :  { %5264 = vst.msk [vmem:[%s10132_s8 + $0x378] sm:$0xff] %vm621_vm1, %v5120_v14  ;;  %v9698_v60 = vmul.f32 %v3536_v51, %v3032_v21  ;;  %v9717_v14 = vmul.f32 %v3846_v18, %v3063_v29  ;;  %v3656_v38 = vsel %vm9723_vm12, %v9652_v11, %v3652_v2  ;;  %v3969_v2 = vld [vmem:[%s10131_s7 + $0x140] sm:$0xff] }
 0x920   :  { %v3380_v21 = vmul.f32 0.5, %v3379_v28 }
 0x921   :  { %4482 = vperm.xlu0 %5758, %v9390_v4   ;;  %v4353_v7 = vpop.permute.xlu2 %4352  ;;  %v2975_v4 = vmax.f32 %v2903_v54, 0.0  ;;  %v9708_v13 = vmul.f32 %v9698_v60, %v9603_v19  ;;  %v10578_v19 = vld [vmem:[#allocation106_spill] sm:$0xff]  ;;  %v9734_v54 = vmul.f32 0.0051020407, %v10582_v34  ;;  %v10586_v34 = vld [vmem:[#allocation64_spill] sm:$0xff] }
 0x922   :  { %v4587_v23 = vmul.f32 %v4353_v7, %v9222_v37  ;;  %v4588_v55 = vmul.f32 %v4353_v7, %v10524_v3  ;;  %v9730_v3 = vmul.f32 %v9717_v14, %v8902_v30  ;;  %v3044_v7 = vld [vmem:[%s10130_s6 + $0x198] sm:$0xff]  ;;  %v3381_v29 = vsub.f32 1.5, %v3380_v21  ;;  %v3999_v21 = vld [vmem:[%s10131_s7 + $0x230] sm:$0xff] }
 0x923   :  { %v4288_v50 = vpop.permute.xlu0 %4287  ;;  %v9720_v15 = vadd.f32 1e-05, %v2975_v4  ;;  %v3908_v11 = vmul.f32 %v3656_v38, %v3044_v7  ;;  %v2804_v51 = vmul.f32 %v9734_v54, %v9734_v54  ;;  %v10587_v38 = vld [vmem:[#allocation39_spill] sm:$0xff] }
 0x924   :  { %v4561_v40 = vmul.f32 %v4288_v50, %v10578_v19  ;;  %v4562_v52 = vmul.f32 %v4288_v50, %v10581_v62  ;;  %v2732_v50 = vmul.f32 0.0051020407, %v10583_v33  ;;  %v3382_v19 = vmul.f32 %v9693_v22, %v3381_v29  ;;  %v10585_v62 = vld [vmem:[#allocation109_spill] sm:$0xff]  ;;  %v3953_v29 = vld [vmem:[%s10131_s7 + $0xc0] sm:$0xff] }
 0x925   :  { %5917 = vrsqrt.f32 %v9720_v15  ;;  %v4052_v4 = vmul.f32 %v3908_v11, %v9595_v36  ;;  %v4113_v36 = vsub.f32 %v3969_v2, %v8973_v8  ;;  %v3017_v8 = vld [vmem:[%s10130_s6 + $0xc0] sm:$0xff]  ;;  %vm3683_vm2 = vweird.f32 %v9720_v15 }
 0x926   :  { %v2876_v63 = vsub.f32 %v2732_v50, %v2804_v51  ;;  %v3386_v28 = vsel %vm3385_vm15, %v9693_v22, %v3382_v19  ;;  %v10589_v19 = vld [vmem:[#allocation3_spill] sm:$0xff] }
 0x929   :  { %4986 = vperm.xlu0 %5758, %v4140_v12   ;;  %v4857_v35 = vpop.permute.xlu2 %4856 }
 0x92a   :  { %v5091_v45 = vadd.f32 %v4857_v35, %v4587_v23  ;;  %v5092_v37 = vadd.f32 %v4857_v35, %v4588_v55  ;;  %v2948_v23 = vmax.f32 %v2876_v63, 0.0  ;;  %v4124_v55 = vsub.f32 %v3980_v5, %v4052_v4  ;;  %v10584_v35 = vld [vmem:[#allocation111_spill] sm:$0xff] }
 0x92b   :  { %v4792_v57 = vpop.permute.xlu0 %4791  ;;  %v9765_v12 = vpop.eup %5917 }
 0x92c   :  { %5235 = vst [vmem:[%s10132_s8 + $0x290] sm:$0xff] %v5091_v45  ;;  %v5065_v30 = vadd.f32 %v4792_v57, %v4561_v40  ;;  %v5066_v48 = vadd.f32 %v4792_v57, %v4562_v52  ;;  %v9776_v40 = vadd.f32 1e-05, %v2948_v23  ;;  %v9786_v57 = vmul.f32 0.0051020407, %v10586_v34 }
 0x92d   :  { %5236 = vst.msk [vmem:[%s10132_s8 + $0x298] sm:$0xff] %vm621_vm1, %v5092_v37  ;;  %vm3684_vm0 = vweird.f32 %v9765_v12 }
 0x92e   :  { %5209 = vst [vmem:[%s10132_s8 + $0x1c0] sm:$0xff] %v5065_v30  ;;  %5919 = vrsqrt.f32 %v9776_v40  ;;  %v2762_v30 = vmul.f32 0.0051020407, %v10587_v38  ;;  %v2834_v22 = vmul.f32 %v9786_v57, %v9786_v57  ;;  %vm3685_vm3 = vmor %vm3683_vm2, %vm3684_vm0  ;;  %vm3413_vm5 = vweird.f32 %v9776_v40 }
 0x92f   :  { %5210 = vst.msk [vmem:[%s10132_s8 + $0x1c8] sm:$0xff] %vm621_vm1, %v5066_v48  ;;  %v3881_v48 = vmul.f32 %v3386_v28, %v3017_v8  ;;  %v10591_v28 = vld [vmem:[#allocation37_spill] sm:$0xff] }
 0x930   :  { %4402 = vperm.xlu1 %5759, %v3908_v11   ;;  %v2906_v50 = vsub.f32 %v2762_v30, %v2834_v22  ;;  %v2735_v34 = vmul.f32 0.0051020407, %v10591_v28  ;;  %v3983_v22 = vld [vmem:[%s10131_s7 + $0x1b0] sm:$0xff] }
 0x931   :  { %4347 = vperm.xlu0 %5758, %v8967_v59   ;;  %v3678_v59 = vmul.f32 %v9765_v12, %v9720_v15  ;;  %v4025_v11 = vmul.f32 %v3881_v48, %v9625_v24 }
 0x932   :  { %v2978_v2 = vmax.f32 %v2906_v50, 0.0 }
 0x933   :  { %v4438_v18 = vpop.permute.xlu0 %4437  ;;  %v3679_v45 = vmul.f32 %v9765_v12, %v3678_v59  ;;  %v10588_v59 = vld [vmem:[#allocation121_spill] sm:$0xff] }
 0x934   :  { %v4621_v17 = vmul.f32 %v4438_v18, %v10584_v35  ;;  %v4622_v52 = vmul.f32 %v4438_v18, %v10585_v62  ;;  %v5920_v51 = vpop.eup %5919  ;;  %v4143_v18 = vsub.f32 %v3999_v21, %v9730_v3 }
 0x935   :  { %v3680_v33 = vmul.f32 0.5, %v3679_v45  ;;  %v3408_v5 = vmul.f32 %v5920_v51, %v9776_v40  ;;  %vm3414_vm4 = vweird.f32 %v5920_v51 }
 0x936   :  { %vm3415_vm6 = vmor %vm3413_vm5, %vm3414_vm4 }
 0x937   :  { %v3681_v63 = vsub.f32 1.5, %v3680_v33  ;;  %v3409_v23 = vmul.f32 %v5920_v51, %v3408_v5 }
 0x938   :  { %4906 = vperm.xlu1 %5759, %v4124_v55   ;;  %v9812_v55 = vadd.f32 1e-05, %v2978_v2  ;;  %v10593_v2 = vld [vmem:[#allocation124_spill] sm:$0xff] }
 0x939   :  { %4851 = vperm.xlu0 %5758, %v4113_v36   ;;  %v3682_v24 = vmul.f32 %v9765_v12, %v3681_v63  ;;  %v3410_v8 = vmul.f32 0.5, %v3409_v23 }
 0x93a   :  { %5921 = vrsqrt.f32 %v9812_v55  ;;  %vm3713_vm7 = vweird.f32 %v9812_v55 }
 0x93b   :  { %v4942_v37 = vpop.permute.xlu0 %4941  ;;  %v3686_v62 = vsel %vm3685_vm3, %v9765_v12, %v3682_v24  ;;  %v3411_v38 = vsub.f32 1.5, %v3410_v8  ;;  %v3020_v24 = vld [vmem:[%s10130_s6 + $0xd8] sm:$0xff] }
 0x93c   :  { %v5125_v9 = vadd.f32 %v4942_v37, %v4621_v17  ;;  %v5126_v7 = vadd.f32 %v4942_v37, %v4622_v52  ;;  %v3047_v17 = vld [vmem:[%s10130_s6 + $0x1b0] sm:$0xff]  ;;  %v10590_v52 = vld [vmem:[#allocation59_spill] sm:$0xff] }
 0x93d   :  { %v9821_v45 = vmul.f32 0.0051020407, %v10590_v52  ;;  %v3412_v63 = vmul.f32 %v5920_v51, %v3411_v38  ;;  %v10595_v52 = vld [vmem:[#allocation78_spill] sm:$0xff] }
 0x93e   :  { %5269 = vst [vmem:[%s10132_s8 + $0x3a0] sm:$0xff] %v5125_v9  ;;  %v3911_v9 = vmul.f32 %v3686_v62, %v3047_v17  ;;  %v2765_v62 = vmul.f32 0.0051020407, %v8773_v20 }
 0x93f   :  { %5270 = vst.msk [vmem:[%s10132_s8 + $0x3a8] sm:$0xff] %vm621_vm1, %v5126_v7  ;;  %v4253_v7 = vpop.permute.xlu1 %4252  ;;  %v2807_v12 = vmul.f32 %v9821_v45, %v9821_v45  ;;  %v3416_v23 = vsel %vm3415_vm6, %v5920_v51, %v3412_v63 }
 0x940   :  { %4267 = vperm.xlu1 %5759, %v3881_v48   ;;  %v4055_v48 = vmul.f32 %v3911_v9, %v9668_v10  ;;  %v9838_v50 = vpop.eup %5921  ;;  %v3884_v17 = vmul.f32 %v3416_v23, %v3020_v24 }
 0x941   :  { %4497 = vperm.xlu0 %5758, %v9717_v14   ;;  %v4097_v14 = vsub.f32 %v3953_v29, %v4025_v11  ;;  %v2879_v30 = vsub.f32 %v2735_v34, %v2807_v12  ;;  %vm3714_vm8 = vweird.f32 %v9838_v50 }
 0x942   :  { %v4127_v21 = vsub.f32 %v3983_v22, %v4055_v48  ;;  %v3956_v48 = vld [vmem:[%s10131_s7 + $0xd8] sm:$0xff]  ;;  %vm3715_vm9 = vmor %vm3713_vm7, %vm3714_vm8 }
 0x943   :  { %v4303_v4 = vpop.permute.xlu0 %4302  ;;  %v2951_v11 = vmax.f32 %v2879_v30, 0.0 }
 0x944   :  { %v4567_v36 = vmul.f32 %v4303_v4, %v10588_v59  ;;  %v4568_v3 = vmul.f32 %v4303_v4, %v10589_v19  ;;  %v3708_v4 = vmul.f32 %v9838_v50, %v9812_v55  ;;  %v10594_v19 = vld [vmem:[#allocation73_spill] sm:$0xff] }
 0x945   :  { %v9845_v10 = vadd.f32 1e-05, %v2951_v11 }
 0x946   :  { %v3709_v59 = vmul.f32 %v9838_v50, %v3708_v4 }
 0x947   :  { %v9842_v29 = vpop.xlane.xlu1 %2191  ;;  %5923 = vrsqrt.f32 %v9845_v10  ;;  %vm3443_vm11 = vweird.f32 %v9845_v10 }
 0x948   :  { %4771 = vperm.xlu1 %5759, %v4097_v14   ;;  %v3710_v51 = vmul.f32 0.5, %v3709_v59  ;;  %v3050_v59 = vld [vmem:[%s10130_s6 + $0x1c8] sm:$0xff] }
 0x949   :  { %5001 = vperm.xlu0 %5758, %v4143_v18   ;;  %v10592_v18 = vld [vmem:[#allocation125_spill] sm:$0xff] }
 0x94a   :  { %v3711_v38 = vsub.f32 1.5, %v3710_v51 }
 0x94b   :  { %v4807_v35 = vpop.permute.xlu0 %4806 }
 0x94c   :  { %v5071_v15 = vadd.f32 %v4807_v35, %v4567_v36  ;;  %v5072_v37 = vadd.f32 %v4807_v35, %v4568_v3  ;;  %v9854_v3 = vmul.f32 0.0051020407, %v10594_v19 }
 0x94e   :  { %5215 = vst [vmem:[%s10132_s8 + $0x1f0] sm:$0xff] %v5071_v15  ;;  %v4547_v15 = vmul.f32 %v4253_v7, %v10595_v52  ;;  %v2837_v34 = vmul.f32 %v9854_v3, %v9854_v3 }
 0x94f   :  { %5216 = vst.msk [vmem:[%s10132_s8 + $0x1f8] sm:$0xff] %vm621_vm1, %v5072_v37  ;;  %v10596_v37 = vld [vmem:[#allocation77_spill] sm:$0xff] }
 0x950   :  { %4417 = vperm.xlu1 %5759, %v3911_v9   ;;  %v4548_v8 = vmul.f32 %v4253_v7, %v10596_v37  ;;  %v2909_v12 = vsub.f32 %v2765_v62, %v2837_v34  ;;  %v4028_v7 = vmul.f32 %v3884_v17, %v9734_v54  ;;  %v3712_v54 = vmul.f32 %v9838_v50, %v3711_v38 }
 0x952   :  { %v2981_v22 = vmax.f32 %v2909_v12, 0.0  ;;  %v4100_v11 = vsub.f32 %v3956_v48, %v4028_v7  ;;  %v10600_v12 = vld [vmem:[#allocation66_spill] sm:$0xff]  ;;  %v3023_v48 = vld [vmem:[%s10130_s6 + $0xf0] sm:$0xff] }
 0x953   :  { %v4453_v33 = vpop.permute.xlu0 %4452 }
 0x954   :  { %v4627_v5 = vmul.f32 %v4453_v33, %v10592_v18  ;;  %v4628_v14 = vmul.f32 %v4453_v33, %v10593_v2  ;;  %v5924_v33 = vpop.eup %5923  ;;  %v3125_v4 = vadd.f32 1e-05, %v2981_v22  ;;  %v10597_v18 = vld [vmem:[#allocation9_spill] sm:$0xff]  ;;  %v10598_v2 = vld [vmem:[#allocation6_spill] sm:$0xff] }
 0x955   :  { %vm3444_vm10 = vweird.f32 %v5924_v33 }
 0x956   :  { %5925 = vrsqrt.f32 %v3125_v4  ;;  %vm3445_vm12 = vmor %vm3443_vm11, %vm3444_vm10  ;;  %vm3743_vm14 = vweird.f32 %v3125_v4 }
 0x958   :  { %4921 = vperm.xlu1 %5759, %v4127_v21   ;;  %v3438_v21 = vmul.f32 %v5924_v33, %v9845_v10 }
 0x95a   :  { %v3439_v24 = vmul.f32 %v5924_v33, %v3438_v21 }
 0x95b   :  { %v4957_v36 = vpop.permute.xlu0 %4956 }
 0x95c   :  { %v5131_v40 = vadd.f32 %v4957_v36, %v4627_v5  ;;  %v5132_v35 = vadd.f32 %v4957_v36, %v4628_v14  ;;  %v3716_v36 = vsel %vm3715_vm9, %v9838_v50, %v3712_v54  ;;  %v3440_v62 = vmul.f32 0.5, %v3439_v24  ;;  %v5926_v51 = vpop.eup %5925  ;;  %v10601_v24 = vld [vmem:[#allocation35_spill] sm:$0xff] }
 0x95d   :  { %v3738_v34 = vmul.f32 %v5926_v51, %v3125_v4  ;;  %vm3744_vm13 = vweird.f32 %v5926_v51 }
 0x95e   :  { %5275 = vst [vmem:[%s10132_s8 + $0x3d0] sm:$0xff] %v5131_v40  ;;  %vm3745_vm15 = vmor %vm3743_vm14, %vm3744_vm13 }
 0x95f   :  { %5276 = vst.msk [vmem:[%s10132_s8 + $0x3d8] sm:$0xff] %vm621_vm1, %v5132_v35  ;;  %v4757_v28 = vpop.permute.xlu1 %4756  ;;  %v3739_v38 = vmul.f32 %v5926_v51, %v3738_v34 }
 0x960   :  { %v5051_v9 = vadd.f32 %v4757_v28, %v4547_v15  ;;  %v5052_v20 = vadd.f32 %v4757_v28, %v4548_v8  ;;  %4282 = vperm.xlu1 %5759, %v3884_v17   ;;  %v3914_v17 = vmul.f32 %v3716_v36, %v3050_v59  ;;  %v3986_v8 = vld [vmem:[%s10131_s7 + $0x1c8] sm:$0xff] }
 0x961   :  { %v3740_v10 = vmul.f32 0.5, %v3739_v38  ;;  %v10602_v59 = vld [vmem:[#allocation11_spill] sm:$0xff]  ;;  %v10606_v38 = vld [vmem:[#allocation81_spill] sm:$0xff] }
 0x962   :  { %5195 = vst [vmem:[%s10132_s8 + $0x150] sm:$0xff] %v5051_v9 }
 0x963   :  { %5196 = vst.msk [vmem:[%s10132_s8 + $0x158] sm:$0xff] %vm621_vm1, %v5052_v20  ;;  %v4318_v30 = vpop.permute.xlu0 %4317 }
 0x964   :  { %v4573_v5 = vmul.f32 %v4318_v30, %v10597_v18  ;;  %v4574_v14 = vmul.f32 %v4318_v30, %v10598_v2  ;;  %v3741_v18 = vsub.f32 1.5, %v3740_v10 }
 0x967   :  { %v4503_v63 = vpop.permute.xlu2 %4502 }
 0x968   :  { %4786 = vperm.xlu1 %5759, %v4100_v11   ;;  %v4647_v35 = vmul.f32 %v4503_v63, %v9379_v42  ;;  %v4648_v55 = vmul.f32 %v4503_v63, %v9375_v26  ;;  %v4058_v26 = vmul.f32 %v3914_v17, %v9786_v57  ;;  %v3441_v42 = vsub.f32 1.5, %v3440_v62  ;;  %v10599_v57 = vld [vmem:[#allocation70_spill] sm:$0xff] }
 0x96a   :  { %v4130_v28 = vsub.f32 %v3986_v8, %v4058_v26  ;;  %v3442_v9 = vmul.f32 %v5924_v33, %v3441_v42  ;;  %v10603_v26 = vld [vmem:[#allocation14_spill] sm:$0xff] }
 0x96b   :  { %v4822_v23 = vpop.permute.xlu0 %4821 }
 0x96c   :  { %v5077_v19 = vadd.f32 %v4822_v23, %v4573_v5  ;;  %v5078_v40 = vadd.f32 %v4822_v23, %v4574_v14  ;;  %v3446_v22 = vsel %vm3445_vm12, %v5924_v33, %v3442_v9  ;;  %v3959_v33 = vld [vmem:[%s10131_s7 + $0xf0] sm:$0xff]  ;;  %v3742_v14 = vmul.f32 %v5926_v51, %v3741_v18 }
 0x96d   :  { %v3887_v63 = vmul.f32 %v3446_v22, %v3023_v48  ;;  %v10607_v48 = vld [vmem:[#allocation56_spill] sm:$0xff] }
 0x96e   :  { %5221 = vst [vmem:[%s10132_s8 + $0x220] sm:$0xff] %v5077_v19 }
 0x96f   :  { %5222 = vst.msk [vmem:[%s10132_s8 + $0x228] sm:$0xff] %vm621_vm1, %v5078_v40  ;;  %v5007_v52 = vpop.permute.xlu2 %5006  ;;  %v4031_v54 = vmul.f32 %v3887_v63, %v9821_v45  ;;  %v3053_v45 = vld [vmem:[%s10130_s6 + $0x1e0] sm:$0xff]  ;;  %v3746_v40 = vsel %vm3745_vm15, %v5926_v51, %v3742_v14 }
 0x970   :  { %v5151_v50 = vadd.f32 %v5007_v52, %v4647_v35  ;;  %v5152_v15 = vadd.f32 %v5007_v52, %v4648_v55  ;;  %4432 = vperm.xlu1 %5759, %v3914_v17   ;;  %v3917_v17 = vmul.f32 %v3746_v40, %v3053_v45  ;;  %v3989_v52 = vld [vmem:[%s10131_s7 + $0x1e0] sm:$0xff]  ;;  %v10612_v40 = vld [vmem:[#allocation36_spill] sm:$0xff] }
 0x971   :  { %v4103_v2 = vsub.f32 %v3959_v33, %v4031_v54 }
 0x972   :  { %5295 = vst [vmem:[%s10132_s8 + $0x470] sm:$0xff] %v5151_v50  ;;  %v4061_v4 = vmul.f32 %v3917_v17, %v9854_v3 }
 0x973   :  { %5296 = vst.msk [vmem:[%s10132_s8 + $0x478] sm:$0xff] %vm621_vm1, %v5152_v15  ;;  %v4468_v37 = vpop.permute.xlu0 %4467 }
 0x974   :  { %v4633_v20 = vmul.f32 %v4468_v37, %v10599_v57  ;;  %v4634_v7 = vmul.f32 %v4468_v37, %v10600_v12  ;;  %v4133_v50 = vsub.f32 %v3989_v52, %v4061_v4  ;;  %v10604_v37 = vld [vmem:[#allocation13_spill] sm:$0xff]  ;;  %v3962_v57 = vld [vmem:[%s10131_s7 + $0x108] sm:$0xff]  ;;  %v10605_v12 = vld [vmem:[#allocation82_spill] sm:$0xff] }
 0x978   :  { %4936 = vperm.xlu1 %5759, %v4130_v28  }
 0x97b   :  { %v4972_v30 = vpop.permute.xlu0 %4971 }
 0x97c   :  { %v5137_v11 = vadd.f32 %v4972_v30, %v4633_v20  ;;  %v5138_v21 = vadd.f32 %v4972_v30, %v4634_v7  ;;  %v4106_v20 = vsub.f32 %v3962_v57, %v9050_v25 }
 0x97e   :  { %5281 = vst [vmem:[%s10132_s8 + $0x400] sm:$0xff] %v5137_v11  ;;  %v10608_v11 = vld [vmem:[#allocation18_spill] sm:$0xff] }
 0x97f   :  { %5282 = vst.msk [vmem:[%s10132_s8 + $0x408] sm:$0xff] %vm621_vm1, %v5138_v21 }
 0x980   :  { %4297 = vperm.xlu1 %5759, %v3887_v63  }
 0x983   :  { %v4333_v5 = vpop.permute.xlu0 %4332 }
 0x984   :  { %v4579_v23 = vmul.f32 %v4333_v5, %v10601_v24  ;;  %v4580_v36 = vmul.f32 %v4333_v5, %v10602_v59  ;;  %v10609_v24 = vld [vmem:[#allocation89_spill] sm:$0xff]  ;;  %v10610_v59 = vld [vmem:[#allocation88_spill] sm:$0xff] }
 0x988   :  { %4801 = vperm.xlu1 %5759, %v4103_v2   ;;  %v3992_v2 = vld [vmem:[%s10131_s7 + $0x1f8] sm:$0xff] }
 0x989   :  { %v4136_v14 = vsub.f32 %v3992_v2, %v9255_v61  ;;  %v10617_v2 = vld [vmem:[#allocation108_spill] sm:$0xff] }
 0x98a   :  { %v2696_v15 = vpop.xlane.xlu1 %2695 }
 0x98b   :  { %v4837_v19 = vpop.permute.xlu0 %4836  ;;  %v2774_v61 = vmul.f32 0.0051020407, %v2696_v15 }
 0x98c   :  { %v5083_v35 = vadd.f32 %v4837_v19, %v4579_v23  ;;  %v5084_v55 = vadd.f32 %v4837_v19, %v4580_v36  ;;  %v10611_v19 = vld [vmem:[#allocation130_spill] sm:$0xff] }
 0x98e   :  { %5227 = vst [vmem:[%s10132_s8 + $0x250] sm:$0xff] %v5083_v35 }
 0x98f   :  { %5228 = vst.msk [vmem:[%s10132_s8 + $0x258] sm:$0xff] %vm621_vm1, %v5084_v55 }
 0x990   :  { %4447 = vperm.xlu1 %5759, %v3917_v17  }
 0x993   :  { %v4483_v62 = vpop.permute.xlu0 %4482 }
 0x994   :  { %v4639_v42 = vmul.f32 %v4483_v62, %v10603_v26  ;;  %v4640_v8 = vmul.f32 %v4483_v62, %v10604_v37  ;;  %v9985_v62 = vmul.f32 0.0051020407, %v9842_v29 }
 0x996   :  { %v2846_v29 = vmul.f32 %v9985_v62, %v9985_v62 }
 0x998   :  { %4951 = vperm.xlu1 %5759, %v4133_v50   ;;  %v2918_v15 = vsub.f32 %v2774_v61, %v2846_v29 }
 0x99a   :  { %v2990_v37 = vmax.f32 %v2918_v15, 0.0 }
 0x99b   :  { %v4987_v51 = vpop.permute.xlu0 %4986 }
 0x99c   :  { %v5143_v28 = vadd.f32 %v4987_v51, %v4639_v42  ;;  %v5144_v34 = vadd.f32 %v4987_v51, %v4640_v8  ;;  %v3965_v42 = vld [vmem:[%s10131_s7 + $0x120] sm:$0xff]  ;;  %v10613_v51 = vld [vmem:[#allocation93_spill] sm:$0xff] }
 0x99d   :  { %v4109_v8 = vsub.f32 %v3965_v42, %v9344_v0  ;;  %v3995_v0 = vld [vmem:[%s10131_s7 + $0x210] sm:$0xff] }
 0x99e   :  { %5287 = vst [vmem:[%s10132_s8 + $0x430] sm:$0xff] %v5143_v28 }
 0x99f   :  { %5288 = vst.msk [vmem:[%s10132_s8 + $0x438] sm:$0xff] %vm621_vm1, %v5144_v34  ;;  %v10614_v34 = vld [vmem:[#allocation92_spill] sm:$0xff] }
 0x9a0   :  { %4312 = vperm.xlu1 %5759, %v9039_v58  }
 0x9a2   :  { %v4403_v3 = vpop.permute.xlu1 %4402 }
 0x9a3   :  { %v4348_v9 = vpop.permute.xlu0 %4347  ;;  %v4607_v7 = vmul.f32 %v4403_v3, %v10605_v12  ;;  %v4608_v30 = vmul.f32 %v4403_v3, %v10606_v38  ;;  %v4139_v38 = vsub.f32 %v3995_v0, %v9565_v39 }
 0x9a4   :  { %v4585_v22 = vmul.f32 %v4348_v9, %v10607_v48  ;;  %v4586_v21 = vmul.f32 %v4348_v9, %v10608_v11  ;;  %v3134_v9 = vadd.f32 1e-05, %v2990_v37  ;;  %v10615_v48 = vld [vmem:[#allocation104_spill] sm:$0xff]  ;;  %v10616_v11 = vld [vmem:[#allocation103_spill] sm:$0xff]  ;;  %v10622_v37 = vld [vmem:[#allocation122_spill] sm:$0xff] }
 0x9a6   :  { %5927 = vrsqrt.f32 %v3134_v9  ;;  %vm3833_vm2 = vweird.f32 %v3134_v9 }
 0x9a8   :  { %4816 = vperm.xlu1 %5759, %v4106_v20  }
 0x9aa   :  { %v4907_v63 = vpop.permute.xlu1 %4906 }
 0x9ab   :  { %v5111_v10 = vadd.f32 %v4907_v63, %v4607_v7  ;;  %v5112_v58 = vadd.f32 %v4907_v63, %v4608_v30  ;;  %v4852_v54 = vpop.permute.xlu0 %4851 }
 0x9ac   :  { %v5089_v18 = vadd.f32 %v4852_v54, %v4585_v22  ;;  %v5090_v5 = vadd.f32 %v4852_v54, %v4586_v21  ;;  %v5928_v7 = vpop.eup %5927 }
 0x9ad   :  { %5255 = vst [vmem:[%s10132_s8 + $0x330] sm:$0xff] %v5111_v10  ;;  %v3828_v30 = vmul.f32 %v5928_v7, %v3134_v9  ;;  %vm3834_vm0 = vweird.f32 %v5928_v7 }
 0x9ae   :  { %5256 = vst.msk [vmem:[%s10132_s8 + $0x338] sm:$0xff] %vm621_vm1, %v5112_v58  ;;  %vm3835_vm3 = vmor %vm3833_vm2, %vm3834_vm0 }
 0x9af   :  { %5233 = vst [vmem:[%s10132_s8 + $0x280] sm:$0xff] %v5089_v18  ;;  %v3829_v10 = vmul.f32 %v5928_v7, %v3828_v30 }
 0x9b0   :  { %5234 = vst.msk [vmem:[%s10132_s8 + $0x288] sm:$0xff] %vm621_vm1, %v5090_v5  ;;  %4462 = vperm.xlu1 %5759, %v9248_v31   ;;  %v3968_v5 = vld [vmem:[%s10131_s7 + $0x138] sm:$0xff] }
 0x9b2   :  { %v4268_v25 = vpop.permute.xlu1 %4267 }
 0x9b3   :  { %v4498_v33 = vpop.permute.xlu0 %4497  ;;  %v4553_v23 = vmul.f32 %v4268_v25, %v10609_v24  ;;  %v4554_v36 = vmul.f32 %v4268_v25, %v10610_v59  ;;  %v4112_v25 = vsub.f32 %v3968_v5, %v9708_v13  ;;  %v10618_v24 = vld [vmem:[#allocation107_spill] sm:$0xff] }
 0x9b4   :  { %v4645_v45 = vmul.f32 %v4498_v33, %v10611_v19  ;;  %v4646_v35 = vmul.f32 %v4498_v33, %v10612_v40  ;;  %v3062_v19 = vld [vmem:[%s10130_s6 + $0x228] sm:$0xff] }
 0x9b8   :  { %4966 = vperm.xlu1 %5759, %v4136_v14  }
 0x9ba   :  { %v4772_v55 = vpop.permute.xlu1 %4771 }
 0x9bb   :  { %v5057_v17 = vadd.f32 %v4772_v55, %v4553_v23  ;;  %v5058_v31 = vadd.f32 %v4772_v55, %v4554_v36  ;;  %v5002_v4 = vpop.permute.xlu0 %5001  ;;  %v3998_v55 = vld [vmem:[%s10131_s7 + $0x228] sm:$0xff] }
 0x9bc   :  { %v5149_v52 = vadd.f32 %v5002_v4, %v4645_v45  ;;  %v5150_v50 = vadd.f32 %v5002_v4, %v4646_v35 }
 0x9bd   :  { %5201 = vst [vmem:[%s10132_s8 + $0x180] sm:$0xff] %v5057_v17 }
 0x9be   :  { %5202 = vst.msk [vmem:[%s10132_s8 + $0x188] sm:$0xff] %vm621_vm1, %v5058_v31  ;;  %v10619_v31 = vld [vmem:[#allocation120_spill] sm:$0xff] }
 0x9bf   :  { %5293 = vst [vmem:[%s10132_s8 + $0x460] sm:$0xff] %v5149_v52  ;;  %v10620_v52 = vld [vmem:[#allocation2_spill] sm:$0xff] }
 0x9c0   :  { %5294 = vst.msk [vmem:[%s10132_s8 + $0x468] sm:$0xff] %vm621_vm1, %v5150_v50  ;;  %4327 = vperm.xlu1 %5759, %v9340_v47  }
 0x9c2   :  { %v4418_v26 = vpop.permute.xlu1 %4417 }
 0x9c3   :  { %v4613_v28 = vmul.f32 %v4418_v26, %v10613_v51  ;;  %v4614_v3 = vmul.f32 %v4418_v26, %v10614_v34  ;;  %v10621_v26 = vld [vmem:[#allocation123_spill] sm:$0xff] }
 0x9c8   :  { %4831 = vperm.xlu1 %5759, %v4109_v8  }
 0x9ca   :  { %v4922_v57 = vpop.permute.xlu1 %4921 }
 0x9cb   :  { %v5117_v20 = vadd.f32 %v4922_v57, %v4613_v28  ;;  %v5118_v12 = vadd.f32 %v4922_v57, %v4614_v3  ;;  %v10623_v57 = vld [vmem:[#allocation5_spill] sm:$0xff] }
 0x9cd   :  { %5261 = vst [vmem:[%s10132_s8 + $0x360] sm:$0xff] %v5117_v20 }
 0x9ce   :  { %5262 = vst.msk [vmem:[%s10132_s8 + $0x368] sm:$0xff] %vm621_vm1, %v5118_v12 }
 0x9d0   :  { %4477 = vperm.xlu1 %5759, %v9559_v46   ;;  %v3830_v46 = vmul.f32 0.5, %v3829_v10 }
 0x9d2   :  { %v4283_v47 = vpop.permute.xlu1 %4282  ;;  %v3831_v18 = vsub.f32 1.5, %v3830_v46 }
 0x9d3   :  { %v4559_v22 = vmul.f32 %v4283_v47, %v10615_v48  ;;  %v4560_v21 = vmul.f32 %v4283_v47, %v10616_v11 }
 0x9d4   :  { %v3832_v33 = vmul.f32 %v5928_v7, %v3831_v18 }
 0x9d6   :  { %v3836_v45 = vsel %vm3835_vm3, %v5928_v7, %v3832_v33 }
 0x9d7   :  { %v3926_v13 = vmul.f32 %v3836_v45, %v3062_v19 }
 0x9d8   :  { %4981 = vperm.xlu1 %5759, %v4139_v38  }
 0x9d9   :  { %v4070_v35 = vmul.f32 %v3926_v13, %v9985_v62 }
 0x9da   :  { %v4787_v63 = vpop.permute.xlu1 %4786 }
 0x9db   :  { %v5063_v58 = vadd.f32 %v4787_v63, %v4559_v22  ;;  %v5064_v54 = vadd.f32 %v4787_v63, %v4560_v21  ;;  %v4142_v17 = vsub.f32 %v3998_v55, %v4070_v35 }
 0x9dd   :  { %5207 = vst [vmem:[%s10132_s8 + $0x1b0] sm:$0xff] %v5063_v58 }
 0x9de   :  { %5208 = vst.msk [vmem:[%s10132_s8 + $0x1b8] sm:$0xff] %vm621_vm1, %v5064_v54 }
 0x9e0   :  { %4342 = vperm.xlu1 %5759, %v9698_v60  }
 0x9e2   :  { %v4433_v39 = vpop.permute.xlu1 %4432 }
 0x9e3   :  { %v4619_v14 = vmul.f32 %v4433_v39, %v10617_v2  ;;  %v4620_v23 = vmul.f32 %v4433_v39, %v10618_v24 }
 0x9e8   :  { %4846 = vperm.xlu1 %5759, %v4112_v25  }
 0x9ea   :  { %v4937_v59 = vpop.permute.xlu1 %4936 }
 0x9eb   :  { %v5123_v36 = vadd.f32 %v4937_v59, %v4619_v14  ;;  %v5124_v60 = vadd.f32 %v4937_v59, %v4620_v23 }
 0x9ed   :  { %5267 = vst [vmem:[%s10132_s8 + $0x390] sm:$0xff] %v5123_v36 }
 0x9ee   :  { %5268 = vst.msk [vmem:[%s10132_s8 + $0x398] sm:$0xff] %vm621_vm1, %v5124_v60 }
 0x9f0   :  { %4492 = vperm.xlu1 %5759, %v3926_v13  }
 0x9f2   :  { %v4298_v40 = vpop.permute.xlu1 %4297 }
 0x9f3   :  { %v4565_v4 = vmul.f32 %v4298_v40, %v10619_v31  ;;  %v4566_v50 = vmul.f32 %v4298_v40, %v10620_v52 }
 0x9f8   :  { %4996 = vperm.xlu1 %5759, %v4142_v17  }
 0x9fa   :  { %v4802_v61 = vpop.permute.xlu1 %4801 }
 0x9fb   :  { %v5069_v29 = vadd.f32 %v4802_v61, %v4565_v4  ;;  %v5070_v15 = vadd.f32 %v4802_v61, %v4566_v50 }
 0x9fd   :  { %5213 = vst [vmem:[%s10132_s8 + $0x1e0] sm:$0xff] %v5069_v29 }
 0x9fe   :  { %5214 = vst.msk [vmem:[%s10132_s8 + $0x1e8] sm:$0xff] %vm621_vm1, %v5070_v15 }
 0xa02   :  { %v4448_v62 = vpop.permute.xlu1 %4447 }
 0xa03   :  { %v4625_v42 = vmul.f32 %v4448_v62, %v10621_v26  ;;  %v4626_v8 = vmul.f32 %v4448_v62, %v10622_v37 }
 0xa0a   :  { %v4952_v51 = vpop.permute.xlu1 %4951 }
 0xa0b   :  { %v5129_v28 = vadd.f32 %v4952_v51, %v4625_v42  ;;  %v5130_v34 = vadd.f32 %v4952_v51, %v4626_v8 }
 0xa0d   :  { %5273 = vst [vmem:[%s10132_s8 + $0x3c0] sm:$0xff] %v5129_v28 }
 0xa0e   :  { %5274 = vst.msk [vmem:[%s10132_s8 + $0x3c8] sm:$0xff] %vm621_vm1, %v5130_v34 }
 0xa12   :  { %v4313_v3 = vpop.permute.xlu1 %4312 }
 0xa13   :  { %v4571_v9 = vmul.f32 %v4313_v3, %v8124_v16  ;;  %v4572_v20 = vmul.f32 %v4313_v3, %v10623_v57 }
 0xa1a   :  { %v4817_v12 = vpop.permute.xlu1 %4816 }
 0xa1b   :  { %v5075_v47 = vadd.f32 %v4817_v12, %v4571_v9  ;;  %v5076_v0 = vadd.f32 %v4817_v12, %v4572_v20 }
 0xa1d   :  { %5219 = vst [vmem:[%s10132_s8 + $0x210] sm:$0xff] %v5075_v47 }
 0xa1e   :  { %5220 = vst.msk [vmem:[%s10132_s8 + $0x218] sm:$0xff] %vm621_vm1, %v5076_v0 }
 0xa22   :  { %v4463_v7 = vpop.permute.xlu1 %4462 }
 0xa23   :  { %v4631_v38 = vmul.f32 %v4463_v7, %v8155_v6  ;;  %v4632_v30 = vmul.f32 %v4463_v7, %v8141_v56 }
 0xa2a   :  { %v4967_v16 = vpop.permute.xlu1 %4966 }
 0xa2b   :  { %v5135_v48 = vadd.f32 %v4967_v16, %v4631_v38  ;;  %v5136_v22 = vadd.f32 %v4967_v16, %v4632_v30 }
 0xa2d   :  { %5279 = vst [vmem:[%s10132_s8 + $0x3f0] sm:$0xff] %v5135_v48 }
 0xa2e   :  { %5280 = vst.msk [vmem:[%s10132_s8 + $0x3f8] sm:$0xff] %vm621_vm1, %v5136_v22 }
 0xa32   :  { %v4328_v11 = vpop.permute.xlu1 %4327 }
 0xa33   :  { %v4577_v21 = vmul.f32 %v4328_v11, %v10509_v53  ;;  %v4578_v63 = vmul.f32 %v4328_v11, %v10508_v43 }
 0xa3a   :  { %v4832_v6 = vpop.permute.xlu1 %4831 }
 0xa3b   :  { %v5081_v10 = vadd.f32 %v4832_v6, %v4577_v21  ;;  %v5082_v56 = vadd.f32 %v4832_v6, %v4578_v63 }
 0xa3d   :  { %5225 = vst [vmem:[%s10132_s8 + $0x240] sm:$0xff] %v5081_v10 }
 0xa3e   :  { %5226 = vst.msk [vmem:[%s10132_s8 + $0x248] sm:$0xff] %vm621_vm1, %v5082_v56 }
 0xa42   :  { %v4478_v58 = vpop.permute.xlu1 %4477 }
 0xa43   :  { %v4637_v54 = vmul.f32 %v4478_v58, %v10525_v49  ;;  %v4638_v46 = vmul.f32 %v4478_v58, %v10523_v41 }
 0xa4a   :  { %v4982_v53 = vpop.permute.xlu1 %4981 }
 0xa4b   :  { %v5141_v39 = vadd.f32 %v4982_v53, %v4637_v54  ;;  %v5142_v43 = vadd.f32 %v4982_v53, %v4638_v46 }
 0xa4d   :  { %5285 = vst [vmem:[%s10132_s8 + $0x420] sm:$0xff] %v5141_v39 }
 0xa4e   :  { %5286 = vst.msk [vmem:[%s10132_s8 + $0x428] sm:$0xff] %vm621_vm1, %v5142_v43 }
 0xa52   :  { %v4343_v18 = vpop.permute.xlu1 %4342 }
 0xa53   :  { %v4583_v5 = vmul.f32 %v4343_v18, %v10545_v27  ;;  %v4584_v25 = vmul.f32 %v4343_v18, %v10544_v1 }
 0xa5a   :  { %v4847_v49 = vpop.permute.xlu1 %4846 }
 0xa5b   :  { %v5087_v33 = vadd.f32 %v4847_v49, %v4583_v5  ;;  %v5088_v41 = vadd.f32 %v4847_v49, %v4584_v25 }
 0xa5d   :  { %5231 = vst [vmem:[%s10132_s8 + $0x270] sm:$0xff] %v5087_v33 }
 0xa5e   :  { %5232 = vst.msk [vmem:[%s10132_s8 + $0x278] sm:$0xff] %vm621_vm1, %v5088_v41 }
 0xa62   :  { %v4493_v2 = vpop.permute.xlu1 %4492 }
 0xa63   :  { %v4643_v14 = vmul.f32 %v4493_v2, %v10562_v32  ;;  %v4644_v24 = vmul.f32 %v4493_v2, %v10559_v44 }
 0xa6a   :  { %v4997_v27 = vpop.permute.xlu1 %4996 }
 0xa6b   :  { %v5147_v23 = vadd.f32 %v4997_v27, %v4643_v14  ;;  %v5148_v1 = vadd.f32 %v4997_v27, %v4644_v24 }
 0xa6d   :  { %5291 = vst [vmem:[%s10132_s8 + $0x450] sm:$0xff] %v5147_v23 }
 0xa6e   :  { %5292 = vst.msk [vmem:[%s10132_s8 + $0x458] sm:$0xff] %vm621_vm1, %v5148_v1 }

</bundles_post_ra>
